<compile_context>
chip_gen: v7x
topology: tpu7x:2x2x1
jax: 0.10.0
libtpu: 0.0.40
codegen_flags: <defaults>
</compile_context>

<pallas_src>
import jax
import jax.numpy as jnp
from jax import lax
from jax.experimental import pallas as pl
from jax.experimental.pallas import tpu as pltpu


def _contact_head_kernel(x_ref, w_ref, mrow_ref, mcol_ref, b_ref, o_ref, acc_ref):
    """One (batch b, channel-chunk c) grid step.

    x_ref    : (1, TC, L, L)  attention block (input dtype, upcast in-kernel)
    w_ref    : (1, TC, 1)     regression weights of this channel chunk (f32)
    mrow_ref : (1, 1, L)      combined eos-mask + bos/eos-trim mask (lane-major)
    mcol_ref : (1, L, 1)      same mask, sublane-major
    b_ref    : (1,)           regression bias (SMEM scalar)
    o_ref    : (1, L, L)      sigmoid(logits); written only on the last chunk
    acc_ref  : (L, L) f32     VMEM accumulator of Z = Y - 0.5 * APC
    """
    c = pl.program_id(1)
    num_c = pl.num_programs(1)

    @pl.when(c == 0)
    def _init():
        acc_ref[...] = jnp.zeros_like(acc_ref)

    x = x_ref[0].astype(jnp.float32)          # (TC, L, L)
    w = w_ref[0]                              # (TC, 1)
    mr = mrow_ref[0]                          # (1, L)
    mc = mcol_ref[0]                          # (L, 1)

    # Fused eos mask + bos/eos trim: zero masked rows & cols.
    m2 = mc * mr                              # (L, L)
    xm = x * m2[None, :, :]                   # (TC, L, L)

    # Weighted channel sum: Y_chunk = sum_c w_c * x_c   (streamed, VPU)
    y_part = jnp.sum(xm * w[:, :, None], axis=0)              # (L, L)

    # Per-channel APC statistics of sym_c = x_c + x_c^T:
    #   a1_c = rowsum(sym_c) = rowsum(x_c) + colsum(x_c),  a12_c = sum(sym_c)
    rowsum = jnp.sum(xm, axis=-1)                              # (TC, L)
    colsum = jnp.sum(xm, axis=-2)                              # (TC, L)
    a1 = rowsum + colsum                                       # (TC, L)
    a12 = jnp.sum(a1, axis=-1, keepdims=True)                  # (TC, 1)

    # sum_c (w_c / a12_c) * a1_c (outer) a1_c  ==  (scale*a1)^T @ a1   (one MXU matmul)
    scale = w / a12                                            # (TC, 1) tiny divide
    a_scaled = a1 * scale                                      # (TC, L)
    apc_part = jnp.dot(a_scaled.T, a1,
                       preferred_element_type=jnp.float32)     # (L, L), symmetric

    # logits = bias + Y + Y^T - APC, with APC symmetric
    #        = bias + Z + Z^T, where Z = Y - 0.5*APC accumulated over chunks.
    acc_ref[...] += y_part - 0.5 * apc_part

    @pl.when(c == num_c - 1)
    def _finish():
        z = acc_ref[...]
        logits = z + z.T + b_ref[0]
        o_ref[0] = jax.nn.sigmoid(logits).astype(o_ref.dtype)


def _pick_channel_chunk(num_channels, seq_len, itemsize,
                        budget_bytes=6 * 1024 * 1024):
    """Largest divisor of num_channels whose (TC, L, L) block fits the budget."""
    per_chan = seq_len * seq_len * itemsize
    max_tc = max(1, int(budget_bytes // per_chan))
    if max_tc >= num_channels:
        return num_channels
    for tc in range(max_tc, 0, -1):
        if num_channels % tc == 0:
            return tc
    return 1


def _contact_head_pallas(x, weight_vec, bias_vec, mask):
    """x: (B, C, L, L); weight_vec: (C,) f32; bias_vec: (1,) f32; mask: (B, L) f32
    -> (B, L, L) f32 contact probabilities (untrimmed; trimmed rows/cols are junk-free
       sigmoid(bias) values and are sliced off by the caller)."""
    B, C, L, _ = x.shape
    tc = _pick_channel_chunk(C, L, x.dtype.itemsize)
    nc = C // tc

    w3 = weight_vec.reshape(nc, tc, 1)
    mrow = mask.reshape(B, 1, L)
    mcol = mask.reshape(B, L, 1)

    return pl.pallas_call(
        _contact_head_kernel,
        out_shape=jax.ShapeDtypeStruct((B, L, L), jnp.float32),
        grid=(B, nc),
        in_specs=[
            pl.BlockSpec((1, tc, L, L), lambda b, c: (b, c, 0, 0)),
            pl.BlockSpec((1, tc, 1), lambda b, c: (c, 0, 0)),
            pl.BlockSpec((1, 1, L), lambda b, c: (b, 0, 0)),
            pl.BlockSpec((1, L, 1), lambda b, c: (b, 0, 0)),
            pl.BlockSpec(memory_space=pltpu.MemorySpace.SMEM),
        ],
        out_specs=pl.BlockSpec((1, L, L), lambda b, c: (b, 0, 0)),
        scratch_shapes=[pltpu.VMEM((L, L), jnp.float32)],
        compiler_params=pltpu.CompilerParams(
            dimension_semantics=("parallel", "arbitrary"),
            vmem_limit_bytes=64 * 1024 * 1024,
        ),
    )(x, w3, mrow, mcol, bias_vec)


def contact_prediction_head(tokens, attentions, weight, bias, *,
                            prepend_bos, append_eos, eos_idx=None):
    """JAX/Pallas equivalent of ContactPredictionHead.forward.

    tokens:     (B, L) int
    attentions: (B, layers, heads, L, L) float (f32 or bf16; kept as-is in HBM)
    weight:     (1, in_features)   (nn.Linear(in_features, 1).weight)
    bias:       (1,)               (nn.Linear(in_features, 1).bias)
    """
    B, layers, heads, L, _ = attentions.shape
    C = layers * heads

    # Metadata-only merge of layers*heads; the big tensor is NOT masked, trimmed
    # or up-cast here -- that is all fused into the kernel (saves a full HBM pass).
    x = attentions.reshape(B, C, L, L)

    mask = jnp.ones((B, L), jnp.float32)
    if append_eos:
        if eos_idx is None:
            raise ValueError("append_eos requires eos_idx")
        mask = mask * (tokens != eos_idx).astype(jnp.float32)
        mask = mask.at[:, L - 1].set(0.0)     # the [..., :-1, :-1] trim
    if prepend_bos:
        mask = mask.at[:, 0].set(0.0)         # the [..., 1:, 1:] trim

    w = weight.reshape(-1).astype(jnp.float32)   # (C,)
    b = bias.reshape(-1).astype(jnp.float32)     # (1,)

    out_full = _contact_head_pallas(x, w, b, mask)   # (B, L, L)

    lo = 1 if prepend_bos else 0
    hi = L - 1 if append_eos else L
    return out_full[:, lo:hi, lo:hi]


def _reference_forward(tokens, attentions, weight, bias, prepend_bos, append_eos, eos_idx):
    """Pure-JAX reference matching the PyTorch module semantics."""
    if append_eos:
        m = (tokens != eos_idx).astype(attentions.dtype)
        m2 = m[:, None, :] * m[:, :, None]
        attentions = attentions * m2[:, None, None, :, :]
        attentions = attentions[..., :-1, :-1]
    if prepend_bos:
        attentions = attentions[..., 1:, 1:]
    B, layers, heads, S, _ = attentions.shape
    x = attentions.reshape(B, layers * heads, S, S)
    sym = x + jnp.swapaxes(x, -1, -2)
    a1 = jnp.sum(sym, axis=-1, keepdims=True)
    a2 = jnp.sum(sym, axis=-2, keepdims=True)
    a12 = jnp.sum(sym, axis=(-1, -2), keepdims=True)
    norm = sym - (a1 * a2) / a12
    feat = jnp.transpose(norm, (0, 2, 3, 1))                          # (B, S, S, C)
    logits = jnp.einsum("bijc,c->bij", feat, weight.reshape(-1)) + bias.reshape(())
    return jax.nn.sigmoid(logits)


if __name__ == "__main__":
    key = jax.random.PRNGKey(0)
    k_attn, k_w, k_b = jax.random.split(key, 3)

    # Small synthetic config: in_features = layers * heads = 8.
    B, layers, heads = 2, 2, 4
    in_features = layers * heads
    eos_idx = 2
    prepend_bos, append_eos = True, True
    L = 130  # token length incl. bos + eos -> S = 128 after trimming (lane-aligned output)

    attentions = jax.random.uniform(k_attn, (B, layers, heads, L, L), jnp.float32)

    tokens = jnp.full((B, L), 5, dtype=jnp.int32)
    tokens = tokens.at[:, 0].set(0)               # bos
    tokens = tokens.at[0, L - 1].set(eos_idx)     # eos at end of seq 0
    tokens = tokens.at[1, L - 3:].set(eos_idx)    # eos + trailing eos-padding for seq 1

    # Deterministic "nn.Linear(in_features, 1)" parameters.
    weight = 0.1 * jax.random.normal(k_w, (1, in_features), jnp.float32)
    bias = 0.1 * jax.random.normal(k_b, (1,), jnp.float32)

    out = contact_prediction_head(
        tokens, attentions, weight, bias,
        prepend_bos=prepend_bos, append_eos=append_eos, eos_idx=eos_idx)
    out = jax.block_until_ready(out)

    ref = _reference_forward(tokens, attentions, weight, bias,
                             prepend_bos, append_eos, eos_idx)
    assert out.shape == (B, L - 2, L - 2), out.shape
    # Tolerance sized for worst-case MXU f32-emulation (bf16-pass) precision of the
    # channel contraction (in either the kernel or the XLA reference einsum); with
    # full-precision f32 matmul passes the observed error is ~1e-6.
    assert jnp.allclose(out, ref, atol=2e-3, rtol=2e-3), float(jnp.max(jnp.abs(out - ref)))

    print("KERNEL_OK")
</pallas_src>

<mosaic_0001>
module attributes {stable_mosaic.version = 11 : i64} {
  func.func @_contact_head_kernel(%arg0: i32, %arg1: i32, %arg2: memref<1x8x130x130xf32, #tpu.memory_space<vmem>>, %arg3: memref<1x8x1xf32, #tpu.memory_space<vmem>>, %arg4: memref<1x1x130xf32, #tpu.memory_space<vmem>>, %arg5: memref<1x130x1xf32, #tpu.memory_space<vmem>>, %arg6: memref<1xf32, #tpu.memory_space<smem>>, %arg7: memref<1x130x130xf32, #tpu.memory_space<vmem>>, %arg8: memref<130x130xf32, #tpu.memory_space<vmem>>) attributes {dimension_semantics = [#tpu.dimension_semantics<parallel>, #tpu.dimension_semantics<arbitrary>], iteration_bounds = array<i64: 2, 1>, scalar_prefetch = 0 : i64, scratch_operands = 1 : i64, tpu.core_type = #tpu.core_type<tc>, window_params = [{transform_indices = @transform_0, window_bounds = array<i64: 1, 8, 130, 130>}, {transform_indices = @transform_1, window_bounds = array<i64: 1, 8, 1>}, {transform_indices = @transform_2, window_bounds = array<i64: 1, 1, 130>}, {transform_indices = @transform_3, window_bounds = array<i64: 1, 130, 1>}, {transform_indices = @transform_4, window_bounds = array<i64: 1>}, {transform_indices = @transform_5, window_bounds = array<i64: 1, 130, 130>}]} {
    %c0_i32 = arith.constant 0 : i32
    %0 = arith.cmpi eq, %arg1, %c0_i32 : i32
    %1 = arith.extui %0 : i1 to i32
    %c0_i32_0 = arith.constant 0 : i32
    %2 = arith.cmpi ne, %1, %c0_i32_0 : i32
    scf.if %2 {
      %cst_24 = arith.constant 0.000000e+00 : f32
      %40 = vector.broadcast %cst_24 : f32 to vector<130x130xf32>
      %c0_25 = arith.constant 0 : index
      %c0_26 = arith.constant 0 : index
      %41 = vector.load %arg8[%c0_25, %c0_26] : memref<130x130xf32, #tpu.memory_space<vmem>>, vector<130x130xf32>
      tpu.vector_store %arg8[%c0_25, %c0_26], %40 {strides = array<i32>} : memref<130x130xf32, #tpu.memory_space<vmem>>, vector<130x130xf32>,
    } else {
    }
    %c0 = arith.constant 0 : index
    %c0_1 = arith.constant 0 : index
    %c0_2 = arith.constant 0 : index
    %c0_3 = arith.constant 0 : index
    %3 = vector.load %arg2[%c0, %c0_1, %c0_2, %c0_3] : memref<1x8x130x130xf32, #tpu.memory_space<vmem>>, vector<1x8x130x130xf32>
    %4 = vector.shape_cast %3 : vector<1x8x130x130xf32> to vector<8x130x130xf32>
    %c0_4 = arith.constant 0 : index
    %c0_5 = arith.constant 0 : index
    %c0_6 = arith.constant 0 : index
    %5 = vector.load %arg3[%c0_4, %c0_5, %c0_6] : memref<1x8x1xf32, #tpu.memory_space<vmem>>, vector<1x8x1xf32>
    %6 = vector.shape_cast %5 : vector<1x8x1xf32> to vector<8x1xf32>
    %c0_7 = arith.constant 0 : index
    %c0_8 = arith.constant 0 : index
    %c0_9 = arith.constant 0 : index
    %7 = vector.load %arg4[%c0_7, %c0_8, %c0_9] : memref<1x1x130xf32, #tpu.memory_space<vmem>>, vector<1x1x130xf32>
    %8 = vector.shape_cast %7 : vector<1x1x130xf32> to vector<1x130xf32>
    %c0_10 = arith.constant 0 : index
    %c0_11 = arith.constant 0 : index
    %c0_12 = arith.constant 0 : index
    %9 = vector.load %arg5[%c0_10, %c0_11, %c0_12] : memref<1x130x1xf32, #tpu.memory_space<vmem>>, vector<1x130x1xf32>
    %10 = vector.shape_cast %9 : vector<1x130x1xf32> to vector<130x1xf32>
    %11 = vector.broadcast %10 : vector<130x1xf32> to vector<130x130xf32>
    %12 = vector.broadcast %8 : vector<1x130xf32> to vector<130x130xf32>
    %13 = arith.mulf %11, %12 : vector<130x130xf32>
    %14 = vector.shape_cast %13 : vector<130x130xf32> to vector<1x130x130xf32>
    %15 = vector.broadcast %14 : vector<1x130x130xf32> to vector<8x130x130xf32>
    %16 = arith.mulf %4, %15 : vector<8x130x130xf32>
    %17 = vector.shape_cast %6 : vector<8x1xf32> to vector<8x1x1xf32>
    %18 = vector.broadcast %17 : vector<8x1x1xf32> to vector<8x130x130xf32>
    %19 = arith.mulf %16, %18 : vector<8x130x130xf32>
    %cst = arith.constant dense<0.000000e+00> : vector<130x130xf32>
    %20 = vector.multi_reduction <add>, %19, %cst [0] : vector<8x130x130xf32> to vector<130x130xf32>
    %cst_13 = arith.constant dense<0.000000e+00> : vector<8x130xf32>
    %21 = vector.multi_reduction <add>, %16, %cst_13 [2] : vector<8x130x130xf32> to vector<8x130xf32>
    %cst_14 = arith.constant dense<0.000000e+00> : vector<8x130xf32>
    %22 = vector.multi_reduction <add>, %16, %cst_14 [1] : vector<8x130x130xf32> to vector<8x130xf32>
    %23 = arith.addf %21, %22 : vector<8x130xf32>
    %cst_15 = arith.constant dense<0.000000e+00> : vector<8xf32>
    %24 = vector.multi_reduction <add>, %23, %cst_15 [1] : vector<8x130xf32> to vector<8xf32>
    %25 = vector.shape_cast %24 : vector<8xf32> to vector<8x1xf32>
    %26 = arith.divf %6, %25 : vector<8x1xf32>
    %27 = vector.broadcast %26 : vector<8x1xf32> to vector<8x130xf32>
    %28 = arith.mulf %23, %27 : vector<8x130xf32>
    %29 = tpu.transpose %28, [1, 0] : vector<8x130xf32> -> vector<130x8xf32>
    %cst_16 = arith.constant dense<0.000000e+00> : vector<130x130xf32>
    %30 = tpu.matmul %29, %23, %cst_16 {dimension_numbers = #tpu.dot_dimension_numbers<[1], [0], [0], [1], [0, 0, 1, 1], [], []>} : vector<130x8xf32>, vector<8x130xf32>, vector<130x130xf32> -> vector<130x130xf32>
    %c0_17 = arith.constant 0 : index
    %c0_18 = arith.constant 0 : index
    %31 = vector.load %arg8[%c0_17, %c0_18] : memref<130x130xf32, #tpu.memory_space<vmem>>, vector<130x130xf32>
    %cst_19 = arith.constant 5.000000e-01 : f32
    %32 = vector.broadcast %cst_19 : f32 to vector<130x130xf32>
    %33 = arith.mulf %32, %30 : vector<130x130xf32>
    %34 = arith.subf %20, %33 : vector<130x130xf32>
    %35 = arith.addf %31, %34 : vector<130x130xf32>
    %c0_20 = arith.constant 0 : index
    %c0_21 = arith.constant 0 : index
    %36 = vector.load %arg8[%c0_20, %c0_21] : memref<130x130xf32, #tpu.memory_space<vmem>>, vector<130x130xf32>
    tpu.vector_store %arg8[%c0_20, %c0_21], %35 {strides = array<i32>} : memref<130x130xf32, #tpu.memory_space<vmem>>, vector<130x130xf32>,
    %c0_i32_22 = arith.constant 0 : i32
    %37 = arith.cmpi eq, %arg1, %c0_i32_22 : i32
    %38 = arith.extui %37 : i1 to i32
    %c0_i32_23 = arith.constant 0 : i32
    %39 = arith.cmpi ne, %38, %c0_i32_23 : i32
    scf.if %39 {
      %c0_24 = arith.constant 0 : index
      %c0_25 = arith.constant 0 : index
      %40 = vector.load %arg8[%c0_24, %c0_25] : memref<130x130xf32, #tpu.memory_space<vmem>>, vector<130x130xf32>
      %41 = tpu.transpose %40, [1, 0] : vector<130x130xf32> -> vector<130x130xf32>
      %42 = arith.addf %40, %41 : vector<130x130xf32>
      %c0_26 = arith.constant 0 : index
      %43 = memref.load %arg6[%c0_26] : memref<1xf32, #tpu.memory_space<smem>>
      %44 = vector.broadcast %43 : f32 to vector<130x130xf32>
      %45 = arith.addf %42, %44 : vector<130x130xf32>
      %46 = arith.negf %45 : vector<130x130xf32>
      %47 = math.exp %46 : vector<130x130xf32>
      %cst_27 = arith.constant 1.000000e+00 : f32
      %48 = vector.broadcast %cst_27 : f32 to vector<130x130xf32>
      %49 = arith.addf %48, %47 : vector<130x130xf32>
      %50 = arith.divf %48, %49 : vector<130x130xf32>
      %c0_28 = arith.constant 0 : index
      %c0_29 = arith.constant 0 : index
      %c0_30 = arith.constant 0 : index
      %51 = vector.load %arg7[%c0_28, %c0_29, %c0_30] : memref<1x130x130xf32, #tpu.memory_space<vmem>>, vector<1x130x130xf32>
      %52 = vector.shape_cast %51 : vector<1x130x130xf32> to vector<130x130xf32>
      %53 = vector.shape_cast %50 : vector<130x130xf32> to vector<1x130x130xf32>
      tpu.vector_store %arg7[%c0_28, %c0_29, %c0_30], %53 {strides = array<i32>} : memref<1x130x130xf32, #tpu.memory_space<vmem>>, vector<1x130x130xf32>,
    } else {
    }
    return
  }
  func.func @transform_0(%arg0: i32, %arg1: i32) -> (i32, i32, i32, i32) {
    %c0_i32 = arith.constant 0 : i32
    %c0_i32_0 = arith.constant 0 : i32
    %c0_i32_1 = arith.constant 0 : i32
    return %arg0, %arg1, %c0_i32, %c0_i32_0 : i32, i32, i32, i32
  }
  func.func @transform_1(%arg0: i32, %arg1: i32) -> (i32, i32, i32) {
    %c0_i32 = arith.constant 0 : i32
    %c0_i32_0 = arith.constant 0 : i32
    %c0_i32_1 = arith.constant 0 : i32
    return %arg1, %c0_i32, %c0_i32_0 : i32, i32, i32
  }
  func.func @transform_2(%arg0: i32, %arg1: i32) -> (i32, i32, i32) {
    %c0_i32 = arith.constant 0 : i32
    %c0_i32_0 = arith.constant 0 : i32
    %c0_i32_1 = arith.constant 0 : i32
    return %arg0, %c0_i32, %c0_i32_0 : i32, i32, i32
  }
  func.func @transform_3(%arg0: i32, %arg1: i32) -> (i32, i32, i32) {
    %c0_i32 = arith.constant 0 : i32
    %c0_i32_0 = arith.constant 0 : i32
    %c0_i32_1 = arith.constant 0 : i32
    return %arg0, %c0_i32, %c0_i32_0 : i32, i32, i32
  }
  func.func @transform_4(%arg0: i32, %arg1: i32) -> i32 {
    %c0_i32 = arith.constant 0 : i32
    %c0_i32_0 = arith.constant 0 : i32
    return %c0_i32 : i32
  }
  func.func @transform_5(%arg0: i32, %arg1: i32) -> (i32, i32, i32) {
    %c0_i32 = arith.constant 0 : i32
    %c0_i32_0 = arith.constant 0 : i32
    %c0_i32_1 = arith.constant 0 : i32
    return %arg0, %c0_i32, %c0_i32_0 : i32, i32, i32
  }
}

</mosaic_0001>

<bundles_post_ra>
// kernel: tpu_custom_call.1
= control target key start
LH: loop header
LB: loop body
LE: loop exit
PB: predicated region body
PF: predicated region fallthrough
CT: control target
= control target key end

     0   :  { %s14383_s0 = inlined_call_operand.hbm [shape: f32[2,8,130,130], index: 0, kind: input, shape index: {}]   ;;  %s14384_s1 = inlined_call_operand.hbm [shape: f32[1,8,1], index: 1, kind: input, shape index: {}]   ;;  %s14385_s2 = inlined_call_operand.hbm [shape: f32[2,1,130], index: 2, kind: input, shape index: {}]   ;;  %s14386_s3 = inlined_call_operand.hbm [shape: f32[2,130,1], index: 3, kind: input, shape index: {}]   ;;  %s14387_s4 = inlined_call_operand.<no memory space> [shape: f32[1], index: 4, kind: input, shape index: {}]   ;;  %s14388_s5 = inlined_call_operand.hbm [shape: f32[2,130,130], index: 5, kind: output, shape index: {}]  }
   0x1   :  { %14979 = sst [smem:[#allocation498_spill]] %s14383_s0 }
   0x2   :  { %14980 = sst [smem:[#allocation499_spill]] %s14385_s2 }
   0x3   :  { %10 = sst [smem:[#allocation3]] %s14387_s4 }
   0x4   :  { %11 = vsyncpa [#allocation5], 0 }
   0x5   :  { %13 = vsyncpa [#allocation5 + $0x1], 0 }
   0x6   :  { %14 = vsyncpa [#allocation8], 0 }
   0x7   :  { %15 = vsyncpa [#allocation6], 0 }
   0x8   :  { %17 = vsyncpa [#allocation6 + $0x1], 0  ;;  %s7896_s20 = smov 0   ;;  %s7898_s21 = smov 0  }
   0x9   :  { %s7900_s22 = smov 0   ;;  %s7902_s23 = smov 0  }
   0xa   :  { %s7904_s24 = smov 0   ;;  %s7906_s25 = smov 0  }
   0xb LB: > { %14981 = sst [smem:[#allocation16_spill]] %s7843_s24  ;;  %s35_s4 = sadd.s32 1, %s7843_s24  ;;  %s7847_s25 = sphi %s7906_s25, %s23_s25   ;;  %s7843_s24 = sphi %s7904_s24, %s16753_s24   ;;  %s7839_s23 = sphi %s7902_s23, %s16752_s23   ;;  %s7835_s22 = sphi %s7900_s22, %s16756_s22   ;;  %s7831_s21 = sphi %s7898_s21, %s16755_s21   ;;  %s7827_s20 = sphi %s7896_s20, %s16754_s20  }
   0xc   : > { %s44_s26 = sadd.s32 1, %s7835_s22  ;;  %p37_p0 = scmp.ge.s32.totalorder %s35_s4, 2 }
   0xd   : > { %p14389_p1 = scmp.ne.s32.totalorder %s7835_s22, %s7831_s21  ;;  %p52_p2 = scmp.eq.s32.totalorder %s7847_s25, 0 }
   0xe   : > { %s16758_s4 = smov (%p37_p0, %s35_s4), 0  ;;  %p7436_p5 = scmp.lt.s32.totalorder %s7847_s25, 2 }
   0xf   : > { %14982 = sst [smem:[#allocation17_spill]] %s16758_s4  ;;  %p53_p4 = por %p52_p2, %p14389_p1 }
  0x10   : > { %s39_s27 = ssub.s32 %s7843_s24, %s16758_s4  ;;  %s222_s28 = sand.u32 1, %s7847_s25  }
  0x11   : > { %p42_p6 = scmp.eq.s32.totalorder %s39_s27, 0  ;;  %s7942_s29 = sand.u32 1, %s7835_s22  }
  0x12   : > { %s7398_s30 = smul.u32 34816, %s7843_s24  ;;  %s14983_s0 = sld [smem:[#allocation498_spill]] }
  0x13   : > { %s7946_s6 = scalar_select %p42_p6, %s7835_s22, %s44_s26  }
  0x14   : > { %s7397_s7 = smul.u32 2176, %s7942_s29  ;;  %p7954_p7 = pnand %p7436_p5, %p53_p4 }
  0x15   : > { %s7333_s14 = sshll.u32 %s7942_s29, 1  ;;  %s7961_s15 = scalar_lea.sflag [#allocation5], %s222_s28 }
  0x16   : > { %s14984_s11 = scalar_select %p7954_p7, 1, 0 }
  0x17   : > { %s226_s12 = scalar_lea.vmem [#allocation4], %s7397_s7  ;;  %p7967_p9 = pneg %p7954_p7 }
  0x18   : > { %s7952_s10 = scalar_lea.hbm %s14983_s0, %s7398_s30  ;;  %s236_s13 = sshll.u32 %s226_s12, 4  ;;  %s7958_s13 = int_to_ptr.vmem [resolvable:$true] %s236_s13 }
  0x19   : > { %s7639_s16 = scalar_lea.hbm %s7952_s10, 34816  ;;  %s7644_s26 = scalar_lea.hbm %s14983_s0, 69632 }
  0x1a   : > { %p7640_p8 = scmp.ne.s32.totalorder %s7952_s10, %s7639_s16  ;;  %p7645_p12 = scmp.lt.u32.totalorder %s7952_s10, %s14983_s0 }
  0x1b   : > { %s14985_s17 = scalar_select %p7967_p9, 1, 0 }
  0x1c   : > { %p7642_p10 = pnand %p7967_p9, %p7640_p8  ;;  %p7646_p13 = scmp.lt.u32.totalorder %s7644_s26, %s7639_s16 }
  0x1d   : > { %p7648_p2 = scmp.lt.u32.totalorder %s7639_s16, %s7952_s10 }
  0x1e   : > { %p7643_p11 = pneg %p7642_p10  ;;  %p7647_p0 = por %p7646_p13, %p7645_p12 }
  0x20   : > { %p7649_p4 = por %p7648_p2, %p7647_p0 }
  0x22   : > { %p7650_p5 = pnand %p7649_p4, %p7643_p11 }
  0x24   : > { %7653 = shalt.err (!%p7650_p5)
}
  0x25   : > { %s7654_s28 = scalar_lea.vmem %s7958_s13, 34816  ;;  %s7849_s7 = smov [#allocation4]  }
  0x26   : > { %p7655_p6 = scmp.ne.s32.totalorder %s7958_s13, %s7654_s28  ;;  %s7659_s8 = sshll.u32 %s7849_s7, 4  ;;  %s7660_s8 = int_to_ptr.vmem [resolvable:$false] %s7659_s8 }
  0x27   : > { %s7661_s9 = scalar_lea.vmem %s7660_s8, 69632  ;;  %p7662_p3 = scmp.lt.s32.totalorder %s7958_s13, %s7660_s8 }
  0x28   : > { %p7657_p8 = pnand %p7655_p6, %p7967_p9  ;;  %p7663_p1 = scmp.lt.s32.totalorder %s7661_s9, %s7654_s28 }
  0x2a   : > { %p7658_p10 = pneg %p7657_p8  ;;  %p7664_p12 = por %p7663_p1, %p7662_p3 }
  0x2c   : > { %p7665_p13 = pnand %p7664_p12, %p7658_p10 }
  0x2e   : > { %7668 = shalt.err (!%p7665_p13)
}
  0x2f   : > { %s7850_s12 = smov 256   ;;  %s7851_s16 = smov 16  }
  0x30   : > { %7424 = dma.hbm_to_vmem [thread:$0]  (!%p7954_p7), %s7952_s10, 34816, %s7958_s13, %s7961_s15, %s7850_s12, %s7850_s12, %s7851_s16  }
  0x31   : > { %s7394_s18 = sshll.u32 %s7843_s24, 5  ;;  %s14986_s2 = sld [smem:[#allocation499_spill]] }
  0x32   : > { %s250_s30 = scalar_lea.vmem [#allocation9], %s7333_s14 }
  0x33   : > { %s258_s28 = sshll.u32 %s250_s30, 4  ;;  %s259_s28 = int_to_ptr.vmem [resolvable:$true] %s258_s28 }
  0x37   : > { %s7995_s27 = scalar_lea.hbm %s14986_s2, %s7394_s18  ;;  %s7674_s8 = scalar_lea.hbm %s14986_s2, 64 }
  0x38   : > { %s7669_s7 = scalar_lea.hbm %s7995_s27, 32  ;;  %p7675_p0 = scmp.lt.u32.totalorder %s7995_s27, %s14986_s2 }
  0x39   : > { %p7670_p1 = scmp.ne.s32.totalorder %s7995_s27, %s7669_s7  ;;  %p7676_p2 = scmp.lt.u32.totalorder %s7674_s8, %s7669_s7 }
  0x3a   : > { %p7678_p5 = scmp.lt.u32.totalorder %s7669_s7, %s7995_s27 }
  0x3b   : > { %p7672_p3 = pnand %p7670_p1, %p7967_p9  ;;  %p7677_p4 = por %p7676_p2, %p7675_p0 }
  0x3d   : > { %p7673_p11 = pneg %p7672_p3  ;;  %p7679_p6 = por %p7678_p5, %p7677_p4 }
  0x3f   : > { %p7680_p8 = pnand %p7679_p6, %p7673_p11 }
  0x41   : > { %7683 = shalt.err (!%p7680_p8)
}
  0x42   : > { %s7684_s14 = scalar_lea.vmem %s259_s28, 32  ;;  %s7852_s16 = smov [#allocation9]  }
  0x43   : > { %p7685_p10 = scmp.ne.s32.totalorder %s259_s28, %s7684_s14  ;;  %s7689_s18 = sshll.u32 %s7852_s16, 4  ;;  %s7690_s18 = int_to_ptr.vmem [resolvable:$false] %s7689_s18 }
  0x44   : > { %s7691_s19 = scalar_lea.vmem %s7690_s18, 64  ;;  %p7692_p1 = scmp.lt.s32.totalorder %s259_s28, %s7690_s18 }
  0x45   : > { %p7687_p12 = pnand %p7685_p10, %p7967_p9  ;;  %p7693_p3 = scmp.lt.s32.totalorder %s7691_s19, %s7684_s14 }
  0x47   : > { %p7688_p13 = pneg %p7687_p12  ;;  %p7694_p7 = por %p7693_p3, %p7692_p1 }
  0x49   : > { %p7695_p0 = pnand %p7694_p7, %p7688_p13 }
  0x4b   : > { %7698 = shalt.err (!%p7695_p0)
}
  0x4c   : > { %p14987_p2 = scmp.ne.s32.totalorder %s14984_s11, 0  ;;  %s8018_s26 = sadd.s32 4294967295, %s7847_s25  }
  0x4d   : > { %s7328_s30 = sadd.s32 4294967294, %s7847_s25   ;;  %p57_p7 = scmp.ne.s32.totalorder %s7831_s21, %s7827_s20 }
  0x4e   : > { %7427 = dma.hbm_to_vmem [thread:$0]  (!%p14987_p2), %s7995_s27, 32, %s259_s28, %s7961_s15  }
  0x4f   : > { %p14394_p11 = scmp.eq.s32.totalorder %s8018_s26, 0  ;;  %p180_p4 = scmp.eq.s32.totalorder %s8018_s26, 1 }
  0x50   : > { %p186_p5 = scmp.eq.s32.totalorder %s7328_s30, 1  ;;  %p7329_p6 = scmp.ge.s32.totalorder %s7847_s25, 1 }
  0x51   : > { %p8028_p8 = por %p14394_p11, %p57_p7  ;;  %p14989_p10 = scmp.ne.s32.totalorder %s7835_s22, %s7831_s21 }
  0x52   : > { %p8039_p13 = por %p186_p5, %p57_p7  ;;  %p193_p1 = scmp.lt.s32.totalorder %s7847_s25, 3 }
  0x53   : > { %s14988_s7 = scalar_select %p8028_p8, 1, 0 }
  0x54   : > { %p8035_p12 = por %p180_p4, %p14989_p10  ;;  %p8044_p3 = pnand %p7329_p6, %p193_p1 }
  0x55   : > { %s14991_s28 = scalar_select %p8039_p13, 1, 0 }
  0x56   : > { %s14990_s27 = scalar_select %p8035_p12, 1, 0 }
  0x57   : > { %s14992_s10 = scalar_select %p8044_p3, 1, 0 }
  0x58   : > { %s7853_s13 = smov [#allocation7]   ;;  %s7399_s9 = smul.u32 136, %s7942_s29 }
  0x59   : > { %s208_s8 = sshll.u32 %s7853_s13, 4  ;;  %p7417_p0 = pneg %p8044_p3  ;;  %s209_s8 = int_to_ptr.vmem [resolvable:$true] %s208_s8 }
  0x5a   : > { %s7400_s12 = smul.u32 2176, %s7843_s24  ;;  %s269_s30 = scalar_lea.vmem [#allocation10], %s7399_s9 }
  0x5b   : > { %p8054_p4 = pnand %p7417_p0, %p14394_p11  ;;  %s276_s0 = sshll.u32 %s269_s30, 4  ;;  %s8063_s0 = int_to_ptr.vmem [resolvable:$true] %s276_s0 }
  0x5c   : > { %s8061_s19 = scalar_lea.hbm %s14386_s3, %s7400_s12  ;;  %s7699_s2 = scalar_lea.hbm %s14384_s1, 128 }
  0x5d   : > { %p7700_p7 = scmp.ne.s32.totalorder %s14384_s1, %s7699_s2  ;;  %p7701_p5 = pneg %p8054_p4 }
  0x5e   : > { %p7706_p1 = scmp.lt.u32.totalorder %s7699_s2, %s14384_s1 }
  0x5f   : > { %p7702_p6 = pnand %p7701_p5, %p7700_p7 }
  0x61   : > { %p7703_p10 = pneg %p7702_p6 }
  0x63   : > { %p7708_p0 = pnand %p7706_p1, %p7703_p10 }
  0x65   : > { %7711 = shalt.err (!%p7708_p0)
}
  0x66   : > { %s7712_s9 = scalar_lea.vmem %s209_s8, 128  ;;  %p7720_p8 = scmp.lt.s32.totalorder %s209_s8, %s209_s8 }
  0x67   : > { %p7713_p11 = scmp.ne.s32.totalorder %s209_s8, %s7712_s9  ;;  %p7721_p3 = scmp.lt.s32.totalorder %s7712_s9, %s7712_s9 }
  0x69   : > { %p7715_p13 = pnand %p7713_p11, %p7701_p5  ;;  %p7722_p2 = por %p7721_p3, %p7720_p8 }
  0x6b   : > { %p7716_p12 = pneg %p7715_p13 }
  0x6d   : > { %p7723_p9 = pnand %p7722_p2, %p7716_p12 }
  0x6f   : > { %7726 = shalt.err (!%p7723_p9)
}
  0x70   : > { %7420 = dma.hbm_to_vmem [thread:$0]  (!%p8054_p4), %s14384_s1, 128, %s209_s8, [#allocation8]  }
  0x71   : > { %s7727_s2 = scalar_lea.hbm %s8061_s19, 2176  ;;  %p14994_p11 = scmp.ne.s32.totalorder %s14985_s17, 0 }
  0x72   : > { %p7728_p7 = scmp.ne.s32.totalorder %s8061_s19, %s7727_s2  ;;  %s7732_s13 = scalar_lea.hbm %s14386_s3, 4352 }
  0x73   : > { %p7733_p9 = scmp.lt.u32.totalorder %s8061_s19, %s14386_s3  ;;  %p7734_p2 = scmp.lt.u32.totalorder %s7732_s13, %s7727_s2 }
  0x74   : > { %p7730_p13 = pnand %p7728_p7, %p14994_p11  ;;  %p7736_p12 = scmp.lt.u32.totalorder %s7727_s2, %s8061_s19 }
  0x75   : > { %p7735_p8 = por %p7734_p2, %p7733_p9 }
  0x76   : > { %p7731_p5 = pneg %p7730_p13 }
  0x77   : > { %p7737_p3 = por %p7736_p12, %p7735_p8 }
  0x79   : > { %p7738_p6 = pnand %p7737_p3, %p7731_p5 }
  0x7b   : > { %7741 = shalt.err (!%p7738_p6)
}
  0x7c   : > { %s7742_s8 = scalar_lea.vmem %s8063_s0, 2176  ;;  %s7854_s16 = smov [#allocation10]  }
  0x7d   : > { %p7743_p4 = scmp.ne.s32.totalorder %s8063_s0, %s7742_s8  ;;  %s7747_s18 = sshll.u32 %s7854_s16, 4  ;;  %s7748_s18 = int_to_ptr.vmem [resolvable:$false] %s7747_s18 }
  0x7e   : > { %s7749_s9 = scalar_lea.vmem %s7748_s18, 4352  ;;  %p7750_p0 = scmp.lt.s32.totalorder %s8063_s0, %s7748_s18 }
  0x7f   : > { %p7745_p10 = pnand %p7743_p4, %p14994_p11  ;;  %p7751_p7 = scmp.lt.s32.totalorder %s7749_s9, %s7742_s8 }
  0x81   : > { %p7746_p1 = pneg %p7745_p10  ;;  %p7752_p13 = por %p7751_p7, %p7750_p0 }
  0x83   : > { %p7753_p9 = pnand %p7752_p13, %p7746_p1 }
  0x85   : > { %7756 = shalt.err (!%p7753_p9)
}
  0x86   : > { %s7855_s24 = smov 128   ;;  %s7856_s4 = smov 8  }
  0x87   : > { %p14995_p5 = scmp.ne.s32.totalorder %s14984_s11, 0  ;;  %p14996_p11 = scmp.ne.s32.totalorder %s14992_s10, 0 }
  0x89   : > { %7430 = dma.hbm_to_vmem [thread:$0]  (!%p14995_p5), %s8061_s19, 2176, %s8063_s0, %s7961_s15, %s7855_s24, %s7855_s24, %s7856_s4  }
  0x8a   : > { %288 = sbr.rel (%p14996_p11) target bundleno = 2633 (0xa49), region = 40 }
  0x91   : > { %s290_s17 = sand.u32 1, %s8018_s26   ;;  %s8107_s2 = sand.u32 1, %s7831_s21  }
  0x92   : > { %s7401_s12 = smul.u32 2176, %s8107_s2  ;;  %s291_s30 = scalar_lea.sflag [#allocation5], %s290_s17 }
  0x93   : > { %p14997_p2 = scmp.ne.s32.totalorder %s14988_s7, 0 }
  0x94   : > { %s8110_s13 = scalar_lea.vmem [#allocation4], %s7401_s12 }
  0x95   : > { %7810 = dma.done.wait (%p14997_p2), %s291_s30, 34816  }
  0x96   : > { %7812 = vsyncadd (%p14997_p2), %s291_s30, 4294932480  ;;  %p14998_p8 = scmp.eq.s32.totalorder %s8018_s26, 0 }
  0x98   : > { %7814 = dma.done.wait (%p14998_p8), [#allocation8], 128   ;;  %p14999_p12 = pmov %p14998_p8 }
  0x99   : > { %s7339_s0 = sshll.u32 %s8107_s2, 1 }
  0x9a   : > { %7816 = vsyncadd (%p14999_p12), [#allocation8], 4294967168  ;;  %s8121_s11 = scalar_lea.vmem [#allocation9], %s7339_s0 }
  0x9b   : > { %7818 = dma.done.wait (%p14997_p2), %s291_s30, 2208  }
  0x9c   : > { %7820 = vsyncadd (%p14997_p2), %s291_s30, 4294965088  ;;  %s7402_s15 = smul.u32 136, %s8107_s2  ;;  %v7857_v0 = vmov 0   ;;  %v14401_v18 = vlaneseq  ;;  %v667_v22 = vld [vmem:[%s8121_s11] sm:$0x3]  ;;  %v394_v27 = vld [vmem:[%s8110_s13] sm:$0xff] }
  0x9d   : > { %7498 = vset.pattern.permute.xlu1 %v7857_v0  ;;  %7497 = vset.pattern.permute.xlu0 %v7857_v0  ;;  %v395_v28 = vld [vmem:[%s8110_s13 + $0x8] sm:$0xff]  ;;  %vm14965_vm0 = vcmask 15360   ;;  %v396_v38 = vld [vmem:[%s8110_s13 + $0x10] sm:$0xff]  ;;  %v397_v39 = vld [vmem:[%s8110_s13 + $0x18] sm:$0xff]  ;;  %vm14964_vm1 = vcmask 9216   ;;  %vm14963_vm2 = vcmask 1041408  }
  0x9e   : > { %s8128_s10 = scalar_lea.vmem [#allocation10], %s7402_s15  ;;  %v8148_v19 = vshrl.u32 %v14401_v18, 7  ;;  %v399_v34 = vld [vmem:[%s8110_s13 + $0x28] sm:$0xff]  ;;  %v400_v40 = vld [vmem:[%s8110_s13 + $0x30] sm:$0xff]  ;;  %v401_v45 = vld [vmem:[%s8110_s13 + $0x38] sm:$0xff]  ;;  %vm4133_vm3 = vcmask 130112  }
  0x9f   : > { %v670_v1 = vld [vmem:[%s8128_s10 + $0x10] sm:$0xff]  ;;  %v668_v2 = vld [vmem:[%s8128_s10] sm:$0xff]  ;;  %v671_v3 = vld [vmem:[%s8128_s10 + $0x18] sm:$0xff]  ;;  %vm4140_vm4 = vcmask 195712   ;;  %vm14969_vm5 = vcmask 261312   ;;  %vm14968_vm6 = vcmask 326912  }
  0xa0   : > { %697 = vperm.xlu1 %7498, %v670_v1   ;;  %687 = vperm.xlu0 %7497, %v668_v2   ;;  %v669_v4 = vld [vmem:[%s8128_s10 + $0x8] sm:$0xff]  ;;  %v672_v6 = vld [vmem:[%s8128_s10 + $0x20] sm:$0xff]  ;;  %v675_v7 = vld [vmem:[%s8128_s10 + $0x38] sm:$0xff]  ;;  %15000 = vst [vmem:[#allocation18_spill] sm:$0xff] %v8148_v19  ;;  %v8151_v20 = vsub.s32 0, %v8148_v19  ;;  %v14400_v21 = vsub.s32 1, %v8148_v19 }
  0xa1   : > { %v673_v5 = vld [vmem:[%s8128_s10 + $0x28] sm:$0xff]  ;;  %v674_v8 = vld [vmem:[%s8128_s10 + $0x30] sm:$0xff]  ;;  %v676_v10 = vld [vmem:[%s8128_s10 + $0x40] sm:$0xff]  ;;  %vm4161_vm7 = vcmask 392512   ;;  %vm4168_vm8 = vcmask 458112   ;;  %vm14966_vm9 = vcmask 523712  }
  0xa2   : > { %v677_v9 = vld [vmem:[%s8128_s10 + $0x48] sm:$0xff]  ;;  %v679_v11 = vld [vmem:[%s8128_s10 + $0x58] sm:$0xff]  ;;  %v678_v12 = vld [vmem:[%s8128_s10 + $0x50] sm:$0xff]  ;;  %15001 = vst [vmem:[#allocation19_spill] sm:$0xff] %v8151_v20  ;;  %v8156_v23 = vrot.slane %v667_v22, %v8151_v20  ;;  %v8160_v24 = vrot.slane %v667_v22, %v14400_v21  ;;  %vm4182_vm10 = vcmask 589312   ;;  %vm4189_vm11 = vcmask 654912  }
  0xa3   : > { %v681_v13 = vld [vmem:[%s8128_s10 + $0x68] sm:$0xff]  ;;  %v680_v14 = vld [vmem:[%s8128_s10 + $0x60] sm:$0xff]  ;;  %v683_v15 = vld [vmem:[%s8128_s10 + $0x78] sm:$0xff]  ;;  %vm4196_vm12 = vcmask 720512   ;;  %vm4203_vm13 = vcmask 786112   ;;  %vm14971_vm14 = vcmask 851712  }
  0xa4   : > { %702 = vperm.xlu1 %7498, %v671_v3   ;;  %692 = vperm.xlu0 %7497, %v669_v4   ;;  %v682_v16 = vld [vmem:[%s8128_s10 + $0x70] sm:$0xff]  ;;  %v684_v17 = vld [vmem:[%s8128_s10 + $0x80] sm:$0x3]  ;;  %vm4217_vm15 = vcmask 917312   ;;  %s6903_s26 = sld [smem:[#allocation3]]  ;;  %s7403_s7 = smul.u32 272, %s8107_s2 }
  0xa5   : > { %v398_v47 = vld [vmem:[%s8110_s13 + $0x20] sm:$0xff]  ;;  %v404_v56 = vld [vmem:[%s8110_s13 + $0x50] sm:$0xff]  ;;  %v405_v61 = vld [vmem:[%s8110_s13 + $0x58] sm:$0xff]  ;;  %s7404_s29 = smul.u32 4352, %s7839_s23  ;;  %s7178_s9 = scalar_lea.sflag [#allocation6], %s8107_s2 }
  0xa6   : > { %v403_v62 = vld [vmem:[%s8110_s13 + $0x48] sm:$0xff]  ;;  %v425_v20 = vld [vmem:[%s8110_s13 + $0xf8] sm:$0xff]  ;;  %s14194_s19 = scalar_lea.vmem [#allocation11], %s7403_s7  ;;  %p16749_p6 = scmp.ne.s32.totalorder %s14990_s27, 0 }
  0xa7   : > { %v407_v22 = vld [vmem:[%s8110_s13 + $0x68] sm:$0xff]  ;;  %s7191_s14 = sshll.u32 %s14194_s19, 4  ;;  %s14331_s18 = scalar_lea.hbm %s14388_s5, %s7404_s29  ;;  %s14333_s14 = int_to_ptr.vmem [resolvable:$true] %s7191_s14 }
  0xa8   : > { %712 = vperm.xlu1 %7498, %v673_v5   ;;  %707 = vperm.xlu0 %7497, %v672_v6   ;;  %s7757_s24 = scalar_lea.vmem %s14333_s14, 4352  ;;  %s7860_s23 = smov [#allocation11]  }
  0xa9   : > { %p7758_p3 = scmp.ne.s32.totalorder %s14333_s14, %s7757_s24  ;;  %s7761_s4 = sshll.u32 %s7860_s23, 4  ;;  %s7762_s4 = int_to_ptr.vmem [resolvable:$false] %s7761_s4 }
  0xaa   : > { %s7763_s17 = scalar_lea.vmem %s7762_s4, 8704  ;;  %p7764_p1 = scmp.lt.s32.totalorder %s14333_s14, %s7762_s4 }
  0xab   : > { %p7759_p4 = pnand %p7758_p3, %p16749_p6  ;;  %p7765_p0 = scmp.lt.s32.totalorder %s7763_s17, %s7757_s24 }
  0xac   : > { %722 = vperm.xlu1 %7498, %v675_v7   ;;  %717 = vperm.xlu0 %7497, %v674_v8   ;;  %v402_v7 = vld [vmem:[%s8110_s13 + $0x40] sm:$0xff] }
  0xad   : > { %p7760_p10 = pneg %p7759_p4  ;;  %p7766_p7 = por %p7765_p0, %p7764_p1 }
  0xaf   : > { %p7767_p13 = pnand %p7766_p7, %p7760_p10 }
  0xb0   : > { %732 = vperm.xlu1 %7498, %v677_v9   ;;  %727 = vperm.xlu0 %7497, %v676_v10  }
  0xb4   : > { %742 = vperm.xlu1 %7498, %v679_v11   ;;  %737 = vperm.xlu0 %7497, %v678_v12   ;;  %v408_v12 = vld [vmem:[%s8110_s13 + $0x70] sm:$0xff] }
  0xb8   : > { %752 = vperm.xlu1 %7498, %v681_v13   ;;  %747 = vperm.xlu0 %7497, %v680_v14   ;;  %v409_v13 = vld [vmem:[%s8110_s13 + $0x78] sm:$0xff] }
  0xbc   : > { %762 = vperm.xlu1 %7498, %v683_v15   ;;  %757 = vperm.xlu0 %7497, %v682_v16  }
  0xc0   : > { %767 = vperm.xlu0 %7497, %v684_v17  }
 0x11f   : > { %v698_v25 = vpop.permute.xlu1 %697  ;;  %v688_v26 = vpop.permute.xlu0 %687 }
 0x120   : > { %v8165_v29 = vmul.f32 %v8156_v23, %v688_v26  ;;  %v8168_v30 = vmul.f32 %v8160_v24, %v688_v26  ;;  %v8171_v31 = vmul.f32 %v8160_v24, %v698_v25  ;;  %v8181_v35 = vmul.f32 %v8156_v23, %v698_v25 }
 0x122   : > { %v8174_v32 = vmul.f32 %v8165_v29, %v394_v27  ;;  %v8177_v33 = vmul.f32 %v8168_v30, %v395_v28  ;;  %v8203_v48 = vmul.f32 %v8171_v31, %v399_v34  ;;  %v8229_v60 = vmul.f32 %v8181_v35, %v398_v47 }
 0x123   : > { %v703_v36 = vpop.permute.xlu1 %702  ;;  %v693_v37 = vpop.permute.xlu0 %692 }
 0x124   : > { %15002 = vst [vmem:[#allocation20_spill] sm:$0xff] %v8174_v32  ;;  %15003 = vst [vmem:[#allocation21_spill] sm:$0xff] %v8177_v33  ;;  %v8187_v41 = vmul.f32 %v8156_v23, %v703_v36  ;;  %v8190_v42 = vmul.f32 %v8160_v24, %v703_v36  ;;  %v8193_v43 = vmul.f32 %v8156_v23, %v693_v37  ;;  %v1858_v46 = vsel %vm14965_vm0, %v8177_v33, 0.0  ;;  %v424_v33 = vld [vmem:[%s8110_s13 + $0xf0] sm:$0xff] }
 0x125   : > { %v8196_v44 = vmul.f32 %v8160_v24, %v693_v37  ;;  %15005 = vst [vmem:[#allocation23_spill] sm:$0xff] %v8203_v48  ;;  %v1859_v49 = vadd.f32 %v1858_v46, %v8174_v32  ;;  %15011 = vst [vmem:[#allocation29_spill] sm:$0xff] %v8229_v60  ;;  %v1866_v2 = vsel %vm14965_vm0, %v8203_v48, 0.0  ;;  %v529_v32 = vld [vmem:[%s8110_s13 + $0x438] sm:$0x3] }
 0x126   : > { %15004 = vst [vmem:[#allocation22_spill] sm:$0xff] %v8187_v41  ;;  %v8207_v50 = vmul.f32 %v8193_v43, %v396_v38  ;;  %v8213_v52 = vmul.f32 %v8187_v41, %v400_v40  ;;  %v8216_v55 = vmul.f32 %v8190_v42, %v401_v45  ;;  %v1867_v17 = vadd.f32 %v1866_v2, %v8229_v60  ;;  %v506_v60 = vld [vmem:[%s8110_s13 + $0x380] sm:$0xff] }
 0x127   : > { %v8210_v51 = vmul.f32 %v8196_v44, %v397_v39  ;;  %v713_v53 = vpop.permute.xlu1 %712  ;;  %v708_v54 = vpop.permute.xlu0 %707  ;;  %1860 = vadd.xlane.f32.xlu1 %v1859_v49  ;;  %v412_v49 = vld [vmem:[%s8110_s13 + $0x90] sm:$0xff] }
 0x128   : > { %15006 = vst [vmem:[#allocation24_spill] sm:$0xff] %v8207_v50  ;;  %15008 = vst [vmem:[#allocation26_spill] sm:$0xff] %v8213_v52  ;;  %v8220_v57 = vmul.f32 %v8156_v23, %v713_v53  ;;  %v8223_v58 = vmul.f32 %v8160_v24, %v713_v53  ;;  %v8226_v59 = vmul.f32 %v8160_v24, %v708_v54  ;;  %v1870_v1 = vsel %vm14965_vm0, %v8216_v55, 0.0  ;;  %v413_v53 = vld [vmem:[%s8110_s13 + $0x98] sm:$0xff] }
 0x129   : > { %15007 = vst [vmem:[#allocation25_spill] sm:$0xff] %v8210_v51  ;;  %15009 = vst [vmem:[#allocation27_spill] sm:$0xff] %v8216_v55  ;;  %v8234_v63 = vmul.f32 %v8156_v23, %v708_v54  ;;  %v1862_v0 = vsel %vm14965_vm0, %v8210_v51, 0.0  ;;  %v1871_v5 = vadd.f32 %v1870_v1, %v8213_v52  ;;  %v433_v55 = vld [vmem:[%s8110_s13 + $0x138] sm:$0xff] }
 0x12a   : > { %15010 = vst [vmem:[#allocation28_spill] sm:$0xff] %v8220_v57  ;;  %v1863_v3 = vadd.f32 %v1862_v0, %v8207_v50  ;;  %v2432_v4 = vadd.f32 %v1862_v0, %v1858_v46  ;;  %v8245_v6 = vmul.f32 %v8220_v57, %v404_v56  ;;  %v8249_v10 = vmul.f32 %v8223_v58, %v405_v61  ;;  %v406_v46 = vld [vmem:[%s8110_s13 + $0x60] sm:$0xff]  ;;  %v411_v0 = vld [vmem:[%s8110_s13 + $0x88] sm:$0xff] }
 0x12b   : > { %v723_v8 = vpop.permute.xlu1 %722  ;;  %v718_v9 = vpop.permute.xlu0 %717  ;;  %v8252_v11 = vmul.f32 %v8226_v59, %v403_v62  ;;  %1872 = vadd.xlane.f32.xlu1 %v1871_v5  ;;  %v8273_v28 = vmul.f32 %v8234_v63, %v402_v7 }
 0x12c   : > { %15012 = vst [vmem:[#allocation30_spill] sm:$0xff] %v8245_v6  ;;  %15013 = vst [vmem:[#allocation31_spill] sm:$0xff] %v8249_v10  ;;  %v8257_v14 = vmul.f32 %v8156_v23, %v723_v8  ;;  %v8260_v15 = vmul.f32 %v8160_v24, %v723_v8  ;;  %v8263_v16 = vmul.f32 %v8160_v24, %v718_v9  ;;  %1864 = vadd.xlane.f32.xlu0 %v1863_v3 }
 0x12d   : > { %15014 = vst [vmem:[#allocation32_spill] sm:$0xff] %v8252_v11  ;;  %v8268_v25 = vmul.f32 %v8156_v23, %v718_v9  ;;  %v2433_v26 = vadd.f32 %v2432_v4, %v1866_v2  ;;  %v1878_v27 = vsel %vm14965_vm0, %v8249_v10, 0.0  ;;  %15015 = vst [vmem:[#allocation33_spill] sm:$0xff] %v8273_v28  ;;  %v1874_v36 = vsel %vm14965_vm0, %v8252_v11, 0.0  ;;  %v410_v4 = vld [vmem:[%s8110_s13 + $0x80] sm:$0xff] }
 0x12e   : > { %v1879_v34 = vadd.f32 %v1878_v27, %v8245_v6  ;;  %v8279_v37 = vmul.f32 %v8257_v14, %v408_v12  ;;  %v8282_v38 = vmul.f32 %v8260_v15, %v409_v13  ;;  %v8286_v47 = vmul.f32 %v8263_v16, %v407_v22 }
 0x12f   : > { %v733_v39 = vpop.permute.xlu1 %732  ;;  %v728_v40 = vpop.permute.xlu0 %727  ;;  %v2434_v45 = vadd.f32 %v2433_v26, %v1870_v1  ;;  %v1875_v1 = vadd.f32 %v1874_v36, %v8273_v28  ;;  %v8309_v7 = vmul.f32 %v8268_v25, %v406_v46  ;;  %v499_v28 = vld [vmem:[%s8110_s13 + $0x348] sm:$0xff] }
 0x130   : > { %15016 = vst [vmem:[#allocation34_spill] sm:$0xff] %v8279_v37  ;;  %15017 = vst [vmem:[#allocation35_spill] sm:$0xff] %v8282_v38  ;;  %v8291_v54 = vmul.f32 %v8156_v23, %v733_v39  ;;  %v8294_v56 = vmul.f32 %v8160_v24, %v733_v39  ;;  %v8297_v61 = vmul.f32 %v8156_v23, %v728_v40  ;;  %1868 = vadd.xlane.f32.xlu0 %v1867_v17 }
 0x131   : > { %15018 = vst [vmem:[#allocation36_spill] sm:$0xff] %v8286_v47  ;;  %v8300_v62 = vmul.f32 %v8160_v24, %v728_v40  ;;  %1880 = vadd.xlane.f32.xlu1 %v1879_v34  ;;  %v2435_v2 = vadd.f32 %v2434_v45, %v1874_v36  ;;  %v1886_v3 = vsel %vm14965_vm0, %v8282_v38, 0.0  ;;  %15021 = vst [vmem:[#allocation39_spill] sm:$0xff] %v8309_v7  ;;  %v1882_v17 = vsel %vm14965_vm0, %v8286_v47, 0.0  ;;  %v416_v34 = vld [vmem:[%s8110_s13 + $0xb0] sm:$0xff]  ;;  %v417_v36 = vld [vmem:[%s8110_s13 + $0xb8] sm:$0xff] }
 0x132   : > { %15019 = vst [vmem:[#allocation37_spill] sm:$0xff] %v8291_v54  ;;  %15020 = vst [vmem:[#allocation38_spill] sm:$0xff] %v8297_v61  ;;  %v1887_v5 = vadd.f32 %v1886_v3, %v8279_v37  ;;  %v8312_v8 = vmul.f32 %v8291_v54, %v412_v49  ;;  %v8315_v9 = vmul.f32 %v8294_v56, %v413_v53 }
 0x133   : > { %v743_v12 = vpop.permute.xlu1 %742  ;;  %v738_v13 = vpop.permute.xlu0 %737  ;;  %v2436_v22 = vadd.f32 %v2435_v2, %v1878_v27  ;;  %v8320_v26 = vmul.f32 %v8300_v62, %v411_v0  ;;  %v8334_v46 = vmul.f32 %v8297_v61, %v410_v4  ;;  %v415_v27 = vld [vmem:[%s8110_s13 + $0xa8] sm:$0xff] }
 0x134   : > { %15022 = vst [vmem:[#allocation40_spill] sm:$0xff] %v8312_v8  ;;  %15023 = vst [vmem:[#allocation41_spill] sm:$0xff] %v8315_v9  ;;  %v8325_v39 = vmul.f32 %v8156_v23, %v743_v12  ;;  %v8328_v40 = vmul.f32 %v8160_v24, %v743_v12  ;;  %v8331_v45 = vmul.f32 %v8160_v24, %v738_v13  ;;  %1876 = vadd.xlane.f32.xlu0 %v1875_v1 }
 0x135   : > { %15024 = vst [vmem:[#allocation42_spill] sm:$0xff] %v8320_v26  ;;  %15026 = vst [vmem:[#allocation44_spill] sm:$0xff] %v8334_v46  ;;  %v8338_v49 = vmul.f32 %v8156_v23, %v738_v13  ;;  %1888 = vadd.xlane.f32.xlu1 %v1887_v5  ;;  %v2437_v53 = vadd.f32 %v2436_v22, %v1882_v17  ;;  %v1894_v0 = vsel %vm14965_vm0, %v8315_v9, 0.0  ;;  %v1890_v2 = vsel %vm14965_vm0, %v8320_v26, 0.0  ;;  %v414_v5 = vld [vmem:[%s8110_s13 + $0xa0] sm:$0xff]  ;;  %v420_v26 = vld [vmem:[%s8110_s13 + $0xd0] sm:$0xff] }
 0x136   : > { %15025 = vst [vmem:[#allocation43_spill] sm:$0xff] %v8325_v39  ;;  %v1883_v12 = vadd.f32 %v1882_v17, %v8309_v7  ;;  %v1895_v1 = vadd.f32 %v1894_v0, %v8312_v8  ;;  %v8347_v4 = vmul.f32 %v8325_v39, %v416_v34  ;;  %v8350_v13 = vmul.f32 %v8328_v40, %v417_v36  ;;  %v421_v17 = vld [vmem:[%s8110_s13 + $0xd8] sm:$0xff]  ;;  %v427_v7 = vld [vmem:[%s8110_s13 + $0x108] sm:$0x3] }
 0x137   : > { %15027 = vst [vmem:[#allocation45_spill] sm:$0xff] %v8338_v49  ;;  %v753_v22 = vpop.permute.xlu1 %752  ;;  %v748_v21 = vpop.permute.xlu0 %747  ;;  %v2438_v18 = vadd.f32 %v2437_v53, %v1886_v3  ;;  %v8354_v9 = vmul.f32 %v8331_v45, %v415_v27  ;;  %v1891_v36 = vadd.f32 %v1890_v2, %v8334_v46  ;;  %v419_v3 = vld [vmem:[%s8110_s13 + $0xc8] sm:$0xff]  ;;  %v429_v53 = vld [vmem:[%s8110_s13 + $0x118] sm:$0xff]  ;;  %v8376_v11 = vmul.f32 %v8338_v49, %v414_v5 }
 0x138   : > { %15028 = vst [vmem:[#allocation46_spill] sm:$0xff] %v8347_v4  ;;  %15029 = vst [vmem:[#allocation47_spill] sm:$0xff] %v8350_v13  ;;  %v8359_v38 = vmul.f32 %v8156_v23, %v753_v22  ;;  %v8362_v47 = vmul.f32 %v8160_v24, %v753_v22  ;;  %v8365_v34 = vmul.f32 %v8160_v24, %v748_v21  ;;  %1884 = vadd.xlane.f32.xlu0 %v1883_v12 }
 0x139   : > { %15030 = vst [vmem:[#allocation48_spill] sm:$0xff] %v8354_v9  ;;  %v8371_v27 = vmul.f32 %v8156_v23, %v748_v21  ;;  %1896 = vadd.xlane.f32.xlu1 %v1895_v1  ;;  %v2439_v10 = vadd.f32 %v2438_v18, %v1890_v2  ;;  %v1902_v22 = vsel %vm14965_vm0, %v8350_v13, 0.0  ;;  %15032 = vst [vmem:[#allocation50_spill] sm:$0xff] %v8376_v11  ;;  %v1898_v48 = vsel %vm14965_vm0, %v8354_v9, 0.0  ;;  %v418_v18 = vld [vmem:[%s8110_s13 + $0xc0] sm:$0xff] }
 0x13a   : > { %15031 = vst [vmem:[#allocation49_spill] sm:$0xff] %v8359_v38  ;;  %v1903_v12 = vadd.f32 %v1902_v22, %v8347_v4  ;;  %v8383_v51 = vmul.f32 %v8359_v38, %v420_v26  ;;  %v8386_v21 = vmul.f32 %v8362_v47, %v421_v17  ;;  %v8390_v5 = vmul.f32 %v8365_v34, %v419_v3 }
 0x13b   : > { %v763_v2 = vpop.permute.xlu1 %762  ;;  %v758_v1 = vpop.permute.xlu0 %757  ;;  %v2440_v13 = vadd.f32 %v2439_v10, %v1894_v0  ;;  %v8395_v19 = vmul.f32 %v8168_v30, %v429_v53  ;;  %v423_v10 = vld [vmem:[%s8110_s13 + $0xe8] sm:$0xff]  ;;  %v8408_v0 = vmul.f32 %v8171_v31, %v433_v55  ;;  %v1899_v3 = vadd.f32 %v1898_v48, %v8376_v11  ;;  %v422_v11 = vld [vmem:[%s8110_s13 + $0xe0] sm:$0xff] }
 0x13c   : > { %15033 = vst [vmem:[#allocation51_spill] sm:$0xff] %v8383_v51  ;;  %15034 = vst [vmem:[#allocation52_spill] sm:$0xff] %v8386_v21  ;;  %v8398_v9 = vmul.f32 %v8156_v23, %v763_v2  ;;  %v8401_v26 = vmul.f32 %v8160_v24, %v763_v2  ;;  %v8404_v17 = vmul.f32 %v8160_v24, %v758_v1  ;;  %1892 = vadd.xlane.f32.xlu0 %v1891_v36  ;;  %v431_v2 = vld [vmem:[%s8110_s13 + $0x128] sm:$0xff] }
 0x13d   : > { %15035 = vst [vmem:[#allocation53_spill] sm:$0xff] %v8390_v5  ;;  %15036 = vst [vmem:[#allocation54_spill] sm:$0xff] %v8395_v19  ;;  %1904 = vadd.xlane.f32.xlu1 %v1903_v12  ;;  %v2441_v53 = vadd.f32 %v2440_v13, %v1898_v48  ;;  %v1910_v4 = vsel %vm14965_vm0, %v8386_v21, 0.0  ;;  %v8414_v8 = vmul.f32 %v8371_v27, %v418_v18  ;;  %v428_v48 = vld [vmem:[%s8110_s13 + $0x110] sm:$0xff]  ;;  %v1906_v18 = vsel %vm14965_vm0, %v8390_v5, 0.0  ;;  %v435_v5 = vld [vmem:[%s8110_s13 + $0x148] sm:$0xff] }
 0x13e   : > { %15037 = vst [vmem:[#allocation55_spill] sm:$0xff] %v8398_v9  ;;  %15038 = vst [vmem:[#allocation56_spill] sm:$0xff] %v8408_v0  ;;  %v8418_v36 = vmul.f32 %v8156_v23, %v758_v1  ;;  %v1911_v46 = vadd.f32 %v1910_v4, %v8383_v51  ;;  %v8422_v55 = vmul.f32 %v8398_v9, %v424_v33  ;;  %v426_v33 = vld [vmem:[%s8110_s13 + $0x100] sm:$0x3] }
 0x13f   : > { %15039 = vst [vmem:[#allocation57_spill] sm:$0xff] %v8414_v8  ;;  %v8425_v12 = vmul.f32 %v8401_v26, %v425_v20  ;;  %v768_v13 = vpop.permute.xlu0 %767  ;;  %v2442_v21 = vadd.f32 %v2441_v53, %v1902_v22  ;;  %v8432_v37 = vmul.f32 %v8404_v17, %v423_v10  ;;  %v8445_v22 = vmul.f32 %v8196_v44, %v431_v2 }
 0x140   : > { %15040 = vst [vmem:[#allocation58_spill] sm:$0xff] %v8422_v55  ;;  %v8435_v1 = vmul.f32 %v8156_v23, %v768_v13  ;;  %v8438_v51 = vmul.f32 %v8160_v24, %v768_v13  ;;  %1900 = vadd.xlane.f32.xlu0 %v1899_v3  ;;  %v8449_v23 = vmul.f32 %v8165_v29, %v428_v48  ;;  %v1927_v24 = vsel %vm14965_vm0, %v8395_v19, 0.0 }
 0x141   : > { %15041 = vst [vmem:[#allocation59_spill] sm:$0xff] %v8425_v12  ;;  %15042 = vst [vmem:[#allocation60_spill] sm:$0xff] %v8432_v37  ;;  %v1918_v20 = vsel %vm14965_vm0, %v8425_v12, 0.0  ;;  %1912 = vadd.xlane.f32.xlu1 %v1911_v46  ;;  %v2443_v10 = vadd.f32 %v2442_v21, %v1906_v18  ;;  %v1907_v3 = vadd.f32 %v1906_v18, %v8414_v8  ;;  %v1935_v2 = vsel %vm14965_vm0, %v8408_v0, 0.0 }
 0x142   : > { %15043 = vst [vmem:[#allocation61_spill] sm:$0xff] %v8435_v1  ;;  %15044 = vst [vmem:[#allocation62_spill] sm:$0xff] %v8445_v22  ;;  %v1919_v53 = vadd.f32 %v1918_v20, %v8422_v55  ;;  %v8455_v13 = vmul.f32 %v8418_v36, %v422_v11  ;;  %v1931_v46 = vsel %vm14965_vm0, %v8445_v22, 0.0  ;;  %v1914_v21 = vsel %vm14965_vm0, %v8432_v37, 0.0  ;;  %v437_v11 = vld [vmem:[%s8110_s13 + $0x158] sm:$0xff] }
 0x143   : > { %15045 = vst [vmem:[#allocation63_spill] sm:$0xff] %v8449_v23  ;;  %v2444_v48 = vadd.f32 %v2443_v10, %v1910_v4  ;;  %v8464_v12 = vmul.f32 %v8435_v1, %v426_v33  ;;  %v8467_v18 = vmul.f32 %v8438_v51, %v427_v7  ;;  %v2476_v0 = vadd.f32 %v1931_v46, %v1927_v24  ;;  %v432_v4 = vld [vmem:[%s8110_s13 + $0x130] sm:$0xff]  ;;  %v430_v10 = vld [vmem:[%s8110_s13 + $0x120] sm:$0xff] }
 0x144   : > { %15046 = vst [vmem:[#allocation64_spill] sm:$0xff] %v8455_v13  ;;  %1908 = vadd.xlane.f32.xlu0 %v1907_v3  ;;  %v1915_v37 = vadd.f32 %v1914_v21, %v8455_v13  ;;  %v8475_v33 = vmul.f32 %v8226_v59, %v437_v11  ;;  %v8478_v7 = vmul.f32 %v8190_v42, %v435_v5  ;;  %v439_v13 = vld [vmem:[%s8110_s13 + $0x168] sm:$0xff]  ;;  %v436_v11 = vld [vmem:[%s8110_s13 + $0x150] sm:$0xff] }
 0x145   : > { %15047 = vst [vmem:[#allocation65_spill] sm:$0xff] %v8464_v12  ;;  %15048 = vst [vmem:[#allocation66_spill] sm:$0xff] %v8467_v18  ;;  %1920 = vadd.xlane.f32.xlu1 %v1919_v53  ;;  %v2445_v22 = vadd.f32 %v2444_v48, %v1914_v21  ;;  %v2477_v19 = vadd.f32 %v2476_v0, %v1935_v2  ;;  %v1928_v3 = vadd.f32 %v1927_v24, %v8449_v23  ;;  %v441_v48 = vld [vmem:[%s8110_s13 + $0x178] sm:$0xff] }
 0x146   : > { %15049 = vst [vmem:[#allocation67_spill] sm:$0xff] %v8475_v33  ;;  %15050 = vst [vmem:[#allocation68_spill] sm:$0xff] %v8478_v7  ;;  %v8483_v55 = vsel %vm14963_vm2, %v8464_v12, 0.0  ;;  %v1923_v53 = vsel %vm14964_vm1, %v8467_v18, 0.0  ;;  %v1939_v5 = vsel %vm14965_vm0, %v8478_v7, 0.0  ;;  %v8495_v24 = vmul.f32 %v8181_v35, %v432_v4  ;;  %v434_v18 = vld [vmem:[%s8110_s13 + $0x140] sm:$0xff] }
 0x147   : > { %15051 = vst [vmem:[#allocation69_spill] sm:$0xff] %v8483_v55  ;;  %v2446_v21 = vadd.f32 %v2445_v22, %v1918_v20  ;;  %v8498_v12 = vmul.f32 %v8193_v43, %v430_v10  ;;  %v2478_v20 = vadd.f32 %v2477_v19, %v1939_v5  ;;  %v1924_v22 = vadd.f32 %v1923_v53, %v8483_v55  ;;  %v445_v19 = vld [vmem:[%s8110_s13 + $0x198] sm:$0xff]  ;;  %v444_v55 = vld [vmem:[%s8110_s13 + $0x190] sm:$0xff] }
 0x148   : > { %1916 = vadd.xlane.f32.xlu0 %v1915_v37  ;;  %15053 = vst [vmem:[#allocation71_spill] sm:$0xff] %v8495_v24  ;;  %v1943_v37 = vsel %vm14965_vm0, %v8475_v33, 0.0  ;;  %v8505_v8 = vmul.f32 %v8263_v16, %v441_v48  ;;  %v8512_v4 = vmul.f32 %v8234_v63, %v436_v11  ;;  %v440_v33 = vld [vmem:[%s8110_s13 + $0x170] sm:$0xff]  ;;  %v8526_v7 = vmul.f32 %v8300_v62, %v445_v19  ;;  %v469_v23 = vld [vmem:[%s8110_s13 + $0x258] sm:$0xff] }
 0x149   : > { %1929 = vadd.xlane.f32.xlu1 %v1928_v3  ;;  %v8492_v0 = vadd.f32 %v2446_v21, %v1923_v53  ;;  %15054 = vst [vmem:[#allocation72_spill] sm:$0xff] %v8498_v12  ;;  %v8508_v3 = vmul.f32 %v8223_v58, %v439_v13  ;;  %v1936_v21 = vadd.f32 %v1935_v2, %v8495_v24  ;;  %v443_v53 = vld [vmem:[%s8110_s13 + $0x188] sm:$0xff]  ;;  %v450_v24 = vld [vmem:[%s8110_s13 + $0x1c0] sm:$0xff] }
 0x14a   : > { %15055 = vst [vmem:[#allocation73_spill] sm:$0xff] %v8505_v8  ;;  %15057 = vst [vmem:[#allocation75_spill] sm:$0xff] %v8512_v4  ;;  %v2479_v10 = vadd.f32 %v2478_v20, %v1943_v37  ;;  %v8520_v13 = vmul.f32 %v8187_v41, %v434_v18  ;;  %v1932_v11 = vadd.f32 %v1931_v46, %v8498_v12  ;;  %v1951_v20 = vsel %vm14965_vm0, %v8505_v8, 0.0  ;;  %v438_v18 = vld [vmem:[%s8110_s13 + $0x160] sm:$0xff]  ;;  %v447_v46 = vld [vmem:[%s8110_s13 + $0x1a8] sm:$0xff] }
 0x14b   : > { %15052 = vst [vmem:[#allocation70_spill] sm:$0xff] %v8492_v0  ;;  %15056 = vst [vmem:[#allocation74_spill] sm:$0xff] %v8508_v3  ;;  %v1947_v48 = vsel %vm14965_vm0, %v8508_v3, 0.0  ;;  %v1944_v0 = vadd.f32 %v1943_v37, %v8512_v4  ;;  %v451_v37 = vld [vmem:[%s8110_s13 + $0x1c8] sm:$0xff] }
 0x14c   : > { %1925 = vadd.xlane.f32.xlu0 %v1924_v22  ;;  %15058 = vst [vmem:[#allocation76_spill] sm:$0xff] %v8520_v13  ;;  %v2480_v2 = vadd.f32 %v2479_v10, %v1947_v48  ;;  %15059 = vst [vmem:[#allocation77_spill] sm:$0xff] %v8526_v7  ;;  %v8529_v22 = vmul.f32 %v8260_v15, %v443_v53  ;;  %v449_v10 = vld [vmem:[%s8110_s13 + $0x1b8] sm:$0xff]  ;;  %v1940_v53 = vadd.f32 %v1939_v5, %v8520_v13  ;;  %v442_v5 = vld [vmem:[%s8110_s13 + $0x180] sm:$0xff] }
 0x14d   : > { %1937 = vadd.xlane.f32.xlu1 %v1936_v21  ;;  %v8533_v21 = vmul.f32 %v8268_v25, %v440_v33  ;;  %v8544_v33 = vmul.f32 %v8220_v57, %v438_v18  ;;  %v8549_v4 = vmul.f32 %v8331_v45, %v449_v10  ;;  %v453_v13 = vld [vmem:[%s8110_s13 + $0x1d8] sm:$0xff]  ;;  %v448_v18 = vld [vmem:[%s8110_s13 + $0x1b0] sm:$0xff] }
 0x14e   : > { %15060 = vst [vmem:[#allocation78_spill] sm:$0xff] %v8529_v22  ;;  %v2481_v3 = vadd.f32 %v2480_v2, %v1951_v20  ;;  %v1955_v19 = vsel %vm14965_vm0, %v8529_v22, 0.0  ;;  %v1959_v2 = vsel %vm14965_vm0, %v8526_v7, 0.0  ;;  %v8564_v7 = vmul.f32 %v8328_v40, %v451_v37  ;;  %v446_v37 = vld [vmem:[%s8110_s13 + $0x1a0] sm:$0xff] }
 0x14f   : > { %15061 = vst [vmem:[#allocation79_spill] sm:$0xff] %v8533_v21  ;;  %15062 = vst [vmem:[#allocation80_spill] sm:$0xff] %v8544_v33  ;;  %v1952_v22 = vadd.f32 %v1951_v20, %v8533_v21  ;;  %v8574_v21 = vmul.f32 %v8365_v34, %v453_v13 }
 0x150   : > { %1933 = vadd.xlane.f32.xlu0 %v1932_v11  ;;  %v2482_v8 = vadd.f32 %v2481_v3, %v1955_v19  ;;  %15063 = vst [vmem:[#allocation81_spill] sm:$0xff] %v8549_v4  ;;  %v8552_v11 = vmul.f32 %v8294_v56, %v447_v46  ;;  %15066 = vst [vmem:[#allocation84_spill] sm:$0xff] %v8564_v7  ;;  %v455_v46 = vld [vmem:[%s8110_s13 + $0x1e8] sm:$0xff] }
 0x151   : > { %1945 = vadd.xlane.f32.xlu1 %v1944_v0  ;;  %v8556_v0 = vmul.f32 %v8297_v61, %v444_v55  ;;  %v1948_v55 = vadd.f32 %v1947_v48, %v8544_v33  ;;  %15068 = vst [vmem:[#allocation86_spill] sm:$0xff] %v8574_v21  ;;  %v457_v48 = vld [vmem:[%s8110_s13 + $0x1f8] sm:$0xff]  ;;  %v1971_v33 = vsel %vm14965_vm0, %v8564_v7, 0.0  ;;  %v8586_v13 = vmul.f32 %v8362_v47, %v455_v46  ;;  %v463_v46 = vld [vmem:[%s8110_s13 + $0x228] sm:$0xff] }
 0x152   : > { %15064 = vst [vmem:[#allocation82_spill] sm:$0xff] %v8552_v11  ;;  %v2483_v3 = vadd.f32 %v2482_v8, %v1959_v2  ;;  %v1963_v10 = vsel %vm14965_vm0, %v8552_v11, 0.0  ;;  %v8569_v8 = vmul.f32 %v8257_v14, %v442_v5  ;;  %v452_v5 = vld [vmem:[%s8110_s13 + $0x1d0] sm:$0xff]  ;;  %v8598_v7 = vmul.f32 %v8404_v17, %v457_v48 }
 0x153   : > { %15065 = vst [vmem:[#allocation83_spill] sm:$0xff] %v8556_v0  ;;  %v1960_v11 = vadd.f32 %v1959_v2, %v8556_v0  ;;  %15070 = vst [vmem:[#allocation88_spill] sm:$0xff] %v8586_v13  ;;  %v459_v0 = vld [vmem:[%s8110_s13 + $0x208] sm:$0xff] }
 0x154   : > { %1941 = vadd.xlane.f32.xlu0 %v1940_v53  ;;  %v2484_v20 = vadd.f32 %v2483_v3, %v1963_v10  ;;  %15067 = vst [vmem:[#allocation85_spill] sm:$0xff] %v8569_v8  ;;  %v1967_v53 = vsel %vm14965_vm0, %v8549_v4, 0.0  ;;  %v465_v4 = vld [vmem:[%s8110_s13 + $0x238] sm:$0xff]  ;;  %15072 = vst [vmem:[#allocation90_spill] sm:$0xff] %v8598_v7  ;;  %v8613_v48 = vmul.f32 %v8401_v26, %v459_v0 }
 0x155   : > { %1953 = vadd.xlane.f32.xlu1 %v1952_v22  ;;  %v8578_v22 = vmul.f32 %v8338_v49, %v448_v18  ;;  %v1956_v18 = vadd.f32 %v1955_v19, %v8569_v8  ;;  %v461_v8 = vld [vmem:[%s8110_s13 + $0x218] sm:$0x3] }
 0x156   : > { %v2485_v3 = vadd.f32 %v2484_v20, %v1967_v53  ;;  %v8592_v20 = vmul.f32 %v8291_v54, %v446_v37  ;;  %v8608_v37 = vmul.f32 %v8196_v44, %v465_v4  ;;  %15075 = vst [vmem:[#allocation93_spill] sm:$0xff] %v8613_v48  ;;  %v8623_v4 = vmul.f32 %v8168_v30, %v463_v46 }
 0x157   : > { %15069 = vst [vmem:[#allocation87_spill] sm:$0xff] %v8578_v22  ;;  %v1968_v12 = vadd.f32 %v1967_v53, %v8578_v22  ;;  %v8617_v53 = vmul.f32 %v8325_v39, %v450_v24  ;;  %v460_v22 = vld [vmem:[%s8110_s13 + $0x210] sm:$0x3]  ;;  %v8633_v24 = vmul.f32 %v8438_v51, %v461_v8 }
 0x158   : > { %1949 = vadd.xlane.f32.xlu0 %v1948_v55  ;;  %v2486_v2 = vadd.f32 %v2485_v3, %v1971_v33  ;;  %15071 = vst [vmem:[#allocation89_spill] sm:$0xff] %v8592_v20  ;;  %v1975_v55 = vsel %vm14965_vm0, %v8574_v21, 0.0  ;;  %v456_v3 = vld [vmem:[%s8110_s13 + $0x1f0] sm:$0xff]  ;;  %15074 = vst [vmem:[#allocation92_spill] sm:$0xff] %v8608_v37  ;;  %v1979_v21 = vsel %vm14965_vm0, %v8586_v13, 0.0  ;;  %v1964_v6 = vadd.f32 %v1963_v10, %v8592_v20 }
 0x159   : > { %1961 = vadd.xlane.f32.xlu1 %v1960_v11  ;;  %v8603_v11 = vmul.f32 %v8371_v27, %v452_v5  ;;  %15076 = vst [vmem:[#allocation94_spill] sm:$0xff] %v8617_v53  ;;  %15077 = vst [vmem:[#allocation95_spill] sm:$0xff] %v8623_v4  ;;  %v8628_v13 = vmul.f32 %v8418_v36, %v456_v3  ;;  %v1996_v46 = vsel %vm14965_vm0, %v8623_v4, 0.0  ;;  %v473_v4 = vld [vmem:[%s8110_s13 + $0x278] sm:$0xff] }
 0x15a   : > { %v2487_v19 = vadd.f32 %v2486_v2, %v1975_v55  ;;  %v2000_v2 = vsel %vm14965_vm0, %v8608_v37, 0.0  ;;  %15079 = vst [vmem:[#allocation97_spill] sm:$0xff] %v8633_v24  ;;  %v8640_v10 = vmul.f32 %v8190_v42, %v469_v23  ;;  %v8643_v3 = vmul.f32 %v8435_v1, %v460_v22  ;;  %v471_v23 = vld [vmem:[%s8110_s13 + $0x268] sm:$0xff] }
 0x15b   : > { %15073 = vst [vmem:[#allocation91_spill] sm:$0xff] %v8603_v11  ;;  %15078 = vst [vmem:[#allocation96_spill] sm:$0xff] %v8628_v13  ;;  %v1976_v0 = vadd.f32 %v1975_v55, %v8603_v11  ;;  %v2520_v8 = vadd.f32 %v2000_v2, %v1996_v46  ;;  %v1972_v55 = vadd.f32 %v1971_v33, %v8617_v53  ;;  %v1992_v22 = vsel %vm14964_vm1, %v8633_v24, 0.0  ;;  %v458_v33 = vld [vmem:[%s8110_s13 + $0x200] sm:$0xff]  ;;  %v464_v24 = vld [vmem:[%s8110_s13 + $0x230] sm:$0xff] }
 0x15c   : > { %1957 = vadd.xlane.f32.xlu0 %v1956_v18  ;;  %v2488_v5 = vadd.f32 %v2487_v19, %v1979_v21  ;;  %v467_v18 = vld [vmem:[%s8110_s13 + $0x248] sm:$0xff]  ;;  %v454_v19 = vld [vmem:[%s8110_s13 + $0x1e0] sm:$0xff]  ;;  %15080 = vst [vmem:[#allocation98_spill] sm:$0xff] %v8640_v10  ;;  %15081 = vst [vmem:[#allocation99_spill] sm:$0xff] %v8643_v3  ;;  %v8672_v53 = vmul.f32 %v8223_v58, %v473_v4 }
 0x15d   : > { %1969 = vadd.xlane.f32.xlu1 %v1968_v12  ;;  %v1983_v12 = vsel %vm14965_vm0, %v8598_v7, 0.0  ;;  %v1987_v7 = vsel %vm14965_vm0, %v8613_v48, 0.0  ;;  %v8648_v20 = vmul.f32 %v8171_v31, %v467_v18  ;;  %v2008_v48 = vsel %vm14965_vm0, %v8640_v10, 0.0 }
 0x15e   : > { %v2489_v37 = vadd.f32 %v2488_v5, %v1983_v12  ;;  %15086 = vst [vmem:[#allocation104_spill] sm:$0xff] %v8672_v53  ;;  %v8675_v10 = vmul.f32 %v8226_v59, %v471_v23  ;;  %v8689_v23 = vmul.f32 %v8193_v43, %v464_v24 }
 0x15f   : > { %15082 = vst [vmem:[#allocation100_spill] sm:$0xff] %v8648_v20  ;;  %v2004_v18 = vsel %vm14965_vm0, %v8648_v20, 0.0  ;;  %v475_v20 = vld [vmem:[%s8110_s13 + $0x288] sm:$0xff] }
 0x160   : > { %1965 = vadd.xlane.f32.xlu0 %v1964_v6  ;;  %v2490_v5 = vadd.f32 %v2489_v37, %v1987_v7  ;;  %v8654_v6 = vmul.f32 %v8359_v38, %v454_v19  ;;  %v2521_v11 = vadd.f32 %v2520_v8, %v2004_v18  ;;  %v8668_v19 = vsel %vm14963_vm2, %v8643_v3, 0.0  ;;  %15087 = vst [vmem:[#allocation105_spill] sm:$0xff] %v8675_v10 }
 0x161   : > { %1977 = vadd.xlane.f32.xlu1 %v1976_v0  ;;  %v1984_v0 = vadd.f32 %v1983_v12, %v8628_v13  ;;  %15085 = vst [vmem:[#allocation103_spill] sm:$0xff] %v8668_v19  ;;  %v8685_v3 = vsel %vm14965_vm0, %v8675_v10, 0.0  ;;  %v1993_v4 = vadd.f32 %v1992_v22, %v8668_v19  ;;  %15089 = vst [vmem:[#allocation107_spill] sm:$0xff] %v8689_v23  ;;  %v481_v19 = vld [vmem:[%s8110_s13 + $0x2b8] sm:$0xff]  ;;  %v483_v13 = vld [vmem:[%s8110_s13 + $0x2c8] sm:$0xff] }
 0x162   : > { %15083 = vst [vmem:[#allocation101_spill] sm:$0xff] %v8654_v6  ;;  %v8664_v37 = vadd.f32 %v2490_v5, %v1992_v22  ;;  %v2522_v12 = vadd.f32 %v2521_v11, %v2008_v48  ;;  %v477_v5 = vld [vmem:[%s8110_s13 + $0x298] sm:$0xff]  ;;  %v1980_v8 = vadd.f32 %v1979_v21, %v8654_v6  ;;  %v2016_v21 = vsel %vm14965_vm0, %v8672_v53, 0.0  ;;  %v479_v22 = vld [vmem:[%s8110_s13 + $0x2a8] sm:$0xff] }
 0x163   : > { %v8700_v10 = vmul.f32 %v8263_v16, %v475_v20 }
 0x164   : > { %15084 = vst [vmem:[#allocation102_spill] sm:$0xff] %v8664_v37  ;;  %1973 = vadd.xlane.f32.xlu0 %v1972_v55  ;;  %v8681_v55 = vmul.f32 %v8398_v9, %v458_v33  ;;  %v2523_v11 = vadd.f32 %v2522_v12, %v8685_v3  ;;  %v468_v37 = vld [vmem:[%s8110_s13 + $0x250] sm:$0xff]  ;;  %v8697_v33 = vmul.f32 %v8260_v15, %v477_v5 }
 0x165   : > { %1985 = vadd.xlane.f32.xlu1 %v1984_v0  ;;  %v462_v0 = vld [vmem:[%s8110_s13 + $0x220] sm:$0xff]  ;;  %15091 = vst [vmem:[#allocation109_spill] sm:$0xff] %v8700_v10  ;;  %v8710_v53 = vsel %vm14965_vm0, %v8700_v10, 0.0  ;;  %v2001_v5 = vadd.f32 %v2000_v2, %v8689_v23  ;;  %v8714_v20 = vmul.f32 %v8187_v41, %v468_v37  ;;  %v8725_v10 = vmul.f32 %v8294_v56, %v481_v19 }
 0x166   : > { %15088 = vst [vmem:[#allocation106_spill] sm:$0xff] %v8681_v55  ;;  %15090 = vst [vmem:[#allocation108_spill] sm:$0xff] %v8697_v33  ;;  %v2524_v24 = vadd.f32 %v2523_v11, %v2016_v21  ;;  %v1988_v12 = vadd.f32 %v1987_v7, %v8681_v55  ;;  %v8718_v11 = vmul.f32 %v8300_v62, %v479_v22  ;;  %v472_v7 = vld [vmem:[%s8110_s13 + $0x270] sm:$0xff]  ;;  %v466_v2 = vld [vmem:[%s8110_s13 + $0x240] sm:$0xff] }
 0x167   : > { %15093 = vst [vmem:[#allocation111_spill] sm:$0xff] %v8714_v20  ;;  %15095 = vst [vmem:[#allocation113_spill] sm:$0xff] %v8725_v10  ;;  %v485_v55 = vld [vmem:[%s8110_s13 + $0x2d8] sm:$0xff]  ;;  %v8739_v6 = vmul.f32 %v8220_v57, %v472_v7  ;;  %v470_v19 = vld [vmem:[%s8110_s13 + $0x260] sm:$0xff] }
 0x168   : > { %1981 = vadd.xlane.f32.xlu0 %v1980_v8  ;;  %v8706_v8 = vmul.f32 %v8165_v29, %v462_v0  ;;  %15094 = vst [vmem:[#allocation112_spill] sm:$0xff] %v8718_v11  ;;  %v2024_v0 = vsel %vm14965_vm0, %v8697_v33, 0.0  ;;  %v8732_v22 = vsel %vm14965_vm0, %v8718_v11, 0.0  ;;  %v2009_v33 = vadd.f32 %v2008_v48, %v8714_v20  ;;  %v476_v11 = vld [vmem:[%s8110_s13 + $0x290] sm:$0xff]  ;;  %v489_v20 = vld [vmem:[%s8110_s13 + $0x2f8] sm:$0xff] }
 0x169   : > { %1994 = vadd.xlane.f32.xlu1 %v1993_v4  ;;  %v2525_v4 = vadd.f32 %v2524_v24, %v8710_v53  ;;  %15097 = vst [vmem:[#allocation115_spill] sm:$0xff] %v8739_v6  ;;  %v8751_v48 = vmul.f32 %v8328_v40, %v485_v55  ;;  %v2017_v55 = vadd.f32 %v2016_v21, %v8739_v6  ;;  %v501_v6 = vld [vmem:[%s8110_s13 + $0x358] sm:$0xff] }
 0x16a   : > { %15092 = vst [vmem:[#allocation110_spill] sm:$0xff] %v8706_v8  ;;  %v1997_v24 = vadd.f32 %v1996_v46, %v8706_v8  ;;  %v8745_v46 = vmul.f32 %v8181_v35, %v466_v2  ;;  %v478_v8 = vld [vmem:[%s8110_s13 + $0x2a0] sm:$0xff] }
 0x16b   : > { %v2526_v37 = vadd.f32 %v2525_v4, %v2024_v0  ;;  %v487_v4 = vld [vmem:[%s8110_s13 + $0x2e8] sm:$0xff]  ;;  %15099 = vst [vmem:[#allocation117_spill] sm:$0xff] %v8751_v48  ;;  %v2040_v23 = vsel %vm14965_vm0, %v8751_v48, 0.0 }
 0x16c   : > { %1989 = vadd.xlane.f32.xlu0 %v1988_v12  ;;  %v8735_v12 = vmul.f32 %v8331_v45, %v483_v13  ;;  %15098 = vst [vmem:[#allocation116_spill] sm:$0xff] %v8745_v46  ;;  %v2032_v13 = vsel %vm14965_vm0, %v8725_v10, 0.0  ;;  %v8763_v10 = vmul.f32 %v8365_v34, %v487_v4  ;;  %v493_v4 = vld [vmem:[%s8110_s13 + $0x318] sm:$0xff] }
 0x16d   : > { %2002 = vadd.xlane.f32.xlu1 %v2001_v5  ;;  %v2527_v5 = vadd.f32 %v2526_v37, %v8732_v22  ;;  %v2005_v37 = vadd.f32 %v2004_v18, %v8745_v46  ;;  %v491_v46 = vld [vmem:[%s8110_s13 + $0x308] sm:$0xff] }
 0x16e   : > { %15096 = vst [vmem:[#allocation114_spill] sm:$0xff] %v8735_v12  ;;  %v8760_v2 = vsel %vm14965_vm0, %v8735_v12, 0.0  ;;  %15101 = vst [vmem:[#allocation119_spill] sm:$0xff] %v8763_v10  ;;  %v8776_v12 = vmul.f32 %v8362_v47, %v489_v20  ;;  %v8789_v48 = vsel %vm14965_vm0, %v8763_v10, 0.0  ;;  %v8792_v20 = vmul.f32 %v8404_v17, %v491_v46  ;;  %v484_v10 = vld [vmem:[%s8110_s13 + $0x2d0] sm:$0xff] }
 0x16f   : > { %v2528_v7 = vadd.f32 %v2527_v5, %v2032_v13  ;;  %v474_v5 = vld [vmem:[%s8110_s13 + $0x280] sm:$0xff] }
 0x170   : > { %1998 = vadd.xlane.f32.xlu0 %v1997_v24  ;;  %v8756_v24 = vmul.f32 %v8234_v63, %v470_v19  ;;  %v480_v19 = vld [vmem:[%s8110_s13 + $0x2b0] sm:$0xff]  ;;  %15103 = vst [vmem:[#allocation121_spill] sm:$0xff] %v8776_v12  ;;  %15105 = vst [vmem:[#allocation123_spill] sm:$0xff] %v8792_v20  ;;  %v2048_v52 = vsel %vm14965_vm0, %v8776_v12, 0.0  ;;  %v8822_v12 = vsel %vm14965_vm0, %v8792_v20, 0.0 }
 0x171   : > { %2010 = vadd.xlane.f32.xlu1 %v2009_v33  ;;  %v8767_v33 = vmul.f32 %v8257_v14, %v476_v11  ;;  %v2529_v18 = vadd.f32 %v2528_v7, %v8760_v2  ;;  %v497_v11 = vld [vmem:[%s8110_s13 + $0x338] sm:$0xff]  ;;  %v488_v20 = vld [vmem:[%s8110_s13 + $0x2f0] sm:$0xff] }
 0x172   : > { %15100 = vst [vmem:[#allocation118_spill] sm:$0xff] %v8756_v24  ;;  %v2013_v7 = vadd.f32 %v8685_v3, %v8756_v24  ;;  %v495_v24 = vld [vmem:[%s8110_s13 + $0x328] sm:$0x3]  ;;  %v8808_v46 = vmul.f32 %v8168_v30, %v497_v11 }
 0x173   : > { %15102 = vst [vmem:[#allocation120_spill] sm:$0xff] %v8767_v33  ;;  %v2530_v21 = vadd.f32 %v2529_v18, %v2040_v23  ;;  %v8796_v18 = vmul.f32 %v8291_v54, %v480_v19  ;;  %v8814_v19 = vmul.f32 %v8297_v61, %v478_v8  ;;  %v8825_v11 = vmul.f32 %v8438_v51, %v495_v24 }
 0x174   : > { %2006 = vadd.xlane.f32.xlu0 %v2005_v37  ;;  %v8784_v37 = vmul.f32 %v8268_v25, %v474_v5  ;;  %v8800_v5 = vmul.f32 %v8401_v26, %v493_v4  ;;  %15108 = vst [vmem:[#allocation126_spill] sm:$0xff] %v8808_v46  ;;  %v2065_v24 = vsel %vm14965_vm0, %v8808_v46, 0.0  ;;  %v507_v46 = vld [vmem:[%s8110_s13 + $0x388] sm:$0xff] }
 0x175   : > { %2018 = vadd.xlane.f32.xlu1 %v2017_v55  ;;  %v2025_v55 = vadd.f32 %v2024_v0, %v8767_v33  ;;  %15106 = vst [vmem:[#allocation124_spill] sm:$0xff] %v8796_v18  ;;  %v2531_v3 = vadd.f32 %v2530_v21, %v8789_v48  ;;  %v8811_v0 = vmul.f32 %v8171_v31, %v501_v6  ;;  %15110 = vst [vmem:[#allocation128_spill] sm:$0xff] %v8814_v19  ;;  %v503_v21 = vld [vmem:[%s8110_s13 + $0x368] sm:$0xff]  ;;  %v482_v33 = vld [vmem:[%s8110_s13 + $0x2c0] sm:$0xff] }
 0x176   : > { %15104 = vst [vmem:[#allocation122_spill] sm:$0xff] %v8784_v37  ;;  %15107 = vst [vmem:[#allocation125_spill] sm:$0xff] %v8800_v5  ;;  %v8828_v6 = vmul.f32 %v8196_v44, %v499_v28  ;;  %v2033_v8 = vadd.f32 %v2032_v13, %v8796_v18  ;;  %v8850_v13 = vmul.f32 %v8190_v42, %v503_v21  ;;  %v486_v18 = vld [vmem:[%s8110_s13 + $0x2e0] sm:$0xff] }
 0x177   : > { %15109 = vst [vmem:[#allocation127_spill] sm:$0xff] %v8811_v0  ;;  %v2532_v4 = vadd.f32 %v2531_v3, %v2048_v52  ;;  %15111 = vst [vmem:[#allocation129_spill] sm:$0xff] %v8825_v11  ;;  %v8843_v28 = vsel %vm14965_vm0, %v8811_v0, 0.0  ;;  %v2029_v0 = vadd.f32 %v8732_v22, %v8814_v19  ;;  %v509_v19 = vld [vmem:[%s8110_s13 + $0x398] sm:$0xff] }
 0x178   : > { %2014 = vadd.xlane.f32.xlu0 %v2013_v7  ;;  %v2021_v7 = vadd.f32 %v8710_v53, %v8784_v37  ;;  %15112 = vst [vmem:[#allocation130_spill] sm:$0xff] %v8828_v6  ;;  %v2056_v53 = vsel %vm14965_vm0, %v8800_v5, 0.0  ;;  %v505_v37 = vld [vmem:[%s8110_s13 + $0x378] sm:$0xff]  ;;  %15114 = vst [vmem:[#allocation132_spill] sm:$0xff] %v8850_v13 }
 0x179   : > { %2026 = vadd.xlane.f32.xlu1 %v2025_v55  ;;  %v8832_v55 = vmul.f32 %v8325_v39, %v484_v10  ;;  %v2533_v3 = vadd.f32 %v2532_v4, %v8822_v12  ;;  %v8847_v10 = vsel %vm14965_vm0, %v8828_v6, 0.0  ;;  %v8853_v4 = vmul.f32 %v8338_v49, %v482_v33 }
 0x17a   : > { %v2564_v5 = vadd.f32 %v8847_v10, %v2065_v24  ;;  %v8861_v6 = vsel %vm14964_vm1, %v8825_v11, 0.0  ;;  %v8864_v21 = vmul.f32 %v8226_v59, %v505_v37  ;;  %v492_v37 = vld [vmem:[%s8110_s13 + $0x310] sm:$0xff] }
 0x17b   : > { %15113 = vst [vmem:[#allocation131_spill] sm:$0xff] %v8832_v55  ;;  %15115 = vst [vmem:[#allocation133_spill] sm:$0xff] %v8853_v4  ;;  %v2041_v33 = vadd.f32 %v2040_v23, %v8832_v55  ;;  %v2037_v55 = vadd.f32 %v8760_v2, %v8853_v4  ;;  %v513_v2 = vld [vmem:[%s8110_s13 + $0x3b8] sm:$0xff]  ;;  %v494_v4 = vld [vmem:[%s8110_s13 + $0x320] sm:$0x3] }
 0x17c   : > { %2022 = vadd.xlane.f32.xlu0 %v2021_v7  ;;  %v2534_v7 = vadd.f32 %v2533_v3, %v2056_v53  ;;  %15116 = vst [vmem:[#allocation134_spill] sm:$0xff] %v8864_v21  ;;  %v8872_v3 = vmul.f32 %v8359_v38, %v488_v20  ;;  %v2565_v11 = vadd.f32 %v2564_v5, %v8843_v28  ;;  %v511_v20 = vld [vmem:[%s8110_s13 + $0x3a8] sm:$0xff]  ;;  %v8893_v5 = vsel %vm14965_vm0, %v8864_v21, 0.0 }
 0x17d   : > { %2034 = vadd.xlane.f32.xlu1 %v2033_v8  ;;  %v8868_v8 = vsel %vm14965_vm0, %v8850_v13, 0.0  ;;  %v8882_v13 = vmul.f32 %v8223_v58, %v507_v46 }
 0x17e   : > { %15117 = vst [vmem:[#allocation135_spill] sm:$0xff] %v8872_v3  ;;  %v8876_v22 = vadd.f32 %v2534_v7, %v8861_v6  ;;  %v2566_v23 = vadd.f32 %v2565_v11, %v8868_v8  ;;  %v8889_v7 = vmul.f32 %v8371_v27, %v486_v18  ;;  %v2049_v46 = vadd.f32 %v2048_v52, %v8872_v3  ;;  %v490_v11 = vld [vmem:[%s8110_s13 + $0x300] sm:$0xff]  ;;  %v496_v18 = vld [vmem:[%s8110_s13 + $0x330] sm:$0xff] }
 0x17f   : > { %15119 = vst [vmem:[#allocation137_spill] sm:$0xff] %v8882_v13  ;;  %v8909_v21 = vsel %vm14965_vm0, %v8882_v13, 0.0  ;;  %v8926_v13 = vmul.f32 %v8300_v62, %v513_v2 }
 0x180   : > { %15118 = vst [vmem:[#allocation136_spill] sm:$0xff] %v8876_v22  ;;  %2030 = vadd.xlane.f32.xlu0 %v2029_v0  ;;  %15120 = vst [vmem:[#allocation138_spill] sm:$0xff] %v8889_v7  ;;  %v8896_v0 = vmul.f32 %v8263_v16, %v509_v19  ;;  %v2567_v22 = vadd.f32 %v2566_v23, %v8893_v5  ;;  %v8912_v19 = vmul.f32 %v8260_v15, %v511_v20 }
 0x181   : > { %2042 = vadd.xlane.f32.xlu1 %v2041_v33  ;;  %v8900_v33 = vmul.f32 %v8398_v9, %v492_v37  ;;  %v515_v37 = vld [vmem:[%s8110_s13 + $0x3c8] sm:$0xff]  ;;  %v2045_v23 = vadd.f32 %v8789_v48, %v8889_v7  ;;  %15125 = vst [vmem:[#allocation143_spill] sm:$0xff] %v8926_v13 }
 0x182   : > { %15121 = vst [vmem:[#allocation139_spill] sm:$0xff] %v8896_v0  ;;  %15123 = vst [vmem:[#allocation141_spill] sm:$0xff] %v8912_v19  ;;  %v2568_v52 = vadd.f32 %v2567_v22, %v8909_v21  ;;  %v8923_v3 = vsel %vm14965_vm0, %v8896_v0, 0.0  ;;  %v8930_v22 = vmul.f32 %v8165_v29, %v496_v18  ;;  %v8939_v0 = vsel %vm14965_vm0, %v8912_v19, 0.0  ;;  %v519_v18 = vld [vmem:[%s8110_s13 + $0x3e8] sm:$0xff]  ;;  %v521_v19 = vld [vmem:[%s8110_s13 + $0x3f8] sm:$0xff] }
 0x183   : > { %15122 = vst [vmem:[#allocation140_spill] sm:$0xff] %v8900_v33  ;;  %v2057_v20 = vadd.f32 %v2056_v53, %v8900_v33  ;;  %v8942_v2 = vmul.f32 %v8294_v56, %v515_v37  ;;  %v523_v7 = vld [vmem:[%s8110_s13 + $0x408] sm:$0xff] }
 0x184   : > { %2038 = vadd.xlane.f32.xlu0 %v2037_v55  ;;  %v8919_v55 = vmul.f32 %v8418_v36, %v490_v11  ;;  %15126 = vst [vmem:[#allocation144_spill] sm:$0xff] %v8930_v22  ;;  %v2569_v48 = vadd.f32 %v2568_v52, %v8923_v3  ;;  %v517_v11 = vld [vmem:[%s8110_s13 + $0x3d8] sm:$0xff]  ;;  %v500_v52 = vld [vmem:[%s8110_s13 + $0x350] sm:$0xff]  ;;  %v2066_v37 = vadd.f32 %v2065_v24, %v8930_v22 }
 0x185   : > { %2050 = vadd.xlane.f32.xlu1 %v2049_v46  ;;  %v8933_v46 = vmul.f32 %v8435_v1, %v494_v4  ;;  %15128 = vst [vmem:[#allocation146_spill] sm:$0xff] %v8942_v2  ;;  %v8954_v33 = vmul.f32 %v8331_v45, %v517_v11  ;;  %v8970_v11 = vmul.f32 %v8328_v40, %v519_v18  ;;  %v508_v22 = vld [vmem:[%s8110_s13 + $0x390] sm:$0xff] }
 0x186   : > { %15124 = vst [vmem:[#allocation142_spill] sm:$0xff] %v8919_v55  ;;  %v2570_v53 = vadd.f32 %v2569_v48, %v8939_v0  ;;  %v2053_v4 = vadd.f32 %v8822_v12, %v8919_v55  ;;  %v498_v48 = vld [vmem:[%s8110_s13 + $0x340] sm:$0xff]  ;;  %v504_v55 = vld [vmem:[%s8110_s13 + $0x370] sm:$0xff]  ;;  %v8973_v24 = vmul.f32 %v8181_v35, %v500_v52  ;;  %v533_v52 = vld [vmem:[%s8110_s13 + $0x458] sm:$0xff] }
 0x187   : > { %15127 = vst [vmem:[#allocation145_spill] sm:$0xff] %v8933_v46  ;;  %15129 = vst [vmem:[#allocation147_spill] sm:$0xff] %v8954_v33  ;;  %v8985_v18 = vsel %vm14965_vm0, %v8954_v33, 0.0  ;;  %v9001_v33 = vsel %vm14965_vm0, %v8970_v11, 0.0 }
 0x188   : > { %2046 = vadd.xlane.f32.xlu0 %v2045_v23  ;;  %v8951_v23 = vsel %vm14965_vm0, %v8926_v13, 0.0  ;;  %v8967_v13 = vsel %vm14965_vm0, %v8942_v2, 0.0  ;;  %15131 = vst [vmem:[#allocation149_spill] sm:$0xff] %v8970_v11  ;;  %15132 = vst [vmem:[#allocation150_spill] sm:$0xff] %v8973_v24  ;;  %v502_v2 = vld [vmem:[%s8110_s13 + $0x360] sm:$0xff] }
 0x189   : > { %2058 = vadd.xlane.f32.xlu1 %v2057_v20  ;;  %v8959_v20 = vsel %vm14963_vm2, %v8933_v46, 0.0  ;;  %v2571_v12 = vadd.f32 %v2570_v53, %v8951_v23 }
 0x18a   : > { %15130 = vst [vmem:[#allocation148_spill] sm:$0xff] %v8959_v20  ;;  %v2062_v53 = vadd.f32 %v8861_v6, %v8959_v20  ;;  %v8994_v6 = vmul.f32 %v8234_v63, %v504_v55  ;;  %v525_v20 = vld [vmem:[%s8110_s13 + $0x418] sm:$0xff] }
 0x18b   : > { %v2572_v46 = vadd.f32 %v2571_v12, %v8967_v13  ;;  %v2074_v12 = vadd.f32 %v8843_v28, %v8973_v24  ;;  %v9007_v28 = vmul.f32 %v8187_v41, %v502_v2  ;;  %v531_v24 = vld [vmem:[%s8110_s13 + $0x448] sm:$0xff]  ;;  %v537_v2 = vld [vmem:[%s8110_s13 + $0x478] sm:$0xff] }
 0x18c   : > { %2054 = vadd.xlane.f32.xlu0 %v2053_v4  ;;  %v8980_v4 = vmul.f32 %v8193_v43, %v498_v48  ;;  %15135 = vst [vmem:[#allocation153_spill] sm:$0xff] %v8994_v6 }
 0x18d   : > { %2067 = vadd.xlane.f32.xlu1 %v2066_v37  ;;  %v8988_v37 = vmul.f32 %v8365_v34, %v521_v19  ;;  %v2573_v48 = vadd.f32 %v2572_v46, %v8985_v18  ;;  %v9004_v19 = vmul.f32 %v8362_v47, %v523_v7  ;;  %15137 = vst [vmem:[#allocation155_spill] sm:$0xff] %v9007_v28  ;;  %v527_v46 = vld [vmem:[%s8110_s13 + $0x428] sm:$0xff] }
 0x18e   : > { %15133 = vst [vmem:[#allocation151_spill] sm:$0xff] %v8980_v4  ;;  %v2070_v11 = vadd.f32 %v8847_v10, %v8980_v4  ;;  %v535_v10 = vld [vmem:[%s8110_s13 + $0x468] sm:$0xff]  ;;  %v512_v4 = vld [vmem:[%s8110_s13 + $0x3b0] sm:$0xff] }
 0x18f   : > { %15134 = vst [vmem:[#allocation152_spill] sm:$0xff] %v8988_v37  ;;  %15136 = vst [vmem:[#allocation154_spill] sm:$0xff] %v9004_v19  ;;  %v2574_v55 = vadd.f32 %v2573_v48, %v9001_v33  ;;  %v9020_v7 = vsel %vm14965_vm0, %v8988_v37, 0.0  ;;  %v2082_v48 = vadd.f32 %v8893_v5, %v8994_v6  ;;  %v9037_v37 = vsel %vm14965_vm0, %v9004_v19, 0.0 }
 0x190   : > { %2063 = vadd.xlane.f32.xlu0 %v2062_v53  ;;  %v9012_v53 = vmul.f32 %v8196_v44, %v533_v52  ;;  %v9029_v52 = vmul.f32 %v8268_v25, %v508_v22  ;;  %v9047_v22 = vmul.f32 %v8168_v30, %v531_v24  ;;  %v9056_v19 = vmul.f32 %v8190_v42, %v537_v2 }
 0x191   : > { %2075 = vadd.xlane.f32.xlu1 %v2074_v12  ;;  %v9023_v12 = vmul.f32 %v8404_v17, %v525_v20  ;;  %v2575_v50 = vadd.f32 %v2574_v55, %v9020_v7  ;;  %v9040_v20 = vmul.f32 %v8401_v26, %v527_v46  ;;  %v9052_v55 = vmul.f32 %v8220_v57, %v506_v60 }
 0x192   : > { %15138 = vst [vmem:[#allocation156_spill] sm:$0xff] %v9012_v53  ;;  %15140 = vst [vmem:[#allocation158_spill] sm:$0xff] %v9029_v52  ;;  %v9044_v5 = vsel %vm14965_vm0, %v9012_v53, 0.0  ;;  %v510_v53 = vld [vmem:[%s8110_s13 + $0x3a0] sm:$0xff]  ;;  %v9064_v24 = vmul.f32 %v8438_v51, %v529_v32  ;;  %v9071_v60 = vmul.f32 %v8171_v31, %v535_v10  ;;  %v9076_v2 = vmul.f32 %v8297_v61, %v512_v4  ;;  %v541_v32 = vld [vmem:[%s8110_s13 + $0x498] sm:$0xff] }
 0x193   : > { %15139 = vst [vmem:[#allocation157_spill] sm:$0xff] %v9023_v12  ;;  %15141 = vst [vmem:[#allocation159_spill] sm:$0xff] %v9040_v20  ;;  %v2576_v46 = vadd.f32 %v2575_v50, %v9037_v37  ;;  %v9061_v6 = vsel %vm14965_vm0, %v9023_v12, 0.0  ;;  %v2090_v50 = vadd.f32 %v8923_v3, %v9029_v52  ;;  %v9086_v10 = vsel %vm14965_vm0, %v9040_v20, 0.0 }
 0x194   : > { %2071 = vadd.xlane.f32.xlu0 %v2070_v11  ;;  %15142 = vst [vmem:[#allocation160_spill] sm:$0xff] %v9047_v22  ;;  %v2078_v11 = vadd.f32 %v8868_v8, %v9007_v28  ;;  %15143 = vst [vmem:[#allocation161_spill] sm:$0xff] %v9052_v55  ;;  %v9068_v8 = vsel %vm14965_vm0, %v9047_v22, 0.0  ;;  %v539_v28 = vld [vmem:[%s8110_s13 + $0x488] sm:$0xff]  ;;  %v516_v22 = vld [vmem:[%s8110_s13 + $0x3d0] sm:$0xff]  ;;  %v9090_v3 = vsel %vm14965_vm0, %v9056_v19, 0.0  ;;  %v2086_v52 = vadd.f32 %v8909_v21, %v9052_v55 }
 0x195   : > { %2083 = vadd.xlane.f32.xlu1 %v2082_v48  ;;  %15144 = vst [vmem:[#allocation162_spill] sm:$0xff] %v9056_v19  ;;  %15145 = vst [vmem:[#allocation163_spill] sm:$0xff] %v9064_v24  ;;  %v2577_v48 = vadd.f32 %v2576_v46, %v9061_v6  ;;  %v2608_v12 = vadd.f32 %v9044_v5, %v9068_v8  ;;  %v9094_v4 = vsel %vm14965_vm0, %v9071_v60, 0.0  ;;  %v9105_v19 = vsel %vm14964_vm1, %v9064_v24, 0.0  ;;  %v520_v55 = vld [vmem:[%s8110_s13 + $0x3f0] sm:$0xff] }
 0x196   : > { %15146 = vst [vmem:[#allocation164_spill] sm:$0xff] %v9071_v60  ;;  %15147 = vst [vmem:[#allocation165_spill] sm:$0xff] %v9076_v2  ;;  %v9097_v46 = vmul.f32 %v8257_v14, %v510_v53  ;;  %v9108_v61 = vmul.f32 %v8223_v58, %v541_v32  ;;  %v2098_v53 = vadd.f32 %v8951_v23, %v9076_v2  ;;  %v545_v60 = vld [vmem:[%s8110_s13 + $0x4b8] sm:$0xff]  ;;  %v543_v32 = vld [vmem:[%s8110_s13 + $0x4a8] sm:$0xff] }
 0x197   : > { %v2609_v20 = vadd.f32 %v2608_v12, %v9094_v4  ;;  %v514_v12 = vld [vmem:[%s8110_s13 + $0x3c0] sm:$0xff]  ;;  %v547_v2 = vld [vmem:[%s8110_s13 + $0x4c8] sm:$0xff] }
 0x198   : > { %2079 = vadd.xlane.f32.xlu0 %v2078_v11  ;;  %15148 = vst [vmem:[#allocation166_spill] sm:$0xff] %v9097_v46  ;;  %v2578_v11 = vadd.f32 %v2577_v48, %v9086_v10  ;;  %15149 = vst [vmem:[#allocation167_spill] sm:$0xff] %v9108_v61  ;;  %v9116_v48 = vmul.f32 %v8338_v49, %v516_v22  ;;  %v2094_v23 = vadd.f32 %v8939_v0, %v9097_v46  ;;  %v557_v46 = vld [vmem:[%s8110_s13 + $0x518] sm:$0xff] }
 0x199   : > { %2091 = vadd.xlane.f32.xlu1 %v2090_v50  ;;  %v9111_v50 = vmul.f32 %v8226_v59, %v539_v28  ;;  %v2610_v24 = vadd.f32 %v2609_v20, %v9090_v3  ;;  %v9134_v20 = vmul.f32 %v8291_v54, %v514_v12  ;;  %v549_v12 = vld [vmem:[%s8110_s13 + $0x4d8] sm:$0xff] }
 0x19a   : > { %15151 = vst [vmem:[#allocation169_spill] sm:$0xff] %v9116_v48  ;;  %v9120_v21 = vadd.f32 %v2578_v11, %v9105_v19  ;;  %v518_v11 = vld [vmem:[%s8110_s13 + $0x3e0] sm:$0xff]  ;;  %v2106_v0 = vadd.f32 %v8985_v18, %v9116_v48  ;;  %v528_v18 = vld [vmem:[%s8110_s13 + $0x430] sm:$0x3]  ;;  %v9172_v48 = vmul.f32 %v8294_v56, %v549_v12 }
 0x19b   : > { %15150 = vst [vmem:[#allocation168_spill] sm:$0xff] %v9111_v50  ;;  %v9128_v28 = vsel %vm14965_vm0, %v9111_v50, 0.0  ;;  %15153 = vst [vmem:[#allocation171_spill] sm:$0xff] %v9134_v20  ;;  %v9145_v50 = vmul.f32 %v8263_v16, %v543_v32  ;;  %v9161_v32 = vmul.f32 %v8325_v39, %v518_v11  ;;  %v9187_v12 = vmul.f32 %v8435_v1, %v528_v18 }
 0x19c   : > { %15152 = vst [vmem:[#allocation170_spill] sm:$0xff] %v9120_v21  ;;  %2087 = vadd.xlane.f32.xlu0 %v2086_v52  ;;  %v2611_v22 = vadd.f32 %v2610_v24, %v9128_v28  ;;  %v9139_v52 = vsel %vm14965_vm0, %v9108_v61, 0.0  ;;  %v9142_v21 = vmul.f32 %v8260_v15, %v545_v60  ;;  %v9150_v24 = vmul.f32 %v8371_v27, %v520_v55  ;;  %v524_v61 = vld [vmem:[%s8110_s13 + $0x410] sm:$0xff] }
 0x19d   : > { %2099 = vadd.xlane.f32.xlu1 %v2098_v53  ;;  %15155 = vst [vmem:[#allocation173_spill] sm:$0xff] %v9145_v50  ;;  %v9158_v60 = vsel %vm14965_vm0, %v9145_v50, 0.0  ;;  %15157 = vst [vmem:[#allocation175_spill] sm:$0xff] %v9161_v32  ;;  %v9175_v50 = vmul.f32 %v8300_v62, %v547_v2  ;;  %v9205_v18 = vsel %vm14965_vm0, %v9172_v48, 0.0 }
 0x19e   : > { %15154 = vst [vmem:[#allocation172_spill] sm:$0xff] %v9142_v21  ;;  %15156 = vst [vmem:[#allocation174_spill] sm:$0xff] %v9150_v24  ;;  %v2612_v53 = vadd.f32 %v2611_v22, %v9139_v52  ;;  %v2102_v22 = vadd.f32 %v8967_v13, %v9134_v20  ;;  %v2114_v11 = vadd.f32 %v9020_v7, %v9150_v24  ;;  %v522_v13 = vld [vmem:[%s8110_s13 + $0x400] sm:$0xff]  ;;  %v555_v24 = vld [vmem:[%s8110_s13 + $0x508] sm:$0xff] }
 0x19f   : > { %15158 = vst [vmem:[#allocation176_spill] sm:$0xff] %v9172_v48  ;;  %15159 = vst [vmem:[#allocation177_spill] sm:$0xff] %v9175_v50  ;;  %v9191_v2 = vsel %vm14965_vm0, %v9175_v50, 0.0 }
 0x1a0   : > { %2095 = vadd.xlane.f32.xlu0 %v2094_v23  ;;  %v2613_v55 = vadd.f32 %v2612_v53, %v9158_v60  ;;  %v9169_v23 = vsel %vm14965_vm0, %v9142_v21, 0.0  ;;  %v9181_v53 = vmul.f32 %v8418_v36, %v524_v61  ;;  %v553_v21 = vld [vmem:[%s8110_s13 + $0x4f8] sm:$0xff]  ;;  %15161 = vst [vmem:[#allocation179_spill] sm:$0xff] %v9187_v12 }
 0x1a1   : > { %2107 = vadd.xlane.f32.xlu1 %v2106_v0  ;;  %v551_v0 = vld [vmem:[%s8110_s13 + $0x4e8] sm:$0xff] }
 0x1a2   : > { %15160 = vst [vmem:[#allocation178_spill] sm:$0xff] %v9181_v53  ;;  %v2614_v20 = vadd.f32 %v2613_v55, %v9169_v23  ;;  %v9195_v61 = vmul.f32 %v8331_v45, %v551_v0  ;;  %v2110_v55 = vadd.f32 %v9001_v33, %v9161_v32  ;;  %v526_v0 = vld [vmem:[%s8110_s13 + $0x420] sm:$0xff]  ;;  %v9217_v33 = vsel %vm14963_vm2, %v9187_v12, 0.0  ;;  %v536_v32 = vld [vmem:[%s8110_s13 + $0x470] sm:$0xff] }
 0x1a3   : > { %15165 = vst [vmem:[#allocation183_spill] sm:$0xff] %v9217_v33  ;;  %v9232_v12 = vmul.f32 %v8398_v9, %v526_v0  ;;  %v561_v0 = vld [vmem:[%s8110_s13 + $0x538] sm:$0xff] }
 0x1a4   : > { %2103 = vadd.xlane.f32.xlu0 %v2102_v22  ;;  %v2615_v7 = vadd.f32 %v2614_v20, %v9191_v2  ;;  %15162 = vst [vmem:[#allocation180_spill] sm:$0xff] %v9195_v61  ;;  %v9201_v22 = vmul.f32 %v8359_v38, %v522_v13  ;;  %v2122_v20 = vadd.f32 %v9061_v6, %v9181_v53  ;;  %v532_v13 = vld [vmem:[%s8110_s13 + $0x450] sm:$0xff]  ;;  %v9222_v48 = vsel %vm14965_vm0, %v9195_v61, 0.0  ;;  %v530_v53 = vld [vmem:[%s8110_s13 + $0x440] sm:$0xff] }
 0x1a5   : > { %2115 = vadd.xlane.f32.xlu1 %v2114_v11  ;;  %v9208_v11 = vmul.f32 %v8328_v40, %v553_v21  ;;  %v9225_v21 = vmul.f32 %v8365_v34, %v555_v24  ;;  %15167 = vst [vmem:[#allocation185_spill] sm:$0xff] %v9232_v12  ;;  %v9240_v24 = vmul.f32 %v8362_v47, %v557_v46  ;;  %v569_v46 = vld [vmem:[%s8110_s13 + $0x578] sm:$0xff] }
 0x1a6   : > { %15163 = vst [vmem:[#allocation181_spill] sm:$0xff] %v9201_v22  ;;  %v2616_v50 = vadd.f32 %v2615_v7, %v9205_v18  ;;  %v559_v7 = vld [vmem:[%s8110_s13 + $0x528] sm:$0xff] }
 0x1a7   : > { %15164 = vst [vmem:[#allocation182_spill] sm:$0xff] %v9208_v11  ;;  %15166 = vst [vmem:[#allocation184_spill] sm:$0xff] %v9225_v21  ;;  %v9237_v61 = vsel %vm14965_vm0, %v9208_v11, 0.0  ;;  %v9253_v11 = vsel %vm14965_vm0, %v9225_v21, 0.0  ;;  %v9256_v1 = vmul.f32 %v8404_v17, %v559_v7  ;;  %v9269_v21 = vsel %vm14965_vm0, %v9240_v24, 0.0 }
 0x1a8   : > { %2111 = vadd.xlane.f32.xlu0 %v2110_v55  ;;  %v2617_v6 = vadd.f32 %v2616_v50, %v9222_v48  ;;  %v2118_v55 = vadd.f32 %v9037_v37, %v9201_v22  ;;  %15168 = vst [vmem:[#allocation186_spill] sm:$0xff] %v9240_v24  ;;  %v2131_v50 = vadd.f32 %v9105_v19, %v9217_v33  ;;  %v565_v22 = vld [vmem:[%s8110_s13 + $0x558] sm:$0xff]  ;;  %v567_v33 = vld [vmem:[%s8110_s13 + $0x568] sm:$0xff]  ;;  %v540_v24 = vld [vmem:[%s8110_s13 + $0x490] sm:$0xff] }
 0x1a9   : > { %2123 = vadd.xlane.f32.xlu1 %v2122_v20  ;;  %v9245_v20 = vmul.f32 %v8193_v43, %v532_v13  ;;  %15170 = vst [vmem:[#allocation188_spill] sm:$0xff] %v9256_v1  ;;  %v9260_v19 = vmul.f32 %v8165_v29, %v530_v53  ;;  %v9272_v7 = vmul.f32 %v8401_v26, %v561_v0  ;;  %v9289_v0 = vsel %vm14965_vm0, %v9256_v1, 0.0 }
 0x1aa   : > { %v2618_v37 = vadd.f32 %v2617_v6, %v9237_v61  ;;  %v563_v6 = vld [vmem:[%s8110_s13 + $0x548] sm:$0x3]  ;;  %v9275_v53 = vmul.f32 %v8168_v30, %v565_v22 }
 0x1ab   : > { %15169 = vst [vmem:[#allocation187_spill] sm:$0xff] %v9245_v20  ;;  %15171 = vst [vmem:[#allocation189_spill] sm:$0xff] %v9260_v19  ;;  %v9292_v22 = vmul.f32 %v8438_v51, %v563_v6  ;;  %v9305_v1 = vsel %vm14965_vm0, %v9272_v7, 0.0 }
 0x1ac   : > { %2119 = vadd.xlane.f32.xlu0 %v2118_v55  ;;  %v2619_v13 = vadd.f32 %v2618_v37, %v9253_v11  ;;  %v2126_v55 = vadd.f32 %v9086_v10, %v9232_v12  ;;  %15172 = vst [vmem:[#allocation190_spill] sm:$0xff] %v9272_v7  ;;  %15173 = vst [vmem:[#allocation191_spill] sm:$0xff] %v9275_v53  ;;  %v9280_v37 = vmul.f32 %v8187_v41, %v536_v32  ;;  %v538_v7 = vld [vmem:[%s8110_s13 + $0x480] sm:$0xff] }
 0x1ad   : > { %2132 = vadd.xlane.f32.xlu1 %v2131_v50  ;;  %v2139_v50 = vadd.f32 %v9044_v5, %v9245_v20  ;;  %v9284_v12 = vmul.f32 %v8171_v31, %v569_v46  ;;  %15176 = vst [vmem:[#allocation194_spill] sm:$0xff] %v9292_v22  ;;  %v9295_v5 = vmul.f32 %v8196_v44, %v567_v33  ;;  %v534_v46 = vld [vmem:[%s8110_s13 + $0x460] sm:$0xff]  ;;  %v571_v20 = vld [vmem:[%s8110_s13 + $0x588] sm:$0xff]  ;;  %v9309_v6 = vsel %vm14965_vm0, %v9275_v53, 0.0 }
 0x1ae   : > { %15174 = vst [vmem:[#allocation192_spill] sm:$0xff] %v9280_v37  ;;  %v2620_v10 = vadd.f32 %v2619_v13, %v9269_v21  ;;  %v2135_v32 = vadd.f32 %v9068_v8, %v9260_v19  ;;  %v9334_v41 = vsel %vm14964_vm1, %v9292_v22, 0.0 }
 0x1af   : > { %15175 = vst [vmem:[#allocation193_spill] sm:$0xff] %v9284_v12  ;;  %15177 = vst [vmem:[#allocation195_spill] sm:$0xff] %v9295_v5  ;;  %v9313_v33 = vsel %vm14965_vm0, %v9284_v12, 0.0  ;;  %v9317_v8 = vsel %vm14965_vm0, %v9295_v5, 0.0  ;;  %v9329_v12 = vmul.f32 %v8181_v35, %v534_v46  ;;  %v544_v5 = vld [vmem:[%s8110_s13 + $0x4b0] sm:$0xff] }
 0x1b0   : > { %2127 = vadd.xlane.f32.xlu0 %v2126_v55  ;;  %v2621_v13 = vadd.f32 %v2620_v10, %v9289_v0  ;;  %v573_v55 = vld [vmem:[%s8110_s13 + $0x598] sm:$0xff]  ;;  %v9322_v10 = vmul.f32 %v8220_v57, %v540_v24  ;;  %v2652_v19 = vadd.f32 %v9317_v8, %v9309_v6  ;;  %v9340_v24 = vmul.f32 %v8190_v42, %v571_v20  ;;  %v575_v57 = vld [vmem:[%s8110_s13 + $0x5a8] sm:$0xff] }
 0x1b1   : > { %2140 = vadd.xlane.f32.xlu1 %v2139_v50  ;;  %v2147_v50 = vadd.f32 %v9090_v3, %v9280_v37  ;;  %15179 = vst [vmem:[#allocation197_spill] sm:$0xff] %v9329_v12  ;;  %v9337_v3 = vmul.f32 %v8226_v59, %v573_v55  ;;  %v577_v37 = vld [vmem:[%s8110_s13 + $0x5b8] sm:$0xff]  ;;  %v2143_v22 = vadd.f32 %v9094_v4, %v9329_v12  ;;  %v548_v4 = vld [vmem:[%s8110_s13 + $0x4d0] sm:$0xff] }
 0x1b2   : > { %15178 = vst [vmem:[#allocation196_spill] sm:$0xff] %v9322_v10  ;;  %v2622_v53 = vadd.f32 %v2621_v13, %v9305_v1  ;;  %15181 = vst [vmem:[#allocation199_spill] sm:$0xff] %v9340_v24  ;;  %v2653_v46 = vadd.f32 %v2652_v19, %v9313_v33  ;;  %v9353_v55 = vmul.f32 %v8234_v63, %v538_v7  ;;  %v9357_v20 = vsel %vm14965_vm0, %v9340_v24, 0.0  ;;  %v542_v19 = vld [vmem:[%s8110_s13 + $0x4a0] sm:$0xff] }
 0x1b3   : > { %15180 = vst [vmem:[#allocation198_spill] sm:$0xff] %v9337_v3  ;;  %v9370_v7 = vsel %vm14965_vm0, %v9337_v3, 0.0  ;;  %v9373_v24 = vmul.f32 %v8263_v16, %v577_v37  ;;  %v9387_v12 = vmul.f32 %v8268_v25, %v542_v19  ;;  %v552_v19 = vld [vmem:[%s8110_s13 + $0x4f0] sm:$0xff] }
 0x1b4   : > { %2136 = vadd.xlane.f32.xlu0 %v2135_v32  ;;  %v9342_v13 = vpop.xlane.xlu1 %1860  ;;  %v9345_v32 = vadd.f32 %v2622_v53, %v9334_v41  ;;  %15184 = vst [vmem:[#allocation202_spill] sm:$0xff] %v9353_v55  ;;  %v9362_v53 = vmul.f32 %v8257_v14, %v544_v5  ;;  %v2151_v3 = vadd.f32 %v9128_v28, %v9353_v55  ;;  %v15196_v55 = vld [vmem:[#allocation38_spill] sm:$0xff] }
 0x1b5   : > { %2148 = vadd.xlane.f32.xlu1 %v2147_v50  ;;  %15182 = vst [vmem:[#allocation200_spill] sm:$0xff] %v9342_v13  ;;  %v2155_v50 = vadd.f32 %v9139_v52, %v9322_v10  ;;  %v2654_v13 = vadd.f32 %v2653_v46, %v9357_v20  ;;  %15186 = vst [vmem:[#allocation204_spill] sm:$0xff] %v9373_v24  ;;  %v9376_v52 = vmul.f32 %v8223_v58, %v575_v57 }
 0x1b6   : > { %15183 = vst [vmem:[#allocation201_spill] sm:$0xff] %v9345_v32  ;;  %15185 = vst [vmem:[#allocation203_spill] sm:$0xff] %v9362_v53  ;;  %v579_v32 = vld [vmem:[%s8110_s13 + $0x5c8] sm:$0xff] }
 0x1b7   : > { %15187 = vst [vmem:[#allocation205_spill] sm:$0xff] %v9376_v52  ;;  %v2655_v46 = vadd.f32 %v2654_v13, %v9370_v7  ;;  %15190 = vst [vmem:[#allocation208_spill] sm:$0xff] %v9387_v12  ;;  %v9391_v57 = vsel %vm14965_vm0, %v9376_v52, 0.0  ;;  %v9394_v37 = vmul.f32 %v8260_v15, %v579_v32  ;;  %v2163_v13 = vadd.f32 %v9169_v23, %v9362_v53  ;;  %v585_v53 = vld [vmem:[%s8110_s13 + $0x5f8] sm:$0xff] }
 0x1b8   : > { %2144 = vadd.xlane.f32.xlu0 %v2143_v22  ;;  %v581_v22 = vld [vmem:[%s8110_s13 + $0x5d8] sm:$0xff]  ;;  %v9382_v10 = vpop.xlane.xlu1 %1872  ;;  %v9407_v52 = vsel %vm14965_vm0, %v9373_v24, 0.0  ;;  %v9433_v24 = vmul.f32 %v8325_v39, %v552_v19 }
 0x1b9   : > { %2156 = vadd.xlane.f32.xlu1 %v2155_v50  ;;  %v9378_v5 = vpop.xlane.xlu0 %1864  ;;  %15189 = vst [vmem:[#allocation207_spill] sm:$0xff] %v9382_v10  ;;  %15191 = vst [vmem:[#allocation209_spill] sm:$0xff] %v9394_v37  ;;  %v9399_v50 = vmul.f32 %v8291_v54, %v548_v4  ;;  %v546_v10 = vld [vmem:[%s8110_s13 + $0x4c0] sm:$0xff]  ;;  %v2656_v28 = vadd.f32 %v2655_v46, %v9391_v57  ;;  %v9410_v32 = vmul.f32 %v8300_v62, %v581_v22 }
 0x1ba   : > { %15188 = vst [vmem:[#allocation206_spill] sm:$0xff] %v9378_v5  ;;  %v583_v5 = vld [vmem:[%s8110_s13 + $0x5e8] sm:$0xff]  ;;  %v9421_v54 = vmul.f32 %v15196_v55, %v546_v10  ;;  %v9425_v22 = vsel %vm14965_vm0, %v9394_v37, 0.0  ;;  %15199 = vst [vmem:[#allocation216_spill] sm:$0xff] %v9433_v24  ;;  %v556_v10 = vld [vmem:[%s8110_s13 + $0x510] sm:$0xff] }
 0x1bb   : > { %15192 = vst [vmem:[#allocation210_spill] sm:$0xff] %v9399_v50  ;;  %15193 = vst [vmem:[#allocation211_spill] sm:$0xff] %v9410_v32  ;;  %v2657_v4 = vadd.f32 %v2656_v28, %v9407_v52  ;;  %v2171_v28 = vadd.f32 %v9205_v18, %v9399_v50  ;;  %v9441_v37 = vsel %vm14965_vm0, %v9410_v32, 0.0  ;;  %v589_v50 = vld [vmem:[%s8110_s13 + $0x618] sm:$0xff]  ;;  %v554_v32 = vld [vmem:[%s8110_s13 + $0x500] sm:$0xff] }
 0x1bc   : > { %2152 = vadd.xlane.f32.xlu0 %v2151_v3  ;;  %v2159_v3 = vadd.f32 %v9158_v60, %v9387_v12  ;;  %15197 = vst [vmem:[#allocation214_spill] sm:$0xff] %v9421_v54 }
 0x1bd   : > { %2164 = vadd.xlane.f32.xlu1 %v2163_v13  ;;  %v9412_v23 = vpop.xlane.xlu0 %1868  ;;  %v9428_v13 = vmul.f32 %v8294_v56, %v583_v5  ;;  %v2658_v60 = vadd.f32 %v2657_v4, %v9425_v22  ;;  %v9444_v5 = vmul.f32 %v8331_v45, %v585_v53  ;;  %v2167_v4 = vadd.f32 %v9191_v2, %v9421_v54 }
 0x1be   : > { %15194 = vst [vmem:[#allocation212_spill] sm:$0xff] %v9412_v23  ;;  %v9416_v46 = vpop.xlane.xlu1 %1880  ;;  %v587_v23 = vld [vmem:[%s8110_s13 + $0x608] sm:$0xff] }
 0x1bf   : > { %15195 = vst [vmem:[#allocation213_spill] sm:$0xff] %v9416_v46  ;;  %15198 = vst [vmem:[#allocation215_spill] sm:$0xff] %v9428_v13  ;;  %v550_v46 = vld [vmem:[%s8110_s13 + $0x4e0] sm:$0xff]  ;;  %v2659_v19 = vadd.f32 %v2658_v60, %v9441_v37  ;;  %v9460_v53 = vsel %vm14965_vm0, %v9428_v13, 0.0  ;;  %v2179_v60 = vadd.f32 %v9237_v61, %v9433_v24  ;;  %v9475_v13 = vsel %vm14965_vm0, %v9444_v5, 0.0  ;;  %v601_v24 = vld [vmem:[%s8110_s13 + $0x678] sm:$0xff] }
 0x1c0   : > { %2160 = vadd.xlane.f32.xlu0 %v2159_v3  ;;  %15200 = vst [vmem:[#allocation217_spill] sm:$0xff] %v9444_v5  ;;  %v9455_v3 = vmul.f32 %v8338_v49, %v550_v46  ;;  %15204 = vst [vmem:[#allocation221_spill] sm:$0xff] %v9460_v53  ;;  %v591_v46 = vld [vmem:[%s8110_s13 + $0x628] sm:$0xff]  ;;  %v558_v5 = vld [vmem:[%s8110_s13 + $0x520] sm:$0xff] }
 0x1c1   : > { %2172 = vadd.xlane.f32.xlu1 %v2171_v28  ;;  %v9446_v18 = vpop.xlane.xlu0 %1876  ;;  %v9463_v28 = vmul.f32 %v8328_v40, %v587_v23  ;;  %v2660_v2 = vadd.f32 %v2659_v19, %v9460_v53  ;;  %v9478_v23 = vmul.f32 %v8365_v34, %v589_v50  ;;  %v562_v53 = vld [vmem:[%s8110_s13 + $0x540] sm:$0x3] }
 0x1c2   : > { %15201 = vst [vmem:[#allocation218_spill] sm:$0xff] %v9446_v18  ;;  %v9450_v12 = vpop.xlane.xlu1 %1888  ;;  %15203 = vst [vmem:[#allocation220_spill] sm:$0xff] %v9455_v3  ;;  %v560_v18 = vld [vmem:[%s8110_s13 + $0x530] sm:$0xff]  ;;  %v2175_v50 = vadd.f32 %v9222_v48, %v9455_v3  ;;  %v595_v48 = vld [vmem:[%s8110_s13 + $0x648] sm:$0xff] }
 0x1c3   : > { %15202 = vst [vmem:[#allocation219_spill] sm:$0xff] %v9450_v12  ;;  %15205 = vst [vmem:[#allocation222_spill] sm:$0xff] %v9463_v28  ;;  %v9468_v12 = vmul.f32 %v8359_v38, %v556_v10  ;;  %v9483_v10 = vmul.f32 %v8371_v27, %v554_v32  ;;  %v2661_v19 = vadd.f32 %v2660_v2, %v9475_v13  ;;  %v564_v38 = vld [vmem:[%s8110_s13 + $0x550] sm:$0xff]  ;;  %v599_v3 = vld [vmem:[%s8110_s13 + $0x668] sm:$0xff] }
 0x1c4   : > { %2168 = vadd.xlane.f32.xlu0 %v2167_v4  ;;  %15207 = vst [vmem:[#allocation224_spill] sm:$0xff] %v9478_v23  ;;  %v593_v4 = vld [vmem:[%s8110_s13 + $0x638] sm:$0xff]  ;;  %v9499_v32 = vmul.f32 %v8362_v47, %v591_v46 }
 0x1c5   : > { %15206 = vst [vmem:[#allocation223_spill] sm:$0xff] %v9468_v12  ;;  %2180 = vadd.xlane.f32.xlu1 %v2179_v60  ;;  %v9480_v61 = vpop.xlane.xlu0 %1884  ;;  %15209 = vst [vmem:[#allocation226_spill] sm:$0xff] %v9483_v10  ;;  %v9496_v60 = vsel %vm14965_vm0, %v9463_v28, 0.0  ;;  %v2187_v2 = vadd.f32 %v9269_v21, %v9468_v12  ;;  %v9512_v28 = vsel %vm14965_vm0, %v9478_v23, 0.0  ;;  %v9515_v46 = vmul.f32 %v8404_v17, %v593_v4  ;;  %v597_v4 = vld [vmem:[%s8110_s13 + $0x658] sm:$0x3] }
 0x1c6   : > { %15208 = vst [vmem:[#allocation225_spill] sm:$0xff] %v9480_v61  ;;  %v9488_v54 = vpop.xlane.xlu1 %1896  ;;  %15211 = vst [vmem:[#allocation228_spill] sm:$0xff] %v9496_v60  ;;  %v9504_v61 = vmul.f32 %v8398_v9, %v560_v18  ;;  %v9518_v21 = vmul.f32 %v8196_v44, %v601_v24  ;;  %v605_v18 = vld [vmem:[%s8110_s13 + $0x698] sm:$0xff]  ;;  %v9529_v9 = vmul.f32 %v8165_v29, %v564_v38  ;;  %v9538_v24 = vsel %vm14965_vm0, %v9499_v32, 0.0 }
 0x1c7   : > { %15210 = vst [vmem:[#allocation227_spill] sm:$0xff] %v9488_v54  ;;  %15212 = vst [vmem:[#allocation229_spill] sm:$0xff] %v9499_v32  ;;  %v2662_v54 = vadd.f32 %v2661_v19, %v9496_v60  ;;  %v2183_v19 = vadd.f32 %v9253_v11, %v9483_v10  ;;  %v603_v60 = vld [vmem:[%s8110_s13 + $0x688] sm:$0xff]  ;;  %v9548_v38 = vmul.f32 %v8168_v30, %v599_v3 }
 0x1c8   : > { %15213 = vst [vmem:[#allocation230_spill] sm:$0xff] %v9504_v61  ;;  %2176 = vadd.xlane.f32.xlu0 %v2175_v50  ;;  %15214 = vst [vmem:[#allocation231_spill] sm:$0xff] %v9515_v46  ;;  %v9526_v50 = vmul.f32 %v8418_v36, %v558_v5  ;;  %v9545_v11 = vsel %vm14965_vm0, %v9518_v21, 0.0  ;;  %v15222_v5 = vld [vmem:[#allocation61_spill] sm:$0xff]  ;;  %v9564_v3 = vmul.f32 %v8438_v51, %v597_v4  ;;  %v611_v10 = vld [vmem:[%s8110_s13 + $0x6c8] sm:$0xff] }
 0x1c9   : > { %15215 = vst [vmem:[#allocation232_spill] sm:$0xff] %v9518_v21  ;;  %2188 = vadd.xlane.f32.xlu1 %v2187_v2  ;;  %v9521_v12 = vpop.xlane.xlu0 %1892  ;;  %15218 = vst [vmem:[#allocation235_spill] sm:$0xff] %v9529_v9  ;;  %v2663_v23 = vadd.f32 %v2662_v54, %v9512_v28  ;;  %v9541_v2 = vmul.f32 %v8401_v26, %v595_v48  ;;  %v2195_v54 = vadd.f32 %v9305_v1, %v9504_v61  ;;  %v566_v61 = vld [vmem:[%s8110_s13 + $0x560] sm:$0xff] }
 0x1ca   : > { %15216 = vst [vmem:[#allocation233_spill] sm:$0xff] %v9521_v12  ;;  %15217 = vst [vmem:[#allocation234_spill] sm:$0xff] %v9526_v50  ;;  %v9534_v39 = vpop.xlane.xlu1 %1904  ;;  %v9557_v48 = vmul.f32 %v8190_v42, %v605_v18  ;;  %v9561_v21 = vsel %vm14965_vm0, %v9515_v46, 0.0  ;;  %v9568_v1 = vsel %vm14965_vm0, %v9548_v38, 0.0  ;;  %v607_v46 = vld [vmem:[%s8110_s13 + $0x6a8] sm:$0xff]  ;;  %v2191_v12 = vadd.f32 %v9289_v0, %v9526_v50 }
 0x1cb   : > { %15219 = vst [vmem:[#allocation236_spill] sm:$0xff] %v9534_v39  ;;  %15220 = vst [vmem:[#allocation237_spill] sm:$0xff] %v9541_v2  ;;  %v9553_v39 = vmul.f32 %v15222_v5, %v562_v53  ;;  %v2664_v32 = vadd.f32 %v2663_v23, %v9538_v24  ;;  %v9571_v53 = vmul.f32 %v8171_v31, %v603_v60  ;;  %v9586_v60 = vsel %vm14965_vm0, %v9541_v2, 0.0 }
 0x1cc   : > { %15221 = vst [vmem:[#allocation238_spill] sm:$0xff] %v9548_v38  ;;  %15224 = vst [vmem:[#allocation239_spill] sm:$0xff] %v9557_v48  ;;  %2184 = vadd.xlane.f32.xlu0 %v2183_v19  ;;  %v2696_v19 = vadd.f32 %v9545_v11, %v9568_v1  ;;  %v568_v38 = vld [vmem:[%s8110_s13 + $0x570] sm:$0xff]  ;;  %v9603_v2 = vsel %vm14965_vm0, %v9557_v48, 0.0  ;;  %v9608_v50 = vsel %vm14964_vm1, %v9564_v3, 0.0 }
 0x1cd   : > { %15223 = vst [vmem:[#allocation61_spill] sm:$0xff] %v9553_v39  ;;  %15225 = vst [vmem:[#allocation240_spill] sm:$0xff] %v9564_v3  ;;  %2196 = vadd.xlane.f32.xlu1 %v2195_v54  ;;  %v9573_v23 = vpop.xlane.xlu0 %1900  ;;  %v2665_v18 = vadd.f32 %v2664_v32, %v9561_v21  ;;  %v9590_v54 = vsel %vm14965_vm0, %v9571_v53, 0.0  ;;  %v2204_v32 = vadd.f32 %v9309_v6, %v9529_v9 }
 0x1ce   : > { %15226 = vst [vmem:[#allocation241_spill] sm:$0xff] %v9571_v53  ;;  %15227 = vst [vmem:[#allocation242_spill] sm:$0xff] %v9573_v23  ;;  %v9579_v4 = vpop.xlane.xlu1 %1912  ;;  %v609_v23 = vld [vmem:[%s8110_s13 + $0x6b8] sm:$0xff]  ;;  %v572_v53 = vld [vmem:[%s8110_s13 + $0x590] sm:$0xff]  ;;  %v2697_v6 = vadd.f32 %v2696_v19, %v9590_v54  ;;  %v9617_v48 = vmul.f32 %v8181_v35, %v568_v38  ;;  %v9631_v19 = vmul.f32 %v8193_v43, %v566_v61 }
 0x1cf   : > { %15228 = vst [vmem:[#allocation243_spill] sm:$0xff] %v9579_v4  ;;  %v9597_v4 = vsel %vm14963_vm2, %v9553_v39, 0.0  ;;  %v2666_v0 = vadd.f32 %v2665_v18, %v9586_v60  ;;  %v9612_v39 = vmul.f32 %v8226_v59, %v607_v46  ;;  %v9623_v3 = vmul.f32 %v8223_v58, %v609_v23  ;;  %v613_v38 = vld [vmem:[%s8110_s13 + $0x6d8] sm:$0xff]  ;;  %v570_v23 = vld [vmem:[%s8110_s13 + $0x580] sm:$0xff] }
 0x1d0   : > { %15229 = vst [vmem:[#allocation244_spill] sm:$0xff] %v9597_v4  ;;  %2192 = vadd.xlane.f32.xlu0 %v2191_v12  ;;  %15232 = vst [vmem:[#allocation247_spill] sm:$0xff] %v9617_v48  ;;  %v2200_v46 = vadd.f32 %v9334_v41, %v9597_v4  ;;  %v576_v41 = vld [vmem:[%s8110_s13 + $0x5b0] sm:$0xff] }
 0x1d1   : > { %15230 = vst [vmem:[#allocation245_spill] sm:$0xff] %v9612_v39  ;;  %2205 = vadd.xlane.f32.xlu1 %v2204_v32  ;;  %v9614_v18 = vpop.xlane.xlu0 %1908  ;;  %v9620_v12 = vadd.f32 %v2666_v0, %v9608_v50  ;;  %15234 = vst [vmem:[#allocation249_spill] sm:$0xff] %v9623_v3  ;;  %v2698_v32 = vadd.f32 %v2697_v6, %v9603_v2  ;;  %v2212_v0 = vadd.f32 %v9313_v33, %v9617_v48  ;;  %v617_v48 = vld [vmem:[%s8110_s13 + $0x6f8] sm:$0xff] }
 0x1d2   : > { %15231 = vst [vmem:[#allocation246_spill] sm:$0xff] %v9614_v18  ;;  %v9626_v9 = vpop.xlane.xlu1 %1920  ;;  %15236 = vst [vmem:[#allocation251_spill] sm:$0xff] %v9631_v19  ;;  %v9638_v18 = vmul.f32 %v8234_v63, %v572_v53  ;;  %v9648_v6 = vmul.f32 %v8263_v16, %v611_v10  ;;  %v9655_v53 = vsel %vm14965_vm0, %v9623_v3, 0.0  ;;  %v15242_v10 = vld [vmem:[#allocation22_spill] sm:$0xff]  ;;  %v9672_v3 = vmul.f32 %v8268_v25, %v576_v41 }
 0x1d3   : > { %15233 = vst [vmem:[#allocation248_spill] sm:$0xff] %v9620_v12  ;;  %15235 = vst [vmem:[#allocation250_spill] sm:$0xff] %v9626_v9  ;;  %v9643_v9 = vsel %vm14965_vm0, %v9612_v39, 0.0  ;;  %v615_v12 = vld [vmem:[%s8110_s13 + $0x6e8] sm:$0xff]  ;;  %v9658_v39 = vmul.f32 %v8260_v15, %v613_v38  ;;  %v9665_v4 = vmul.f32 %v15242_v10, %v570_v23  ;;  %v574_v38 = vld [vmem:[%s8110_s13 + $0x5a0] sm:$0xff] }
 0x1d4   : > { %15237 = vst [vmem:[#allocation252_spill] sm:$0xff] %v9638_v18  ;;  %2201 = vadd.xlane.f32.xlu0 %v2200_v46  ;;  %v2699_v61 = vadd.f32 %v2698_v32, %v9643_v9  ;;  %15238 = vst [vmem:[#allocation253_spill] sm:$0xff] %v9648_v6  ;;  %v2208_v32 = vadd.f32 %v9317_v8, %v9631_v19  ;;  %v9680_v8 = vmul.f32 %v8300_v62, %v615_v12  ;;  %v580_v23 = vld [vmem:[%s8110_s13 + $0x5d0] sm:$0xff]  ;;  %v619_v19 = vld [vmem:[%s8110_s13 + $0x708] sm:$0xff] }
 0x1d5   : > { %2213 = vadd.xlane.f32.xlu1 %v2212_v0  ;;  %v9651_v33 = vpop.xlane.xlu0 %1916  ;;  %15240 = vst [vmem:[#allocation255_spill] sm:$0xff] %v9658_v39  ;;  %15243 = vst [vmem:[#allocation22_spill] sm:$0xff] %v9665_v4  ;;  %v9689_v41 = vsel %vm14965_vm0, %v9658_v39, 0.0  ;;  %v9706_v39 = vmul.f32 %v15196_v55, %v580_v23  ;;  %v592_v55 = vld [vmem:[%s8110_s13 + $0x630] sm:$0xff] }
 0x1d6   : > { %15239 = vst [vmem:[#allocation254_spill] sm:$0xff] %v9651_v33  ;;  %v9660_v46 = vpop.xlane.xlu1 %1929  ;;  %v2700_v0 = vadd.f32 %v2699_v61, %v9655_v53  ;;  %v2220_v33 = vadd.f32 %v9370_v7, %v9638_v18  ;;  %15244 = vst [vmem:[#allocation257_spill] sm:$0xff] %v9672_v3  ;;  %v15250_v18 = vld [vmem:[#allocation28_spill] sm:$0xff] }
 0x1d7   : > { %15241 = vst [vmem:[#allocation256_spill] sm:$0xff] %v9660_v46  ;;  %v9677_v46 = vsel %vm14965_vm0, %v9648_v6, 0.0  ;;  %15246 = vst [vmem:[#allocation259_spill] sm:$0xff] %v9680_v8  ;;  %v9692_v6 = vmul.f32 %v8294_v56, %v617_v48  ;;  %v578_v48 = vld [vmem:[%s8110_s13 + $0x5c0] sm:$0xff] }
 0x1d8   : > { %15245 = vst [vmem:[#allocation258_spill] sm:$0xff] %v9677_v46  ;;  %2209 = vadd.xlane.f32.xlu0 %v2208_v32  ;;  %v2701_v61 = vadd.f32 %v2700_v0, %v9677_v46  ;;  %v2216_v32 = vadd.f32 %v9357_v20, %v9665_v4  ;;  %v9699_v0 = vmul.f32 %v15250_v18, %v574_v38  ;;  %v621_v46 = vld [vmem:[%s8110_s13 + $0x718] sm:$0xff]  ;;  %15252 = vst [vmem:[#allocation263_spill] sm:$0xff] %v9706_v39  ;;  %v584_v38 = vld [vmem:[%s8110_s13 + $0x5f0] sm:$0xff] }
 0x1d9   : > { %2221 = vadd.xlane.f32.xlu1 %v2220_v33  ;;  %v9685_v7 = vpop.xlane.xlu0 %1925  ;;  %15248 = vst [vmem:[#allocation261_spill] sm:$0xff] %v9692_v6  ;;  %v9714_v20 = vmul.f32 %v8331_v45, %v619_v19  ;;  %v623_v4 = vld [vmem:[%s8110_s13 + $0x728] sm:$0xff]  ;;  %v9723_v23 = vsel %vm14965_vm0, %v9692_v6, 0.0  ;;  %v2236_v6 = vadd.f32 %v9441_v37, %v9706_v39 }
 0x1da   : > { %15247 = vst [vmem:[#allocation260_spill] sm:$0xff] %v9685_v7  ;;  %v9694_v12 = vpop.xlane.xlu1 %1937  ;;  %15251 = vst [vmem:[#allocation28_spill] sm:$0xff] %v9699_v0  ;;  %v2702_v33 = vadd.f32 %v2701_v61, %v9689_v41  ;;  %v2228_v7 = vadd.f32 %v9407_v52, %v9672_v3  ;;  %v625_v3 = vld [vmem:[%s8110_s13 + $0x738] sm:$0xff] }
 0x1db   : > { %15249 = vst [vmem:[#allocation262_spill] sm:$0xff] %v9694_v12  ;;  %v9711_v12 = vsel %vm14965_vm0, %v9680_v8, 0.0  ;;  %15254 = vst [vmem:[#allocation265_spill] sm:$0xff] %v9714_v20  ;;  %v9726_v8 = vmul.f32 %v8328_v40, %v621_v46  ;;  %v9741_v46 = vmul.f32 %v8338_v49, %v584_v38  ;;  %v15264_v38 = vld [vmem:[#allocation37_spill] sm:$0xff]  ;;  %v586_v49 = vld [vmem:[%s8110_s13 + $0x600] sm:$0xff] }
 0x1dc   : > { %15253 = vst [vmem:[#allocation264_spill] sm:$0xff] %v9711_v12  ;;  %2217 = vadd.xlane.f32.xlu0 %v2216_v32  ;;  %v2703_v61 = vadd.f32 %v2702_v33, %v9711_v12  ;;  %15256 = vst [vmem:[#allocation267_spill] sm:$0xff] %v9723_v23  ;;  %v2224_v32 = vadd.f32 %v9391_v57, %v9699_v0  ;;  %v9733_v33 = vmul.f32 %v8257_v14, %v578_v48  ;;  %v588_v12 = vld [vmem:[%s8110_s13 + $0x610] sm:$0xff]  ;;  %v627_v48 = vld [vmem:[%s8110_s13 + $0x748] sm:$0xff] }
 0x1dd   : > { %2229 = vadd.xlane.f32.xlu1 %v2228_v7  ;;  %v9719_v52 = vpop.xlane.xlu0 %1933  ;;  %15257 = vst [vmem:[#allocation268_spill] sm:$0xff] %v9726_v8  ;;  %v582_v7 = vld [vmem:[%s8110_s13 + $0x5e0] sm:$0xff]  ;;  %15260 = vst [vmem:[#allocation271_spill] sm:$0xff] %v9741_v46  ;;  %v9749_v57 = vmul.f32 %v8365_v34, %v623_v4  ;;  %v633_v0 = vld [vmem:[%s8110_s13 + $0x778] sm:$0xff]  ;;  %v9765_v4 = vmul.f32 %v8362_v47, %v625_v3  ;;  %v2244_v3 = vadd.f32 %v9475_v13, %v9741_v46 }
 0x1de   : > { %15255 = vst [vmem:[#allocation266_spill] sm:$0xff] %v9719_v52  ;;  %v9728_v19 = vpop.xlane.xlu1 %1945  ;;  %15259 = vst [vmem:[#allocation270_spill] sm:$0xff] %v9733_v33  ;;  %v2704_v52 = vadd.f32 %v2703_v61, %v9723_v23  ;;  %v9757_v39 = vmul.f32 %v15264_v38, %v582_v7 }
 0x1df   : > { %15258 = vst [vmem:[#allocation269_spill] sm:$0xff] %v9728_v19  ;;  %v9746_v19 = vsel %vm14965_vm0, %v9714_v20, 0.0  ;;  %15262 = vst [vmem:[#allocation273_spill] sm:$0xff] %v9749_v57  ;;  %v9762_v20 = vsel %vm14965_vm0, %v9726_v8, 0.0  ;;  %v9778_v8 = vmul.f32 %v8404_v17, %v627_v48 }
 0x1e0   : > { %15261 = vst [vmem:[#allocation272_spill] sm:$0xff] %v9746_v19  ;;  %2225 = vadd.xlane.f32.xlu0 %v2224_v32  ;;  %v2705_v61 = vadd.f32 %v2704_v52, %v9746_v19  ;;  %15265 = vst [vmem:[#allocation37_spill] sm:$0xff] %v9757_v39  ;;  %v637_v32 = vld [vmem:[%s8110_s13 + $0x798] sm:$0xff]  ;;  %v9773_v52 = vmul.f32 %v8371_v27, %v588_v12  ;;  %v635_v19 = vld [vmem:[%s8110_s13 + $0x788] sm:$0xff] }
 0x1e1   : > { %2237 = vadd.xlane.f32.xlu1 %v2236_v6  ;;  %v9754_v37 = vpop.xlane.xlu0 %1941  ;;  %15266 = vst [vmem:[#allocation275_spill] sm:$0xff] %v9765_v4  ;;  %v2232_v6 = vadd.f32 %v9425_v22, %v9733_v33  ;;  %15269 = vst [vmem:[#allocation278_spill] sm:$0xff] %v9778_v8  ;;  %v9789_v22 = vmul.f32 %v8168_v30, %v633_v0  ;;  %v15272_v12 = vld [vmem:[#allocation43_spill] sm:$0xff]  ;;  %v9797_v13 = vmul.f32 %v8171_v31, %v637_v32  ;;  %v596_v0 = vld [vmem:[%s8110_s13 + $0x650] sm:$0x3] }
 0x1e2   : > { %15263 = vst [vmem:[#allocation274_spill] sm:$0xff] %v9754_v37  ;;  %v9768_v23 = vpop.xlane.xlu1 %1953  ;;  %15268 = vst [vmem:[#allocation277_spill] sm:$0xff] %v9773_v52  ;;  %v2706_v7 = vadd.f32 %v2705_v61, %v9762_v20  ;;  %v629_v37 = vld [vmem:[%s8110_s13 + $0x758] sm:$0xff]  ;;  %v9792_v61 = vmul.f32 %v15272_v12, %v586_v49  ;;  %v631_v33 = vld [vmem:[%s8110_s13 + $0x768] sm:$0x3]  ;;  %v9806_v49 = vsel %vm14965_vm0, %v9765_v4, 0.0  ;;  %v2252_v31 = vadd.f32 %v9512_v28, %v9773_v52 }
 0x1e3   : > { %15267 = vst [vmem:[#allocation276_spill] sm:$0xff] %v9768_v23  ;;  %v9786_v23 = vsel %vm14965_vm0, %v9749_v57, 0.0  ;;  %15271 = vst [vmem:[#allocation280_spill] sm:$0xff] %v9789_v22  ;;  %v15276_v57 = vld [vmem:[#allocation221_spill] sm:$0xff]  ;;  %v9819_v32 = vmul.f32 %v8418_v36, %v592_v55  ;;  %v9838_v55 = vsel %vm14965_vm0, %v9797_v13, 0.0 }
 0x1e4   : > { %15270 = vst [vmem:[#allocation279_spill] sm:$0xff] %v9786_v23  ;;  %2233 = vadd.xlane.f32.xlu0 %v2232_v6  ;;  %15273 = vst [vmem:[#allocation43_spill] sm:$0xff] %v9792_v61  ;;  %v2707_v48 = vadd.f32 %v2706_v7, %v9786_v23  ;;  %v2240_v30 = vadd.f32 %v15276_v57, %v9757_v39  ;;  %v9809_v6 = vmul.f32 %v8401_v26, %v629_v37  ;;  %v641_v4 = vld [vmem:[%s8110_s13 + $0x7b8] sm:$0xff]  ;;  %v639_v37 = vld [vmem:[%s8110_s13 + $0x7a8] sm:$0xff] }
 0x1e5   : > { %15274 = vst [vmem:[#allocation281_spill] sm:$0xff] %v9797_v13  ;;  %2245 = vadd.xlane.f32.xlu1 %v2244_v3  ;;  %v9799_v46 = vpop.xlane.xlu0 %1949  ;;  %v9812_v7 = vmul.f32 %v8196_v44, %v635_v19  ;;  %15280 = vst [vmem:[#allocation285_spill] sm:$0xff] %v9819_v32  ;;  %v9823_v57 = vsel %vm14965_vm0, %v9778_v8, 0.0  ;;  %v9831_v44 = vsel %vm14965_vm0, %v9789_v22, 0.0  ;;  %v9834_v19 = vmul.f32 %v8438_v51, %v631_v33  ;;  %v15289_v52 = vld [vmem:[#allocation49_spill] sm:$0xff] }
 0x1e6   : > { %15275 = vst [vmem:[#allocation282_spill] sm:$0xff] %v9799_v46  ;;  %15277 = vst [vmem:[#allocation221_spill] sm:$0xff] %v9809_v6  ;;  %v9814_v23 = vpop.xlane.xlu1 %1961  ;;  %v2708_v3 = vadd.f32 %v2707_v48, %v9806_v49  ;;  %v590_v46 = vld [vmem:[%s8110_s13 + $0x620] sm:$0xff]  ;;  %v9845_v48 = vmul.f32 %v15222_v5, %v596_v0  ;;  %v9854_v13 = vsel %vm14965_vm0, %v9809_v6, 0.0  ;;  %v645_v39 = vld [vmem:[%s8110_s13 + $0x7d8] sm:$0xff] }
 0x1e7   : > { %15278 = vst [vmem:[#allocation283_spill] sm:$0xff] %v9812_v7  ;;  %15279 = vst [vmem:[#allocation284_spill] sm:$0xff] %v9814_v23  ;;  %v9842_v28 = vsel %vm14965_vm0, %v9812_v7, 0.0  ;;  %v9857_v7 = vmul.f32 %v8226_v59, %v641_v4  ;;  %v2260_v59 = vadd.f32 %v9561_v21, %v9819_v32  ;;  %v594_v4 = vld [vmem:[%s8110_s13 + $0x640] sm:$0xff] }
 0x1e8   : > { %15281 = vst [vmem:[#allocation286_spill] sm:$0xff] %v9834_v19  ;;  %15282 = vst [vmem:[#allocation287_spill] sm:$0xff] %v9842_v28  ;;  %2241 = vadd.xlane.f32.xlu0 %v2240_v30  ;;  %v2709_v8 = vadd.f32 %v2708_v3, %v9823_v57  ;;  %v2740_v33 = vadd.f32 %v9842_v28, %v9831_v44  ;;  %v9860_v30 = vmul.f32 %v8190_v42, %v639_v37  ;;  %v15288_v3 = vld [vmem:[#allocation228_spill] sm:$0xff] }
 0x1e9   : > { %15283 = vst [vmem:[#allocation288_spill] sm:$0xff] %v9845_v48  ;;  %2253 = vadd.xlane.f32.xlu1 %v2252_v31  ;;  %v9850_v22 = vpop.xlane.xlu0 %1957  ;;  %15285 = vst [vmem:[#allocation290_spill] sm:$0xff] %v9857_v7  ;;  %v2248_v23 = vadd.f32 %v15288_v3, %v9792_v61  ;;  %v9867_v31 = vmul.f32 %v15289_v52, %v590_v46  ;;  %v643_v28 = vld [vmem:[%s8110_s13 + $0x7c8] sm:$0xff]  ;;  %v9878_v42 = vsel %vm14964_vm1, %v9834_v19, 0.0  ;;  %v600_v46 = vld [vmem:[%s8110_s13 + $0x670] sm:$0xff]  ;;  %v9897_v19 = vsel %vm14965_vm0, %v9857_v7, 0.0 }
 0x1ea   : > { %15284 = vst [vmem:[#allocation289_spill] sm:$0xff] %v9850_v22  ;;  %15286 = vst [vmem:[#allocation291_spill] sm:$0xff] %v9860_v30  ;;  %v9862_v0 = vpop.xlane.xlu1 %1969  ;;  %v2710_v22 = vadd.f32 %v2709_v8, %v9854_v13  ;;  %v2741_v6 = vadd.f32 %v2740_v33, %v9838_v55  ;;  %v9882_v37 = vsel %vm14965_vm0, %v9860_v30, 0.0  ;;  %v9886_v8 = vsel %vm14963_vm2, %v9845_v48, 0.0  ;;  %v647_v7 = vld [vmem:[%s8110_s13 + $0x7e8] sm:$0xff] }
 0x1eb   : > { %15287 = vst [vmem:[#allocation292_spill] sm:$0xff] %v9862_v0  ;;  %15290 = vst [vmem:[#allocation228_spill] sm:$0xff] %v9867_v31  ;;  %v9903_v48 = vmul.f32 %v8223_v58, %v643_v28  ;;  %v598_v58 = vld [vmem:[%s8110_s13 + $0x660] sm:$0xff] }
 0x1ec   : > { %2249 = vadd.xlane.f32.xlu0 %v2248_v23  ;;  %15291 = vst [vmem:[#allocation49_spill] sm:$0xff] %v9886_v8  ;;  %v9890_v21 = vadd.f32 %v2710_v22, %v9878_v42  ;;  %v2742_v33 = vadd.f32 %v2741_v6, %v9882_v37  ;;  %v9900_v23 = vmul.f32 %v8263_v16, %v645_v39  ;;  %v15297_v6 = vld [vmem:[#allocation55_spill] sm:$0xff] }
 0x1ed   : > { %2261 = vadd.xlane.f32.xlu1 %v2260_v59  ;;  %v9893_v3 = vpop.xlane.xlu0 %1965  ;;  %15295 = vst [vmem:[#allocation296_spill] sm:$0xff] %v9903_v48  ;;  %v2256_v22 = vadd.f32 %v9538_v24, %v9867_v31  ;;  %v9910_v59 = vmul.f32 %v15297_v6, %v594_v4  ;;  %v2269_v16 = vadd.f32 %v9608_v50, %v9886_v8  ;;  %v9923_v28 = vsel %vm14965_vm0, %v9903_v48, 0.0  ;;  %v604_v24 = vld [vmem:[%s8110_s13 + $0x690] sm:$0xff]  ;;  %v651_v48 = vld [vmem:[%s8110_s13 + $0x808] sm:$0xff] }
 0x1ee   : > { %15292 = vst [vmem:[#allocation293_spill] sm:$0xff] %v9890_v21  ;;  %15293 = vst [vmem:[#allocation294_spill] sm:$0xff] %v9893_v3  ;;  %v9905_v30 = vpop.xlane.xlu1 %1977  ;;  %v2743_v0 = vadd.f32 %v2742_v33, %v9897_v19  ;;  %v649_v3 = vld [vmem:[%s8110_s13 + $0x7f8] sm:$0xff]  ;;  %v9918_v39 = vmul.f32 %v8193_v43, %v600_v46  ;;  %v9931_v50 = vsel %vm14965_vm0, %v9900_v23, 0.0  ;;  %v606_v21 = vld [vmem:[%s8110_s13 + $0x6a0] sm:$0xff] }
 0x1ef   : > { %15294 = vst [vmem:[#allocation295_spill] sm:$0xff] %v9900_v23  ;;  %15296 = vst [vmem:[#allocation297_spill] sm:$0xff] %v9905_v30  ;;  %v9934_v46 = vmul.f32 %v8300_v62, %v649_v3  ;;  %v9937_v30 = vmul.f32 %v8260_v15, %v647_v7  ;;  %v9952_v15 = vmul.f32 %v15242_v10, %v604_v24 }
 0x1f0   : > { %15298 = vst [vmem:[#allocation55_spill] sm:$0xff] %v9910_v59  ;;  %15299 = vst [vmem:[#allocation298_spill] sm:$0xff] %v9918_v39  ;;  %2257 = vadd.xlane.f32.xlu0 %v2256_v22  ;;  %v2744_v4 = vadd.f32 %v2743_v0, %v9923_v28  ;;  %v2264_v0 = vadd.f32 %v9586_v60, %v9910_v59  ;;  %v2277_v62 = vadd.f32 %v9545_v11, %v9918_v39  ;;  %v608_v60 = vld [vmem:[%s8110_s13 + $0x6b0] sm:$0xff] }
 0x1f1   : > { %2270 = vadd.xlane.f32.xlu1 %v2269_v16  ;;  %v9927_v33 = vpop.xlane.xlu0 %1973  ;;  %15301 = vst [vmem:[#allocation300_spill] sm:$0xff] %v9934_v46  ;;  %15302 = vst [vmem:[#allocation301_spill] sm:$0xff] %v9937_v30  ;;  %v9945_v16 = vmul.f32 %v8165_v29, %v598_v58  ;;  %v9956_v7 = vsel %vm14965_vm0, %v9937_v30, 0.0  ;;  %v9961_v58 = vmul.f32 %v8294_v56, %v651_v48  ;;  %v9969_v24 = vsel %vm14965_vm0, %v9934_v46, 0.0  ;;  %v659_v46 = vld [vmem:[%s8110_s13 + $0x848] sm:$0xff]  ;;  %v15339_v59 = vld [vmem:[#allocation45_spill] sm:$0xff] }
 0x1f2   : > { %15300 = vst [vmem:[#allocation299_spill] sm:$0xff] %v9927_v33  ;;  %v9940_v22 = vpop.xlane.xlu1 %1985  ;;  %v2745_v23 = vadd.f32 %v2744_v4, %v9931_v50  ;;  %v653_v33 = vld [vmem:[%s8110_s13 + $0x818] sm:$0xff]  ;;  %15305 = vst [vmem:[#allocation304_spill] sm:$0xff] %v9952_v15  ;;  %v655_v4 = vld [vmem:[%s8110_s13 + $0x828] sm:$0xff] }
 0x1f3   : > { %15303 = vst [vmem:[#allocation302_spill] sm:$0xff] %v9940_v22  ;;  %15304 = vst [vmem:[#allocation303_spill] sm:$0xff] %v9945_v16  ;;  %v602_v22 = vld [vmem:[%s8110_s13 + $0x680] sm:$0xff]  ;;  %v2273_v56 = vadd.f32 %v9568_v1, %v9945_v16 }
 0x1f4   : > { %2265 = vadd.xlane.f32.xlu0 %v2264_v0  ;;  %v2746_v3 = vadd.f32 %v2745_v23, %v9956_v7  ;;  %15306 = vst [vmem:[#allocation305_spill] sm:$0xff] %v9961_v58  ;;  %v9972_v0 = vmul.f32 %v8331_v45, %v653_v33  ;;  %v657_v23 = vld [vmem:[%s8110_s13 + $0x838] sm:$0xff]  ;;  %v9988_v45 = vsel %vm14965_vm0, %v9961_v58, 0.0  ;;  %v9991_v33 = vmul.f32 %v8328_v40, %v655_v4 }
 0x1f5   : > { %2278 = vadd.xlane.f32.xlu1 %v2277_v62  ;;  %v9964_v11 = vpop.xlane.xlu0 %1981  ;;  %v2285_v62 = vadd.f32 %v9603_v2, %v9952_v15  ;;  %v9994_v1 = vmul.f32 %v8181_v35, %v602_v22  ;;  %v10006_v40 = vmul.f32 %v8365_v34, %v657_v23  ;;  %v610_v34 = vld [vmem:[%s8110_s13 + $0x6c0] sm:$0xff] }
 0x1f6   : > { %15307 = vst [vmem:[#allocation306_spill] sm:$0xff] %v9964_v11  ;;  %15308 = vst [vmem:[#allocation307_spill] sm:$0xff] %v9972_v0  ;;  %v9974_v30 = vpop.xlane.xlu1 %1994  ;;  %v2747_v48 = vadd.f32 %v2746_v3, %v9969_v24  ;;  %v9983_v11 = vmul.f32 %v15250_v18, %v608_v60  ;;  %v612_v3 = vld [vmem:[%s8110_s13 + $0x6d0] sm:$0xff]  ;;  %v10003_v58 = vsel %vm14965_vm0, %v9972_v0, 0.0  ;;  %v10025_v23 = vsel %vm14965_vm0, %v9991_v33, 0.0 }
 0x1f7   : > { %15309 = vst [vmem:[#allocation308_spill] sm:$0xff] %v9974_v30  ;;  %15311 = vst [vmem:[#allocation310_spill] sm:$0xff] %v9991_v33  ;;  %v2281_v22 = vadd.f32 %v9590_v54, %v9994_v1  ;;  %v10020_v0 = vmul.f32 %v8257_v14, %v612_v3  ;;  %v10028_v54 = vmul.f32 %v8362_v47, %v659_v46  ;;  %v10037_v3 = vsel %vm14965_vm0, %v10006_v40, 0.0 }
 0x1f8   : > { %15310 = vst [vmem:[#allocation309_spill] sm:$0xff] %v9983_v11  ;;  %2274 = vadd.xlane.f32.xlu0 %v2273_v56  ;;  %15312 = vst [vmem:[#allocation311_spill] sm:$0xff] %v9994_v1  ;;  %v2748_v2 = vadd.f32 %v2747_v48, %v9988_v45  ;;  %v10013_v56 = vmul.f32 %v8234_v63, %v606_v21  ;;  %v2293_v30 = vadd.f32 %v9655_v53, %v9983_v11  ;;  %v616_v21 = vld [vmem:[%s8110_s13 + $0x6f0] sm:$0xff] }
 0x1f9   : > { %2286 = vadd.xlane.f32.xlu1 %v2285_v62  ;;  %v9999_v60 = vpop.xlane.xlu0 %1989  ;;  %15314 = vst [vmem:[#allocation313_spill] sm:$0xff] %v10006_v40  ;;  %v661_v62 = vld [vmem:[%s8110_s13 + $0x858] sm:$0xff]  ;;  %15317 = vst [vmem:[#allocation316_spill] sm:$0xff] %v10020_v0  ;;  %v10047_v46 = vmul.f32 %v8268_v25, %v610_v34  ;;  %v10054_v40 = vmul.f32 %v15264_v38, %v616_v21  ;;  %v15326_v34 = vld [vmem:[#allocation24_spill] sm:$0xff] }
 0x1fa   : > { %15313 = vst [vmem:[#allocation312_spill] sm:$0xff] %v9999_v60  ;;  %v10008_v4 = vpop.xlane.xlu1 %2002  ;;  %15316 = vst [vmem:[#allocation315_spill] sm:$0xff] %v10013_v56  ;;  %v2749_v48 = vadd.f32 %v2748_v2, %v10003_v58  ;;  %v10040_v33 = vmul.f32 %v8404_v17, %v661_v62  ;;  %v2289_v47 = vadd.f32 %v9643_v9, %v10013_v56  ;;  %v10059_v17 = vsel %vm14965_vm0, %v10028_v54, 0.0  ;;  %v15325_v62 = vld [vmem:[#allocation20_spill] sm:$0xff] }
 0x1fb   : > { %15315 = vst [vmem:[#allocation314_spill] sm:$0xff] %v10008_v4  ;;  %15318 = vst [vmem:[#allocation317_spill] sm:$0xff] %v10028_v54  ;;  %v663_v4 = vld [vmem:[%s8110_s13 + $0x868] sm:$0xff] }
 0x1fc   : > { %2282 = vadd.xlane.f32.xlu0 %v2281_v22  ;;  %v2750_v2 = vadd.f32 %v2749_v48, %v10025_v23  ;;  %15320 = vst [vmem:[#allocation319_spill] sm:$0xff] %v10040_v33  ;;  %15322 = vst [vmem:[#allocation321_spill] sm:$0xff] %v10047_v46  ;;  %v665_v22 = vld [vmem:[%s8110_s13 + $0x878] sm:$0x3]  ;;  %v2301_v48 = vadd.f32 %v9689_v41, %v10020_v0  ;;  %v10062_v9 = vmul.f32 %v8401_v26, %v663_v4  ;;  %v15330_v4 = vld [vmem:[#allocation258_spill] sm:$0xff] }
 0x1fd   : > { %2294 = vadd.xlane.f32.xlu1 %v2293_v30  ;;  %v10033_v53 = vpop.xlane.xlu0 %1998  ;;  %15323 = vst [vmem:[#allocation322_spill] sm:$0xff] %v10054_v40  ;;  %v10072_v8 = vsel %vm14965_vm0, %v10040_v33, 0.0  ;;  %v10075_v54 = vmul.f32 %v8438_v51, %v665_v22  ;;  %v618_v33 = vld [vmem:[%s8110_s13 + $0x700] sm:$0xff]  ;;  %v15335_v22 = vld [vmem:[#allocation29_spill] sm:$0xff] }
 0x1fe   : > { %15319 = vst [vmem:[#allocation318_spill] sm:$0xff] %v10033_v53  ;;  %v10042_v60 = vpop.xlane.xlu1 %2010  ;;  %v2751_v30 = vadd.f32 %v2750_v2, %v10037_v3  ;;  %v614_v53 = vld [vmem:[%s8110_s13 + $0x6e0] sm:$0xff]  ;;  %15324 = vst [vmem:[#allocation323_spill] sm:$0xff] %v10062_v9  ;;  %v620_v2 = vld [vmem:[%s8110_s13 + $0x710] sm:$0xff]  ;;  %v10093_v51 = vsel %vm14965_vm0, %v10062_v9, 0.0  ;;  %vm14967_vm0 = vcmask 1041409  }
 0x1ff   : > { %15321 = vst [vmem:[#allocation320_spill] sm:$0xff] %v10042_v60  ;;  %v2410_v60 = vadd.f32 %v15326_v34, %v15325_v62  ;;  %15328 = vst [vmem:[#allocation325_spill] sm:$0xff] %v10075_v54  ;;  %v2297_v34 = vadd.f32 %v15330_v4, %v10047_v46  ;;  %v10088_v0 = vmul.f32 %v15272_v12, %v620_v2  ;;  %v10102_v2 = vsel %vm14964_vm1, %v10075_v54, 0.0  ;;  %v622_v54 = vld [vmem:[%s8110_s13 + $0x720] sm:$0xff] }
 0x200   : > { %2290 = vadd.xlane.f32.xlu0 %v2289_v47  ;;  %v2752_v41 = vadd.f32 %v2751_v30, %v10059_v17  ;;  %v15331_v47 = vld [vmem:[#allocation38_spill] sm:$0xff]  ;;  %vm14978_vm1 = vcmask 1048512  }
 0x201   : > { %2302 = vadd.xlane.f32.xlu1 %v2301_v48  ;;  %v10068_v21 = vpop.xlane.xlu0 %2006  ;;  %v10082_v62 = vmul.f32 %v15331_v47, %v614_v53  ;;  %v15333_v48 = vld [vmem:[#allocation267_spill] sm:$0xff]  ;;  %15334 = vst [vmem:[#allocation38_spill] sm:$0xff] %v10088_v0  ;;  %v624_v53 = vld [vmem:[%s8110_s13 + $0x730] sm:$0xff] }
 0x202   : > { %15327 = vst [vmem:[#allocation324_spill] sm:$0xff] %v10068_v21  ;;  %v10077_v26 = vpop.xlane.xlu1 %2018  ;;  %v2753_v30 = vadd.f32 %v2752_v41, %v10072_v8  ;;  %v2309_v21 = vadd.f32 %v15333_v48, %v10054_v40  ;;  %v15338_v40 = vld [vmem:[#allocation264_spill] sm:$0xff] }
 0x203   : > { %15329 = vst [vmem:[#allocation326_spill] sm:$0xff] %v10077_v26  ;;  %15332 = vst [vmem:[#allocation258_spill] sm:$0xff] %v10082_v62  ;;  %v2411_v26 = vadd.f32 %v2410_v60, %v15335_v22  ;;  %v2305_v9 = vadd.f32 %v15338_v40, %v10082_v62  ;;  %v10109_v60 = vmul.f32 %v15339_v59, %v618_v33  ;;  %v15343_v22 = vld [vmem:[#allocation26_spill] sm:$0xff]  ;;  %v628_v40 = vld [vmem:[%s8110_s13 + $0x750] sm:$0xff] }
 0x204   : > { %2298 = vadd.xlane.f32.xlu0 %v2297_v34  ;;  %v2754_v4 = vadd.f32 %v2753_v30, %v10093_v51  ;;  %v10117_v30 = vmul.f32 %v15289_v52, %v624_v53 }
 0x205   : > { %2310 = vadd.xlane.f32.xlu1 %v2309_v21  ;;  %v10098_v41 = vpop.xlane.xlu0 %2014  ;;  %15340 = vst [vmem:[#allocation264_spill] sm:$0xff] %v10109_v60  ;;  %v2317_v21 = vadd.f32 %v9762_v20, %v10088_v0  ;;  %v10129_v20 = vmul.f32 %v8371_v27, %v622_v54  ;;  %v10134_v0 = vmul.f32 %v15297_v6, %v628_v40  ;;  %v15352_v54 = vld [vmem:[#allocation279_spill] sm:$0xff] }
 0x206   : > { %15336 = vst [vmem:[#allocation267_spill] sm:$0xff] %v10098_v41  ;;  %v10104_v48 = vpop.xlane.xlu1 %2026  ;;  %v10112_v34 = vadd.f32 %v2754_v4, %v10102_v2  ;;  %15342 = vst [vmem:[#allocation328_spill] sm:$0xff] %v10117_v30  ;;  %v15346_v4 = vld [vmem:[#allocation272_spill] sm:$0xff]  ;;  %v2325_v53 = vadd.f32 %v9806_v49, %v10117_v30 }
 0x207   : > { %15337 = vst [vmem:[#allocation327_spill] sm:$0xff] %v10104_v48  ;;  %v2412_v48 = vadd.f32 %v2411_v26, %v15343_v22  ;;  %15347 = vst [vmem:[#allocation272_spill] sm:$0xff] %v10129_v20  ;;  %v626_v26 = vld [vmem:[%s8110_s13 + $0x740] sm:$0xff] }
 0x208   : > { %15341 = vst [vmem:[#allocation45_spill] sm:$0xff] %v10112_v34  ;;  %2306 = vadd.xlane.f32.xlu0 %v2305_v9  ;;  %v2313_v34 = vadd.f32 %v15346_v4, %v10109_v60  ;;  %15348 = vst [vmem:[#allocation331_spill] sm:$0xff] %v10134_v0  ;;  %v15349_v9 = vld [vmem:[#allocation33_spill] sm:$0xff]  ;;  %v2321_v60 = vadd.f32 %v15352_v54, %v10129_v20  ;;  %v10147_v49 = vmul.f32 %v8418_v36, %v626_v26 }
 0x209   : > { %2318 = vadd.xlane.f32.xlu1 %v2317_v21  ;;  %v10122_v41 = vpop.xlane.xlu0 %2022  ;;  %v2413_v22 = vadd.f32 %v2412_v48, %v15349_v9  ;;  %v632_v21 = vld [vmem:[%s8110_s13 + $0x770] sm:$0xff]  ;;  %v2333_v48 = vadd.f32 %v9854_v13, %v10134_v0 }
 0x20a   : > { %15344 = vst [vmem:[#allocation329_spill] sm:$0xff] %v10122_v41  ;;  %v10124_v33 = vpop.xlane.xlu1 %2034  ;;  %v630_v41 = vld [vmem:[%s8110_s13 + $0x760] sm:$0x3]  ;;  %15353 = vst [vmem:[#allocation279_spill] sm:$0xff] %v10147_v49  ;;  %v2329_v26 = vadd.f32 %v9823_v57, %v10147_v49 }
 0x20b   : > { %15345 = vst [vmem:[#allocation330_spill] sm:$0xff] %v10124_v33  ;;  %v10155_v40 = vmul.f32 %v15222_v5, %v630_v41  ;;  %v15358_v41 = vld [vmem:[#allocation39_spill] sm:$0xff] }
 0x20c   : > { %2314 = vadd.xlane.f32.xlu0 %v2313_v34  ;;  %v10152_v34 = vmul.f32 %v8165_v29, %v632_v21  ;;  %v640_v21 = vld [vmem:[%s8110_s13 + $0x7b0] sm:$0xff] }
 0x20d   : > { %2326 = vadd.xlane.f32.xlu1 %v2325_v53  ;;  %v10140_v33 = vpop.xlane.xlu0 %2030  ;;  %15355 = vst [vmem:[#allocation335_spill] sm:$0xff] %v10155_v40  ;;  %v15356_v53 = vld [vmem:[#allocation30_spill] sm:$0xff]  ;;  %v10169_v13 = vsel %vm14963_vm2, %v10155_v40, 0.0 }
 0x20e   : > { %15350 = vst [vmem:[#allocation332_spill] sm:$0xff] %v10140_v33  ;;  %v10142_v4 = vpop.xlane.xlu1 %2042  ;;  %15354 = vst [vmem:[#allocation334_spill] sm:$0xff] %v10152_v34  ;;  %v2414_v9 = vadd.f32 %v2413_v22, %v15356_v53  ;;  %v636_v33 = vld [vmem:[%s8110_s13 + $0x790] sm:$0xff]  ;;  %v2342_v29 = vadd.f32 %v9831_v44, %v10152_v34  ;;  %v634_v22 = vld [vmem:[%s8110_s13 + $0x780] sm:$0xff]  ;;  %v2338_v44 = vadd.f32 %v9878_v42, %v10169_v13 }
 0x20f   : > { %15351 = vst [vmem:[#allocation333_spill] sm:$0xff] %v10142_v4  ;;  %v10177_v57 = vmul.f32 %v8181_v35, %v636_v33  ;;  %v10184_v40 = vmul.f32 %v8193_v43, %v634_v22  ;;  %v644_v33 = vld [vmem:[%s8110_s13 + $0x7d0] sm:$0xff]  ;;  %v15366_v43 = vld [vmem:[#allocation287_spill] sm:$0xff] }
 0x210   : > { %2322 = vadd.xlane.f32.xlu0 %v2321_v60  ;;  %v2415_v60 = vadd.f32 %v2414_v9, %v15358_v41  ;;  %v15363_v41 = vld [vmem:[#allocation34_spill] sm:$0xff]  ;;  %v10206_v22 = vmul.f32 %v8268_v25, %v644_v33  ;;  %v15374_v33 = vld [vmem:[#allocation40_spill] sm:$0xff] }
 0x211   : > { %2334 = vadd.xlane.f32.xlu1 %v2333_v48  ;;  %v10158_v4 = vpop.xlane.xlu0 %2038  ;;  %15359 = vst [vmem:[#allocation337_spill] sm:$0xff] %v10177_v57  ;;  %15361 = vst [vmem:[#allocation339_spill] sm:$0xff] %v10184_v40  ;;  %v2350_v9 = vadd.f32 %v9838_v55, %v10177_v57  ;;  %v2346_v42 = vadd.f32 %v15366_v43, %v10184_v40 }
 0x212   : > { %v10160_v54 = vpop.xlane.xlu1 %2050  ;;  %v2416_v35 = vadd.f32 %v2415_v60, %v15363_v41  ;;  %15368 = vst [vmem:[#allocation343_spill] sm:$0xff] %v10206_v22  ;;  %v642_v60 = vld [vmem:[%s8110_s13 + $0x7c0] sm:$0xff]  ;;  %v2366_v25 = vadd.f32 %v9931_v50, %v10206_v22 }
 0x213   : > { %15357 = vst [vmem:[#allocation336_spill] sm:$0xff] %v10160_v54 }
 0x214   : > { %2330 = vadd.xlane.f32.xlu0 %v2329_v26  ;;  %v10189_v26 = vmul.f32 %v8234_v63, %v640_v21  ;;  %v15369_v21 = vld [vmem:[#allocation44_spill] sm:$0xff] }
 0x215   : > { %2343 = vadd.xlane.f32.xlu1 %v2342_v29  ;;  %v10174_v48 = vpop.xlane.xlu0 %2046  ;;  %v638_v29 = vld [vmem:[%s8110_s13 + $0x7a0] sm:$0xff] }
 0x216   : > { %v10179_v53 = vpop.xlane.xlu1 %2058  ;;  %15362 = vst [vmem:[#allocation340_spill] sm:$0xff] %v10189_v26  ;;  %v10201_v55 = vmul.f32 %v15242_v10, %v638_v29  ;;  %v2358_v63 = vadd.f32 %v9897_v19, %v10189_v26  ;;  %v10218_v19 = vmul.f32 %v15250_v18, %v642_v60  ;;  %v650_v60 = vld [vmem:[%s8110_s13 + $0x800] sm:$0xff] }
 0x217   : > { %15360 = vst [vmem:[#allocation338_spill] sm:$0xff] %v10179_v53 }
 0x218   : > { %2339 = vadd.xlane.f32.xlu0 %v2338_v44  ;;  %15367 = vst [vmem:[#allocation287_spill] sm:$0xff] %v10201_v55  ;;  %v2417_v44 = vadd.f32 %v2416_v35, %v15369_v21  ;;  %v2354_v10 = vadd.f32 %v9882_v37, %v10201_v55  ;;  %15372 = vst [vmem:[#allocation346_spill] sm:$0xff] %v10218_v19  ;;  %v646_v35 = vld [vmem:[%s8110_s13 + $0x7e0] sm:$0xff]  ;;  %v2362_v18 = vadd.f32 %v9923_v28, %v10218_v19  ;;  %v656_v28 = vld [vmem:[%s8110_s13 + $0x830] sm:$0xff] }
 0x219   : > { %2351 = vadd.xlane.f32.xlu1 %v2350_v9  ;;  %v10194_v53 = vpop.xlane.xlu0 %2054  ;;  %v648_v9 = vld [vmem:[%s8110_s13 + $0x7f0] sm:$0xff]  ;;  %v10235_v37 = vmul.f32 %v8257_v14, %v646_v35 }
 0x21a   : > { %15364 = vst [vmem:[#allocation341_spill] sm:$0xff] %v10194_v53  ;;  %v10196_v54 = vpop.xlane.xlu1 %2067  ;;  %v10223_v29 = vmul.f32 %v15331_v47, %v648_v9  ;;  %v2418_v43 = vadd.f32 %v2417_v44, %v15374_v33  ;;  %v15379_v44 = vld [vmem:[#allocation50_spill] sm:$0xff] }
 0x21b   : > { %15365 = vst [vmem:[#allocation342_spill] sm:$0xff] %v10196_v54  ;;  %15377 = vst [vmem:[#allocation350_spill] sm:$0xff] %v10235_v37 }
 0x21c   : > { %2347 = vadd.xlane.f32.xlu0 %v2346_v42  ;;  %15373 = vst [vmem:[#allocation347_spill] sm:$0xff] %v10223_v29  ;;  %v652_v42 = vld [vmem:[%s8110_s13 + $0x810] sm:$0xff]  ;;  %v2374_v50 = vadd.f32 %v9969_v24, %v10223_v29  ;;  %v2419_v9 = vadd.f32 %v2418_v43, %v15379_v44  ;;  %v2370_v24 = vadd.f32 %v9956_v7, %v10235_v37  ;;  %v15387_v44 = vld [vmem:[#allocation71_spill] sm:$0xff] }
 0x21d   : > { %2359 = vadd.xlane.f32.xlu1 %v2358_v63  ;;  %v10211_v41 = vpop.xlane.xlu0 %2063  ;;  %v10240_v47 = vmul.f32 %v15339_v59, %v652_v42  ;;  %v10254_v59 = vmul.f32 %v15264_v38, %v650_v60  ;;  %v10259_v43 = vmul.f32 %v8371_v27, %v656_v28  ;;  %v654_v42 = vld [vmem:[%s8110_s13 + $0x820] sm:$0xff]  ;;  %v664_v7 = vld [vmem:[%s8110_s13 + $0x870] sm:$0x3]  ;;  %v15392_v28 = vld [vmem:[#allocation57_spill] sm:$0xff] }
 0x21e   : > { %15370 = vst [vmem:[#allocation344_spill] sm:$0xff] %v10211_v41  ;;  %v10213_v54 = vpop.xlane.xlu1 %2075 }
 0x21f   : > { %15371 = vst [vmem:[#allocation345_spill] sm:$0xff] %v10213_v54  ;;  %15378 = vst [vmem:[#allocation351_spill] sm:$0xff] %v10240_v47  ;;  %v2382_v35 = vadd.f32 %v10003_v58, %v10240_v47  ;;  %v2378_v60 = vadd.f32 %v9988_v45, %v10254_v59  ;;  %v10273_v58 = vmul.f32 %v15272_v12, %v654_v42  ;;  %v15425_v54 = vld [vmem:[#allocation87_spill] sm:$0xff] }
 0x220   : > { %2355 = vadd.xlane.f32.xlu0 %v2354_v10  ;;  %v15380_v10 = vld [vmem:[#allocation63_spill] sm:$0xff]  ;;  %15384 = vst [vmem:[#allocation354_spill] sm:$0xff] %v10254_v59  ;;  %15385 = vst [vmem:[#allocation355_spill] sm:$0xff] %v10259_v43  ;;  %v2390_v27 = vadd.f32 %v10037_v3, %v10259_v43 }
 0x221   : > { %2367 = vadd.xlane.f32.xlu1 %v2366_v25  ;;  %v10228_v63 = vpop.xlane.xlu0 %2071  ;;  %v15381_v25 = vld [vmem:[#allocation72_spill] sm:$0xff]  ;;  %15390 = vst [vmem:[#allocation358_spill] sm:$0xff] %v10273_v58  ;;  %v2386_v3 = vadd.f32 %v10025_v23, %v10273_v58 }
 0x222   : > { %15375 = vst [vmem:[#allocation348_spill] sm:$0xff] %v10228_v63  ;;  %v10230_v21 = vpop.xlane.xlu1 %2083  ;;  %v2454_v33 = vadd.f32 %v15381_v25, %v15380_v10  ;;  %v660_v10 = vld [vmem:[%s8110_s13 + $0x850] sm:$0xff] }
 0x223   : > { %15376 = vst [vmem:[#allocation349_spill] sm:$0xff] %v10230_v21 }
 0x224   : > { %2363 = vadd.xlane.f32.xlu0 %v2362_v18  ;;  %v15386_v18 = vld [vmem:[#allocation46_spill] sm:$0xff]  ;;  %v2455_v25 = vadd.f32 %v2454_v33, %v15387_v44  ;;  %v10278_v33 = vmul.f32 %v8418_v36, %v660_v10  ;;  %v10284_v44 = vmul.f32 %v15222_v5, %v664_v7  ;;  %v7858_v10 = vmov 1966171168   ;;  %v15399_v7 = vld [vmem:[#allocation75_spill] sm:$0xff] }
 0x225   : > { %2375 = vadd.xlane.f32.xlu1 %v2374_v50  ;;  %v10247_v21 = vpop.xlane.xlu0 %2079  ;;  %v2420_v50 = vadd.f32 %v2419_v9, %v15386_v18  ;;  %v658_v9 = vld [vmem:[%s8110_s13 + $0x840] sm:$0xff]  ;;  %v1090_v42 = vunpack.c.l.s4 %v7858_v10 }
 0x226   : > { %15382 = vst [vmem:[#allocation352_spill] sm:$0xff] %v10247_v21  ;;  %v10249_v14 = vpop.xlane.xlu1 %2091  ;;  %15391 = vst [vmem:[#allocation359_spill] sm:$0xff] %v10278_v33  ;;  %v10293_v36 = vmul.f32 %v15289_v52, %v658_v9 }
 0x227   : > { %15383 = vst [vmem:[#allocation353_spill] sm:$0xff] %v10249_v14  ;;  %15394 = vst [vmem:[#allocation360_spill] sm:$0xff] %v10284_v44  ;;  %v1091_v10 = vunpack.c.0.s8 %v1090_v42  ;;  %v15408_v42 = vld [vmem:[#allocation58_spill] sm:$0xff] }
 0x228   : > { %2371 = vadd.xlane.f32.xlu0 %v2370_v24  ;;  %v2421_v24 = vadd.f32 %v2420_v50, %v15392_v28  ;;  %15397 = vst [vmem:[#allocation363_spill] sm:$0xff] %v10293_v36  ;;  %v662_v50 = vld [vmem:[%s8110_s13 + $0x860] sm:$0xff]  ;;  %v10302_v28 = vsel %vm14963_vm2, %v10284_v44, 0.0  ;;  %v2394_v9 = vadd.f32 %v10059_v17, %v10293_v36  ;;  %vm14972_vm2 = vcmask 982912  }
 0x229   : > { %2383 = vadd.xlane.f32.xlu1 %v2382_v35  ;;  %v10265_v14 = vpop.xlane.xlu0 %2087  ;;  %v15393_v35 = vld [vmem:[#allocation76_spill] sm:$0xff] }
 0x22a   : > { %15388 = vst [vmem:[#allocation356_spill] sm:$0xff] %v10265_v14  ;;  %v10268_v38 = vpop.xlane.xlu1 %2099  ;;  %v2456_v18 = vadd.f32 %v2455_v25, %v15393_v35  ;;  %v2398_v25 = vadd.f32 %v10072_v8, %v10278_v33  ;;  %v10311_v8 = vmul.f32 %v15297_v6, %v662_v50  ;;  %v15407_v35 = vld [vmem:[#allocation18_spill] sm:$0xff] }
 0x22b   : > { %15389 = vst [vmem:[#allocation357_spill] sm:$0xff] %v10268_v38  ;;  %v1094_v6 = vsub.s32 %v1091_v10, %v15407_v35  ;;  %v666_v50 = vld [vmem:[#allocation7] sm:$0xff] }
 0x22c   : > { %2379 = vadd.xlane.f32.xlu0 %v2378_v60  ;;  %v15398_v60 = vld [vmem:[#allocation51_spill] sm:$0xff]  ;;  %15402 = vst [vmem:[#allocation366_spill] sm:$0xff] %v10311_v8  ;;  %v2402_v17 = vadd.f32 %v10093_v51, %v10311_v8  ;;  %v1088_v35 = vcombine.high %v666_v50, %v666_v50 }
 0x22d   : > { %2391 = vadd.xlane.f32.xlu1 %v2390_v27  ;;  %v10286_v45 = vpop.xlane.xlu0 %2095  ;;  %v2422_v5 = vadd.f32 %v2421_v24, %v15398_v60  ;;  %v2457_v27 = vadd.f32 %v2456_v18, %v15399_v7  ;;  %v2407_v18 = vadd.f32 %v10102_v2, %v10302_v28  ;;  %v15403_v24 = vld [vmem:[#allocation64_spill] sm:$0xff] }
 0x22e   : > { %15395 = vst [vmem:[#allocation361_spill] sm:$0xff] %v10286_v45  ;;  %v10288_v12 = vpop.xlane.xlu1 %2107  ;;  %v15404_v60 = vld [vmem:[#allocation80_spill] sm:$0xff]  ;;  %v15422_v45 = vld [vmem:[#allocation107_spill] sm:$0xff] }
 0x22f   : > { %15396 = vst [vmem:[#allocation362_spill] sm:$0xff] %v10288_v12  ;;  %v2458_v44 = vadd.f32 %v2457_v27, %v15404_v60  ;;  %v15409_v12 = vld [vmem:[#allocation79_spill] sm:$0xff]  ;;  %v15413_v60 = vld [vmem:[#allocation85_spill] sm:$0xff] }
 0x230   : > { %2387 = vadd.xlane.f32.xlu0 %v2386_v3  ;;  %v2423_v3 = vadd.f32 %v2422_v5, %v15403_v24 }
 0x231   : > { %2399 = vadd.xlane.f32.xlu1 %v2398_v25  ;;  %v10304_v23 = vpop.xlane.xlu0 %2103  ;;  %v2459_v2 = vadd.f32 %v2458_v44, %v15409_v12  ;;  %v15419_v12 = vld [vmem:[#allocation19_spill] sm:$0xff] }
 0x232   : > { %15400 = vst [vmem:[#allocation364_spill] sm:$0xff] %v10304_v23  ;;  %v10306_v52 = vpop.xlane.xlu1 %2115  ;;  %v1102_v23 = vrot.slane %v1088_v35, %v1094_v6  ;;  %v15426_v35 = vld [vmem:[#allocation116_spill] sm:$0xff] }
 0x233   : > { %15401 = vst [vmem:[#allocation365_spill] sm:$0xff] %v10306_v52  ;;  %v2424_v52 = vadd.f32 %v2423_v3, %v15408_v42  ;;  %v15416_v3 = vld [vmem:[#allocation83_spill] sm:$0xff] }
 0x234   : > { %2395 = vadd.xlane.f32.xlu0 %v2394_v9  ;;  %v1095_v9 = vrot.slane %v666_v50, %v1094_v6 }
 0x235   : > { %2408 = vadd.xlane.f32.xlu1 %v2407_v18  ;;  %v10317_v25 = vpop.xlane.xlu0 %2111  ;;  %v15412_v18 = vld [vmem:[#allocation69_spill] sm:$0xff] }
 0x236   : > { %15405 = vst [vmem:[#allocation367_spill] sm:$0xff] %v10317_v25  ;;  %v10319_v7 = vpop.xlane.xlu1 %2123  ;;  %v2425_v24 = vadd.f32 %v2424_v52, %v15412_v18  ;;  %v1111_v10 = vrot.slane %v1095_v9, %v1094_v6  ;;  %v1103_v52 = vcombine.high %v1095_v9, %v1095_v9 }
 0x237   : > { %15406 = vst [vmem:[#allocation368_spill] sm:$0xff] %v10319_v7  ;;  %v2460_v7 = vadd.f32 %v2459_v2, %v15413_v60  ;;  %v15420_v2 = vld [vmem:[#allocation89_spill] sm:$0xff] }
 0x238   : > { %2403 = vadd.xlane.f32.xlu0 %v2402_v17  ;;  %v2426_v38 = vrot.slane %v2425_v24, 4 }
 0x239   : > { %v10326_v5 = vpop.xlane.xlu0 %2119  ;;  %v2461_v42 = vadd.f32 %v2460_v7, %v15416_v3  ;;  %v1118_v3 = vrot.slane %v1102_v23, %v1094_v6 }
 0x23a   : > { %15410 = vst [vmem:[#allocation369_spill] sm:$0xff] %v10326_v5  ;;  %v10328_v27 = vpop.xlane.xlu1 %2132  ;;  %v1133_v5 = vcombine.high %v1111_v10, %v1111_v10  ;;  %v2427_v18 = vadd.f32 %v2426_v38, %v2425_v24  ;;  %v1104_v24 = vcombine.high %v1102_v23, %v1102_v23 }
 0x23b   : > { %15411 = vst [vmem:[#allocation370_spill] sm:$0xff] %v10328_v27  ;;  %v1140_v27 = vrot.slane %v1111_v10, %v15419_v12  ;;  %v2462_v60 = vadd.f32 %v2461_v42, %v15420_v2  ;;  %v1156_v2 = vrot.slane %v1118_v3, %v15419_v12 }
 0x23c   : > { %v1148_v7 = vrot.slane %v1133_v5, %v15419_v12 }
 0x23d   : > { %v10332_v25 = vpop.xlane.xlu0 %2127  ;;  %v2463_v10 = vadd.f32 %v2462_v60, %v15425_v54  ;;  %v1132_v54 = vrot.slane %v1104_v24, %v1094_v6 }
 0x23e   : > { %15414 = vst [vmem:[#allocation69_spill] sm:$0xff] %v10332_v25  ;;  %v10334_v51 = vpop.xlane.xlu1 %2140  ;;  %v15421_v25 = vld [vmem:[#allocation110_spill] sm:$0xff] }
 0x23f   : > { %15415 = vst [vmem:[#allocation371_spill] sm:$0xff] %v10334_v51  ;;  %v2498_v51 = vadd.f32 %v15422_v45, %v15421_v25  ;;  %v1134_v45 = vcombine.high %v1118_v3, %v1118_v3 }
 0x241   : > { %v10337_v44 = vpop.xlane.xlu0 %2136  ;;  %v2499_v9 = vadd.f32 %v2498_v51, %v15426_v35  ;;  %v1164_v23 = vrot.slane %v1134_v45, %v15419_v12  ;;  %v15437_v45 = vld [vmem:[#allocation101_spill] sm:$0xff] }
 0x242   : > { %15417 = vst [vmem:[#allocation372_spill] sm:$0xff] %v10337_v44  ;;  %v10339_v17 = vpop.xlane.xlu1 %2148  ;;  %v2428_v44 = vrot.slane %v2427_v18, 2 }
 0x243   : > { %15418 = vst [vmem:[#allocation373_spill] sm:$0xff] %v10339_v17  ;;  %v1125_v17 = vrot.slane %v1103_v52, %v1094_v6 }
 0x244   : > { %v2429_v5 = vadd.f32 %v2428_v44, %v2427_v18 }
 0x245   : > { %v10345_v14 = vpop.xlane.xlu0 %2144  ;;  %v1135_v25 = vcombine.high %v1125_v17, %v1125_v17 }
 0x246   : > { %15423 = vst [vmem:[#allocation374_spill] sm:$0xff] %v10345_v14  ;;  %1170 = vperm.xlu1 %7498, %v1140_v27   ;;  %v10347_v50 = vpop.xlane.xlu1 %2156  ;;  %v1144_v27 = vrot.slane %v1125_v17, %v15419_v12  ;;  %v15430_v14 = vld [vmem:[#allocation111_spill] sm:$0xff]  ;;  %v2430_v35 = vrot.slane %v2429_v5, 1  ;;  %v15434_v17 = vld [vmem:[#allocation118_spill] sm:$0xff] }
 0x247   : > { %15424 = vst [vmem:[#allocation375_spill] sm:$0xff] %v10347_v50  ;;  %v15429_v50 = vld [vmem:[#allocation94_spill] sm:$0xff]  ;;  %v2500_v21 = vadd.f32 %v2499_v9, %v15430_v14  ;;  %v1136_v9 = vcombine.high %v1132_v54, %v1132_v54 }
 0x248   : > { %v2464_v52 = vadd.f32 %v2463_v10, %v15429_v50 }
 0x249   : > { %v10352_v38 = vpop.xlane.xlu0 %2152  ;;  %v2501_v44 = vadd.f32 %v2500_v21, %v15434_v17 }
 0x24a   : > { %15427 = vst [vmem:[#allocation376_spill] sm:$0xff] %v10352_v38  ;;  %1178 = vperm.xlu1 %7498, %v1148_v7   ;;  %v10354_v42 = vpop.xlane.xlu1 %2164  ;;  %v1152_v7 = vrot.slane %v1135_v25, %v15419_v12  ;;  %v15438_v25 = vld [vmem:[#allocation115_spill] sm:$0xff] }
 0x24b   : > { %15428 = vst [vmem:[#allocation377_spill] sm:$0xff] %v10354_v42  ;;  %v15433_v42 = vld [vmem:[#allocation91_spill] sm:$0xff]  ;;  %v2502_v6 = vadd.f32 %v2501_v44, %v15438_v25  ;;  %v15446_v44 = vld [vmem:[#allocation120_spill] sm:$0xff] }
 0x24c   : > { %v2465_v3 = vadd.f32 %v2464_v52, %v15433_v42  ;;  %v1168_v52 = vrot.slane %v1136_v9, %v15419_v12  ;;  %v15442_v42 = vld [vmem:[#allocation122_spill] sm:$0xff] }
 0x24d   : > { %v10360_v60 = vpop.xlane.xlu0 %2160  ;;  %v2503_v17 = vadd.f32 %v2502_v6, %v15442_v42  ;;  %v15450_v6 = vld [vmem:[#allocation103_spill] sm:$0xff]  ;;  %v15451_v42 = vld [vmem:[#allocation128_spill] sm:$0xff] }
 0x24e   : > { %15431 = vst [vmem:[#allocation378_spill] sm:$0xff] %v10360_v60  ;;  %1186 = vperm.xlu1 %7498, %v1156_v2   ;;  %v10362_v51 = vpop.xlane.xlu1 %2172  ;;  %1174 = vperm.xlu0 %7497, %v1144_v27   ;;  %v1160_v2 = vrot.slane %v1132_v54, %v15419_v12  ;;  %v10373_v27 = vadd.f32 %v2430_v35, %v2429_v5  ;;  %v15445_v5 = vld [vmem:[#allocation106_spill] sm:$0xff] }
 0x24f   : > { %15432 = vst [vmem:[#allocation379_spill] sm:$0xff] %v10362_v51  ;;  %v2466_v50 = vadd.f32 %v2465_v3, %v15437_v45  ;;  %v2504_v45 = vadd.f32 %v2503_v17, %v15446_v44 }
 0x251   : > { %v10368_v18 = vpop.xlane.xlu0 %2168  ;;  %v2505_v14 = vadd.f32 %v2504_v45, %v15451_v42  ;;  %v15457_v42 = vld [vmem:[#allocation133_spill] sm:$0xff] }
 0x252   : > { %15435 = vst [vmem:[#allocation380_spill] sm:$0xff] %v10368_v18  ;;  %1194 = vperm.xlu1 %7498, %v1164_v23   ;;  %v10370_v10 = vpop.xlane.xlu1 %2180  ;;  %1182 = vperm.xlu0 %7497, %v1152_v7   ;;  %v15441_v23 = vld [vmem:[#allocation96_spill] sm:$0xff] }
 0x253   : > { %15436 = vst [vmem:[#allocation381_spill] sm:$0xff] %v10370_v10  ;;  %v2467_v7 = vadd.f32 %v2466_v50, %v15441_v23  ;;  %v15449_v50 = vld [vmem:[#allocation70_spill] sm:$0xff] }
 0x254   : > { %v2448_v9 = vrot.slane %v15449_v50, 4 }
 0x255   : > { %v10377_v24 = vpop.xlane.xlu0 %2176  ;;  %v2468_v3 = vadd.f32 %v2467_v7, %v15445_v5  ;;  %v15454_v5 = vld [vmem:[#allocation124_spill] sm:$0xff] }
 0x256   : > { %15439 = vst [vmem:[#allocation382_spill] sm:$0xff] %v10377_v24  ;;  %2783 = vbcast.lane.b32.xlu1 %v10373_v27, 264  ;;  %v10380_v21 = vpop.xlane.xlu1 %2188  ;;  %1190 = vperm.xlu0 %7497, %v1160_v2   ;;  %v2449_v17 = vadd.f32 %v2448_v9, %v15449_v50  ;;  %v2506_v44 = vadd.f32 %v2505_v14, %v15454_v5  ;;  %v15462_v9 = vld [vmem:[#allocation131_spill] sm:$0xff] }
 0x257   : > { %15440 = vst [vmem:[#allocation383_spill] sm:$0xff] %v10380_v21  ;;  %v2469_v23 = vadd.f32 %v2468_v3, %v15450_v6 }
 0x258   : > { %v2450_v45 = vrot.slane %v2449_v17, 2 }
 0x259   : > { %v10385_v54 = vpop.xlane.xlu0 %2184  ;;  %v2470_v7 = vrot.slane %v2469_v23, 4 }
 0x25a   : > { %15443 = vst [vmem:[#allocation384_spill] sm:$0xff] %v10385_v54  ;;  %2787 = vbcast.lane.b32.xlu1 %v10373_v27, 272  ;;  %v10388_v35 = vpop.xlane.xlu1 %2196  ;;  %1198 = vperm.xlu0 %7497, %v1168_v52   ;;  %v2451_v10 = vadd.f32 %v2450_v45, %v2449_v17  ;;  %v15470_v17 = vld [vmem:[#allocation135_spill] sm:$0xff] }
 0x25b   : > { %15444 = vst [vmem:[#allocation385_spill] sm:$0xff] %v10388_v35  ;;  %v2471_v6 = vadd.f32 %v2470_v7, %v2469_v23  ;;  %v2507_v35 = vadd.f32 %v2506_v44, %v15457_v42  ;;  %v15466_v42 = vld [vmem:[#allocation138_spill] sm:$0xff] }
 0x25d   : > { %v10392_v25 = vpop.xlane.xlu0 %2192  ;;  %v2472_v50 = vrot.slane %v2471_v6, 2  ;;  %v2508_v5 = vadd.f32 %v2507_v35, %v15462_v9  ;;  %v15471_v9 = vld [vmem:[#allocation153_spill] sm:$0xff] }
 0x25e   : > { %15447 = vst [vmem:[#allocation386_spill] sm:$0xff] %v10392_v25  ;;  %2795 = vbcast.lane.b32.xlu1 %v10373_v27, 288  ;;  %v10395_v2 = vpop.xlane.xlu1 %2205  ;;  %2779 = vbcast.lane.b32.xlu0 %v10373_v27, 256 }
 0x25f   : > { %15448 = vst [vmem:[#allocation387_spill] sm:$0xff] %v10395_v2  ;;  %v2473_v7 = vadd.f32 %v2472_v50, %v2471_v6  ;;  %v15474_v50 = vld [vmem:[#allocation142_spill] sm:$0xff] }
 0x261   : > { %v10401_v12 = vpop.xlane.xlu0 %2201  ;;  %v2474_v35 = vrot.slane %v2473_v7, 1 }
 0x262   : > { %15452 = vst [vmem:[#allocation70_spill] sm:$0xff] %v10401_v12  ;;  %2803 = vbcast.lane.b32.xlu1 %v10373_v27, 304  ;;  %v10404_v52 = vpop.xlane.xlu1 %2213  ;;  %2791 = vbcast.lane.b32.xlu0 %v10373_v27, 280  ;;  %v15459_v12 = vld [vmem:[#allocation151_spill] sm:$0xff] }
 0x263   : > { %15453 = vst [vmem:[#allocation103_spill] sm:$0xff] %v10404_v52  ;;  %v15458_v52 = vld [vmem:[#allocation144_spill] sm:$0xff] }
 0x264   : > { %v2542_v21 = vadd.f32 %v15459_v12, %v15458_v52  ;;  %v2509_v12 = vadd.f32 %v2508_v5, %v15466_v42  ;;  %v15467_v52 = vld [vmem:[#allocation155_spill] sm:$0xff] }
 0x265   : > { %v10409_v2 = vpop.xlane.xlu0 %2209 }
 0x266   : > { %15455 = vst [vmem:[#allocation388_spill] sm:$0xff] %v10409_v2  ;;  %2811 = vbcast.lane.b32.xlu1 %v10373_v27, 320  ;;  %v10412_v3 = vpop.xlane.xlu1 %2221  ;;  %2799 = vbcast.lane.b32.xlu0 %v10373_v27, 296  ;;  %v2510_v45 = vadd.f32 %v2509_v12, %v15470_v17 }
 0x267   : > { %15456 = vst [vmem:[#allocation389_spill] sm:$0xff] %v10412_v3  ;;  %v15463_v3 = vld [vmem:[#allocation150_spill] sm:$0xff] }
 0x268   : > { %v2543_v2 = vadd.f32 %v2542_v21, %v15463_v3  ;;  %v2511_v42 = vadd.f32 %v2510_v45, %v15474_v50  ;;  %v15483_v45 = vld [vmem:[#allocation166_spill] sm:$0xff] }
 0x269   : > { %v10418_v25 = vpop.xlane.xlu0 %2217 }
 0x26a   : > { %15460 = vst [vmem:[#allocation390_spill] sm:$0xff] %v10418_v25  ;;  %2819 = vbcast.lane.b32.xlu1 %v10373_v27, 336  ;;  %v10421_v14 = vpop.xlane.xlu1 %2229  ;;  %2807 = vbcast.lane.b32.xlu0 %v10373_v27, 312  ;;  %v2452_v25 = vrot.slane %v2451_v10, 1 }
 0x26b   : > { %15461 = vst [vmem:[#allocation391_spill] sm:$0xff] %v10421_v14  ;;  %v2544_v14 = vadd.f32 %v2543_v2, %v15467_v52  ;;  %v10447_v2 = vadd.f32 %v2474_v35, %v2473_v7  ;;  %v15475_v52 = vld [vmem:[#allocation161_spill] sm:$0xff] }
 0x26d   : > { %v10426_v23 = vpop.xlane.xlu0 %2225  ;;  %v2545_v3 = vadd.f32 %v2544_v14, %v15471_v9  ;;  %v15479_v14 = vld [vmem:[#allocation158_spill] sm:$0xff] }
 0x26e   : > { %15464 = vst [vmem:[#allocation392_spill] sm:$0xff] %v10426_v23  ;;  %2827 = vbcast.lane.b32.xlu1 %v10373_v27, 352  ;;  %v10429_v44 = vpop.xlane.xlu1 %2237  ;;  %2815 = vbcast.lane.b32.xlu0 %v10373_v27, 328 }
 0x26f   : > { %15465 = vst [vmem:[#allocation393_spill] sm:$0xff] %v10429_v44  ;;  %v2453_v44 = vadd.f32 %v2452_v25, %v2451_v10  ;;  %v15478_v10 = vld [vmem:[#allocation140_spill] sm:$0xff] }
 0x270   : > { %v2512_v25 = vadd.f32 %v2511_v42, %v15478_v10 }
 0x271   : > { %v10434_v54 = vpop.xlane.xlu0 %2233 }
 0x272   : > { %15468 = vst [vmem:[#allocation394_spill] sm:$0xff] %v10434_v54  ;;  %2835 = vbcast.lane.b32.xlu1 %v10373_v27, 368  ;;  %v10437_v21 = vpop.xlane.xlu1 %2245  ;;  %2823 = vbcast.lane.b32.xlu0 %v10373_v27, 344 }
 0x273   : > { %15469 = vst [vmem:[#allocation395_spill] sm:$0xff] %v10437_v21  ;;  %v2546_v21 = vadd.f32 %v2545_v3, %v15475_v52  ;;  %v15482_v3 = vld [vmem:[#allocation148_spill] sm:$0xff] }
 0x274   : > { %v2513_v35 = vadd.f32 %v2512_v25, %v15482_v3  ;;  %v15489_v25 = vld [vmem:[#allocation102_spill] sm:$0xff] }
 0x275   : > { %v10442_v6 = vpop.xlane.xlu0 %2241 }
 0x276   : > { %15472 = vst [vmem:[#allocation396_spill] sm:$0xff] %v10442_v6  ;;  %2842 = vbcast.lane.b32.xlu1 %v2453_v44, 256  ;;  %v10444_v5 = vpop.xlane.xlu1 %2253  ;;  %2831 = vbcast.lane.b32.xlu0 %v10373_v27, 360  ;;  %v2547_v44 = vadd.f32 %v2546_v21, %v15479_v14  ;;  %v2514_v42 = vrot.slane %v2513_v35, 4  ;;  %v15486_v21 = vld [vmem:[#allocation165_spill] sm:$0xff] }
 0x277   : > { %15473 = vst [vmem:[#allocation397_spill] sm:$0xff] %v10444_v5 }
 0x278   : > { %v2548_v50 = vadd.f32 %v2547_v44, %v15483_v45  ;;  %v2492_v44 = vrot.slane %v15489_v25, 4  ;;  %v2515_v3 = vadd.f32 %v2514_v42, %v2513_v35  ;;  %v15490_v45 = vld [vmem:[#allocation171_spill] sm:$0xff] }
 0x279   : > { %v10451_v54 = vpop.xlane.xlu0 %2249 }
 0x27a   : > { %15476 = vst [vmem:[#allocation398_spill] sm:$0xff] %v10451_v54  ;;  %2849 = vbcast.lane.b32.xlu1 %v10447_v2, 264  ;;  %v10454_v12 = vpop.xlane.xlu1 %2261  ;;  %2839 = vbcast.lane.b32.xlu0 %v10373_v27, 376  ;;  %v2549_v10 = vadd.f32 %v2548_v50, %v15486_v21  ;;  %v2493_v21 = vadd.f32 %v2492_v44, %v15489_v25  ;;  %v15496_v54 = vld [vmem:[#allocation197_spill] sm:$0xff]  ;;  %v15503_v44 = vld [vmem:[#allocation174_spill] sm:$0xff] }
 0x27b   : > { %15477 = vst [vmem:[#allocation399_spill] sm:$0xff] %v10454_v12  ;;  %v15491_v12 = vld [vmem:[#allocation189_spill] sm:$0xff] }
 0x27c   : > { %v2494_v6 = vrot.slane %v2493_v21, 2 }
 0x27d   : > { %v10459_v17 = vpop.xlane.xlu0 %2257 }
 0x27e   : > { %15480 = vst [vmem:[#allocation400_spill] sm:$0xff] %v10459_v17  ;;  %2857 = vbcast.lane.b32.xlu1 %v10447_v2, 280  ;;  %v10462_v7 = vpop.xlane.xlu1 %2270  ;;  %2845 = vbcast.lane.b32.xlu0 %v10447_v2, 256 }
 0x27f   : > { %15481 = vst [vmem:[#allocation401_spill] sm:$0xff] %v10462_v7  ;;  %v2550_v7 = vadd.f32 %v2549_v10, %v15490_v45 }
 0x281   : > { %v10467_v52 = vpop.xlane.xlu0 %2265 }
 0x282   : > { %15484 = vst [vmem:[#allocation148_spill] sm:$0xff] %v10467_v52  ;;  %2865 = vbcast.lane.b32.xlu1 %v10447_v2, 296  ;;  %v10470_v27 = vpop.xlane.xlu1 %2278  ;;  %2853 = vbcast.lane.b32.xlu0 %v10447_v2, 272 }
 0x283   : > { %15485 = vst [vmem:[#allocation402_spill] sm:$0xff] %v10470_v27  ;;  %v15492_v27 = vld [vmem:[#allocation187_spill] sm:$0xff] }
 0x284   : > { %v2586_v52 = vadd.f32 %v15492_v27, %v15491_v12  ;;  %v15499_v27 = vld [vmem:[#allocation175_spill] sm:$0xff] }
 0x285   : > { %v10474_v14 = vpop.xlane.xlu0 %2274 }
 0x286   : > { %15487 = vst [vmem:[#allocation403_spill] sm:$0xff] %v10474_v14  ;;  %2873 = vbcast.lane.b32.xlu1 %v10447_v2, 312  ;;  %v10477_v9 = vpop.xlane.xlu1 %2286  ;;  %2861 = vbcast.lane.b32.xlu0 %v10447_v2, 288  ;;  %v15495_v14 = vld [vmem:[#allocation169_spill] sm:$0xff]  ;;  %v2587_v35 = vadd.f32 %v2586_v52, %v15496_v54  ;;  %v15504_v54 = vld [vmem:[#allocation202_spill] sm:$0xff] }
 0x287   : > { %15488 = vst [vmem:[#allocation404_spill] sm:$0xff] %v10477_v9  ;;  %v2516_v9 = vrot.slane %v2515_v3, 2  ;;  %v2551_v17 = vadd.f32 %v2550_v7, %v15495_v14 }
 0x289   : > { %v10484_v5 = vpop.xlane.xlu0 %2282  ;;  %v2517_v45 = vadd.f32 %v2516_v9, %v2515_v3  ;;  %v2552_v12 = vadd.f32 %v2551_v17, %v15499_v27 }
 0x28a   : > { %15493 = vst [vmem:[#allocation102_spill] sm:$0xff] %v10484_v5  ;;  %2881 = vbcast.lane.b32.xlu1 %v10447_v2, 328  ;;  %v10487_v50 = vpop.xlane.xlu1 %2294  ;;  %2869 = vbcast.lane.b32.xlu0 %v10447_v2, 304 }
 0x28b   : > { %15494 = vst [vmem:[#allocation405_spill] sm:$0xff] %v10487_v50  ;;  %v15500_v50 = vld [vmem:[#allocation192_spill] sm:$0xff]  ;;  %v2518_v52 = vrot.slane %v2517_v45, 1  ;;  %v2553_v14 = vadd.f32 %v2552_v12, %v15503_v44 }
 0x28c   : > { %v2588_v5 = vadd.f32 %v2587_v35, %v15500_v50  ;;  %v15507_v35 = vld [vmem:[#allocation181_spill] sm:$0xff]  ;;  %v15508_v50 = vld [vmem:[#allocation196_spill] sm:$0xff] }
 0x28d   : > { %v10493_v42 = vpop.xlane.xlu0 %2290  ;;  %v10515_v3 = vadd.f32 %v2518_v52, %v2517_v45  ;;  %v2554_v27 = vadd.f32 %v2553_v14, %v15507_v35  ;;  %v15516_v35 = vld [vmem:[#allocation203_spill] sm:$0xff] }
 0x28e   : > { %15497 = vst [vmem:[#allocation406_spill] sm:$0xff] %v10493_v42  ;;  %2889 = vbcast.lane.b32.xlu1 %v10447_v2, 344  ;;  %v10496_v10 = vpop.xlane.xlu1 %2302  ;;  %2877 = vbcast.lane.b32.xlu0 %v10447_v2, 320  ;;  %v2495_v42 = vadd.f32 %v2494_v6, %v2493_v21  ;;  %v15512_v21 = vld [vmem:[#allocation208_spill] sm:$0xff] }
 0x28f   : > { %15498 = vst [vmem:[#allocation407_spill] sm:$0xff] %v10496_v10  ;;  %v2589_v10 = vadd.f32 %v2588_v5, %v15504_v54  ;;  %v15511_v5 = vld [vmem:[#allocation178_spill] sm:$0xff] }
 0x290   : > { %v2555_v12 = vadd.f32 %v2554_v27, %v15511_v5  ;;  %v15519_v27 = vld [vmem:[#allocation136_spill] sm:$0xff]  ;;  %v15521_v5 = vld [vmem:[#allocation214_spill] sm:$0xff] }
 0x291   : > { %v10501_v25 = vpop.xlane.xlu0 %2298 }
 0x292   : > { %15501 = vst [vmem:[#allocation408_spill] sm:$0xff] %v10501_v25  ;;  %2897 = vbcast.lane.b32.xlu1 %v10447_v2, 360  ;;  %v10504_v7 = vpop.xlane.xlu1 %2310  ;;  %2885 = vbcast.lane.b32.xlu0 %v10447_v2, 336  ;;  %v2496_v25 = vrot.slane %v2495_v42, 1 }
 0x293   : > { %15502 = vst [vmem:[#allocation409_spill] sm:$0xff] %v10504_v7  ;;  %v2590_v7 = vadd.f32 %v2589_v10, %v15508_v50  ;;  %v15515_v10 = vld [vmem:[#allocation185_spill] sm:$0xff] }
 0x294   : > { %v2497_v54 = vadd.f32 %v2496_v25, %v2495_v42  ;;  %v2556_v52 = vadd.f32 %v2555_v12, %v15515_v10  ;;  %v2536_v42 = vrot.slane %v15519_v27, 4  ;;  %v15520_v25 = vld [vmem:[#allocation183_spill] sm:$0xff]  ;;  %v15524_v10 = vld [vmem:[#allocation210_spill] sm:$0xff] }
 0x295   : > { %v10509_v9 = vpop.xlane.xlu0 %2306  ;;  %v2591_v44 = vadd.f32 %v2590_v7, %v15512_v21 }
 0x296   : > { %15505 = vst [vmem:[#allocation410_spill] sm:$0xff] %v10509_v9  ;;  %2905 = vbcast.lane.b32.xlu1 %v10447_v2, 376  ;;  %v10512_v17 = vpop.xlane.xlu1 %2318  ;;  %2893 = vbcast.lane.b32.xlu0 %v10447_v2, 352  ;;  %v2557_v7 = vadd.f32 %v2556_v52, %v15520_v25 }
 0x297   : > { %15506 = vst [vmem:[#allocation411_spill] sm:$0xff] %v10512_v17  ;;  %v2592_v50 = vadd.f32 %v2591_v44, %v15516_v35  ;;  %v2537_v44 = vadd.f32 %v2536_v42, %v15519_v27  ;;  %v15532_v42 = vld [vmem:[#allocation216_spill] sm:$0xff] }
 0x298   : > { %v2558_v12 = vrot.slane %v2557_v7, 4 }
 0x299   : > { %v10519_v23 = vpop.xlane.xlu0 %2314  ;;  %v2593_v21 = vadd.f32 %v2592_v50, %v15521_v5  ;;  %v2538_v50 = vrot.slane %v2537_v44, 2  ;;  %v15527_v5 = vld [vmem:[#allocation220_spill] sm:$0xff] }
 0x29a   : > { %15509 = vst [vmem:[#allocation412_spill] sm:$0xff] %v10519_v23  ;;  %2911 = vbcast.lane.b32.xlu1 %v10515_v3, 256  ;;  %v10522_v6 = vpop.xlane.xlu1 %2326  ;;  %2901 = vbcast.lane.b32.xlu0 %v10447_v2, 368  ;;  %v2559_v25 = vadd.f32 %v2558_v12, %v2557_v7 }
 0x29b   : > { %15510 = vst [vmem:[#allocation413_spill] sm:$0xff] %v10522_v6  ;;  %v2594_v35 = vadd.f32 %v2593_v21, %v15524_v10  ;;  %v15529_v6 = vld [vmem:[#allocation251_spill] sm:$0xff]  ;;  %v2539_v23 = vadd.f32 %v2538_v50, %v2537_v44 }
 0x29c   : > { %v2560_v27 = vrot.slane %v2559_v25, 2  ;;  %v15540_v44 = vld [vmem:[#allocation223_spill] sm:$0xff] }
 0x29d   : > { %v10527_v45 = vpop.xlane.xlu0 %2322 }
 0x29e   : > { %15513 = vst [vmem:[#allocation414_spill] sm:$0xff] %v10527_v45  ;;  %2919 = vbcast.lane.b32.xlu1 %v10515_v3, 272  ;;  %v10530_v14 = vpop.xlane.xlu1 %2334  ;;  %2908 = vbcast.lane.b32.xlu0 %v2497_v54, 256  ;;  %v2561_v12 = vadd.f32 %v2560_v27, %v2559_v25  ;;  %v15544_v27 = vld [vmem:[#allocation234_spill] sm:$0xff] }
 0x29f   : > { %15514 = vst [vmem:[#allocation415_spill] sm:$0xff] %v10530_v14 }
 0x2a1   : > { %v10534_v17 = vpop.xlane.xlu0 %2330 }
 0x2a2   : > { %15517 = vst [vmem:[#allocation416_spill] sm:$0xff] %v10534_v17  ;;  %2927 = vbcast.lane.b32.xlu1 %v10515_v3, 288  ;;  %v10537_v2 = vpop.xlane.xlu1 %2343  ;;  %2915 = vbcast.lane.b32.xlu0 %v10515_v3, 264 }
 0x2a3   : > { %15518 = vst [vmem:[#allocation417_spill] sm:$0xff] %v10537_v2 }
 0x2a5   : > { %v10543_v14 = vpop.xlane.xlu0 %2339 }
 0x2a6   : > { %15522 = vst [vmem:[#allocation136_spill] sm:$0xff] %v10543_v14  ;;  %2935 = vbcast.lane.b32.xlu1 %v10515_v3, 304  ;;  %v10546_v54 = vpop.xlane.xlu1 %2351  ;;  %2923 = vbcast.lane.b32.xlu0 %v10515_v3, 280  ;;  %v2595_v14 = vadd.f32 %v2594_v35, %v15527_v5  ;;  %v15536_v5 = vld [vmem:[#allocation226_spill] sm:$0xff] }
 0x2a7   : > { %15523 = vst [vmem:[#allocation183_spill] sm:$0xff] %v10546_v54  ;;  %v15528_v54 = vld [vmem:[#allocation235_spill] sm:$0xff] }
 0x2a8   : > { %v2630_v17 = vadd.f32 %v15529_v6, %v15528_v54  ;;  %v2596_v10 = vadd.f32 %v2595_v14, %v15532_v42  ;;  %v15537_v54 = vld [vmem:[#allocation22_spill] sm:$0xff]  ;;  %v2562_v14 = vrot.slane %v2561_v12, 1  ;;  %v15541_v42 = vld [vmem:[#allocation252_spill] sm:$0xff] }
 0x2a9   : > { %v10551_v2 = vpop.xlane.xlu0 %2347 }
 0x2aa   : > { %15525 = vst [vmem:[#allocation418_spill] sm:$0xff] %v10551_v2  ;;  %2943 = vbcast.lane.b32.xlu1 %v10515_v3, 320  ;;  %v10554_v52 = vpop.xlane.xlu1 %2359  ;;  %2931 = vbcast.lane.b32.xlu0 %v10515_v3, 296  ;;  %v2597_v6 = vadd.f32 %v2596_v10, %v15536_v5 }
 0x2ab   : > { %15526 = vst [vmem:[#allocation419_spill] sm:$0xff] %v10554_v52  ;;  %v15533_v52 = vld [vmem:[#allocation247_spill] sm:$0xff] }
 0x2ac   : > { %v2631_v2 = vadd.f32 %v2630_v17, %v15533_v52  ;;  %v2598_v50 = vadd.f32 %v2597_v6, %v15540_v44 }
 0x2ad   : > { %v10560_v45 = vpop.xlane.xlu0 %2355 }
 0x2ae   : > { %15530 = vst [vmem:[#allocation420_spill] sm:$0xff] %v10560_v45  ;;  %2951 = vbcast.lane.b32.xlu1 %v10515_v3, 336  ;;  %v10563_v21 = vpop.xlane.xlu1 %2367  ;;  %2939 = vbcast.lane.b32.xlu0 %v10515_v3, 312  ;;  %v2540_v45 = vrot.slane %v2539_v23, 1  ;;  %v2599_v5 = vadd.f32 %v2598_v50, %v15544_v27 }
 0x2af   : > { %15531 = vst [vmem:[#allocation421_spill] sm:$0xff] %v10563_v21  ;;  %v2632_v21 = vadd.f32 %v2631_v2, %v15537_v54  ;;  %v2563_v2 = vadd.f32 %v2562_v14, %v2561_v12  ;;  %v15545_v54 = vld [vmem:[#allocation28_spill] sm:$0xff] }
 0x2b0   : > { %v15552_v14 = vld [vmem:[#allocation244_spill] sm:$0xff] }
 0x2b1   : > { %v10568_v7 = vpop.xlane.xlu0 %2363  ;;  %v2633_v52 = vadd.f32 %v2632_v21, %v15541_v42 }
 0x2b2   : > { %15534 = vst [vmem:[#allocation422_spill] sm:$0xff] %v10568_v7  ;;  %2959 = vbcast.lane.b32.xlu1 %v10515_v3, 352  ;;  %v10571_v35 = vpop.xlane.xlu1 %2375  ;;  %2947 = vbcast.lane.b32.xlu0 %v10515_v3, 328 }
 0x2b3   : > { %15535 = vst [vmem:[#allocation423_spill] sm:$0xff] %v10571_v35  ;;  %v2541_v35 = vadd.f32 %v2540_v45, %v2539_v23  ;;  %v15548_v23 = vld [vmem:[#allocation230_spill] sm:$0xff]  ;;  %v15549_v45 = vld [vmem:[#allocation257_spill] sm:$0xff] }
 0x2b4   : > { %v2600_v6 = vadd.f32 %v2599_v5, %v15548_v23  ;;  %v15558_v23 = vld [vmem:[#allocation170_spill] sm:$0xff] }
 0x2b5   : > { %v10576_v9 = vpop.xlane.xlu0 %2371 }
 0x2b6   : > { %15538 = vst [vmem:[#allocation424_spill] sm:$0xff] %v10576_v9  ;;  %2967 = vbcast.lane.b32.xlu1 %v10515_v3, 368  ;;  %v10579_v17 = vpop.xlane.xlu1 %2383  ;;  %2955 = vbcast.lane.b32.xlu0 %v10515_v3, 344  ;;  %v2601_v50 = vadd.f32 %v2600_v6, %v15552_v14 }
 0x2b7   : > { %15539 = vst [vmem:[#allocation425_spill] sm:$0xff] %v10579_v17  ;;  %v2634_v17 = vadd.f32 %v2633_v52, %v15545_v54  ;;  %v15553_v52 = vld [vmem:[#allocation270_spill] sm:$0xff] }
 0x2b8   : > { %v2602_v54 = vrot.slane %v2601_v50, 4 }
 0x2b9   : > { %v10584_v25 = vpop.xlane.xlu0 %2379  ;;  %v2635_v21 = vadd.f32 %v2634_v17, %v15549_v45  ;;  %v2580_v45 = vrot.slane %v15558_v23, 4 }
 0x2ba   : > { %15542 = vst [vmem:[#allocation426_spill] sm:$0xff] %v10584_v25  ;;  %2974 = vbcast.lane.b32.xlu1 %v2541_v35, 256  ;;  %v10586_v10 = vpop.xlane.xlu1 %2391  ;;  %2963 = vbcast.lane.b32.xlu0 %v10515_v3, 360 }
 0x2bb   : > { %15543 = vst [vmem:[#allocation427_spill] sm:$0xff] %v10586_v10  ;;  %v2636_v27 = vadd.f32 %v2635_v21, %v15553_v52  ;;  %v2674_v21 = vadd.f32 %v9918_v39, %v9945_v16 }
 0x2bd   : > { %v10591_v9 = vpop.xlane.xlu0 %2387 }
 0x2be   : > { %15546 = vst [vmem:[#allocation428_spill] sm:$0xff] %v10591_v9  ;;  %2981 = vbcast.lane.b32.xlu1 %v2563_v2, 264  ;;  %v10593_v7 = vpop.xlane.xlu1 %2399  ;;  %2971 = vbcast.lane.b32.xlu0 %v10515_v3, 376  ;;  %v15555_v3 = vld [vmem:[#allocation263_spill] sm:$0xff] }
 0x2bf   : > { %15547 = vst [vmem:[#allocation429_spill] sm:$0xff] %v10593_v7  ;;  %v2637_v42 = vadd.f32 %v2636_v27, %v15555_v3  ;;  %v15559_v7 = vld [vmem:[#allocation37_spill] sm:$0xff]  ;;  %v2581_v27 = vadd.f32 %v2580_v45, %v15558_v23 }
 0x2c1   : > { %v10600_v12 = vpop.xlane.xlu0 %2395  ;;  %v2638_v6 = vadd.f32 %v2637_v42, %v15559_v7  ;;  %v2582_v39 = vrot.slane %v2581_v27, 2 }
 0x2c2   : > { %2989 = vbcast.lane.b32.xlu1 %v2563_v2, 280  ;;  %v10598_v35 = vpop.xlane.xlu1 %2408  ;;  %2977 = vbcast.lane.b32.xlu0 %v2563_v2, 256  ;;  %15551 = vst [vmem:[#allocation431_spill] sm:$0xff] %v10600_v12 }
 0x2c3   : > { %15550 = vst [vmem:[#allocation430_spill] sm:$0xff] %v10598_v35  ;;  %v2603_v35 = vadd.f32 %v2602_v54, %v2601_v50 }
 0x2c5   : > { %v10607_v5 = vpop.xlane.xlu0 %2403  ;;  %v2604_v3 = vrot.slane %v2603_v35, 2 }
 0x2c6   : > { %2997 = vbcast.lane.b32.xlu1 %v2563_v2, 296  ;;  %v10604_v44 = vpop.permute.xlu1 %1170  ;;  %2985 = vbcast.lane.b32.xlu0 %v2563_v2, 272  ;;  %15556 = vst [vmem:[#allocation432_spill] sm:$0xff] %v10607_v5  ;;  %v2675_v5 = vadd.f32 %v2674_v21, %v9994_v1  ;;  %v2583_v1 = vadd.f32 %v2582_v39, %v2581_v27 }
 0x2c7   : > { %15554 = vst [vmem:[#allocation244_spill] sm:$0xff] %v10604_v44  ;;  %v15562_v44 = vld [vmem:[#allocation271_spill] sm:$0xff]  ;;  %v2605_v42 = vadd.f32 %v2604_v3, %v2603_v35 }
 0x2c8   : > { %v2676_v7 = vadd.f32 %v2675_v5, %v9952_v15 }
 0x2c9   : > { %v2606_v45 = vrot.slane %v2605_v42, 1 }
 0x2ca   : > { %3005 = vbcast.lane.b32.xlu1 %v2563_v2, 312  ;;  %v10609_v17 = vpop.permute.xlu1 %1178  ;;  %2993 = vbcast.lane.b32.xlu0 %v2563_v2, 288 }
 0x2cb   : > { %15557 = vst [vmem:[#allocation433_spill] sm:$0xff] %v10609_v17  ;;  %v2639_v17 = vadd.f32 %v2638_v6, %v15562_v44  ;;  %v15566_v6 = vld [vmem:[#allocation277_spill] sm:$0xff]  ;;  %v2677_v44 = vadd.f32 %v2676_v7, %v10013_v56  ;;  %v10638_v3 = vadd.f32 %v2606_v45, %v2605_v42 }
 0x2cd   : > { %v10615_v14 = vpop.permute.xlu0 %1174  ;;  %v2640_v50 = vadd.f32 %v2639_v17, %v9792_v61  ;;  %v2678_v17 = vadd.f32 %v2677_v44, %v9983_v11  ;;  %v2584_v61 = vrot.slane %v2583_v1, 1  ;;  %v15568_v44 = vld [vmem:[#allocation55_spill] sm:$0xff] }
 0x2ce   : > { %15560 = vst [vmem:[#allocation170_spill] sm:$0xff] %v10615_v14  ;;  %3013 = vbcast.lane.b32.xlu1 %v2563_v2, 328  ;;  %v10617_v52 = vpop.permute.xlu1 %1186  ;;  %3001 = vbcast.lane.b32.xlu0 %v2563_v2, 304 }
 0x2cf   : > { %15561 = vst [vmem:[#allocation434_spill] sm:$0xff] %v10617_v52  ;;  %v2641_v21 = vadd.f32 %v2640_v50, %v15566_v6  ;;  %v2679_v7 = vadd.f32 %v2678_v17, %v10047_v46  ;;  %v2585_v27 = vadd.f32 %v2584_v61, %v2583_v1  ;;  %v15570_v61 = vld [vmem:[#allocation201_spill] sm:$0xff] }
 0x2d0   : > { %v2624_v1 = vrot.slane %v15570_v61, 4 }
 0x2d1   : > { %v10622_v10 = vpop.permute.xlu0 %1182  ;;  %v2642_v5 = vadd.f32 %v2641_v21, %v9867_v31  ;;  %v15569_v21 = vld [vmem:[#allocation316_spill] sm:$0xff] }
 0x2d2   : > { %15563 = vst [vmem:[#allocation435_spill] sm:$0xff] %v10622_v10  ;;  %3021 = vbcast.lane.b32.xlu1 %v2563_v2, 344  ;;  %v10624_v54 = vpop.permute.xlu1 %1194  ;;  %3009 = vbcast.lane.b32.xlu0 %v2563_v2, 320  ;;  %v2680_v31 = vadd.f32 %v2679_v7, %v15569_v21  ;;  %v2625_v21 = vadd.f32 %v2624_v1, %v15570_v61  ;;  %v15574_v1 = vld [vmem:[#allocation38_spill] sm:$0xff] }
 0x2d3   : > { %15564 = vst [vmem:[#allocation436_spill] sm:$0xff] %v10624_v54  ;;  %v2643_v39 = vadd.f32 %v2642_v5, %v9819_v32  ;;  %v15571_v5 = vld [vmem:[#allocation49_spill] sm:$0xff] }
 0x2d4   : > { %v2681_v32 = vadd.f32 %v2680_v31, %v10082_v62 }
 0x2d5   : > { %v10628_v16 = vpop.permute.xlu0 %1190  ;;  %v2644_v45 = vadd.f32 %v2643_v39, %v15568_v44 }
 0x2d6   : > { %15565 = vst [vmem:[#allocation437_spill] sm:$0xff] %v10628_v16  ;;  %3029 = vbcast.lane.b32.xlu1 %v2563_v2, 360  ;;  %v10630_v23 = vpop.permute.xlu1 %2783  ;;  %3017 = vbcast.lane.b32.xlu0 %v2563_v2, 336  ;;  %v2626_v16 = vrot.slane %v2625_v21, 2 }
 0x2d7   : > { %v2645_v17 = vadd.f32 %v2644_v45, %v15571_v5  ;;  %v15573_v5 = vld [vmem:[#allocation264_spill] sm:$0xff] }
 0x2d9   : > { %v10634_v54 = vpop.permute.xlu0 %1198  ;;  %v2646_v7 = vrot.slane %v2645_v17, 4 }
 0x2da   : > { %15567 = vst [vmem:[#allocation438_spill] sm:$0xff] %v10634_v54  ;;  %3037 = vbcast.lane.b32.xlu1 %v2563_v2, 376  ;;  %v10636_v35 = vpop.permute.xlu1 %2787  ;;  %3025 = vbcast.lane.b32.xlu0 %v2563_v2, 352  ;;  %v2718_v54 = vadd.f32 %v10184_v40, %v10152_v34 }
 0x2db   : > { %v2647_v31 = vadd.f32 %v2646_v7, %v2645_v17  ;;  %v2627_v17 = vadd.f32 %v2626_v16, %v2625_v21 }
 0x2dc   : > { %v2719_v10 = vadd.f32 %v2718_v54, %v10177_v57 }
 0x2dd   : > { %v10642_v15 = vpop.permute.xlu0 %2779  ;;  %v2648_v61 = vrot.slane %v2647_v31, 2  ;;  %v2628_v14 = vrot.slane %v2627_v17, 1 }
 0x2de   : > { %3043 = vbcast.lane.b32.xlu1 %v10638_v3, 256  ;;  %v10645_v50 = vpop.permute.xlu1 %2795  ;;  %3033 = vbcast.lane.b32.xlu0 %v2563_v2, 368  ;;  %v2720_v34 = vadd.f32 %v2719_v10, %v10201_v55 }
 0x2e0   : > { %v2721_v21 = vadd.f32 %v2720_v34, %v10189_v26 }
 0x2e1   : > { %v10649_v6 = vpop.permute.xlu0 %2791 }
 0x2e2   : > { %3051 = vbcast.lane.b32.xlu1 %v10638_v3, 272  ;;  %v10652_v42 = vpop.permute.xlu1 %2803  ;;  %3040 = vbcast.lane.b32.xlu0 %v2585_v27, 256  ;;  %v15572_v27 = vld [vmem:[#allocation322_spill] sm:$0xff] }
 0x2e3   : > { %v2682_v44 = vadd.f32 %v2681_v32, %v15572_v27 }
 0x2e5   : > { %v10656_v11 = vpop.permute.xlu0 %2799  ;;  %v2683_v62 = vadd.f32 %v2682_v44, %v15573_v5  ;;  %v2649_v5 = vadd.f32 %v2648_v61, %v2647_v31 }
 0x2e6   : > { %3059 = vbcast.lane.b32.xlu1 %v10638_v3, 288  ;;  %v10659_v2 = vpop.permute.xlu1 %2811  ;;  %3047 = vbcast.lane.b32.xlu0 %v10638_v3, 264 }
 0x2e7   : > { %v2684_v27 = vadd.f32 %v2683_v62, %v15574_v1  ;;  %v2650_v16 = vrot.slane %v2649_v5, 1  ;;  %v2629_v1 = vadd.f32 %v2628_v14, %v2627_v17 }
 0x2e9   : > { %v10665_v46 = vpop.permute.xlu0 %2807  ;;  %v2685_v40 = vadd.f32 %v2684_v27, %v10129_v20  ;;  %v2651_v10 = vadd.f32 %v2650_v16, %v2649_v5  ;;  %v2722_v20 = vadd.f32 %v2721_v21, %v10218_v19 }
 0x2ea   : > { %3067 = vbcast.lane.b32.xlu1 %v10638_v3, 304  ;;  %v10668_v39 = vpop.permute.xlu1 %2819  ;;  %3055 = vbcast.lane.b32.xlu0 %v10638_v3, 280 }
 0x2eb   : > { %v2686_v54 = vadd.f32 %v2685_v40, %v10117_v30  ;;  %v2723_v40 = vadd.f32 %v2722_v20, %v10206_v22 }
 0x2ed   : > { %v10673_v56 = vpop.permute.xlu0 %2815  ;;  %v2687_v61 = vadd.f32 %v2686_v54, %v10147_v49  ;;  %v2724_v17 = vadd.f32 %v2723_v40, %v10235_v37 }
 0x2ee   : > { %3075 = vbcast.lane.b32.xlu1 %v10638_v3, 320  ;;  %v10676_v45 = vpop.permute.xlu1 %2827  ;;  %3063 = vbcast.lane.b32.xlu0 %v10638_v3, 296 }
 0x2ef   : > { %v2688_v34 = vadd.f32 %v2687_v61, %v10134_v0  ;;  %v2725_v21 = vadd.f32 %v2724_v17, %v10223_v29 }
 0x2f1   : > { %v10682_v52 = vpop.permute.xlu0 %2823  ;;  %v2689_v5 = vadd.f32 %v2688_v34, %v10169_v13  ;;  %v2726_v13 = vadd.f32 %v2725_v21, %v10254_v59  ;;  %v15575_v34 = vld [vmem:[#allocation248_spill] sm:$0xff] }
 0x2f2   : > { %3083 = vbcast.lane.b32.xlu1 %v10638_v3, 336  ;;  %v10685_v32 = vpop.permute.xlu1 %2835  ;;  %3071 = vbcast.lane.b32.xlu0 %v10638_v3, 312  ;;  %v2668_v40 = vrot.slane %v15575_v34, 4 }
 0x2f3   : > { %v2727_v17 = vadd.f32 %v2726_v13, %v10240_v47 }
 0x2f4   : > { %v2669_v29 = vadd.f32 %v2668_v40, %v15575_v34 }
 0x2f5   : > { %v10690_v7 = vpop.permute.xlu0 %2831 }
 0x2f6   : > { %3091 = vbcast.lane.b32.xlu1 %v10638_v3, 352  ;;  %v10693_v44 = vpop.permute.xlu1 %2842  ;;  %3079 = vbcast.lane.b32.xlu0 %v10638_v3, 328  ;;  %v2670_v21 = vrot.slane %v2669_v29, 2 }
 0x2f8   : > { %v2671_v34 = vadd.f32 %v2670_v21, %v2669_v29 }
 0x2f9   : > { %v10698_v12 = vpop.permute.xlu0 %2839 }
 0x2fa   : > { %3099 = vbcast.lane.b32.xlu1 %v10638_v3, 368  ;;  %v10701_v62 = vpop.permute.xlu1 %2849  ;;  %3087 = vbcast.lane.b32.xlu0 %v10638_v3, 344 }
 0x2fd   : > { %v10706_v31 = vpop.permute.xlu0 %2845 }
 0x2fe   : > { %3106 = vbcast.lane.b32.xlu1 %v2629_v1, 256  ;;  %v10708_v27 = vpop.permute.xlu1 %2857  ;;  %3095 = vbcast.lane.b32.xlu0 %v10638_v3, 360 }
 0x301   : > { %v10713_v55 = vpop.permute.xlu0 %2853 }
 0x302   : > { %3113 = vbcast.lane.b32.xlu1 %v2651_v10, 264  ;;  %v10715_v57 = vpop.permute.xlu1 %2865  ;;  %3103 = vbcast.lane.b32.xlu0 %v10638_v3, 376  ;;  %v2690_v3 = vrot.slane %v2689_v5, 4 }
 0x304   : > { %v2691_v0 = vadd.f32 %v2690_v3, %v2689_v5  ;;  %v2728_v3 = vadd.f32 %v2727_v17, %v10273_v58  ;;  %v2672_v17 = vrot.slane %v2671_v34, 1 }
 0x305   : > { %v10720_v14 = vpop.permute.xlu0 %2861 }
 0x306   : > { %3121 = vbcast.lane.b32.xlu1 %v2651_v10, 280  ;;  %v10722_v1 = vpop.permute.xlu1 %2873  ;;  %3109 = vbcast.lane.b32.xlu0 %v2651_v10, 256  ;;  %v2692_v37 = vrot.slane %v2691_v0, 2  ;;  %v2729_v13 = vadd.f32 %v2728_v3, %v10259_v43  ;;  %v2673_v3 = vadd.f32 %v2672_v17, %v2671_v34 }
 0x308   : > { %v2693_v5 = vadd.f32 %v2692_v37, %v2691_v0  ;;  %v2730_v37 = vadd.f32 %v2729_v13, %v10293_v36  ;;  %v15576_v36 = vld [vmem:[#allocation293_spill] sm:$0xff] }
 0x309   : > { %v10726_v16 = vpop.permute.xlu0 %2869  ;;  %v2712_v43 = vrot.slane %v15576_v36, 4 }
 0x30a   : > { %3129 = vbcast.lane.b32.xlu1 %v2651_v10, 296  ;;  %v10728_v54 = vpop.permute.xlu1 %2881  ;;  %3117 = vbcast.lane.b32.xlu0 %v2651_v10, 272  ;;  %v2694_v9 = vrot.slane %v2693_v5, 1  ;;  %v2731_v51 = vadd.f32 %v2730_v37, %v10278_v33 }
 0x30c   : > { %v2695_v0 = vadd.f32 %v2694_v9, %v2693_v5  ;;  %v2732_v9 = vadd.f32 %v2731_v51, %v10311_v8 }
 0x30d   : > { %v10731_v20 = vpop.permute.xlu0 %2877 }
 0x30e   : > { %3137 = vbcast.lane.b32.xlu1 %v2651_v10, 312  ;;  %v10733_v61 = vpop.permute.xlu1 %2889  ;;  %3125 = vbcast.lane.b32.xlu0 %v2651_v10, 288 }
 0x311   : > { %v10737_v49 = vpop.permute.xlu0 %2885 }
 0x312   : > { %3145 = vbcast.lane.b32.xlu1 %v2651_v10, 328  ;;  %v10739_v30 = vpop.permute.xlu1 %2897  ;;  %3133 = vbcast.lane.b32.xlu0 %v2651_v10, 304 }
 0x315   : > { %v10743_v22 = vpop.permute.xlu0 %2893 }
 0x316   : > { %3153 = vbcast.lane.b32.xlu1 %v2651_v10, 344  ;;  %v10745_v19 = vpop.permute.xlu1 %2905  ;;  %3141 = vbcast.lane.b32.xlu0 %v2651_v10, 320 }
 0x319   : > { %v10748_v59 = vpop.permute.xlu0 %2901 }
 0x31a   : > { %3161 = vbcast.lane.b32.xlu1 %v2651_v10, 360  ;;  %v10750_v26 = vpop.permute.xlu1 %2911  ;;  %3149 = vbcast.lane.b32.xlu0 %v2651_v10, 336 }
 0x31d   : > { %v10753_v40 = vpop.permute.xlu0 %2908 }
 0x31e   : > { %3169 = vbcast.lane.b32.xlu1 %v2651_v10, 376  ;;  %v10755_v47 = vpop.permute.xlu1 %2919  ;;  %3157 = vbcast.lane.b32.xlu0 %v2651_v10, 352 }
 0x321   : > { %v10758_v58 = vpop.permute.xlu0 %2915 }
 0x322   : > { %3175 = vbcast.lane.b32.xlu1 %v2695_v0, 256  ;;  %v10760_v25 = vpop.permute.xlu1 %2927  ;;  %3165 = vbcast.lane.b32.xlu0 %v2651_v10, 368  ;;  %v2733_v10 = vadd.f32 %v2732_v9, %v10302_v28 }
 0x324   : > { %v2734_v17 = vrot.slane %v2733_v10, 4 }
 0x325   : > { %v10763_v29 = vpop.permute.xlu0 %2923 }
 0x326   : > { %3183 = vbcast.lane.b32.xlu1 %v2695_v0, 272  ;;  %v10765_v21 = vpop.permute.xlu1 %2935  ;;  %3172 = vbcast.lane.b32.xlu0 %v2673_v3, 256  ;;  %v2713_v3 = vadd.f32 %v2712_v43, %v15576_v36  ;;  %v2735_v33 = vadd.f32 %v2734_v17, %v2733_v10 }
 0x328   : > { %v2714_v24 = vrot.slane %v2713_v3, 2  ;;  %v2736_v9 = vrot.slane %v2735_v33, 2 }
 0x329   : > { %v10768_v5 = vpop.permute.xlu0 %2931 }
 0x32a   : > { %3191 = vbcast.lane.b32.xlu1 %v2695_v0, 288  ;;  %v10770_v13 = vpop.permute.xlu1 %2943  ;;  %3179 = vbcast.lane.b32.xlu0 %v2695_v0, 264  ;;  %v2715_v60 = vadd.f32 %v2714_v24, %v2713_v3  ;;  %v2737_v36 = vadd.f32 %v2736_v9, %v2735_v33 }
 0x32c   : > { %v2716_v63 = vrot.slane %v2715_v60, 1  ;;  %v2738_v17 = vrot.slane %v2737_v36, 1 }
 0x32d   : > { %v10774_v37 = vpop.permute.xlu0 %2939 }
 0x32e   : > { %3199 = vbcast.lane.b32.xlu1 %v2695_v0, 304  ;;  %v10776_v34 = vpop.permute.xlu1 %2951  ;;  %3187 = vbcast.lane.b32.xlu0 %v2695_v0, 280  ;;  %v2717_v53 = vadd.f32 %v2716_v63, %v2715_v60  ;;  %v2739_v3 = vadd.f32 %v2738_v17, %v2737_v36  ;;  %v15589_v17 = vld [vmem:[#allocation45_spill] sm:$0xff] }
 0x331   : > { %v10779_v51 = vpop.permute.xlu0 %2947 }
 0x332   : > { %3207 = vbcast.lane.b32.xlu1 %v2695_v0, 320  ;;  %v10781_v8 = vpop.permute.xlu1 %2959  ;;  %3195 = vbcast.lane.b32.xlu0 %v2695_v0, 296 }
 0x335   : > { %v10783_v18 = vpop.permute.xlu0 %2955 }
 0x336   : > { %3215 = vbcast.lane.b32.xlu1 %v2695_v0, 336  ;;  %v10785_v28 = vpop.permute.xlu1 %2967  ;;  %3203 = vbcast.lane.b32.xlu0 %v2695_v0, 312 }
 0x337   : > { %15577 = vst [vmem:[#allocation201_spill] sm:$0xff] %v10785_v28 }
 0x339   : > { %v10787_v38 = vpop.permute.xlu0 %2963 }
 0x33a   : > { %15578 = vst [vmem:[#allocation49_spill] sm:$0xff] %v10787_v38  ;;  %3223 = vbcast.lane.b32.xlu1 %v2695_v0, 352  ;;  %v10789_v43 = vpop.permute.xlu1 %2974  ;;  %3211 = vbcast.lane.b32.xlu0 %v2695_v0, 328 }
 0x33d   : > { %v10791_v41 = vpop.permute.xlu0 %2971 }
 0x33e   : > { %3231 = vbcast.lane.b32.xlu1 %v2695_v0, 368  ;;  %v10793_v10 = vpop.permute.xlu1 %2981  ;;  %3219 = vbcast.lane.b32.xlu0 %v2695_v0, 344 }
 0x33f   : > { %15579 = vst [vmem:[#allocation248_spill] sm:$0xff] %v10793_v10 }
 0x341   : > { %v10795_v28 = vpop.permute.xlu0 %2977 }
 0x342   : > { %3238 = vbcast.lane.b32.xlu1 %v2717_v53, 256  ;;  %v10797_v24 = vpop.permute.xlu1 %2989  ;;  %3227 = vbcast.lane.b32.xlu0 %v2695_v0, 360 }
 0x343   : > { %15580 = vst [vmem:[#allocation293_spill] sm:$0xff] %v10797_v24 }
 0x345   : > { %v10799_v38 = vpop.permute.xlu0 %2985 }
 0x346   : > { %15581 = vst [vmem:[#allocation439_spill] sm:$0xff] %v10799_v38  ;;  %3245 = vbcast.lane.b32.xlu1 %v2739_v3, 264  ;;  %v10801_v33 = vpop.permute.xlu1 %2997  ;;  %3235 = vbcast.lane.b32.xlu0 %v2695_v0, 376  ;;  %v2756_v0 = vrot.slane %v15589_v17, 4 }
 0x347   : > { %15582 = vst [vmem:[#allocation440_spill] sm:$0xff] %v10801_v33 }
 0x349   : > { %v10803_v9 = vpop.permute.xlu0 %2993 }
 0x34a   : > { %15583 = vst [vmem:[#allocation441_spill] sm:$0xff] %v10803_v9  ;;  %3253 = vbcast.lane.b32.xlu1 %v2739_v3, 280  ;;  %v10805_v10 = vpop.permute.xlu1 %3005  ;;  %3241 = vbcast.lane.b32.xlu0 %v2739_v3, 256 }
 0x34b   : > { %15584 = vst [vmem:[#allocation442_spill] sm:$0xff] %v10805_v10 }
 0x34d   : > { %v10807_v63 = vpop.permute.xlu0 %3001 }
 0x34e   : > { %15585 = vst [vmem:[#allocation443_spill] sm:$0xff] %v10807_v63  ;;  %3261 = vbcast.lane.b32.xlu1 %v2739_v3, 296  ;;  %v10809_v53 = vpop.permute.xlu1 %3013  ;;  %3249 = vbcast.lane.b32.xlu0 %v2739_v3, 272  ;;  %v2757_v63 = vadd.f32 %v2756_v0, %v15589_v17  ;;  %v15598_v17 = vld [vmem:[#allocation200_spill] sm:$0xff] }
 0x34f   : > { %15586 = vst [vmem:[#allocation444_spill] sm:$0xff] %v10809_v53  ;;  %v10835_v0 = vadd.f32 %v10642_v15, %v15598_v17  ;;  %v15603_v15 = vld [vmem:[#allocation206_spill] sm:$0xff] }
 0x350   : > { %v10853_v17 = vadd.f32 %v10630_v23, %v15603_v15 }
 0x351   : > { %v10811_v60 = vpop.permute.xlu0 %3009  ;;  %15599 = vst [vmem:[#allocation200_spill] sm:$0xff] %v10835_v0 }
 0x352   : > { %15587 = vst [vmem:[#allocation445_spill] sm:$0xff] %v10811_v60  ;;  %3269 = vbcast.lane.b32.xlu1 %v2739_v3, 312  ;;  %v10813_v36 = vpop.permute.xlu1 %3021  ;;  %3257 = vbcast.lane.b32.xlu0 %v2739_v3, 288  ;;  %v2758_v60 = vrot.slane %v2757_v63, 2  ;;  %15604 = vst [vmem:[#allocation206_spill] sm:$0xff] %v10853_v17 }
 0x353   : > { %15588 = vst [vmem:[#allocation446_spill] sm:$0xff] %v10813_v36 }
 0x355   : > { %v10816_v33 = vpop.permute.xlu0 %3017 }
 0x356   : > { %15590 = vst [vmem:[#allocation45_spill] sm:$0xff] %v10816_v33  ;;  %3277 = vbcast.lane.b32.xlu1 %v2739_v3, 328  ;;  %v10818_v9 = vpop.permute.xlu1 %3029  ;;  %3265 = vbcast.lane.b32.xlu0 %v2739_v3, 304  ;;  %v2759_v33 = vadd.f32 %v2758_v60, %v2757_v63 }
 0x357   : > { %15591 = vst [vmem:[#allocation447_spill] sm:$0xff] %v10818_v9 }
 0x359   : > { %v10821_v10 = vpop.permute.xlu0 %3025 }
 0x35a   : > { %15592 = vst [vmem:[#allocation448_spill] sm:$0xff] %v10821_v10  ;;  %3285 = vbcast.lane.b32.xlu1 %v2739_v3, 344  ;;  %v10823_v53 = vpop.permute.xlu1 %3037  ;;  %3273 = vbcast.lane.b32.xlu0 %v2739_v3, 320 }
 0x35b   : > { %15593 = vst [vmem:[#allocation449_spill] sm:$0xff] %v10823_v53  ;;  %v2760_v53 = vrot.slane %v2759_v33, 1 }
 0x35d   : > { %v10825_v38 = vpop.permute.xlu0 %3033  ;;  %v2761_v60 = vadd.f32 %v2760_v53, %v2759_v33  ;;  %v15607_v33 = vld [vmem:[#allocation207_spill] sm:$0xff] }
 0x35e   : > { %15594 = vst [vmem:[#allocation450_spill] sm:$0xff] %v10825_v38  ;;  %3293 = vbcast.lane.b32.xlu1 %v2739_v3, 360  ;;  %v10827_v36 = vpop.permute.xlu1 %3043  ;;  %3281 = vbcast.lane.b32.xlu0 %v2739_v3, 336  ;;  %v10867_v53 = vadd.f32 %v10649_v6, %v15607_v33 }
 0x35f   : > { %15595 = vst [vmem:[#allocation451_spill] sm:$0xff] %v10827_v36  ;;  %v15601_v36 = vld [vmem:[#allocation212_spill] sm:$0xff] }
 0x360   : > { %v10844_v63 = vadd.f32 %v10636_v35, %v15601_v36  ;;  %15608 = vst [vmem:[#allocation207_spill] sm:$0xff] %v10867_v53  ;;  %v15609_v36 = vld [vmem:[#allocation225_spill] sm:$0xff] }
 0x361   : > { %v10829_v24 = vpop.permute.xlu0 %3040  ;;  %v10871_v23 = vadd.f32 %v10652_v42, %v15609_v36  ;;  %v15615_v36 = vld [vmem:[#allocation219_spill] sm:$0xff] }
 0x362   : > { %15596 = vst [vmem:[#allocation452_spill] sm:$0xff] %v10829_v24  ;;  %3301 = vbcast.lane.b32.xlu1 %v2739_v3, 376  ;;  %v10831_v9 = vpop.permute.xlu1 %3051  ;;  %3289 = vbcast.lane.b32.xlu0 %v2739_v3, 352  ;;  %15602 = vst [vmem:[#allocation212_spill] sm:$0xff] %v10844_v63 }
 0x363   : > { %15597 = vst [vmem:[#allocation453_spill] sm:$0xff] %v10831_v9  ;;  %15610 = vst [vmem:[#allocation225_spill] sm:$0xff] %v10871_v23 }
 0x365   : > { %v10837_v10 = vpop.permute.xlu0 %3047 }
 0x366   : > { %3715 = vperm.xlu1 %7498, %v10835_v0   ;;  %v10840_v38 = vpop.permute.xlu1 %3059  ;;  %3297 = vbcast.lane.b32.xlu0 %v2739_v3, 368  ;;  %v15605_v0 = vld [vmem:[#allocation218_spill] sm:$0xff] }
 0x367   : > { %15600 = vst [vmem:[#allocation454_spill] sm:$0xff] %v10840_v38  ;;  %v10857_v38 = vadd.f32 %v10645_v50, %v15605_v0  ;;  %v15611_v0 = vld [vmem:[#allocation213_spill] sm:$0xff] }
 0x368   : > { %v10881_v15 = vadd.f32 %v10656_v11, %v15611_v0 }
 0x369   : > { %v10846_v24 = vpop.permute.xlu0 %3055  ;;  %15606 = vst [vmem:[#allocation218_spill] sm:$0xff] %v10857_v38 }
 0x36a   : > { %3721 = vperm.xlu1 %7498, %v10844_v63   ;;  %v10849_v9 = vpop.permute.xlu1 %3067  ;;  %3304 = vbcast.lane.b32.xlu0 %v2761_v60, 256  ;;  %15612 = vst [vmem:[#allocation213_spill] sm:$0xff] %v10881_v15 }
 0x36d   : > { %v10859_v3 = vpop.permute.xlu0 %3063 }
 0x36e   : > { %3727 = vperm.xlu1 %7498, %v10857_v38   ;;  %v10862_v35 = vpop.permute.xlu1 %3075  ;;  %3718 = vperm.xlu0 %7497, %v10853_v17   ;;  %v15613_v38 = vld [vmem:[#allocation233_spill] sm:$0xff]  ;;  %v15637_v17 = vld [vmem:[#allocation274_spill] sm:$0xff] }
 0x36f   : > { %v10885_v6 = vadd.f32 %v10659_v2, %v15613_v38  ;;  %v15619_v2 = vld [vmem:[#allocation227_spill] sm:$0xff] }
 0x370   : > { %v10909_v63 = vadd.f32 %v10673_v56, %v15619_v2 }
 0x371   : > { %v10873_v60 = vpop.permute.xlu0 %3071  ;;  %15614 = vst [vmem:[#allocation233_spill] sm:$0xff] %v10885_v6 }
 0x372   : > { %3733 = vperm.xlu1 %7498, %v10871_v23   ;;  %v10876_v50 = vpop.permute.xlu1 %3083  ;;  %3724 = vperm.xlu0 %7497, %v10867_v53   ;;  %v10895_v23 = vadd.f32 %v10665_v46, %v15615_v36  ;;  %v15617_v53 = vld [vmem:[#allocation242_spill] sm:$0xff]  ;;  %15620 = vst [vmem:[#allocation227_spill] sm:$0xff] %v10909_v63 }
 0x373   : > { %v10899_v11 = vadd.f32 %v10668_v39, %v15617_v53  ;;  %v15623_v53 = vld [vmem:[#allocation236_spill] sm:$0xff] }
 0x374   : > { %15616 = vst [vmem:[#allocation219_spill] sm:$0xff] %v10895_v23 }
 0x375   : > { %v10887_v33 = vpop.permute.xlu0 %3079  ;;  %15618 = vst [vmem:[#allocation242_spill] sm:$0xff] %v10899_v11 }
 0x376   : > { %3739 = vperm.xlu1 %7498, %v10885_v6   ;;  %v10890_v42 = vpop.permute.xlu1 %3091  ;;  %3730 = vperm.xlu0 %7497, %v10881_v15   ;;  %v15621_v15 = vld [vmem:[#allocation246_spill] sm:$0xff]  ;;  %v15709_v6 = vld [vmem:[#allocation293_spill] sm:$0xff] }
 0x377   : > { %v10913_v46 = vadd.f32 %v10676_v45, %v15621_v15  ;;  %v15627_v15 = vld [vmem:[#allocation243_spill] sm:$0xff] }
 0x379   : > { %v10901_v0 = vpop.permute.xlu0 %3087  ;;  %15622 = vst [vmem:[#allocation246_spill] sm:$0xff] %v10913_v46 }
 0x37a   : > { %3745 = vperm.xlu1 %7498, %v10899_v11   ;;  %v10904_v38 = vpop.permute.xlu1 %3099  ;;  %3736 = vperm.xlu0 %7497, %v10895_v23   ;;  %v10923_v11 = vadd.f32 %v10682_v52, %v15623_v53  ;;  %v15625_v23 = vld [vmem:[#allocation254_spill] sm:$0xff] }
 0x37b   : > { %v10927_v56 = vadd.f32 %v10685_v32, %v15625_v23  ;;  %v15631_v23 = vld [vmem:[#allocation250_spill] sm:$0xff] }
 0x37c   : > { %15624 = vst [vmem:[#allocation236_spill] sm:$0xff] %v10923_v11 }
 0x37d   : > { %v10915_v36 = vpop.permute.xlu0 %3095  ;;  %15626 = vst [vmem:[#allocation254_spill] sm:$0xff] %v10927_v56 }
 0x37e   : > { %3751 = vperm.xlu1 %7498, %v10913_v46   ;;  %v10918_v39 = vpop.permute.xlu1 %3106  ;;  %3742 = vperm.xlu0 %7497, %v10909_v63   ;;  %v10937_v46 = vadd.f32 %v10690_v7, %v15627_v15  ;;  %v15629_v63 = vld [vmem:[#allocation260_spill] sm:$0xff] }
 0x37f   : > { %v10941_v52 = vadd.f32 %v10693_v44, %v15629_v63  ;;  %v15635_v63 = vld [vmem:[#allocation256_spill] sm:$0xff] }
 0x380   : > { %15628 = vst [vmem:[#allocation243_spill] sm:$0xff] %v10937_v46 }
 0x381   : > { %v10929_v2 = vpop.permute.xlu0 %3103  ;;  %15630 = vst [vmem:[#allocation260_spill] sm:$0xff] %v10941_v52 }
 0x382   : > { %3757 = vperm.xlu1 %7498, %v10927_v56   ;;  %v10932_v45 = vpop.permute.xlu1 %3113  ;;  %3748 = vperm.xlu0 %7497, %v10923_v11   ;;  %v10951_v56 = vadd.f32 %v10698_v12, %v15631_v23  ;;  %v15633_v11 = vld [vmem:[#allocation266_spill] sm:$0xff]  ;;  %v10969_v12 = vadd.f32 %v10708_v27, %v15637_v17  ;;  %v15643_v17 = vld [vmem:[#allocation269_spill] sm:$0xff] }
 0x383   : > { %v10955_v7 = vadd.f32 %v10701_v62, %v15633_v11  ;;  %v15639_v11 = vld [vmem:[#allocation262_spill] sm:$0xff] }
 0x384   : > { %15632 = vst [vmem:[#allocation250_spill] sm:$0xff] %v10951_v56  ;;  %15638 = vst [vmem:[#allocation274_spill] sm:$0xff] %v10969_v12 }
 0x385   : > { %v10943_v53 = vpop.permute.xlu0 %3109  ;;  %15634 = vst [vmem:[#allocation266_spill] sm:$0xff] %v10955_v7 }
 0x386   : > { %3763 = vperm.xlu1 %7498, %v10941_v52   ;;  %v10946_v32 = vpop.permute.xlu1 %3121  ;;  %3754 = vperm.xlu0 %7497, %v10937_v46   ;;  %v10965_v52 = vadd.f32 %v10706_v31, %v15635_v63  ;;  %v15702_v46 = vld [vmem:[#allocation248_spill] sm:$0xff] }
 0x388   : > { %15636 = vst [vmem:[#allocation256_spill] sm:$0xff] %v10965_v52 }
 0x389   : > { %v10957_v15 = vpop.permute.xlu0 %3117 }
 0x38a   : > { %3769 = vperm.xlu1 %7498, %v10955_v7   ;;  %v10960_v44 = vpop.permute.xlu1 %3129  ;;  %3760 = vperm.xlu0 %7497, %v10951_v56   ;;  %v10979_v7 = vadd.f32 %v10713_v55, %v15639_v11  ;;  %v15641_v56 = vld [vmem:[#allocation282_spill] sm:$0xff] }
 0x38b   : > { %v10983_v31 = vadd.f32 %v10715_v57, %v15641_v56  ;;  %v15647_v56 = vld [vmem:[#allocation276_spill] sm:$0xff] }
 0x38c   : > { %15640 = vst [vmem:[#allocation262_spill] sm:$0xff] %v10979_v7 }
 0x38d   : > { %v10971_v23 = vpop.permute.xlu0 %3125  ;;  %15642 = vst [vmem:[#allocation282_spill] sm:$0xff] %v10983_v31 }
 0x38e   : > { %3775 = vperm.xlu1 %7498, %v10969_v12   ;;  %v10974_v62 = vpop.permute.xlu1 %3137  ;;  %3766 = vperm.xlu0 %7497, %v10965_v52   ;;  %v10993_v12 = vadd.f32 %v10720_v14, %v15643_v17  ;;  %v15645_v52 = vld [vmem:[#allocation289_spill] sm:$0xff] }
 0x38f   : > { %v10997_v55 = vadd.f32 %v10722_v1, %v15645_v52  ;;  %v15651_v52 = vld [vmem:[#allocation284_spill] sm:$0xff] }
 0x390   : > { %15644 = vst [vmem:[#allocation269_spill] sm:$0xff] %v10993_v12 }
 0x391   : > { %v10985_v63 = vpop.permute.xlu0 %3133  ;;  %15646 = vst [vmem:[#allocation289_spill] sm:$0xff] %v10997_v55 }
 0x392   : > { %3781 = vperm.xlu1 %7498, %v10983_v31   ;;  %v10988_v27 = vpop.permute.xlu1 %3145  ;;  %3772 = vperm.xlu0 %7497, %v10979_v7   ;;  %v11007_v31 = vadd.f32 %v10726_v16, %v15647_v56  ;;  %v15649_v7 = vld [vmem:[#allocation294_spill] sm:$0xff] }
 0x393   : > { %v11011_v14 = vadd.f32 %v10728_v54, %v15649_v7  ;;  %v15655_v7 = vld [vmem:[#allocation292_spill] sm:$0xff] }
 0x394   : > { %15648 = vst [vmem:[#allocation276_spill] sm:$0xff] %v11007_v31 }
 0x395   : > { %v10999_v11 = vpop.permute.xlu0 %3141  ;;  %15650 = vst [vmem:[#allocation294_spill] sm:$0xff] %v11011_v14 }
 0x396   : > { %3787 = vperm.xlu1 %7498, %v10997_v55   ;;  %v11002_v57 = vpop.permute.xlu1 %3153  ;;  %3778 = vperm.xlu0 %7497, %v10993_v12   ;;  %v11021_v55 = vadd.f32 %v10731_v20, %v15651_v52  ;;  %v15653_v12 = vld [vmem:[#allocation299_spill] sm:$0xff] }
 0x397   : > { %v11025_v16 = vadd.f32 %v10733_v61, %v15653_v12  ;;  %v15659_v12 = vld [vmem:[#allocation297_spill] sm:$0xff] }
 0x398   : > { %15652 = vst [vmem:[#allocation284_spill] sm:$0xff] %v11021_v55 }
 0x399   : > { %v11013_v17 = vpop.permute.xlu0 %3149  ;;  %15654 = vst [vmem:[#allocation299_spill] sm:$0xff] %v11025_v16 }
 0x39a   : > { %3793 = vperm.xlu1 %7498, %v11011_v14   ;;  %v11016_v1 = vpop.permute.xlu1 %3161  ;;  %3784 = vperm.xlu0 %7497, %v11007_v31   ;;  %v11035_v14 = vadd.f32 %v10737_v49, %v15655_v7  ;;  %v15657_v31 = vld [vmem:[#allocation306_spill] sm:$0xff] }
 0x39b   : > { %v11039_v20 = vadd.f32 %v10739_v30, %v15657_v31  ;;  %v15663_v31 = vld [vmem:[#allocation302_spill] sm:$0xff] }
 0x39c   : > { %15656 = vst [vmem:[#allocation292_spill] sm:$0xff] %v11035_v14 }
 0x39d   : > { %v11027_v56 = vpop.permute.xlu0 %3157  ;;  %15658 = vst [vmem:[#allocation306_spill] sm:$0xff] %v11039_v20 }
 0x39e   : > { %3799 = vperm.xlu1 %7498, %v11025_v16   ;;  %v11030_v54 = vpop.permute.xlu1 %3169  ;;  %3790 = vperm.xlu0 %7497, %v11021_v55   ;;  %v11049_v16 = vadd.f32 %v10743_v22, %v15659_v12  ;;  %v15661_v55 = vld [vmem:[#allocation312_spill] sm:$0xff] }
 0x39f   : > { %v11053_v49 = vadd.f32 %v10745_v19, %v15661_v55  ;;  %v15667_v55 = vld [vmem:[#allocation308_spill] sm:$0xff] }
 0x3a0   : > { %15660 = vst [vmem:[#allocation297_spill] sm:$0xff] %v11049_v16 }
 0x3a1   : > { %v11041_v52 = vpop.permute.xlu0 %3165  ;;  %15662 = vst [vmem:[#allocation312_spill] sm:$0xff] %v11053_v49 }
 0x3a2   : > { %3805 = vperm.xlu1 %7498, %v11039_v20   ;;  %v11044_v61 = vpop.permute.xlu1 %3175  ;;  %3796 = vperm.xlu0 %7497, %v11035_v14   ;;  %v11063_v20 = vadd.f32 %v10748_v59, %v15663_v31  ;;  %v15665_v14 = vld [vmem:[#allocation318_spill] sm:$0xff] }
 0x3a3   : > { %v11067_v22 = vadd.f32 %v10750_v26, %v15665_v14  ;;  %v15671_v14 = vld [vmem:[#allocation314_spill] sm:$0xff] }
 0x3a4   : > { %15664 = vst [vmem:[#allocation302_spill] sm:$0xff] %v11063_v20 }
 0x3a5   : > { %v11055_v7 = vpop.permute.xlu0 %3172  ;;  %15666 = vst [vmem:[#allocation318_spill] sm:$0xff] %v11067_v22 }
 0x3a6   : > { %3811 = vperm.xlu1 %7498, %v11053_v49   ;;  %v11058_v30 = vpop.permute.xlu1 %3183  ;;  %3802 = vperm.xlu0 %7497, %v11049_v16   ;;  %v11077_v49 = vadd.f32 %v10753_v40, %v15667_v55  ;;  %v15669_v16 = vld [vmem:[#allocation324_spill] sm:$0xff] }
 0x3a7   : > { %v11081_v59 = vadd.f32 %v10755_v47, %v15669_v16  ;;  %v15675_v16 = vld [vmem:[#allocation320_spill] sm:$0xff] }
 0x3a8   : > { %15668 = vst [vmem:[#allocation308_spill] sm:$0xff] %v11077_v49 }
 0x3a9   : > { %v11069_v12 = vpop.permute.xlu0 %3179  ;;  %15670 = vst [vmem:[#allocation324_spill] sm:$0xff] %v11081_v59 }
 0x3aa   : > { %3817 = vperm.xlu1 %7498, %v11067_v22   ;;  %v11072_v19 = vpop.permute.xlu1 %3191  ;;  %3808 = vperm.xlu0 %7497, %v11063_v20   ;;  %v11091_v22 = vadd.f32 %v10758_v58, %v15671_v14  ;;  %v15673_v20 = vld [vmem:[#allocation267_spill] sm:$0xff] }
 0x3ab   : > { %v11095_v40 = vadd.f32 %v10760_v25, %v15673_v20  ;;  %v15679_v20 = vld [vmem:[#allocation326_spill] sm:$0xff] }
 0x3ac   : > { %15672 = vst [vmem:[#allocation314_spill] sm:$0xff] %v11091_v22 }
 0x3ad   : > { %v11083_v31 = vpop.permute.xlu0 %3187  ;;  %15674 = vst [vmem:[#allocation267_spill] sm:$0xff] %v11095_v40 }
 0x3ae   : > { %3823 = vperm.xlu1 %7498, %v11081_v59   ;;  %v11086_v26 = vpop.permute.xlu1 %3199  ;;  %3814 = vperm.xlu0 %7497, %v11077_v49   ;;  %v11105_v59 = vadd.f32 %v10763_v29, %v15675_v16  ;;  %v15677_v49 = vld [vmem:[#allocation329_spill] sm:$0xff] }
 0x3af   : > { %v11109_v58 = vadd.f32 %v10765_v21, %v15677_v49  ;;  %v15683_v49 = vld [vmem:[#allocation327_spill] sm:$0xff] }
 0x3b0   : > { %15676 = vst [vmem:[#allocation320_spill] sm:$0xff] %v11105_v59 }
 0x3b1   : > { %v11097_v55 = vpop.permute.xlu0 %3195  ;;  %15678 = vst [vmem:[#allocation329_spill] sm:$0xff] %v11109_v58 }
 0x3b2   : > { %3829 = vperm.xlu1 %7498, %v11095_v40   ;;  %v11100_v47 = vpop.permute.xlu1 %3207  ;;  %3820 = vperm.xlu0 %7497, %v11091_v22   ;;  %v11119_v40 = vadd.f32 %v10768_v5, %v15679_v20  ;;  %v15681_v22 = vld [vmem:[#allocation332_spill] sm:$0xff]  ;;  %v11137_v5 = vadd.f32 %v10776_v34, %v10158_v4  ;;  %v15689_v34 = vld [vmem:[#allocation333_spill] sm:$0xff] }
 0x3b3   : > { %v11123_v29 = vadd.f32 %v10770_v13, %v15681_v22  ;;  %v15686_v22 = vld [vmem:[#allocation330_spill] sm:$0xff] }
 0x3b4   : > { %15680 = vst [vmem:[#allocation326_spill] sm:$0xff] %v11119_v40  ;;  %15685 = vst [vmem:[#allocation455_spill] sm:$0xff] %v11137_v5 }
 0x3b5   : > { %v11111_v14 = vpop.permute.xlu0 %3203  ;;  %15682 = vst [vmem:[#allocation332_spill] sm:$0xff] %v11123_v29 }
 0x3b6   : > { %3835 = vperm.xlu1 %7498, %v11109_v58   ;;  %v11114_v25 = vpop.permute.xlu1 %3215  ;;  %3826 = vperm.xlu0 %7497, %v11105_v59   ;;  %v11133_v58 = vadd.f32 %v10774_v37, %v15683_v49  ;;  %v11151_v37 = vadd.f32 %v10781_v8, %v10174_v48  ;;  %v15694_v8 = vld [vmem:[#allocation336_spill] sm:$0xff] }
 0x3b8   : > { %15684 = vst [vmem:[#allocation327_spill] sm:$0xff] %v11133_v58  ;;  %15688 = vst [vmem:[#allocation456_spill] sm:$0xff] %v11151_v37 }
 0x3b9   : > { %v11125_v16 = vpop.permute.xlu0 %3211 }
 0x3ba   : > { %3841 = vperm.xlu1 %7498, %v11123_v29   ;;  %v11128_v21 = vpop.permute.xlu1 %3223  ;;  %3832 = vperm.xlu0 %7497, %v11119_v40   ;;  %v11147_v29 = vadd.f32 %v10779_v51, %v15686_v22  ;;  %v15692_v40 = vld [vmem:[#allocation201_spill] sm:$0xff] }
 0x3bc   : > { %15687 = vst [vmem:[#allocation330_spill] sm:$0xff] %v11147_v29 }
 0x3bd   : > { %v11139_v20 = vpop.permute.xlu0 %3219 }
 0x3be   : > { %3847 = vperm.xlu1 %7498, %v11137_v5   ;;  %v11142_v13 = vpop.permute.xlu1 %3231  ;;  %3838 = vperm.xlu0 %7497, %v11133_v58   ;;  %v11161_v5 = vadd.f32 %v10783_v18, %v15689_v34  ;;  %v15691_v58 = vld [vmem:[#allocation341_spill] sm:$0xff] }
 0x3bf   : > { %v11165_v51 = vadd.f32 %v15692_v40, %v15691_v58  ;;  %v15699_v58 = vld [vmem:[#allocation338_spill] sm:$0xff] }
 0x3c0   : > { %15690 = vst [vmem:[#allocation333_spill] sm:$0xff] %v11161_v5 }
 0x3c1   : > { %v11153_v49 = vpop.permute.xlu0 %3227  ;;  %15693 = vst [vmem:[#allocation341_spill] sm:$0xff] %v11165_v51 }
 0x3c2   : > { %3853 = vperm.xlu1 %7498, %v11151_v37   ;;  %v11156_v4 = vpop.permute.xlu1 %3238  ;;  %3844 = vperm.xlu0 %7497, %v11147_v29   ;;  %v15695_v37 = vld [vmem:[#allocation49_spill] sm:$0xff]  ;;  %v15697_v29 = vld [vmem:[#allocation344_spill] sm:$0xff] }
 0x3c3   : > { %v11175_v59 = vadd.f32 %v15695_v37, %v15694_v8  ;;  %v11179_v18 = vadd.f32 %v10789_v43, %v15697_v29  ;;  %v15706_v29 = vld [vmem:[#allocation342_spill] sm:$0xff] }
 0x3c5   : > { %v11167_v22 = vpop.permute.xlu0 %3235  ;;  %15696 = vst [vmem:[#allocation201_spill] sm:$0xff] %v11175_v59  ;;  %15698 = vst [vmem:[#allocation336_spill] sm:$0xff] %v11179_v18 }
 0x3c6   : > { %3859 = vperm.xlu1 %7498, %v11165_v51   ;;  %v11170_v48 = vpop.permute.xlu1 %3245  ;;  %3850 = vperm.xlu0 %7497, %v11161_v5   ;;  %v11189_v51 = vadd.f32 %v10791_v41, %v15699_v58  ;;  %v15701_v5 = vld [vmem:[#allocation348_spill] sm:$0xff] }
 0x3c7   : > { %v11193_v37 = vadd.f32 %v15702_v46, %v15701_v5  ;;  %v15713_v5 = vld [vmem:[#allocation345_spill] sm:$0xff] }
 0x3c8   : > { %15700 = vst [vmem:[#allocation49_spill] sm:$0xff] %v11189_v51 }
 0x3c9   : > { %v11181_v34 = vpop.permute.xlu0 %3241  ;;  %15703 = vst [vmem:[#allocation344_spill] sm:$0xff] %v11193_v37 }
 0x3ca   : > { %3865 = vperm.xlu1 %7498, %v11179_v18   ;;  %v11184_v40 = vpop.permute.xlu1 %3253  ;;  %3856 = vperm.xlu0 %7497, %v11175_v59   ;;  %v11203_v18 = vadd.f32 %v10795_v28, %v15706_v29  ;;  %v15708_v59 = vld [vmem:[#allocation352_spill] sm:$0xff] }
 0x3cb   : > { %v11207_v41 = vadd.f32 %v15709_v6, %v15708_v59  ;;  %v15721_v59 = vld [vmem:[#allocation349_spill] sm:$0xff] }
 0x3cc   : > { %15707 = vst [vmem:[#allocation248_spill] sm:$0xff] %v11203_v18 }
 0x3cd   : > { %v11195_v8 = vpop.permute.xlu0 %3249  ;;  %15710 = vst [vmem:[#allocation342_spill] sm:$0xff] %v11207_v41 }
 0x3ce   : > { %15704 = vst [vmem:[#allocation338_spill] sm:$0xff] %v11195_v8  ;;  %3871 = vperm.xlu1 %7498, %v11193_v37   ;;  %v11198_v43 = vpop.permute.xlu1 %3261  ;;  %3862 = vperm.xlu0 %7497, %v11189_v51   ;;  %v15714_v37 = vld [vmem:[#allocation439_spill] sm:$0xff]  ;;  %v15716_v51 = vld [vmem:[#allocation356_spill] sm:$0xff] }
 0x3cf   : > { %15705 = vst [vmem:[#allocation348_spill] sm:$0xff] %v11198_v43  ;;  %v11217_v43 = vadd.f32 %v15714_v37, %v15713_v5  ;;  %v15717_v8 = vld [vmem:[#allocation440_spill] sm:$0xff] }
 0x3d0   : > { %v11221_v28 = vadd.f32 %v15717_v8, %v15716_v51  ;;  %v15729_v8 = vld [vmem:[#allocation353_spill] sm:$0xff] }
 0x3d1   : > { %v11209_v58 = vpop.permute.xlu0 %3257  ;;  %15715 = vst [vmem:[#allocation345_spill] sm:$0xff] %v11217_v43 }
 0x3d2   : > { %15711 = vst [vmem:[#allocation352_spill] sm:$0xff] %v11209_v58  ;;  %3877 = vperm.xlu1 %7498, %v11207_v41   ;;  %v11212_v46 = vpop.permute.xlu1 %3269  ;;  %3868 = vperm.xlu0 %7497, %v11203_v18   ;;  %15718 = vst [vmem:[#allocation439_spill] sm:$0xff] %v11221_v28  ;;  %v15722_v41 = vld [vmem:[#allocation441_spill] sm:$0xff]  ;;  %v15725_v58 = vld [vmem:[#allocation442_spill] sm:$0xff] }
 0x3d3   : > { %15712 = vst [vmem:[#allocation293_spill] sm:$0xff] %v11212_v46  ;;  %v11231_v46 = vadd.f32 %v15722_v41, %v15721_v59  ;;  %v15724_v18 = vld [vmem:[#allocation361_spill] sm:$0xff] }
 0x3d4   : > { %v11235_v37 = vadd.f32 %v15725_v58, %v15724_v18  ;;  %v15737_v58 = vld [vmem:[#allocation357_spill] sm:$0xff] }
 0x3d5   : > { %v11223_v29 = vpop.permute.xlu0 %3265  ;;  %15723 = vst [vmem:[#allocation349_spill] sm:$0xff] %v11231_v46 }
 0x3d6   : > { %15719 = vst [vmem:[#allocation356_spill] sm:$0xff] %v11223_v29  ;;  %3883 = vperm.xlu1 %7498, %v11221_v28   ;;  %v11226_v6 = vpop.permute.xlu1 %3277  ;;  %3874 = vperm.xlu0 %7497, %v11217_v43   ;;  %15726 = vst [vmem:[#allocation441_spill] sm:$0xff] %v11235_v37  ;;  %v15730_v28 = vld [vmem:[#allocation443_spill] sm:$0xff]  ;;  %v15732_v43 = vld [vmem:[#allocation364_spill] sm:$0xff] }
 0x3d7   : > { %15720 = vst [vmem:[#allocation440_spill] sm:$0xff] %v11226_v6  ;;  %v11245_v6 = vadd.f32 %v15730_v28, %v15729_v8  ;;  %v15733_v29 = vld [vmem:[#allocation444_spill] sm:$0xff] }
 0x3d8   : > { %v11249_v41 = vadd.f32 %v15733_v29, %v15732_v43  ;;  %v15745_v29 = vld [vmem:[#allocation362_spill] sm:$0xff] }
 0x3d9   : > { %v11237_v5 = vpop.permute.xlu0 %3273  ;;  %15731 = vst [vmem:[#allocation353_spill] sm:$0xff] %v11245_v6 }
 0x3da   : > { %15727 = vst [vmem:[#allocation361_spill] sm:$0xff] %v11237_v5  ;;  %3889 = vperm.xlu1 %7498, %v11235_v37   ;;  %v11240_v51 = vpop.permute.xlu1 %3285  ;;  %3880 = vperm.xlu0 %7497, %v11231_v46   ;;  %15734 = vst [vmem:[#allocation443_spill] sm:$0xff] %v11249_v41  ;;  %v15738_v37 = vld [vmem:[#allocation445_spill] sm:$0xff]  ;;  %v15740_v46 = vld [vmem:[#allocation367_spill] sm:$0xff] }
 0x3db   : > { %15728 = vst [vmem:[#allocation442_spill] sm:$0xff] %v11240_v51  ;;  %v11259_v51 = vadd.f32 %v15738_v37, %v15737_v58  ;;  %v15741_v5 = vld [vmem:[#allocation446_spill] sm:$0xff] }
 0x3dc   : > { %v11263_v28 = vadd.f32 %v15741_v5, %v15740_v46  ;;  %v15753_v5 = vld [vmem:[#allocation365_spill] sm:$0xff] }
 0x3dd   : > { %v11251_v59 = vpop.permute.xlu0 %3281  ;;  %15739 = vst [vmem:[#allocation357_spill] sm:$0xff] %v11259_v51 }
 0x3de   : > { %15735 = vst [vmem:[#allocation364_spill] sm:$0xff] %v11251_v59  ;;  %3895 = vperm.xlu1 %7498, %v11249_v41   ;;  %v11254_v18 = vpop.permute.xlu1 %3293  ;;  %3886 = vperm.xlu0 %7497, %v11245_v6   ;;  %15742 = vst [vmem:[#allocation445_spill] sm:$0xff] %v11263_v28  ;;  %v15746_v41 = vld [vmem:[#allocation45_spill] sm:$0xff]  ;;  %v15749_v59 = vld [vmem:[#allocation447_spill] sm:$0xff] }
 0x3df   : > { %15736 = vst [vmem:[#allocation444_spill] sm:$0xff] %v11254_v18  ;;  %v11273_v18 = vadd.f32 %v15746_v41, %v15745_v29  ;;  %v15748_v6 = vld [vmem:[#allocation369_spill] sm:$0xff] }
 0x3e0   : > { %v11277_v37 = vadd.f32 %v15749_v59, %v15748_v6  ;;  %v15761_v59 = vld [vmem:[#allocation368_spill] sm:$0xff] }
 0x3e1   : > { %v11265_v8 = vpop.permute.xlu0 %3289  ;;  %15747 = vst [vmem:[#allocation362_spill] sm:$0xff] %v11273_v18 }
 0x3e2   : > { %15743 = vst [vmem:[#allocation367_spill] sm:$0xff] %v11265_v8  ;;  %3901 = vperm.xlu1 %7498, %v11263_v28   ;;  %v11268_v43 = vpop.permute.xlu1 %3301  ;;  %3892 = vperm.xlu0 %7497, %v11259_v51   ;;  %15750 = vst [vmem:[#allocation45_spill] sm:$0xff] %v11277_v37  ;;  %v15754_v28 = vld [vmem:[#allocation448_spill] sm:$0xff]  ;;  %v15756_v51 = vld [vmem:[#allocation69_spill] sm:$0xff] }
 0x3e3   : > { %15744 = vst [vmem:[#allocation446_spill] sm:$0xff] %v11268_v43  ;;  %v11287_v43 = vadd.f32 %v15754_v28, %v15753_v5  ;;  %v15757_v8 = vld [vmem:[#allocation449_spill] sm:$0xff] }
 0x3e4   : > { %v11291_v41 = vadd.f32 %v15757_v8, %v15756_v51  ;;  %v15768_v8 = vld [vmem:[#allocation370_spill] sm:$0xff] }
 0x3e5   : > { %v11279_v58 = vpop.permute.xlu0 %3297  ;;  %15755 = vst [vmem:[#allocation365_spill] sm:$0xff] %v11287_v43 }
 0x3e6   : > { %15751 = vst [vmem:[#allocation369_spill] sm:$0xff] %v11279_v58  ;;  %3907 = vperm.xlu1 %7498, %v11277_v37   ;;  %v11282_v46 = vpop.permute.xlu1 %3715  ;;  %3898 = vperm.xlu0 %7497, %v11273_v18   ;;  %15758 = vst [vmem:[#allocation448_spill] sm:$0xff] %v11291_v41  ;;  %v15762_v37 = vld [vmem:[#allocation450_spill] sm:$0xff]  ;;  %v15764_v18 = vld [vmem:[#allocation372_spill] sm:$0xff] }
 0x3e7   : > { %15752 = vst [vmem:[#allocation447_spill] sm:$0xff] %v11282_v46  ;;  %v11301_v46 = vadd.f32 %v15762_v37, %v15761_v59  ;;  %v15765_v58 = vld [vmem:[#allocation451_spill] sm:$0xff] }
 0x3e8   : > { %v11305_v28 = vadd.f32 %v15765_v58, %v15764_v18  ;;  %v15774_v58 = vld [vmem:[#allocation371_spill] sm:$0xff] }
 0x3e9   : > { %v11293_v29 = vpop.permute.xlu0 %3304  ;;  %15763 = vst [vmem:[#allocation368_spill] sm:$0xff] %v11301_v46 }
 0x3ea   : > { %15759 = vst [vmem:[#allocation69_spill] sm:$0xff] %v11293_v29  ;;  %3913 = vperm.xlu1 %7498, %v11291_v41   ;;  %v11296_v6 = vpop.permute.xlu1 %3721  ;;  %3904 = vperm.xlu0 %7497, %v11287_v43   ;;  %15766 = vst [vmem:[#allocation450_spill] sm:$0xff] %v11305_v28  ;;  %v15769_v41 = vld [vmem:[#allocation452_spill] sm:$0xff]  ;;  %v15771_v43 = vld [vmem:[#allocation374_spill] sm:$0xff] }
 0x3eb   : > { %15760 = vst [vmem:[#allocation449_spill] sm:$0xff] %v11296_v6  ;;  %v11315_v6 = vadd.f32 %v15769_v41, %v15768_v8  ;;  %v15772_v29 = vld [vmem:[#allocation453_spill] sm:$0xff] }
 0x3ec   : > { %v11319_v37 = vadd.f32 %v15772_v29, %v15771_v43  ;;  %v15779_v29 = vld [vmem:[#allocation373_spill] sm:$0xff] }
 0x3ed   : > { %v11307_v5 = vpop.permute.xlu0 %3718  ;;  %15770 = vst [vmem:[#allocation451_spill] sm:$0xff] %v11315_v6 }
 0x3ee   : > { %3919 = vperm.xlu1 %7498, %v11305_v28   ;;  %v11310_v51 = vpop.permute.xlu1 %3727  ;;  %3910 = vperm.xlu0 %7497, %v11301_v46   ;;  %15773 = vst [vmem:[#allocation370_spill] sm:$0xff] %v11319_v37  ;;  %v11329_v28 = vadd.f32 %v10837_v10, %v15774_v58  ;;  %v15776_v46 = vld [vmem:[#allocation376_spill] sm:$0xff] }
 0x3ef   : > { %15767 = vst [vmem:[#allocation372_spill] sm:$0xff] %v11310_v51  ;;  %v15777_v51 = vld [vmem:[#allocation454_spill] sm:$0xff] }
 0x3f0   : > { %15775 = vst [vmem:[#allocation452_spill] sm:$0xff] %v11329_v28  ;;  %v11333_v41 = vadd.f32 %v15777_v51, %v15776_v46  ;;  %v15783_v51 = vld [vmem:[#allocation375_spill] sm:$0xff] }
 0x3f1   : > { %v11321_v59 = vpop.permute.xlu0 %3724 }
 0x3f2   : > { %3925 = vperm.xlu1 %7498, %v11319_v37   ;;  %v11324_v18 = vpop.permute.xlu1 %3733  ;;  %3916 = vperm.xlu0 %7497, %v11315_v6   ;;  %15778 = vst [vmem:[#allocation374_spill] sm:$0xff] %v11333_v41  ;;  %v11343_v37 = vadd.f32 %v10846_v24, %v15779_v29  ;;  %v15781_v6 = vld [vmem:[#allocation378_spill] sm:$0xff] }
 0x3f3   : > { %v11347_v10 = vadd.f32 %v10849_v9, %v15781_v6  ;;  %v15787_v6 = vld [vmem:[#allocation377_spill] sm:$0xff] }
 0x3f4   : > { %15780 = vst [vmem:[#allocation453_spill] sm:$0xff] %v11343_v37 }
 0x3f5   : > { %v11335_v8 = vpop.permute.xlu0 %3730  ;;  %15782 = vst [vmem:[#allocation371_spill] sm:$0xff] %v11347_v10 }
 0x3f6   : > { %3931 = vperm.xlu1 %7498, %v11333_v41   ;;  %v11338_v43 = vpop.permute.xlu1 %3739  ;;  %3922 = vperm.xlu0 %7497, %v11329_v28   ;;  %v11357_v41 = vadd.f32 %v10859_v3, %v15783_v51  ;;  %v15785_v28 = vld [vmem:[#allocation380_spill] sm:$0xff] }
 0x3f7   : > { %v11361_v24 = vadd.f32 %v10862_v35, %v15785_v28  ;;  %v15792_v28 = vld [vmem:[#allocation379_spill] sm:$0xff] }
 0x3f8   : > { %15784 = vst [vmem:[#allocation376_spill] sm:$0xff] %v11357_v41 }
 0x3f9   : > { %v11349_v58 = vpop.permute.xlu0 %3736  ;;  %15786 = vst [vmem:[#allocation454_spill] sm:$0xff] %v11361_v24 }
 0x3fa   : > { %3937 = vperm.xlu1 %7498, %v11347_v10   ;;  %v11352_v46 = vpop.permute.xlu1 %3745  ;;  %3928 = vperm.xlu0 %7497, %v11343_v37   ;;  %v11371_v10 = vadd.f32 %v10873_v60, %v15787_v6  ;;  %v15789_v37 = vld [vmem:[#allocation382_spill] sm:$0xff] }
 0x3fb   : > { %v11375_v3 = vadd.f32 %v10876_v50, %v15789_v37  ;;  %v15797_v37 = vld [vmem:[#allocation381_spill] sm:$0xff] }
 0x3fc   : > { %15788 = vst [vmem:[#allocation373_spill] sm:$0xff] %v11371_v10 }
 0x3fd   : > { %v11363_v29 = vpop.permute.xlu0 %3742  ;;  %15790 = vst [vmem:[#allocation378_spill] sm:$0xff] %v11375_v3 }
 0x3fe   : > { %3943 = vperm.xlu1 %7498, %v11361_v24   ;;  %v11366_v9 = vpop.permute.xlu1 %3751  ;;  %3934 = vperm.xlu0 %7497, %v11357_v41   ;;  %v11385_v24 = vadd.f32 %v10887_v33, %v15792_v28  ;;  %v15794_v41 = vld [vmem:[#allocation384_spill] sm:$0xff] }
 0x3ff   : > { %v11389_v60 = vadd.f32 %v10890_v42, %v15794_v41  ;;  %v15802_v41 = vld [vmem:[#allocation383_spill] sm:$0xff] }
 0x400   : > { %15793 = vst [vmem:[#allocation380_spill] sm:$0xff] %v11385_v24 }
 0x401   : > { %v11377_v51 = vpop.permute.xlu0 %3748  ;;  %15795 = vst [vmem:[#allocation377_spill] sm:$0xff] %v11389_v60 }
 0x402   : > { %3949 = vperm.xlu1 %7498, %v11375_v3   ;;  %v11380_v35 = vpop.permute.xlu1 %3757  ;;  %3940 = vperm.xlu0 %7497, %v11371_v10   ;;  %v11399_v3 = vadd.f32 %v10901_v0, %v15797_v37  ;;  %v15799_v10 = vld [vmem:[#allocation386_spill] sm:$0xff] }
 0x403   : > { %15791 = vst [vmem:[#allocation375_spill] sm:$0xff] %v11380_v35  ;;  %v11403_v33 = vadd.f32 %v10904_v38, %v15799_v10  ;;  %v15806_v10 = vld [vmem:[#allocation385_spill] sm:$0xff] }
 0x404   : > { %15798 = vst [vmem:[#allocation379_spill] sm:$0xff] %v11399_v3 }
 0x405   : > { %v11391_v6 = vpop.permute.xlu0 %3754  ;;  %15800 = vst [vmem:[#allocation384_spill] sm:$0xff] %v11403_v33 }
 0x406   : > { %3955 = vperm.xlu1 %7498, %v11389_v60   ;;  %v11394_v50 = vpop.permute.xlu1 %3763  ;;  %3946 = vperm.xlu0 %7497, %v11385_v24   ;;  %v11413_v60 = vadd.f32 %v10915_v36, %v15802_v41  ;;  %v15804_v24 = vld [vmem:[#allocation70_spill] sm:$0xff] }
 0x407   : > { %15796 = vst [vmem:[#allocation382_spill] sm:$0xff] %v11394_v50  ;;  %v11417_v0 = vadd.f32 %v10918_v39, %v15804_v24  ;;  %v15810_v24 = vld [vmem:[#allocation387_spill] sm:$0xff] }
 0x408   : > { %15803 = vst [vmem:[#allocation386_spill] sm:$0xff] %v11413_v60 }
 0x409   : > { %v11405_v28 = vpop.permute.xlu0 %3760  ;;  %15805 = vst [vmem:[#allocation383_spill] sm:$0xff] %v11417_v0 }
 0x40a   : > { %15801 = vst [vmem:[#allocation381_spill] sm:$0xff] %v11405_v28  ;;  %3961 = vperm.xlu1 %7498, %v11403_v33   ;;  %v11408_v42 = vpop.permute.xlu1 %3769  ;;  %3952 = vperm.xlu0 %7497, %v11399_v3   ;;  %v11427_v33 = vadd.f32 %v10929_v2, %v15806_v10  ;;  %v15808_v3 = vld [vmem:[#allocation388_spill] sm:$0xff] }
 0x40b   : > { %v11431_v36 = vadd.f32 %v10932_v45, %v15808_v3  ;;  %v15814_v3 = vld [vmem:[#allocation103_spill] sm:$0xff] }
 0x40c   : > { %15807 = vst [vmem:[#allocation70_spill] sm:$0xff] %v11427_v33 }
 0x40d   : > { %v11419_v37 = vpop.permute.xlu0 %3766  ;;  %15809 = vst [vmem:[#allocation385_spill] sm:$0xff] %v11431_v36 }
 0x40e   : > { %3967 = vperm.xlu1 %7498, %v11417_v0   ;;  %v11422_v38 = vpop.permute.xlu1 %3775  ;;  %3958 = vperm.xlu0 %7497, %v11413_v60   ;;  %v11441_v0 = vadd.f32 %v10943_v53, %v15810_v24  ;;  %v15812_v60 = vld [vmem:[#allocation390_spill] sm:$0xff] }
 0x40f   : > { %v11445_v2 = vadd.f32 %v10946_v32, %v15812_v60  ;;  %v15818_v60 = vld [vmem:[#allocation389_spill] sm:$0xff] }
 0x410   : > { %15811 = vst [vmem:[#allocation388_spill] sm:$0xff] %v11441_v0 }
 0x411   : > { %v11433_v41 = vpop.permute.xlu0 %3772  ;;  %15813 = vst [vmem:[#allocation387_spill] sm:$0xff] %v11445_v2 }
 0x412   : > { %3973 = vperm.xlu1 %7498, %v11431_v36   ;;  %v11436_v39 = vpop.permute.xlu1 %3781  ;;  %3964 = vperm.xlu0 %7497, %v11427_v33   ;;  %v11455_v36 = vadd.f32 %v10957_v15, %v15814_v3  ;;  %v15816_v33 = vld [vmem:[#allocation392_spill] sm:$0xff] }
 0x413   : > { %v11459_v53 = vadd.f32 %v10960_v44, %v15816_v33  ;;  %v15822_v33 = vld [vmem:[#allocation391_spill] sm:$0xff] }
 0x414   : > { %15815 = vst [vmem:[#allocation390_spill] sm:$0xff] %v11455_v36 }
 0x415   : > { %v11447_v10 = vpop.permute.xlu0 %3778  ;;  %15817 = vst [vmem:[#allocation103_spill] sm:$0xff] %v11459_v53 }
 0x416   : > { %3979 = vperm.xlu1 %7498, %v11445_v2   ;;  %v11450_v45 = vpop.permute.xlu1 %3787  ;;  %3970 = vperm.xlu0 %7497, %v11441_v0   ;;  %v11469_v2 = vadd.f32 %v10971_v23, %v15818_v60  ;;  %v15820_v0 = vld [vmem:[#allocation394_spill] sm:$0xff] }
 0x417   : > { %v11473_v15 = vadd.f32 %v10974_v62, %v15820_v0  ;;  %v15827_v0 = vld [vmem:[#allocation393_spill] sm:$0xff] }
 0x418   : > { %15819 = vst [vmem:[#allocation392_spill] sm:$0xff] %v11469_v2 }
 0x419   : > { %v11461_v24 = vpop.permute.xlu0 %3784  ;;  %15821 = vst [vmem:[#allocation389_spill] sm:$0xff] %v11473_v15 }
 0x41a   : > { %3985 = vperm.xlu1 %7498, %v11459_v53   ;;  %v11464_v32 = vpop.permute.xlu1 %3793  ;;  %3976 = vperm.xlu0 %7497, %v11455_v36   ;;  %v11483_v53 = vadd.f32 %v10985_v63, %v15822_v33  ;;  %v15824_v36 = vld [vmem:[#allocation396_spill] sm:$0xff] }
 0x41b   : > { %v11487_v23 = vadd.f32 %v10988_v27, %v15824_v36  ;;  %v15832_v36 = vld [vmem:[#allocation395_spill] sm:$0xff] }
 0x41c   : > { %15823 = vst [vmem:[#allocation394_spill] sm:$0xff] %v11483_v53 }
 0x41d   : > { %v11475_v3 = vpop.permute.xlu0 %3790  ;;  %15825 = vst [vmem:[#allocation391_spill] sm:$0xff] %v11487_v23 }
 0x41e   : > { %3991 = vperm.xlu1 %7498, %v11473_v15   ;;  %v11478_v44 = vpop.permute.xlu1 %3799  ;;  %3982 = vperm.xlu0 %7497, %v11469_v2   ;;  %v11497_v15 = vadd.f32 %v10999_v11, %v15827_v0  ;;  %v15829_v2 = vld [vmem:[#allocation398_spill] sm:$0xff] }
 0x41f   : > { %v11501_v63 = vadd.f32 %v11002_v57, %v15829_v2  ;;  %v15837_v2 = vld [vmem:[#allocation397_spill] sm:$0xff] }
 0x420   : > { %15828 = vst [vmem:[#allocation393_spill] sm:$0xff] %v11497_v15 }
 0x421   : > { %v11489_v60 = vpop.permute.xlu0 %3796  ;;  %15830 = vst [vmem:[#allocation398_spill] sm:$0xff] %v11501_v63 }
 0x422   : > { %3997 = vperm.xlu1 %7498, %v11487_v23   ;;  %v11492_v62 = vpop.permute.xlu1 %3805  ;;  %3988 = vperm.xlu0 %7497, %v11483_v53   ;;  %v11511_v23 = vadd.f32 %v11013_v17, %v15832_v36  ;;  %v15834_v53 = vld [vmem:[#allocation400_spill] sm:$0xff] }
 0x423   : > { %15826 = vst [vmem:[#allocation396_spill] sm:$0xff] %v11492_v62  ;;  %v11515_v11 = vadd.f32 %v11016_v1, %v15834_v53  ;;  %v15842_v53 = vld [vmem:[#allocation399_spill] sm:$0xff] }
 0x424   : > { %15833 = vst [vmem:[#allocation395_spill] sm:$0xff] %v11511_v23 }
 0x425   : > { %v11503_v33 = vpop.permute.xlu0 %3802  ;;  %15835 = vst [vmem:[#allocation400_spill] sm:$0xff] %v11515_v11 }
 0x426   : > { %4003 = vperm.xlu1 %7498, %v11501_v63   ;;  %v11506_v27 = vpop.permute.xlu1 %3811  ;;  %3994 = vperm.xlu0 %7497, %v11497_v15   ;;  %v11525_v63 = vadd.f32 %v11027_v56, %v15837_v2  ;;  %v15839_v15 = vld [vmem:[#allocation148_spill] sm:$0xff] }
 0x427   : > { %15831 = vst [vmem:[#allocation457_spill] sm:$0xff] %v11506_v27  ;;  %v11529_v17 = vadd.f32 %v11030_v54, %v15839_v15  ;;  %v15846_v15 = vld [vmem:[#allocation401_spill] sm:$0xff]  ;;  %v15931_v27 = vld [vmem:[#allocation444_spill] sm:$0xff] }
 0x428   : > { %15838 = vst [vmem:[#allocation397_spill] sm:$0xff] %v11525_v63 }
 0x429   : > { %v11517_v0 = vpop.permute.xlu0 %3808  ;;  %15840 = vst [vmem:[#allocation148_spill] sm:$0xff] %v11529_v17 }
 0x42a   : > { %15836 = vst [vmem:[#allocation458_spill] sm:$0xff] %v11517_v0  ;;  %4009 = vperm.xlu1 %7498, %v11515_v11   ;;  %v11520_v57 = vpop.permute.xlu1 %3817  ;;  %4000 = vperm.xlu0 %7497, %v11511_v23   ;;  %v11539_v11 = vadd.f32 %v11041_v52, %v15842_v53  ;;  %v15844_v23 = vld [vmem:[#allocation403_spill] sm:$0xff] }
 0x42b   : > { %v11543_v56 = vadd.f32 %v11044_v61, %v15844_v23  ;;  %v15850_v23 = vld [vmem:[#allocation402_spill] sm:$0xff] }
 0x42c   : > { %15843 = vst [vmem:[#allocation399_spill] sm:$0xff] %v11539_v11 }
 0x42d   : > { %v11531_v36 = vpop.permute.xlu0 %3814  ;;  %15845 = vst [vmem:[#allocation403_spill] sm:$0xff] %v11543_v56 }
 0x42e   : > { %15841 = vst [vmem:[#allocation459_spill] sm:$0xff] %v11531_v36  ;;  %4015 = vperm.xlu1 %7498, %v11529_v17   ;;  %v11534_v1 = vpop.permute.xlu1 %3823  ;;  %4006 = vperm.xlu0 %7497, %v11525_v63   ;;  %v11553_v17 = vadd.f32 %v11055_v7, %v15846_v15  ;;  %v15848_v63 = vld [vmem:[#allocation102_spill] sm:$0xff]  ;;  %v15907_v36 = vld [vmem:[#allocation293_spill] sm:$0xff] }
 0x42f   : > { %v11557_v52 = vadd.f32 %v11058_v30, %v15848_v63  ;;  %v15855_v63 = vld [vmem:[#allocation404_spill] sm:$0xff] }
 0x430   : > { %15847 = vst [vmem:[#allocation401_spill] sm:$0xff] %v11553_v17 }
 0x431   : > { %v11545_v2 = vpop.permute.xlu0 %3820  ;;  %15849 = vst [vmem:[#allocation102_spill] sm:$0xff] %v11557_v52 }
 0x432   : > { %4021 = vperm.xlu1 %7498, %v11543_v56   ;;  %v11548_v54 = vpop.permute.xlu1 %3829  ;;  %4012 = vperm.xlu0 %7497, %v11539_v11   ;;  %v11567_v56 = vadd.f32 %v11069_v12, %v15850_v23  ;;  %v15852_v11 = vld [vmem:[#allocation406_spill] sm:$0xff] }
 0x433   : > { %v11571_v7 = vadd.f32 %v11072_v19, %v15852_v11  ;;  %v15860_v11 = vld [vmem:[#allocation405_spill] sm:$0xff] }
 0x434   : > { %15851 = vst [vmem:[#allocation402_spill] sm:$0xff] %v11567_v56 }
 0x435   : > { %v11559_v53 = vpop.permute.xlu0 %3826  ;;  %15853 = vst [vmem:[#allocation406_spill] sm:$0xff] %v11571_v7 }
 0x436   : > { %4027 = vperm.xlu1 %7498, %v11557_v52   ;;  %v11562_v61 = vpop.permute.xlu1 %3835  ;;  %4018 = vperm.xlu0 %7497, %v11553_v17   ;;  %v11581_v52 = vadd.f32 %v11083_v31, %v15855_v63  ;;  %v15857_v17 = vld [vmem:[#allocation408_spill] sm:$0xff] }
 0x437   : > { %v11585_v12 = vadd.f32 %v11086_v26, %v15857_v17  ;;  %v15866_v17 = vld [vmem:[#allocation407_spill] sm:$0xff] }
 0x438   : > { %15856 = vst [vmem:[#allocation404_spill] sm:$0xff] %v11581_v52 }
 0x439   : > { %v11573_v15 = vpop.permute.xlu0 %3832  ;;  %15858 = vst [vmem:[#allocation408_spill] sm:$0xff] %v11585_v12 }
 0x43a   : > { %4033 = vperm.xlu1 %7498, %v11571_v7   ;;  %v11576_v30 = vpop.permute.xlu1 %3841  ;;  %4024 = vperm.xlu0 %7497, %v11567_v56   ;;  %v11595_v7 = vadd.f32 %v11097_v55, %v15860_v11  ;;  %v15862_v56 = vld [vmem:[#allocation410_spill] sm:$0xff] }
 0x43b   : > { %15854 = vst [vmem:[#allocation460_spill] sm:$0xff] %v11576_v30  ;;  %v11599_v31 = vadd.f32 %v11100_v47, %v15862_v56  ;;  %v15872_v56 = vld [vmem:[#allocation409_spill] sm:$0xff] }
 0x43c   : > { %15861 = vst [vmem:[#allocation405_spill] sm:$0xff] %v11595_v7 }
 0x43d   : > { %v11587_v23 = vpop.permute.xlu0 %3838  ;;  %15863 = vst [vmem:[#allocation410_spill] sm:$0xff] %v11599_v31 }
 0x43e   : > { %4039 = vperm.xlu1 %7498, %v11585_v12   ;;  %v11590_v19 = vpop.permute.xlu1 %3847  ;;  %4030 = vperm.xlu0 %7497, %v11581_v52   ;;  %v11609_v12 = vadd.f32 %v11111_v14, %v15866_v17  ;;  %v15868_v52 = vld [vmem:[#allocation412_spill] sm:$0xff] }
 0x43f   : > { %15859 = vst [vmem:[#allocation461_spill] sm:$0xff] %v11590_v19  ;;  %v11613_v55 = vadd.f32 %v11114_v25, %v15868_v52  ;;  %v15878_v52 = vld [vmem:[#allocation411_spill] sm:$0xff] }
 0x440   : > { %15867 = vst [vmem:[#allocation407_spill] sm:$0xff] %v11609_v12 }
 0x441   : > { %v11601_v63 = vpop.permute.xlu0 %3844  ;;  %15869 = vst [vmem:[#allocation412_spill] sm:$0xff] %v11613_v55 }
 0x442   : > { %15864 = vst [vmem:[#allocation462_spill] sm:$0xff] %v11601_v63  ;;  %4045 = vperm.xlu1 %7498, %v11599_v31   ;;  %v11604_v26 = vpop.permute.xlu1 %3853  ;;  %4036 = vperm.xlu0 %7497, %v11595_v7   ;;  %v11623_v31 = vadd.f32 %v11125_v16, %v15872_v56  ;;  %v15874_v7 = vld [vmem:[#allocation414_spill] sm:$0xff] }
 0x443   : > { %15865 = vst [vmem:[#allocation463_spill] sm:$0xff] %v11604_v26  ;;  %v11627_v14 = vadd.f32 %v11128_v21, %v15874_v7  ;;  %v15883_v7 = vld [vmem:[#allocation413_spill] sm:$0xff]  ;;  %v15915_v26 = vld [vmem:[#allocation440_spill] sm:$0xff] }
 0x444   : > { %15873 = vst [vmem:[#allocation409_spill] sm:$0xff] %v11623_v31 }
 0x445   : > { %v11615_v11 = vpop.permute.xlu0 %3850  ;;  %15875 = vst [vmem:[#allocation414_spill] sm:$0xff] %v11627_v14 }
 0x446   : > { %15870 = vst [vmem:[#allocation464_spill] sm:$0xff] %v11615_v11  ;;  %4051 = vperm.xlu1 %7498, %v11613_v55   ;;  %v11618_v47 = vpop.permute.xlu1 %3859  ;;  %4042 = vperm.xlu0 %7497, %v11609_v12   ;;  %v11637_v55 = vadd.f32 %v11139_v20, %v15878_v52  ;;  %v15880_v12 = vld [vmem:[#allocation416_spill] sm:$0xff] }
 0x447   : > { %15871 = vst [vmem:[#allocation465_spill] sm:$0xff] %v11618_v47  ;;  %v11641_v16 = vadd.f32 %v11142_v13, %v15880_v12  ;;  %v15887_v12 = vld [vmem:[#allocation415_spill] sm:$0xff]  ;;  %v15900_v47 = vld [vmem:[#allocation348_spill] sm:$0xff] }
 0x448   : > { %15879 = vst [vmem:[#allocation411_spill] sm:$0xff] %v11637_v55 }
 0x449   : > { %v11629_v17 = vpop.permute.xlu0 %3856  ;;  %15881 = vst [vmem:[#allocation416_spill] sm:$0xff] %v11641_v16 }
 0x44a   : > { %15876 = vst [vmem:[#allocation466_spill] sm:$0xff] %v11629_v17  ;;  %4057 = vperm.xlu1 %7498, %v11627_v14   ;;  %v11632_v25 = vpop.permute.xlu1 %3865  ;;  %4048 = vperm.xlu0 %7497, %v11623_v31   ;;  %v11651_v14 = vadd.f32 %v11153_v49, %v15883_v7  ;;  %v15885_v31 = vld [vmem:[#allocation136_spill] sm:$0xff]  ;;  %v15923_v17 = vld [vmem:[#allocation442_spill] sm:$0xff] }
 0x44b   : > { %15877 = vst [vmem:[#allocation467_spill] sm:$0xff] %v11632_v25  ;;  %v11655_v20 = vadd.f32 %v11156_v4, %v15885_v31  ;;  %v15891_v31 = vld [vmem:[#allocation417_spill] sm:$0xff] }
 0x44c   : > { %15884 = vst [vmem:[#allocation413_spill] sm:$0xff] %v11651_v14 }
 0x44d   : > { %v11643_v56 = vpop.permute.xlu0 %3862  ;;  %15886 = vst [vmem:[#allocation136_spill] sm:$0xff] %v11655_v20 }
 0x44e   : > { %15882 = vst [vmem:[#allocation468_spill] sm:$0xff] %v11643_v56  ;;  %4063 = vperm.xlu1 %7498, %v11641_v16   ;;  %v11646_v21 = vpop.permute.xlu1 %3871  ;;  %4054 = vperm.xlu0 %7497, %v11637_v55   ;;  %v11665_v16 = vadd.f32 %v11167_v22, %v15887_v12  ;;  %v15889_v55 = vld [vmem:[#allocation418_spill] sm:$0xff] }
 0x44f   : > { %v11669_v49 = vadd.f32 %v11170_v48, %v15889_v55  ;;  %v15896_v55 = vld [vmem:[#allocation183_spill] sm:$0xff] }
 0x450   : > { %15888 = vst [vmem:[#allocation415_spill] sm:$0xff] %v11665_v16 }
 0x451   : > { %v11657_v52 = vpop.permute.xlu0 %3868  ;;  %15890 = vst [vmem:[#allocation418_spill] sm:$0xff] %v11669_v49 }
 0x452   : > { %4069 = vperm.xlu1 %7498, %v11655_v20   ;;  %v11660_v13 = vpop.permute.xlu1 %3877  ;;  %4060 = vperm.xlu0 %7497, %v11651_v14   ;;  %v11679_v20 = vadd.f32 %v11181_v34, %v15891_v31  ;;  %v15893_v14 = vld [vmem:[#allocation420_spill] sm:$0xff] }
 0x453   : > { %v11683_v22 = vadd.f32 %v11184_v40, %v15893_v14  ;;  %v15903_v14 = vld [vmem:[#allocation419_spill] sm:$0xff] }
 0x454   : > { %15892 = vst [vmem:[#allocation417_spill] sm:$0xff] %v11679_v20 }
 0x455   : > { %v11671_v7 = vpop.permute.xlu0 %3874  ;;  %15894 = vst [vmem:[#allocation420_spill] sm:$0xff] %v11683_v22 }
 0x456   : > { %4075 = vperm.xlu1 %7498, %v11669_v49   ;;  %v11674_v4 = vpop.permute.xlu1 %3883  ;;  %4066 = vperm.xlu0 %7497, %v11665_v16   ;;  %v15897_v49 = vld [vmem:[#allocation338_spill] sm:$0xff] }
 0x457   : > { %v11693_v56 = vadd.f32 %v15897_v49, %v15896_v55  ;;  %v15899_v16 = vld [vmem:[#allocation422_spill] sm:$0xff] }
 0x458   : > { %v11697_v34 = vadd.f32 %v15900_v47, %v15899_v16  ;;  %v15911_v16 = vld [vmem:[#allocation421_spill] sm:$0xff] }
 0x459   : > { %v11685_v12 = vpop.permute.xlu0 %3880  ;;  %15898 = vst [vmem:[#allocation183_spill] sm:$0xff] %v11693_v56 }
 0x45a   : > { %4081 = vperm.xlu1 %7498, %v11683_v22   ;;  %v11688_v48 = vpop.permute.xlu1 %3889  ;;  %4072 = vperm.xlu0 %7497, %v11679_v20   ;;  %15901 = vst [vmem:[#allocation338_spill] sm:$0xff] %v11697_v34  ;;  %v15904_v22 = vld [vmem:[#allocation352_spill] sm:$0xff] }
 0x45b   : > { %15895 = vst [vmem:[#allocation469_spill] sm:$0xff] %v11688_v48  ;;  %v11707_v25 = vadd.f32 %v15904_v22, %v15903_v14  ;;  %v15906_v20 = vld [vmem:[#allocation424_spill] sm:$0xff] }
 0x45c   : > { %v11711_v49 = vadd.f32 %v15907_v36, %v15906_v20  ;;  %v15919_v20 = vld [vmem:[#allocation423_spill] sm:$0xff] }
 0x45d   : > { %v11699_v31 = vpop.permute.xlu0 %3886  ;;  %15905 = vst [vmem:[#allocation348_spill] sm:$0xff] %v11707_v25 }
 0x45e   : > { %4087 = vperm.xlu1 %7498, %v11697_v34   ;;  %v11702_v40 = vpop.permute.xlu1 %3895  ;;  %4078 = vperm.xlu0 %7497, %v11693_v56   ;;  %15908 = vst [vmem:[#allocation419_spill] sm:$0xff] %v11711_v49  ;;  %v15912_v34 = vld [vmem:[#allocation356_spill] sm:$0xff]  ;;  %v15914_v56 = vld [vmem:[#allocation426_spill] sm:$0xff] }
 0x45f   : > { %15902 = vst [vmem:[#allocation422_spill] sm:$0xff] %v11702_v40  ;;  %v11721_v50 = vadd.f32 %v15912_v34, %v15911_v16  ;;  %v11725_v22 = vadd.f32 %v15915_v26, %v15914_v56  ;;  %v15927_v56 = vld [vmem:[#allocation425_spill] sm:$0xff] }
 0x461   : > { %v11713_v55 = vpop.permute.xlu0 %3892  ;;  %15913 = vst [vmem:[#allocation293_spill] sm:$0xff] %v11721_v50  ;;  %15916 = vst [vmem:[#allocation421_spill] sm:$0xff] %v11725_v22 }
 0x462   : > { %15909 = vst [vmem:[#allocation352_spill] sm:$0xff] %v11713_v55  ;;  %4093 = vperm.xlu1 %7498, %v11711_v49   ;;  %v11716_v47 = vpop.permute.xlu1 %3901  ;;  %4084 = vperm.xlu0 %7497, %v11707_v25   ;;  %v15920_v49 = vld [vmem:[#allocation361_spill] sm:$0xff]  ;;  %v15922_v25 = vld [vmem:[#allocation428_spill] sm:$0xff] }
 0x463   : > { %15910 = vst [vmem:[#allocation424_spill] sm:$0xff] %v11716_v47  ;;  %v11735_v47 = vadd.f32 %v15920_v49, %v15919_v20  ;;  %v11739_v34 = vadd.f32 %v15923_v17, %v15922_v25  ;;  %v15935_v25 = vld [vmem:[#allocation427_spill] sm:$0xff] }
 0x465   : > { %v11727_v14 = vpop.permute.xlu0 %3898  ;;  %15921 = vst [vmem:[#allocation440_spill] sm:$0xff] %v11735_v47  ;;  %15924 = vst [vmem:[#allocation423_spill] sm:$0xff] %v11739_v34 }
 0x466   : > { %15917 = vst [vmem:[#allocation356_spill] sm:$0xff] %v11727_v14  ;;  %4099 = vperm.xlu1 %7498, %v11725_v22   ;;  %v11730_v36 = vpop.permute.xlu1 %3907  ;;  %4090 = vperm.xlu0 %7497, %v11721_v50   ;;  %v15928_v22 = vld [vmem:[#allocation364_spill] sm:$0xff]  ;;  %v15930_v50 = vld [vmem:[#allocation431_spill] sm:$0xff] }
 0x467   : > { %15918 = vst [vmem:[#allocation426_spill] sm:$0xff] %v11730_v36  ;;  %v11749_v36 = vadd.f32 %v15928_v22, %v15927_v56  ;;  %v11753_v49 = vadd.f32 %v15931_v27, %v15930_v50  ;;  %v15943_v27 = vld [vmem:[#allocation429_spill] sm:$0xff] }
 0x469   : > { %v11741_v16 = vpop.permute.xlu0 %3904  ;;  %15929 = vst [vmem:[#allocation442_spill] sm:$0xff] %v11749_v36  ;;  %15932 = vst [vmem:[#allocation425_spill] sm:$0xff] %v11753_v49 }
 0x46a   : > { %15925 = vst [vmem:[#allocation361_spill] sm:$0xff] %v11741_v16  ;;  %4105 = vperm.xlu1 %7498, %v11739_v34   ;;  %v11744_v26 = vpop.permute.xlu1 %3913  ;;  %4096 = vperm.xlu0 %7497, %v11735_v47   ;;  %v15936_v34 = vld [vmem:[#allocation367_spill] sm:$0xff]  ;;  %v15938_v47 = vld [vmem:[#allocation432_spill] sm:$0xff]  ;;  %v15939_v16 = vld [vmem:[#allocation446_spill] sm:$0xff] }
 0x46b   : > { %15926 = vst [vmem:[#allocation428_spill] sm:$0xff] %v11744_v26  ;;  %v11763_v26 = vadd.f32 %v15936_v34, %v15935_v25  ;;  %v11767_v22 = vadd.f32 %v15939_v16, %v15938_v47  ;;  %v15948_v47 = vld [vmem:[#allocation430_spill] sm:$0xff]  ;;  %v15949_v16 = vld [vmem:[#allocation69_spill] sm:$0xff] }
 0x46c   : > { %v11786_v25 = vadd.f32 %v15949_v16, %v15948_v47 }
 0x46d   : > { %v11755_v20 = vpop.permute.xlu0 %3910  ;;  %15937 = vst [vmem:[#allocation444_spill] sm:$0xff] %v11763_v26  ;;  %15940 = vst [vmem:[#allocation427_spill] sm:$0xff] %v11767_v22 }
 0x46e   : > { %15933 = vst [vmem:[#allocation364_spill] sm:$0xff] %v11755_v20  ;;  %4111 = vperm.xlu1 %7498, %v11753_v49   ;;  %v11758_v17 = vpop.permute.xlu1 %3919  ;;  %4102 = vperm.xlu0 %7497, %v11749_v36   ;;  %v15944_v49 = vld [vmem:[#allocation369_spill] sm:$0xff]  ;;  %15950 = vst [vmem:[#allocation430_spill] sm:$0xff] %v11786_v25 }
 0x46f   : > { %15934 = vst [vmem:[#allocation431_spill] sm:$0xff] %v11758_v17  ;;  %v11777_v20 = vadd.f32 %v15944_v49, %v15943_v27 }
 0x471   : > { %v11769_v56 = vpop.permute.xlu0 %3916  ;;  %15945 = vst [vmem:[#allocation446_spill] sm:$0xff] %v11777_v20 }
 0x472   : > { %15941 = vst [vmem:[#allocation367_spill] sm:$0xff] %v11769_v56  ;;  %4117 = vperm.xlu1 %7498, %v11767_v22   ;;  %v11772_v50 = vpop.permute.xlu1 %3925  ;;  %4108 = vperm.xlu0 %7497, %v11763_v26  }
 0x473   : > { %15942 = vst [vmem:[#allocation432_spill] sm:$0xff] %v11772_v50 }
 0x475   : > { %v11779_v36 = vpop.permute.xlu0 %3922 }
 0x476   : > { %15946 = vst [vmem:[#allocation429_spill] sm:$0xff] %v11779_v36  ;;  %v11781_v34 = vpop.permute.xlu1 %3931  ;;  %4114 = vperm.xlu0 %7497, %v11777_v20  }
 0x477   : > { %15947 = vst [vmem:[#allocation369_spill] sm:$0xff] %v11781_v34 }
 0x479   : > { %v11788_v56 = vpop.permute.xlu0 %3928 }
 0x47a   : > { %15951 = vst [vmem:[#allocation69_spill] sm:$0xff] %v11788_v56  ;;  %v11790_v22 = vpop.permute.xlu1 %3937  ;;  %4120 = vperm.xlu0 %7497, %v11786_v25  }
 0x47b   : > { %15952 = vst [vmem:[#allocation470_spill] sm:$0xff] %v11790_v22 }
 0x47d   : > { %v11793_v26 = vpop.permute.xlu0 %3934 }
 0x47e   : > { %15953 = vst [vmem:[#allocation471_spill] sm:$0xff] %v11793_v26  ;;  %v11795_v49 = vpop.permute.xlu1 %3943 }
 0x47f   : > { %15954 = vst [vmem:[#allocation472_spill] sm:$0xff] %v11795_v49 }
 0x481   : > { %v11797_v27 = vpop.permute.xlu0 %3940 }
 0x482   : > { %15955 = vst [vmem:[#allocation473_spill] sm:$0xff] %v11797_v27  ;;  %v11799_v50 = vpop.permute.xlu1 %3949 }
 0x483   : > { %15956 = vst [vmem:[#allocation474_spill] sm:$0xff] %v11799_v50 }
 0x485   : > { %v11801_v34 = vpop.permute.xlu0 %3946 }
 0x486   : > { %15957 = vst [vmem:[#allocation475_spill] sm:$0xff] %v11801_v34  ;;  %v11803_v20 = vpop.permute.xlu1 %3955 }
 0x487   : > { %15958 = vst [vmem:[#allocation476_spill] sm:$0xff] %v11803_v20 }
 0x489   : > { %v11805_v47 = vpop.permute.xlu0 %3952 }
 0x48a   : > { %15959 = vst [vmem:[#allocation477_spill] sm:$0xff] %v11805_v47  ;;  %v11807_v16 = vpop.permute.xlu1 %3961 }
 0x48b   : > { %15960 = vst [vmem:[#allocation478_spill] sm:$0xff] %v11807_v16 }
 0x48d   : > { %v11809_v56 = vpop.permute.xlu0 %3958 }
 0x48e   : > { %15961 = vst [vmem:[#allocation479_spill] sm:$0xff] %v11809_v56  ;;  %v11811_v22 = vpop.permute.xlu1 %3967 }
 0x48f   : > { %15962 = vst [vmem:[#allocation480_spill] sm:$0xff] %v11811_v22  ;;  %v15973_v22 = vlaneseq }
 0x491   : > { %v11813_v25 = vpop.permute.xlu0 %3964 }
 0x492   : > { %15963 = vst [vmem:[#allocation481_spill] sm:$0xff] %v11813_v25  ;;  %v11815_v26 = vpop.permute.xlu1 %3973  ;;  %v11834_v25 = vand.u32 127, %v15973_v22 }
 0x493   : > { %15964 = vst [vmem:[#allocation482_spill] sm:$0xff] %v11815_v26 }
 0x494   : > { %v4177_v28 = vadd.s32 4294967232, %v11834_v25  ;;  %v4198_v35 = vadd.s32 4294967208, %v11834_v25 }
 0x495   : > { %v11817_v49 = vpop.permute.xlu0 %3970 }
 0x496   : > { %15965 = vst [vmem:[#allocation483_spill] sm:$0xff] %v11817_v49  ;;  %v11819_v27 = vpop.permute.xlu1 %3979 }
 0x497   : > { %15966 = vst [vmem:[#allocation484_spill] sm:$0xff] %v11819_v27  ;;  %v4128_v27 = vadd.s32 4294967288, %v11834_v25 }
 0x499   : > { %v11821_v50 = vpop.permute.xlu0 %3976 }
 0x49a   : > { %15967 = vst [vmem:[#allocation485_spill] sm:$0xff] %v11821_v50  ;;  %v11823_v34 = vpop.permute.xlu1 %3985 }
 0x49b   : > { %15968 = vst [vmem:[#allocation486_spill] sm:$0xff] %v11823_v34 }
 0x49d   : > { %v11825_v20 = vpop.permute.xlu0 %3982 }
 0x49e   : > { %15969 = vst [vmem:[#allocation487_spill] sm:$0xff] %v11825_v20  ;;  %v11827_v47 = vpop.permute.xlu1 %3991  ;;  %v15978_v20 = vld [vmem:[#allocation18_spill] sm:$0xff] }
 0x49f   : > { %15970 = vst [vmem:[#allocation488_spill] sm:$0xff] %v11827_v47  ;;  %v11846_v17 = vsub.s32 %v4128_v27, %v15978_v20  ;;  %v4142_v47 = vadd.s32 4294967272, %v11834_v25  ;;  %v11852_v22 = vsub.s32 %v11834_v25, %v15978_v20  ;;  %v11894_v0 = vsub.s32 %v4177_v28, %v15978_v20 }
 0x4a0   : > { %v4205_v28 = vadd.s32 4294967200, %v11834_v25 }
 0x4a1   : > { %v11829_v16 = vpop.permute.xlu0 %3988  ;;  %v4132_v27 = vrot.slane %v11307_v5, %v11846_v17  ;;  %v11864_v36 = vsub.s32 %v4142_v47, %v15978_v20  ;;  %v4240_v11 = vrot.slane %v11419_v37, %v11852_v22  ;;  %v4244_v37 = vrot.slane %v11408_v42, %v11846_v17 }
 0x4a2   : > { %15971 = vst [vmem:[#allocation489_spill] sm:$0xff] %v11829_v16  ;;  %v11831_v56 = vpop.permute.xlu1 %3997  ;;  %v4163_v16 = vadd.s32 4294967248, %v11834_v25 }
 0x4a3   : > { %15972 = vst [vmem:[#allocation490_spill] sm:$0xff] %v11831_v56  ;;  %v4135_v56 = vadd.s32 4294967280, %v11834_v25  ;;  %v4245_v42 = vsel %vm4133_vm3, %v4244_v37, %v4240_v11  ;;  %v4327_v11 = vrot.slane %v11545_v2, %v11846_v17 }
 0x4a4   : > { %v11879_v47 = vsub.s32 %v4163_v16, %v15978_v20 }
 0x4a5   : > { %v11836_v26 = vpop.permute.xlu0 %3994  ;;  %v11867_v40 = vsub.s32 %v4135_v56, %v15978_v20 }
 0x4a6   : > { %15974 = vst [vmem:[#allocation491_spill] sm:$0xff] %v11836_v26  ;;  %v11838_v49 = vpop.permute.xlu1 %4003  ;;  %v4149_v26 = vadd.s32 4294967264, %v11834_v25 }
 0x4a7   : > { %15975 = vst [vmem:[#allocation492_spill] sm:$0xff] %v11838_v49 }
 0x4a8   : > { %v11873_v19 = vsub.s32 %v4149_v26, %v15978_v20  ;;  %v4146_v26 = vrot.slane %v11321_v59, %v11864_v36  ;;  %v4184_v59 = vadd.s32 4294967224, %v11834_v25 }
 0x4a9   : > { %v11841_v50 = vpop.permute.xlu0 %4000 }
 0x4aa   : > { %15976 = vst [vmem:[#allocation493_spill] sm:$0xff] %v11841_v50  ;;  %v11843_v34 = vpop.permute.xlu1 %4009  ;;  %v4156_v50 = vadd.s32 4294967256, %v11834_v25  ;;  %v4259_v63 = vrot.slane %v11447_v10, %v11873_v19  ;;  %v11940_v10 = vsub.s32 %v4198_v35, %v15978_v20  ;;  %v4167_v35 = vrot.slane %v11324_v18, %v11879_v47 }
 0x4ab   : > { %15977 = vst [vmem:[#allocation494_spill] sm:$0xff] %v11843_v34  ;;  %v4406_v18 = vrot.slane %v11657_v52, %v11852_v22 }
 0x4ac   : > { %v11882_v56 = vsub.s32 %v4156_v50, %v15978_v20  ;;  %v4249_v50 = vrot.slane %v11433_v41, %v11867_v40  ;;  %v4219_v41 = vadd.s32 4294967184, %v11834_v25 }
 0x4ad   : > { %v11855_v49 = vpop.permute.xlu0 %4006 }
 0x4ae   : > { %15979 = vst [vmem:[#allocation18_spill] sm:$0xff] %v11855_v49  ;;  %v11859_v34 = vpop.permute.xlu1 %4015  ;;  %v15981_v49 = vld [vmem:[#allocation447_spill] sm:$0xff]  ;;  %v4160_v55 = vrot.slane %v11335_v8, %v11882_v56  ;;  %v4254_v8 = vrot.slane %v11422_v38, %v11864_v36 }
 0x4af   : > { %15980 = vst [vmem:[#allocation495_spill] sm:$0xff] %v11859_v34  ;;  %v4127_v14 = vrot.slane %v15981_v49, %v11852_v22  ;;  %v4170_v34 = vadd.s32 4294967240, %v11834_v25 }
 0x4b1   : > { %v11876_v5 = vpop.permute.xlu0 %4012  ;;  %v4134_v49 = vsel %vm4133_vm3, %v4132_v27, %v4127_v14  ;;  %v4191_v14 = vadd.s32 4294967216, %v11834_v25 }
 0x4b2   : > { %15982 = vst [vmem:[#allocation447_spill] sm:$0xff] %v11876_v5  ;;  %v11884_v62 = vpop.permute.xlu1 %4021  ;;  %v15984_v5 = vld [vmem:[#allocation449_spill] sm:$0xff] }
 0x4b3   : > { %15983 = vst [vmem:[#allocation496_spill] sm:$0xff] %v11884_v62  ;;  %v4139_v16 = vrot.slane %v15984_v5, %v11867_v40  ;;  %v11899_v62 = vsub.s32 %v4170_v34, %v15978_v20 }
 0x4b5   : > { %v11905_v27 = vpop.permute.xlu0 %4018  ;;  %v4141_v5 = vsel %vm4140_vm4, %v4139_v16, %v4134_v49  ;;  %v4212_v49 = vadd.s32 4294967192, %v11834_v25  ;;  %v4250_v16 = vsel %vm4140_vm4, %v4249_v50, %v4245_v42  ;;  %v11937_v50 = vsub.s32 %v4205_v28, %v15978_v20 }
 0x4b6   : > { %15985 = vst [vmem:[#allocation449_spill] sm:$0xff] %v11905_v27  ;;  %v11911_v48 = vpop.permute.xlu1 %4027  ;;  %v4148_v34 = vsel %vm14969_vm5, %v4146_v26, %v4141_v5  ;;  %v15987_v27 = vld [vmem:[#allocation372_spill] sm:$0xff]  ;;  %v11927_v26 = vsub.s32 %v4184_v59, %v15978_v20  ;;  %v4174_v2 = vrot.slane %v11349_v58, %v11899_v62  ;;  %v4255_v5 = vsel %vm14969_vm5, %v4254_v8, %v4250_v16 }
 0x4b7   : > { %15986 = vst [vmem:[#allocation497_spill] sm:$0xff] %v11911_v48  ;;  %v4153_v30 = vrot.slane %v15987_v27, %v11873_v19  ;;  %v11924_v48 = vsub.s32 %v4191_v14, %v15978_v20  ;;  %v11943_v14 = vsub.s32 %v4219_v41, %v15978_v20  ;;  %v11956_v28 = vsub.s32 %v4212_v49, %v15978_v20 }
 0x4b8   : > { %v4260_v41 = vsel %vm14968_vm6, %v4259_v63, %v4255_v5  ;;  %v4264_v58 = vrot.slane %v11436_v39, %v11882_v56  ;;  %v11972_v63 = vadd.s32 4294967176, %v11834_v25  ;;  %v4415_v39 = vrot.slane %v11671_v7, %v11867_v40 }
 0x4b9   : > { %v11933_v37 = vpop.permute.xlu0 %4024  ;;  %v4155_v27 = vsel %vm14968_vm6, %v4153_v30, %v4148_v34  ;;  %v4323_v30 = vrot.slane %v11520_v57, %v11852_v22  ;;  %v4337_v57 = vrot.slane %v11559_v53, %v11864_v36  ;;  %v4188_v52 = vrot.slane %v11363_v29, %v11927_v26 }
 0x4ba   : > { %v11945_v59 = vpop.permute.xlu1 %4033  ;;  %v4162_v38 = vsel %vm4161_vm7, %v4160_v55, %v4155_v27  ;;  %v4269_v55 = vrot.slane %v11461_v24, %v11879_v47  ;;  %v4332_v24 = vrot.slane %v11534_v1, %v11867_v40  ;;  %v4265_v8 = vsel %vm4161_vm7, %v4264_v58, %v4260_v41 }
 0x4bb   : > { %v4328_v34 = vsel %vm4133_vm3, %v4327_v11, %v4323_v30  ;;  %v4169_v49 = vsel %vm4168_vm8, %v4167_v35, %v4162_v38  ;;  %v4410_v11 = vrot.slane %v11646_v21, %v11846_v17  ;;  %v4181_v25 = vrot.slane %v11338_v43, %v11894_v0 }
 0x4bc   : > { %v4176_v53 = vsel %vm14966_vm9, %v4174_v2, %v4169_v49  ;;  %v4270_v1 = vsel %vm4168_vm8, %v4269_v55, %v4265_v8  ;;  %v4279_v7 = vrot.slane %v11475_v3, %v11894_v0  ;;  %v4333_v27 = vsel %vm4140_vm4, %v4332_v24, %v4328_v34 }
 0x4bd   : > { %v11968_v42 = vpop.permute.xlu0 %4030  ;;  %v4274_v29 = vrot.slane %v11450_v45, %v11899_v62  ;;  %v4338_v38 = vsel %vm14969_vm5, %v4337_v57, %v4333_v27  ;;  %v4347_v21 = vrot.slane %v11573_v15, %v11882_v56  ;;  %v4411_v2 = vsel %vm4133_vm3, %v4410_v11, %v4406_v18  ;;  %v15988_v27 = vld [vmem:[#allocation462_spill] sm:$0xff] }
 0x4be   : > { %v11978_v16 = vpop.permute.xlu1 %4039  ;;  %v4183_v5 = vsel %vm4182_vm10, %v4181_v25, %v4176_v53  ;;  %v4342_v3 = vrot.slane %v11548_v54, %v11873_v19  ;;  %v4416_v30 = vsel %vm4140_vm4, %v4415_v39, %v4411_v2  ;;  %v4425_v35 = vrot.slane %v11685_v12, %v11873_v19  ;;  %v15990_v2 = vld [vmem:[#allocation352_spill] sm:$0xff] }
 0x4bf   : > { %v4190_v41 = vsel %vm4189_vm11, %v4188_v52, %v4183_v5  ;;  %v4202_v15 = vrot.slane %v11377_v51, %v11940_v10  ;;  %v4275_v55 = vsel %vm14966_vm9, %v4274_v29, %v4270_v1  ;;  %v4420_v58 = vrot.slane %v11660_v13, %v11864_v36 }
 0x4c0   : > { %v4195_v54 = vrot.slane %v11352_v46, %v11924_v48  ;;  %v4280_v34 = vsel %vm4182_vm10, %v4279_v7, %v4275_v55  ;;  %v4289_v12 = vrot.slane %v11489_v60, %v11924_v48  ;;  %v4343_v57 = vsel %vm14968_vm6, %v4342_v3, %v4338_v38  ;;  %v15992_v55 = vld [vmem:[#allocation375_spill] sm:$0xff] }
 0x4c1   : > { %v11998_v43 = vpop.permute.xlu0 %4036  ;;  %v4284_v18 = vrot.slane %v11464_v32, %v11927_v26  ;;  %v4348_v51 = vsel %vm4161_vm7, %v4347_v21, %v4343_v57  ;;  %v4357_v49 = vrot.slane %v11587_v23, %v11899_v62  ;;  %v4421_v13 = vsel %vm14969_vm5, %v4420_v58, %v4416_v30  ;;  %v15993_v57 = vld [vmem:[#allocation458_spill] sm:$0xff] }
 0x4c2   : > { %v12006_v45 = vpop.permute.xlu1 %4045  ;;  %v4197_v46 = vsel %vm4196_vm12, %v4195_v54, %v4190_v41  ;;  %v4352_v60 = vrot.slane %v11562_v61, %v11879_v47  ;;  %v4426_v39 = vsel %vm14968_vm6, %v4425_v35, %v4421_v13  ;;  %v4435_v53 = vrot.slane %v11699_v31, %v11879_v47  ;;  %v15991_v41 = vld [vmem:[#allocation469_spill] sm:$0xff] }
 0x4c3   : > { %v4209_v52 = vrot.slane %v11366_v9, %v11937_v50  ;;  %v4204_v23 = vsel %vm4203_vm13, %v4202_v15, %v4197_v46  ;;  %v4285_v8 = vsel %vm4189_vm11, %v4284_v18, %v4280_v34  ;;  %v4430_v11 = vrot.slane %v11674_v4, %v11882_v56 }
 0x4c4   : > { %v4216_v61 = vrot.slane %v11391_v6, %v11956_v28  ;;  %v4290_v25 = vsel %vm4196_vm12, %v4289_v12, %v4285_v8  ;;  %v4299_v31 = vrot.slane %v11503_v33, %v11937_v50  ;;  %v4353_v1 = vsel %vm4168_vm8, %v4352_v60, %v4348_v51  ;;  %v15989_v6 = vld [vmem:[#allocation460_spill] sm:$0xff] }
 0x4c5   : > { %v12026_v24 = vpop.permute.xlu0 %4042  ;;  %v4294_v9 = vrot.slane %v11478_v44, %v11940_v10  ;;  %v4358_v7 = vsel %vm14966_vm9, %v4357_v49, %v4353_v1  ;;  %v4367_v29 = vrot.slane %v15988_v27, %v11927_v26  ;;  %v4431_v4 = vsel %vm4161_vm7, %v4430_v11, %v4426_v39  ;;  %v15994_v51 = vld [vmem:[#allocation464_spill] sm:$0xff]  ;;  %v15999_v1 = vld [vmem:[#allocation422_spill] sm:$0xff]  ;;  %v16000_v27 = vld [vmem:[#allocation457_spill] sm:$0xff] }
 0x4c6   : > { %v12034_v32 = vpop.permute.xlu1 %4051  ;;  %v4362_v21 = vrot.slane %v15989_v6, %v11894_v0  ;;  %v4436_v33 = vsel %vm4168_vm8, %v4435_v53, %v4431_v4  ;;  %v4445_v5 = vrot.slane %v15990_v2, %v11894_v0  ;;  %v4211_v44 = vsel %vm14971_vm14, %v4209_v52, %v4204_v23  ;;  %v15995_v60 = vld [vmem:[#allocation396_spill] sm:$0xff]  ;;  %v15996_v53 = vld [vmem:[#allocation461_spill] sm:$0xff]  ;;  %v16001_v2 = vld [vmem:[#allocation466_spill] sm:$0xff] }
 0x4c7   : > { %v12066_v30 = vsub.s32 %v11972_v63, %v15978_v20  ;;  %v4295_v35 = vsel %vm4203_vm13, %v4294_v9, %v4290_v25  ;;  %v4440_v15 = vrot.slane %v15991_v41, %v11899_v62  ;;  %v4223_v58 = vrot.slane %v15992_v55, %v11943_v14  ;;  %v15997_v8 = vld [vmem:[#allocation356_spill] sm:$0xff]  ;;  %v15998_v25 = vld [vmem:[#allocation381_spill] sm:$0xff]  ;;  %v16002_v41 = vld [vmem:[#allocation463_spill] sm:$0xff] }
 0x4c8   : > { %v4218_v54 = vsel %vm4217_vm15, %v4216_v61, %v4211_v44  ;;  %v4300_v34 = vsel %vm14971_vm14, %v4299_v31, %v4295_v35  ;;  %v4363_v12 = vsel %vm4182_vm10, %v4362_v21, %v4358_v7  ;;  %v4309_v18 = vrot.slane %v15993_v57, %v11943_v14 }
 0x4c9   : > { %v12054_v38 = vpop.permute.xlu0 %4048  ;;  %v4368_v63 = vsel %vm4189_vm11, %v4367_v29, %v4363_v12  ;;  %v4377_v49 = vrot.slane %v15994_v51, %v11940_v10  ;;  %v4441_v13 = vsel %vm14966_vm9, %v4440_v15, %v4436_v33  ;;  %v4304_v39 = vrot.slane %v15995_v60, %v11956_v28  ;;  %v16007_v60 = vld [vmem:[#allocation424_spill] sm:$0xff] }
 0x4ca   : > { %v12061_v3 = vpop.permute.xlu1 %4057  ;;  %v4372_v52 = vrot.slane %v15996_v53, %v11924_v48  ;;  %v4446_v23 = vsel %vm4182_vm10, %v4445_v5, %v4441_v13  ;;  %v4455_v11 = vrot.slane %v15997_v8, %v11924_v48  ;;  %v4230_v31 = vrot.slane %v15998_v25, %v12066_v30 }
 0x4cb   : > { %vm14970_vm9 = vcmask 1042434   ;;  %v4450_v9 = vrot.slane %v15999_v1, %v11927_v26  ;;  %v4225_v7 = vsel %vm14972_vm2, %v4223_v58, %v4218_v54  ;;  %v4314_v29 = vrot.slane %v16000_v27, %v12066_v30  ;;  %v16003_v58 = vld [vmem:[#allocation361_spill] sm:$0xff] }
 0x4cc   : > { %v4305_v4 = vsel %vm4217_vm15, %v4304_v39, %v4300_v34  ;;  %v4373_v6 = vsel %vm4196_vm12, %v4372_v52, %v4368_v63  ;;  %v4387_v5 = vrot.slane %v16001_v2, %v11956_v28  ;;  %v4382_v15 = vrot.slane %v16002_v41, %v11937_v50  ;;  %v16004_v34 = vld [vmem:[#allocation429_spill] sm:$0xff] }
 0x4cd   : > { %v12082_v46 = vpop.permute.xlu0 %4054  ;;  %v4310_v21 = vsel %vm14972_vm2, %v4309_v18, %v4305_v4  ;;  %v4378_v33 = vsel %vm4203_vm13, %v4377_v49, %v4373_v6  ;;  %v4451_v44 = vsel %vm4189_vm11, %v4450_v9, %v4446_v23  ;;  %v4465_v54 = vrot.slane %v16003_v58, %v11937_v50  ;;  %v16005_v18 = vld [vmem:[#allocation382_spill] sm:$0xff]  ;;  %v16006_v49 = vld [vmem:[#allocation459_spill] sm:$0xff]  ;;  %v16010_v1 = vld [vmem:[#allocation465_spill] sm:$0xff] }
 0x4ce   : > { %v12091_v61 = vpop.permute.xlu1 %4063  ;;  %v4456_v55 = vsel %vm4196_vm12, %v4455_v11, %v4451_v44  ;;  %v4493_v12 = vrot.slane %v16004_v34, %v11846_v17  ;;  %v4236_v63 = vrot.slane %v16005_v18, %v11852_v22  ;;  %v4232_v51 = vsel %vm14978_vm1, %v4230_v31, %v4225_v7  ;;  %v16008_v23 = vld [vmem:[#allocation467_spill] sm:$0xff]  ;;  %v16011_v7 = vld [vmem:[#allocation468_spill] sm:$0xff]  ;;  %v16013_v44 = vld [vmem:[#allocation69_spill] sm:$0xff] }
 0x4cf   : > { %v4319_v13 = vrot.slane %v16006_v49, %v11852_v22  ;;  %v4460_v39 = vrot.slane %v16007_v60, %v11940_v10  ;;  %v4315_v53 = vsel %vm14978_vm1, %v4314_v29, %v4310_v21  ;;  %v4383_v52 = vsel %vm14971_vm14, %v4382_v15, %v4378_v33  ;;  %v16009_v11 = vld [vmem:[#allocation431_spill] sm:$0xff]  ;;  %v16012_v21 = vld [vmem:[#allocation364_spill] sm:$0xff]  ;;  %v16014_v58 = vld [vmem:[#allocation426_spill] sm:$0xff] }
 0x4d0   : > { %v4402_v8 = vrot.slane %v16008_v23, %v11852_v22  ;;  %v4489_v25 = vrot.slane %v16009_v11, %v11852_v22  ;;  %v4392_v9 = vrot.slane %v16010_v1, %v11943_v14  ;;  %v4388_v31 = vsel %vm4217_vm15, %v4387_v5, %v4383_v52  ;;  %v16016_v49 = vld [vmem:[#allocation483_spill] sm:$0xff]  ;;  %v16017_v52 = vld [vmem:[#allocation485_spill] sm:$0xff]  ;;  %v16018_v11 = vld [vmem:[#allocation482_spill] sm:$0xff] }
 0x4d1   : > { %v12107_v35 = vpop.permute.xlu0 %4060  ;;  %v4397_v27 = vrot.slane %v16011_v7, %v12066_v30  ;;  %v4461_v4 = vsel %vm4203_vm13, %v4460_v39, %v4456_v55  ;;  %v4475_v33 = vrot.slane %v16012_v21, %v11943_v14  ;;  %v4503_v41 = vrot.slane %v16013_v44, %v11864_v36  ;;  %v16015_v55 = vld [vmem:[#allocation432_spill] sm:$0xff] }
 0x4d2   : > { %v12116_v57 = vpop.permute.xlu1 %4069  ;;  %v4466_v29 = vsel %vm14971_vm14, %v4465_v54, %v4461_v4  ;;  %v4494_v2 = vsel %vm4133_vm3, %v4493_v12, %v4489_v25  ;;  %v4832_v5 = vsel %vm14967_vm0, %v4319_v13, %v4236_v63  ;;  %v4470_v34 = vrot.slane %v16014_v58, %v11956_v28 }
 0x4d3   : > { %v4498_v18 = vrot.slane %v16015_v55, %v11867_v40  ;;  %v4572_v54 = vrot.slane %v16016_v49, %v11852_v22  ;;  %v12153_v60 = vsel %vm14970_vm9, %v4402_v8, %v4832_v5  ;;  %v4393_v12 = vsel %vm14972_vm2, %v4392_v9, %v4388_v31  ;;  %v16022_v5 = vld [vmem:[#allocation367_spill] sm:$0xff]  ;;  %v16025_v49 = vld [vmem:[#allocation484_spill] sm:$0xff] }
 0x4d4   : > { %v12157_v39 = vsel %vm14967_vm0, %v4315_v53, %v4232_v51  ;;  %v4581_v63 = vrot.slane %v16017_v52, %v11867_v40  ;;  %v4471_v13 = vsel %vm4217_vm15, %v4470_v34, %v4466_v29  ;;  %v4576_v25 = vrot.slane %v16018_v11, %v11846_v17  ;;  %v16019_v51 = vld [vmem:[#allocation428_spill] sm:$0xff]  ;;  %v16020_v29 = vld [vmem:[#allocation471_spill] sm:$0xff]  ;;  %v16023_v34 = vld [vmem:[#allocation369_spill] sm:$0xff] }
 0x4d5   : > { %v12137_v6 = vpop.permute.xlu0 %4066  ;;  %v4499_v23 = vsel %vm4140_vm4, %v4498_v18, %v4494_v2  ;;  %v4659_v1 = vrot.slane %v11933_v37, %v11846_v17  ;;  %v12168_v7 = vsel %vm14978_vm1, %v4397_v27, %v4393_v12  ;;  %v4480_v53 = vrot.slane %v16019_v51, %v12066_v30  ;;  %v16021_v37 = vld [vmem:[#allocation496_spill] sm:$0xff]  ;;  %v16026_v11 = vld [vmem:[#allocation470_spill] sm:$0xff] }
 0x4d6   : > { %v4076_v15 = vpop.permute.xlu1 %4075  ;;  %v12173_v9 = vsel %vm14972_vm2, %v4475_v33, %v4471_v13  ;;  %v4504_v31 = vsel %vm14969_vm5, %v4503_v41, %v4499_v23  ;;  %v4513_v21 = vrot.slane %v16020_v29, %v11882_v56  ;;  %v4577_v2 = vsel %vm4133_vm3, %v4576_v25, %v4572_v54  ;;  %v16024_v41 = vld [vmem:[#allocation487_spill] sm:$0xff] }
 0x4d7   : > { %v4655_v44 = vrot.slane %v16021_v37, %v11852_v22  ;;  %v4485_v58 = vrot.slane %v16022_v5, %v11852_v22  ;;  %v4508_v33 = vrot.slane %v16023_v34, %v11873_v19  ;;  %v4582_v55 = vsel %vm4140_vm4, %v4581_v63, %v4577_v2  ;;  %v16027_v63 = vld [vmem:[#allocation497_spill] sm:$0xff] }
 0x4d8   : > { %v4591_v18 = vrot.slane %v16024_v41, %v11873_v19  ;;  %v4586_v12 = vrot.slane %v16025_v49, %v11864_v36  ;;  %v4669_v52 = vrot.slane %v11968_v42, %v11864_v36  ;;  %v4742_v13 = vrot.slane %v4076_v15, %v11846_v17  ;;  %v16029_v49 = vld [vmem:[#allocation489_spill] sm:$0xff] }
 0x4d9   : > { %v4073_v8 = vpop.permute.xlu0 %4072  ;;  %v4660_v54 = vsel %vm4133_vm3, %v4659_v1, %v4655_v44  ;;  %v4518_v25 = vrot.slane %v16026_v11, %v11879_v47  ;;  %v4664_v29 = vrot.slane %v16027_v63, %v11867_v40  ;;  %v16028_v1 = vld [vmem:[#allocation473_spill] sm:$0xff]  ;;  %vm16032_vm0 = vcmask 523712  }
 0x4da   : > { %v4082_v4 = vpop.permute.xlu1 %4081  ;;  %v4738_v27 = vrot.slane %v4073_v8, %v11852_v22  ;;  %v4509_v8 = vsel %vm14968_vm6, %v4508_v33, %v4504_v31  ;;  %v4523_v44 = vrot.slane %v16028_v1, %v11899_v62  ;;  %v4587_v42 = vsel %vm14969_vm5, %v4586_v12, %v4582_v55 }
 0x4db   : > { %v4514_v34 = vsel %vm4161_vm7, %v4513_v21, %v4509_v8  ;;  %v4592_v41 = vsel %vm14968_vm6, %v4591_v18, %v4587_v42  ;;  %v4601_v31 = vrot.slane %v16029_v49, %v11879_v47  ;;  %v4665_v33 = vsel %vm4140_vm4, %v4664_v29, %v4660_v54  ;;  %v16031_v18 = vld [vmem:[#allocation472_spill] sm:$0xff]  ;;  %v16034_v49 = vld [vmem:[#allocation491_spill] sm:$0xff] }
 0x4dc   : > { %v4743_v15 = vsel %vm4133_vm3, %v4742_v13, %v4738_v27  ;;  %v4670_v21 = vsel %vm14969_vm5, %v4669_v52, %v4665_v33  ;;  %v4679_v8 = vrot.slane %v11998_v43, %v11882_v56  ;;  %v4752_v55 = vrot.slane %v4082_v4, %v11864_v36  ;;  %v16033_v52 = vld [vmem:[#allocation475_spill] sm:$0xff]  ;;  %v16035_v33 = vld [vmem:[#allocation488_spill] sm:$0xff] }
 0x4dd   : > { %v4079_v23 = vpop.permute.xlu0 %4078  ;;  %v4528_v12 = vrot.slane %v16031_v18, %v11894_v0  ;;  %v4519_v13 = vsel %vm4168_vm8, %v4518_v25, %v4514_v34  ;;  %v4674_v54 = vrot.slane %v11945_v59, %v11873_v19  ;;  %v4533_v42 = vrot.slane %v16033_v52, %v11927_v26 }
 0x4de   : > { %v4747_v2 = vrot.slane %v4079_v23, %v11867_v40  ;;  %v4088_v37 = vpop.permute.xlu1 %4087  ;;  %v16030_v23 = vld [vmem:[#allocation486_spill] sm:$0xff]  ;;  %v4524_v1 = vsel %vm16032_vm0, %v4523_v44, %v4519_v13  ;;  %v4611_v25 = vrot.slane %v16034_v49, %v11894_v0  ;;  %vm14977_vm0 = vcmask 1043459  }
 0x4df   : > { %v4596_v63 = vrot.slane %v16030_v23, %v11882_v56  ;;  %v4675_v34 = vsel %vm14968_vm6, %v4674_v54, %v4670_v21  ;;  %v4606_v23 = vrot.slane %v16035_v33, %v11899_v62  ;;  %v4684_v21 = vrot.slane %v11978_v16, %v11879_v47  ;;  %v16037_v54 = vld [vmem:[#allocation477_spill] sm:$0xff] }
 0x4e0   : > { %v4748_v11 = vsel %vm4140_vm4, %v4747_v2, %v4743_v15  ;;  %v4680_v44 = vsel %vm4161_vm7, %v4679_v8, %v4675_v34  ;;  %v4699_v34 = vrot.slane %v12054_v38, %v11927_v26 }
 0x4e1   : > { %v4085_v27 = vpop.permute.xlu0 %4084  ;;  %v4597_v43 = vsel %vm4161_vm7, %v4596_v63, %v4592_v41  ;;  %v4753_v4 = vsel %vm14969_vm5, %v4752_v55, %v4748_v11  ;;  %v4762_v41 = vrot.slane %v4088_v37, %v11882_v56  ;;  %v4529_v55 = vsel %vm4182_vm10, %v4528_v12, %v4524_v1 }
 0x4e2   : > { %v4757_v29 = vrot.slane %v4085_v27, %v11873_v19  ;;  %v4094_v2 = vpop.permute.xlu1 %4093  ;;  %v4602_v15 = vsel %vm4168_vm8, %v4601_v31, %v4597_v43  ;;  %v4689_v27 = vrot.slane %v12026_v24, %v11899_v62  ;;  %v16036_v31 = vld [vmem:[#allocation474_spill] sm:$0xff]  ;;  %v4534_v8 = vsel %vm4189_vm11, %v4533_v42, %v4529_v55  ;;  %v16039_v43 = vld [vmem:[#allocation493_spill] sm:$0xff] }
 0x4e3   : > { %v4538_v63 = vrot.slane %v16036_v31, %v11924_v48  ;;  %v4543_v24 = vrot.slane %v16037_v54, %v11940_v10  ;;  %v4621_v12 = vrot.slane %v16039_v43, %v11924_v48  ;;  %v4685_v1 = vsel %vm4168_vm8, %v4684_v21, %v4680_v44  ;;  %v16045_v54 = vld [vmem:[#allocation492_spill] sm:$0xff] }
 0x4e4   : > { %v4758_v59 = vsel %vm14968_vm6, %v4757_v29, %v4753_v4  ;;  %vm16038_vm6 = vcmask 523712   ;;  %v16040_v4 = vld [vmem:[#allocation490_spill] sm:$0xff]  ;;  %v4694_v44 = vrot.slane %v12006_v45, %v11894_v0 }
 0x4e5   : > { %v4091_v11 = vpop.permute.xlu0 %4090  ;;  %v4607_v37 = vsel %vm16038_vm6, %v4606_v23, %v4602_v15  ;;  %v4763_v29 = vsel %vm4161_vm7, %v4762_v41, %v4758_v59  ;;  %v4616_v49 = vrot.slane %v16040_v4, %v11927_v26  ;;  %vm16041_vm5 = vmmov %vm16038_vm6  ;;  %v4772_v15 = vrot.slane %v4094_v2, %v11899_v62 }
 0x4e6   : > { %v4767_v18 = vrot.slane %v4091_v11, %v11879_v47  ;;  %v4100_v13 = vpop.permute.xlu1 %4099  ;;  %v4612_v52 = vsel %vm4182_vm10, %v4611_v25, %v4607_v37  ;;  %v4690_v42 = vsel %vm16041_vm5, %v4689_v27, %v4685_v1  ;;  %v16042_v25 = vld [vmem:[#allocation476_spill] sm:$0xff]  ;;  %v4539_v23 = vsel %vm4196_vm12, %v4538_v63, %v4534_v8  ;;  %v16043_v27 = vld [vmem:[#allocation479_spill] sm:$0xff] }
 0x4e7   : > { %v4548_v33 = vrot.slane %v16042_v25, %v11937_v50  ;;  %v4544_v31 = vsel %vm4203_vm13, %v4543_v24, %v4539_v23  ;;  %v4553_v55 = vrot.slane %v16043_v27, %v11956_v28  ;;  %v4617_v38 = vsel %vm4189_vm11, %v4616_v49, %v4612_v52 }
 0x4e8   : > { %v4768_v16 = vsel %vm4168_vm8, %v4767_v18, %v4763_v29  ;;  %v4622_v21 = vsel %vm4196_vm12, %v4621_v12, %v4617_v38  ;;  %v16044_v18 = vld [vmem:[#allocation18_spill] sm:$0xff]  ;;  %v4695_v8 = vsel %vm4182_vm10, %v4694_v44, %v4690_v42  ;;  %v4626_v37 = vrot.slane %v16045_v54, %v11940_v10  ;;  %v16046_v42 = vld [vmem:[#allocation447_spill] sm:$0xff] }
 0x4e9   : > { %v4097_v59 = vpop.permute.xlu0 %4096  ;;  %v4773_v2 = vsel %vm16041_vm5, %v4772_v15, %v4768_v16  ;;  %v4631_v63 = vrot.slane %v16044_v18, %v11937_v50  ;;  %v4700_v24 = vsel %vm4189_vm11, %v4699_v34, %v4695_v8  ;;  %v4709_v29 = vrot.slane %v12082_v46, %v11940_v10 }
 0x4ea   : > { %v4777_v41 = vrot.slane %v4097_v59, %v11894_v0  ;;  %v4106_v11 = vpop.permute.xlu1 %4105  ;;  %v4782_v52 = vrot.slane %v4100_v13, %v11927_v26  ;;  %v4821_v12 = vsel %vm14970_vm9, %v12168_v7, %v12157_v39  ;;  %v4481_v1 = vsel %vm14978_vm1, %v4480_v53, %v12173_v9  ;;  %v16047_v59 = vld [vmem:[#allocation478_spill] sm:$0xff] }
 0x4eb   : > { %vm14976_vm6 = vcmask 1044484   ;;  %v4704_v16 = vrot.slane %v12034_v32, %v11924_v48  ;;  %v4834_v46 = vsel %vm14977_vm0, %v4485_v58, %v12153_v60  ;;  %v4549_v39 = vsel %vm14971_vm14, %v4548_v33, %v4544_v31  ;;  %v16048_v33 = vld [vmem:[#allocation494_spill] sm:$0xff]  ;;  %v16049_v31 = vld [vmem:[#allocation480_spill] sm:$0xff] }
 0x4ec   : > { %v4778_v45 = vsel %vm4182_vm10, %v4777_v41, %v4773_v2  ;;  %v4627_v7 = vsel %vm4203_vm13, %v4626_v37, %v4622_v21  ;;  %v4554_v53 = vsel %vm4217_vm15, %v4553_v55, %v4549_v39  ;;  %v4641_v5 = vrot.slane %v16046_v42, %v11943_v14  ;;  %v16050_v55 = vld [vmem:[#allocation481_spill] sm:$0xff] }
 0x4ed   : > { %v4103_v43 = vpop.permute.xlu0 %4102  ;;  %v4783_v51 = vsel %vm4189_vm11, %v4782_v52, %v4778_v45  ;;  %v4632_v9 = vsel %vm14971_vm14, %v4631_v63, %v4627_v7  ;;  %v4705_v32 = vsel %vm4196_vm12, %v4704_v16, %v4700_v24  ;;  %v4719_v58 = vrot.slane %v12107_v35, %v11956_v28  ;;  %v16051_v24 = vld [vmem:[#allocation495_spill] sm:$0xff]  ;;  %v16052_v52 = vld [vmem:[#allocation449_spill] sm:$0xff] }
 0x4ee   : > { %v4787_v4 = vrot.slane %v4103_v43, %v11924_v48  ;;  %v4112_v13 = vpop.permute.xlu1 %4111  ;;  %v4710_v60 = vsel %vm4203_vm13, %v4709_v29, %v4705_v32  ;;  %v4792_v34 = vrot.slane %v4106_v11, %v11940_v10  ;;  %v4558_v25 = vrot.slane %v16047_v59, %v11943_v14 }
 0x4ef   : > { %v4636_v23 = vrot.slane %v16048_v33, %v11956_v28  ;;  %v4714_v44 = vrot.slane %v12061_v3, %v11937_v50  ;;  %v4568_v27 = vrot.slane %v16049_v31, %v11852_v22  ;;  %v4563_v35 = vrot.slane %v16050_v55, %v12066_v30 }
 0x4f0   : > { %v4788_v49 = vsel %vm4196_vm12, %v4787_v4, %v4783_v51  ;;  %vm14975_vm5 = vcmask 1045509   ;;  %v4559_v38 = vsel %vm14972_vm2, %v4558_v25, %v4554_v53  ;;  %v4729_v8 = vrot.slane %v12137_v6, %v12066_v30 }
 0x4f1   : > { %v4109_v15 = vpop.permute.xlu0 %4108  ;;  %v4793_v11 = vsel %vm4203_vm13, %v4792_v34, %v4788_v49  ;;  %v4637_v2 = vsel %vm4217_vm15, %v4636_v23, %v4632_v9  ;;  %v4715_v21 = vsel %vm14971_vm14, %v4714_v44, %v4710_v60  ;;  %v4802_v45 = vrot.slane %v4112_v13, %v11956_v28  ;;  %v7638_v44 = vld [vmem:[#allocation7] sm:$0xff] }
 0x4f2   : > { %v4797_v41 = vrot.slane %v4109_v15, %v11937_v50  ;;  %v4642_v3 = vsel %vm14972_vm2, %v4641_v5, %v4637_v2  ;;  %v4720_v63 = vsel %vm4217_vm15, %v4719_v58, %v4715_v21  ;;  %v4118_v54 = vpop.permute.xlu1 %4117  ;;  %v4646_v29 = vrot.slane %v16051_v24, %v12066_v30  ;;  %v16057_v21 = vld [vmem:[#allocation243_spill] sm:$0xff]  ;;  %v16061_v24 = vld [vmem:[#allocation212_spill] sm:$0xff] }
 0x4f3   : > { %v4651_v43 = vrot.slane %v16052_v52, %v11852_v22  ;;  %v4724_v16 = vrot.slane %v12091_v61, %v11943_v14  ;;  %v4564_v39 = vsel %vm14978_vm1, %v4563_v35, %v4559_v38  ;;  %v4734_v6 = vrot.slane %v12116_v57, %v11852_v22  ;;  %v16055_v35 = vld [vmem:[#allocation233_spill] sm:$0xff]  ;;  %v16056_v38 = vld [vmem:[#allocation200_spill] sm:$0xff] }
 0x4f4   : > { %v4798_v18 = vsel %vm14971_vm14, %v4797_v41, %v4793_v11  ;;  %vm14974_vm9 = vcmask 1046534   ;;  %v4812_v51 = vrot.slane %v4118_v54, %v12066_v30  ;;  %v4647_v13 = vsel %vm14978_vm1, %v4646_v29, %v4642_v3  ;;  %v16058_v3 = vld [vmem:[#allocation206_spill] sm:$0xff]  ;;  %v16062_v52 = vld [vmem:[#allocation256_spill] sm:$0xff] }
 0x4f5   : > { %v4115_v37 = vpop.permute.xlu0 %4114  ;;  %v4803_v7 = vsel %vm4217_vm15, %v4802_v45, %v4798_v18  ;;  %v4725_v53 = vsel %vm14972_vm2, %v4724_v16, %v4720_v63  ;;  %v4835_v61 = vsel %vm14976_vm6, %v4568_v27, %v4834_v46  ;;  %vm14973_vm14 = vcmask 1047559   ;;  %v16054_v27 = vld [vmem:[#allocation19_spill] sm:$0xff]  ;;  %v16060_v54 = vld [vmem:[#allocation250_spill] sm:$0xff] }
 0x4f6   : > { %v4807_v4 = vrot.slane %v4115_v37, %v11943_v14  ;;  %v4730_v49 = vsel %vm14978_vm1, %v4729_v8, %v4725_v53  ;;  %v4823_v42 = vsel %vm14977_vm0, %v4481_v1, %v4821_v12  ;;  %v4836_v5 = vsel %vm14975_vm5, %v4651_v43, %v4835_v61  ;;  %v16063_v16 = vld [vmem:[#allocation207_spill] sm:$0xff] }
 0x4f7   : > { %v4825_v58 = vsel %vm14976_vm6, %v4564_v39, %v4823_v42  ;;  %v4837_v34 = vsel %vm14974_vm9, %v4734_v6, %v4836_v5  ;;  %v16059_v8 = vsub.s32 1, %v15978_v20  ;;  %v16064_v39 = vld [vmem:[#allocation262_spill] sm:$0xff]  ;;  %v16069_v42 = vld [vmem:[#allocation225_spill] sm:$0xff]  ;;  %v16070_v5 = vld [vmem:[#allocation284_spill] sm:$0xff] }
 0x4f8   : > { %v4808_v9 = vsel %vm14972_vm2, %v4807_v4, %v4803_v7  ;;  %v4827_v15 = vsel %vm14975_vm5, %v4647_v13, %v4825_v58  ;;  %vm16053_vm2 = vcmask 15360   ;;  %v16065_v7 = vld [vmem:[#allocation218_spill] sm:$0xff]  ;;  %v16066_v13 = vld [vmem:[#allocation269_spill] sm:$0xff]  ;;  %v16071_v58 = vld [vmem:[#allocation219_spill] sm:$0xff] }
 0x4f9   : > { %v4121_v32 = vpop.permute.xlu0 %4120  ;;  %v4813_v60 = vsel %vm14978_vm1, %v4812_v51, %v4808_v9  ;;  %v4829_v59 = vsel %vm14974_vm9, %v4730_v49, %v4827_v15  ;;  %v16067_v9 = vld [vmem:[#allocation213_spill] sm:$0xff]  ;;  %v16072_v15 = vld [vmem:[#allocation292_spill] sm:$0xff] }
 0x4fa   : > { %v4817_v57 = vrot.slane %v4121_v32, %v11852_v22  ;;  %v4831_v12 = vsel %vm14973_vm14, %v4813_v60, %v4829_v59  ;;  %v16068_v32 = vld [vmem:[#allocation276_spill] sm:$0xff]  ;;  %v16073_v59 = vld [vmem:[#allocation227_spill] sm:$0xff] }
 0x4fc   : > { %v4838_v46 = vsel %vm14973_vm14, %v4817_v57, %v4837_v34  ;;  %vm16189_vm14 = vcmask 326912  }
 0x4fd   : > { %v4841_v25 = vsel %vm16053_vm2, %v4838_v46, 0.0  ;;  %6367 = vmatprep.subr.mxu0 %v4838_v46  ;;  %7395 = vmatprep.subr.mxu1 %v4838_v46  ;;  %vm16188_vm2 = vcmask 261312  }
 0x4fe   : > { %6368 = vmatpush1.msra.mxu0 %v4831_v12  ;;  %7396 = vmatpush1.msra.mxu1 %v4831_v12  ;;  %v4842_v1 = vadd.f32 %v4841_v25, %v4831_v12  ;;  %v16074_v12 = vld [vmem:[#allocation297_spill] sm:$0xff] }
 0x500   : > { %4843 = vadd.xlane.f32.xlu1 %v4842_v1 }
 0x58d   : > { %v4844_v33 = vpop.xlane.xlu1 %4843 }
 0x58e   : > { %7500 = vrcp.f32 %v4844_v33  ;;  %v16075_v33 = vld [vmem:[#allocation242_spill] sm:$0xff] }
 0x598   : > { %v7501_v23 = vpop.eup %7500 }
 0x599   : > { %v4846_v41 = vmul.f32 %v7638_v44, %v7501_v23  ;;  %v4861_v44 = vsub.s32 2, %v15978_v20 }
 0x59b   : > { %4849 = vperm.xlu0 %7497, %v4846_v41   ;;  %v16076_v41 = vld [vmem:[#allocation302_spill] sm:$0xff] }
 0x61a   : > { %v12361_v31 = vpop.permute.xlu0 %4849 }
 0x61b   : > { %v4854_v55 = vrot.slane %v12361_v31, %v16054_v27  ;;  %v12372_v45 = vrot.slane %v12361_v31, %v16059_v8 }
 0x61d   : > { %v4899_v11 = vmul.f32 %v4854_v55, %v16055_v35  ;;  %v4891_v2 = vmul.f32 %v4854_v55, %v16056_v38  ;;  %v4904_v18 = vmul.f32 %v4854_v55, %v16057_v21  ;;  %v4892_v63 = vmul.f32 %v4854_v55, %v16058_v3  ;;  %v16077_v35 = vld [vmem:[#allocation236_spill] sm:$0xff] }
 0x61e   : > { %v4906_v37 = vmul.f32 %v4854_v55, %v16060_v54  ;;  %v4893_v29 = vmul.f32 %v4854_v55, %v16061_v24  ;;  %v4908_v43 = vmul.f32 %v12372_v45, %v16062_v52  ;;  %v4894_v4 = vmul.f32 %v4854_v55, %v16063_v16  ;;  %v16081_v54 = vld [vmem:[#allocation254_spill] sm:$0xff]  ;;  %v16082_v24 = vld [vmem:[#allocation320_spill] sm:$0xff] }
 0x61f   : > { %5188 = vperm.xlu1 %7498, %v4899_v11   ;;  %5164 = vperm.xlu0 %7497, %v4891_v2   ;;  %v4910_v6 = vmul.f32 %v12372_v45, %v16064_v39  ;;  %v4895_v51 = vmul.f32 %v4854_v55, %v16065_v7  ;;  %v4912_v53 = vmul.f32 %v12372_v45, %v16066_v13  ;;  %v16078_v2 = vld [vmem:[#allocation308_spill] sm:$0xff]  ;;  %v16084_v16 = vld [vmem:[#allocation326_spill] sm:$0xff]  ;;  %v16086_v7 = vld [vmem:[#allocation327_spill] sm:$0xff] }
 0x620   : > { %v4896_v61 = vmul.f32 %v4854_v55, %v16067_v9  ;;  %v4914_v49 = vmul.f32 %v12372_v45, %v16068_v32  ;;  %v4897_v57 = vmul.f32 %v4854_v55, %v16069_v42  ;;  %v4916_v60 = vmul.f32 %v12372_v45, %v16070_v5  ;;  %v16083_v52 = vld [vmem:[#allocation260_spill] sm:$0xff]  ;;  %v16085_v39 = vld [vmem:[#allocation266_spill] sm:$0xff] }
 0x621   : > { %v4898_v34 = vmul.f32 %v4854_v55, %v16071_v58  ;;  %v4918_v46 = vmul.f32 %v12372_v45, %v16072_v15  ;;  %v4900_v25 = vmul.f32 %v4854_v55, %v16073_v59  ;;  %v4920_v1 = vmul.f32 %v12372_v45, %v16074_v12  ;;  %v16087_v13 = vld [vmem:[#allocation274_spill] sm:$0xff]  ;;  %v16092_v58 = vld [vmem:[#allocation201_spill] sm:$0xff] }
 0x622   : > { %v4901_v23 = vmul.f32 %v4854_v55, %v16075_v33  ;;  %v4922_v27 = vmul.f32 %v12372_v45, %v16076_v41  ;;  %v4902_v11 = vmul.f32 %v4854_v55, %v16077_v35  ;;  %v12402_v38 = vrot.slane %v12361_v31, %v4861_v44  ;;  %v16088_v9 = vld [vmem:[#allocation330_spill] sm:$0xff]  ;;  %v16094_v12 = vld [vmem:[#allocation49_spill] sm:$0xff]  ;;  %v16095_v33 = vld [vmem:[#allocation299_spill] sm:$0xff] }
 0x623   : > { %5203 = vperm.xlu1 %7498, %v4904_v18   ;;  %5167 = vperm.xlu0 %7497, %v4892_v63   ;;  %v4924_v21 = vmul.f32 %v12372_v45, %v16078_v2  ;;  %v16079_v18 = vld [vmem:[#allocation246_spill] sm:$0xff]  ;;  %v4869_v59 = vsub.s32 4, %v15978_v20  ;;  %v16096_v41 = vld [vmem:[#allocation344_spill] sm:$0xff]  ;;  %v4873_v2 = vsub.s32 5, %v15978_v20 }
 0x624   : > { %v4903_v3 = vmul.f32 %v4854_v55, %v16079_v18  ;;  %v16080_v63 = vld [vmem:[#allocation314_spill] sm:$0xff] }
 0x625   : > { %v4926_v8 = vmul.f32 %v12402_v38, %v16080_v63  ;;  %v16093_v15 = vld [vmem:[#allocation294_spill] sm:$0xff]  ;;  %v12443_v44 = vrot.slane %v12361_v31, %v4869_v59 }
 0x626   : > { %v16097_v35 = vld [vmem:[#allocation306_spill] sm:$0xff] }
 0x627   : > { %5209 = vperm.xlu1 %7498, %v4906_v37   ;;  %5170 = vperm.xlu0 %7497, %v4893_v29   ;;  %v4905_v37 = vmul.f32 %v4854_v55, %v16081_v54  ;;  %v4928_v29 = vmul.f32 %v12402_v38, %v16082_v24  ;;  %v16100_v54 = vld [vmem:[#allocation342_spill] sm:$0xff] }
 0x628   : > { %v16101_v24 = vld [vmem:[#allocation318_spill] sm:$0xff] }
 0x629   : > { %v16112_v59 = vld [vmem:[#allocation102_spill] sm:$0xff] }
 0x62b   : > { %5215 = vperm.xlu1 %7498, %v4908_v43   ;;  %5173 = vperm.xlu0 %7497, %v4894_v4   ;;  %v4907_v43 = vmul.f32 %v4854_v55, %v16083_v52  ;;  %v4930_v4 = vmul.f32 %v12402_v38, %v16084_v16  ;;  %v4934_v55 = vmul.f32 %v12402_v38, %v16088_v9  ;;  %v16102_v52 = vld [vmem:[#allocation388_spill] sm:$0xff] }
 0x62c   : > { %v16103_v16 = vld [vmem:[#allocation324_spill] sm:$0xff] }
 0x62f   : > { %5221 = vperm.xlu1 %7498, %v4910_v6   ;;  %5176 = vperm.xlu0 %7497, %v4895_v51   ;;  %v4909_v6 = vmul.f32 %v12372_v45, %v16085_v39  ;;  %v4932_v51 = vmul.f32 %v12402_v38, %v16086_v7  ;;  %v16104_v39 = vld [vmem:[#allocation349_spill] sm:$0xff]  ;;  %v16105_v7 = vld [vmem:[#allocation267_spill] sm:$0xff] }
 0x633   : > { %5227 = vperm.xlu1 %7498, %v4912_v53   ;;  %5179 = vperm.xlu0 %7497, %v4896_v61   ;;  %v4911_v53 = vmul.f32 %v12372_v45, %v16087_v13  ;;  %v16089_v61 = vld [vmem:[#allocation282_spill] sm:$0xff] }
 0x634   : > { %v4913_v32 = vmul.f32 %v12372_v45, %v16089_v61 }
 0x637   : > { %5233 = vperm.xlu1 %7498, %v4914_v49   ;;  %5182 = vperm.xlu0 %7497, %v4897_v57   ;;  %v16090_v49 = vld [vmem:[#allocation333_spill] sm:$0xff] }
 0x638   : > { %v4936_v42 = vmul.f32 %v12402_v38, %v16090_v49  ;;  %v16091_v57 = vld [vmem:[#allocation289_spill] sm:$0xff] }
 0x639   : > { %v4915_v5 = vmul.f32 %v12372_v45, %v16091_v57 }
 0x63b   : > { %5239 = vperm.xlu1 %7498, %v4916_v60   ;;  %5185 = vperm.xlu0 %7497, %v4898_v34   ;;  %v4865_v60 = vsub.s32 3, %v15978_v20  ;;  %v4938_v34 = vmul.f32 %v12402_v38, %v16092_v58 }
 0x63f   : > { %5245 = vperm.xlu1 %7498, %v4918_v46   ;;  %5191 = vperm.xlu0 %7497, %v4900_v25   ;;  %v4917_v46 = vmul.f32 %v12372_v45, %v16093_v15  ;;  %v12436_v25 = vrot.slane %v12361_v31, %v4865_v60  ;;  %v16110_v60 = vld [vmem:[#allocation374_spill] sm:$0xff] }
 0x640   : > { %v4963_v58 = vmul.f32 %v12443_v44, %v16110_v60 }
 0x643   : > { %5251 = vperm.xlu1 %7498, %v4920_v1   ;;  %5194 = vperm.xlu0 %7497, %v4901_v23   ;;  %v4940_v1 = vmul.f32 %v12402_v38, %v16094_v12  ;;  %v4919_v23 = vmul.f32 %v12372_v45, %v16095_v33 }
 0x647   : > { %5257 = vperm.xlu1 %7498, %v4922_v27   ;;  %5197 = vperm.xlu0 %7497, %v4902_v11   ;;  %v4943_v27 = vmul.f32 %v12436_v25, %v16096_v41  ;;  %v4921_v11 = vmul.f32 %v12372_v45, %v16097_v35  ;;  %v16115_v41 = vld [vmem:[#allocation341_spill] sm:$0xff]  ;;  %v16116_v35 = vld [vmem:[#allocation376_spill] sm:$0xff] }
 0x64b   : > { %5263 = vperm.xlu1 %7498, %v4924_v21   ;;  %5200 = vperm.xlu0 %7497, %v4903_v3   ;;  %v16098_v21 = vld [vmem:[#allocation450_spill] sm:$0xff]  ;;  %v16099_v3 = vld [vmem:[#allocation312_spill] sm:$0xff] }
 0x64c   : > { %v4959_v18 = vmul.f32 %v12443_v44, %v16098_v21  ;;  %v4923_v63 = vmul.f32 %v12372_v45, %v16099_v3  ;;  %v4877_v45 = vsub.s32 6, %v15978_v20  ;;  %v16118_v21 = vld [vmem:[#allocation404_spill] sm:$0xff]  ;;  %v16119_v3 = vld [vmem:[#allocation345_spill] sm:$0xff] }
 0x64e   : > { %v12471_v13 = vrot.slane %v12361_v31, %v4877_v45  ;;  %v16124_v45 = vld [vmem:[#allocation370_spill] sm:$0xff] }
 0x64f   : > { %5269 = vperm.xlu1 %7498, %v4926_v8   ;;  %5206 = vperm.xlu0 %7497, %v4905_v37   ;;  %v12455_v8 = vrot.slane %v12361_v31, %v4873_v2  ;;  %v4945_v37 = vmul.f32 %v12436_v25, %v16100_v54  ;;  %v16120_v54 = vld [vmem:[#allocation441_spill] sm:$0xff] }
 0x650   : > { %v4995_v12 = vmul.f32 %v12471_v13, %v16112_v59  ;;  %v16132_v59 = vld [vmem:[#allocation403_spill] sm:$0xff] }
 0x653   : > { %5275 = vperm.xlu1 %7498, %v4928_v29   ;;  %5212 = vperm.xlu0 %7497, %v4907_v43   ;;  %v4925_v29 = vmul.f32 %v12402_v38, %v16101_v24  ;;  %v4976_v43 = vmul.f32 %v12455_v8, %v16102_v52  ;;  %v16121_v24 = vld [vmem:[#allocation452_spill] sm:$0xff] }
 0x657   : > { %5281 = vperm.xlu1 %7498, %v4930_v4   ;;  %5218 = vperm.xlu0 %7497, %v4909_v6   ;;  %v4927_v4 = vmul.f32 %v12402_v38, %v16103_v16  ;;  %v4946_v6 = vmul.f32 %v12436_v25, %v16104_v39  ;;  %v16123_v16 = vld [vmem:[#allocation103_spill] sm:$0xff]  ;;  %v4961_v39 = vmul.f32 %v12443_v44, %v16124_v45  ;;  %v16140_v45 = vld [vmem:[#allocation380_spill] sm:$0xff] }
 0x65b   : > { %5287 = vperm.xlu1 %7498, %v4932_v51   ;;  %5224 = vperm.xlu0 %7497, %v4911_v53   ;;  %v4929_v51 = vmul.f32 %v12402_v38, %v16105_v7  ;;  %v16106_v53 = vld [vmem:[#allocation390_spill] sm:$0xff] }
 0x65c   : > { %v4978_v9 = vmul.f32 %v12455_v8, %v16106_v53 }
 0x65f   : > { %5293 = vperm.xlu1 %7498, %v4934_v55   ;;  %5230 = vperm.xlu0 %7497, %v4913_v32   ;;  %v16107_v55 = vld [vmem:[#allocation329_spill] sm:$0xff]  ;;  %v16108_v32 = vld [vmem:[#allocation402_spill] sm:$0xff] }
 0x660   : > { %v4931_v61 = vmul.f32 %v12402_v38, %v16107_v55  ;;  %v4994_v49 = vmul.f32 %v12471_v13, %v16108_v32 }
 0x663   : > { %5299 = vperm.xlu1 %7498, %v4936_v42   ;;  %5236 = vperm.xlu0 %7497, %v4915_v5   ;;  %v16109_v42 = vld [vmem:[#allocation332_spill] sm:$0xff]  ;;  %v4881_v5 = vsub.s32 7, %v15978_v20  ;;  %v16114_v20 = vld [vmem:[#allocation418_spill] sm:$0xff] }
 0x664   : > { %v4933_v57 = vmul.f32 %v12402_v38, %v16109_v42 }
 0x667   : > { %5305 = vperm.xlu1 %7498, %v4938_v34   ;;  %5242 = vperm.xlu0 %7497, %v4917_v46   ;;  %v16111_v34 = vld [vmem:[#allocation455_spill] sm:$0xff]  ;;  %v12487_v46 = vrot.slane %v12361_v31, %v4881_v5  ;;  %v4964_v31 = vmul.f32 %v12443_v44, %v16116_v35 }
 0x668   : > { %v4935_v15 = vmul.f32 %v12402_v38, %v16111_v34  ;;  %v16131_v34 = vld [vmem:[#allocation405_spill] sm:$0xff] }
 0x66b   : > { %5311 = vperm.xlu1 %7498, %v4940_v1   ;;  %5248 = vperm.xlu0 %7497, %v4919_v23   ;;  %v16113_v1 = vld [vmem:[#allocation456_spill] sm:$0xff]  ;;  %v5011_v23 = vmul.f32 %v12487_v46, %v16114_v20  ;;  %v16133_v20 = vld [vmem:[#allocation443_spill] sm:$0xff] }
 0x66c   : > { %v4937_v33 = vmul.f32 %v12402_v38, %v16113_v1 }
 0x66f   : > { %5320 = vperm.xlu1 %7498, %v4943_v27   ;;  %5254 = vperm.xlu0 %7497, %v4921_v11   ;;  %v4939_v27 = vmul.f32 %v12402_v38, %v16115_v41  ;;  %v16117_v11 = vld [vmem:[#allocation248_spill] sm:$0xff]  ;;  %v16134_v41 = vld [vmem:[#allocation439_spill] sm:$0xff] }
 0x670   : > { %v4942_v2 = vmul.f32 %v12436_v25, %v16117_v11  ;;  %v16135_v11 = vld [vmem:[#allocation389_spill] sm:$0xff] }
 0x673   : > { %5368 = vperm.xlu1 %7498, %v4959_v18   ;;  %5260 = vperm.xlu0 %7497, %v4923_v63   ;;  %v4996_v18 = vmul.f32 %v12471_v13, %v16118_v21  ;;  %v4944_v63 = vmul.f32 %v12436_v25, %v16119_v3  ;;  %v16136_v21 = vld [vmem:[#allocation387_spill] sm:$0xff] }
 0x677   : > { %5326 = vperm.xlu1 %7498, %v4945_v37   ;;  %5266 = vperm.xlu0 %7497, %v4925_v29   ;;  %v4949_v37 = vmul.f32 %v12436_v25, %v16120_v54  ;;  %v4960_v29 = vmul.f32 %v12443_v44, %v16121_v24  ;;  %v16137_v54 = vld [vmem:[#allocation338_spill] sm:$0xff]  ;;  %v16138_v24 = vld [vmem:[#allocation417_spill] sm:$0xff] }
 0x67b   : > { %5419 = vperm.xlu1 %7498, %v4976_v43   ;;  %5272 = vperm.xlu0 %7497, %v4927_v4   ;;  %v4981_v4 = vmul.f32 %v12455_v8, %v16123_v16 }
 0x67f   : > { %5329 = vperm.xlu1 %7498, %v4946_v6   ;;  %5278 = vperm.xlu0 %7497, %v4929_v51   ;;  %v16126_v51 = vld [vmem:[#allocation420_spill] sm:$0xff] }
 0x680   : > { %v5013_v53 = vmul.f32 %v12487_v46, %v16126_v51  ;;  %v16141_v51 = vld [vmem:[#allocation353_spill] sm:$0xff] }
 0x683   : > { %5425 = vperm.xlu1 %7498, %v4978_v9   ;;  %5284 = vperm.xlu0 %7497, %v4931_v61   ;;  %v16127_v9 = vld [vmem:[#allocation385_spill] sm:$0xff] }
 0x684   : > { %v4977_v55 = vmul.f32 %v12455_v8, %v16127_v9 }
 0x687   : > { %5473 = vperm.xlu1 %7498, %v4994_v49   ;;  %5290 = vperm.xlu0 %7497, %v4933_v57   ;;  %v16129_v49 = vld [vmem:[#allocation373_spill] sm:$0xff] }
 0x688   : > { %v4966_v42 = vmul.f32 %v12443_v44, %v16129_v49  ;;  %v16130_v57 = vld [vmem:[#allocation453_spill] sm:$0xff]  ;;  %v16144_v49 = vld [vmem:[#allocation407_spill] sm:$0xff] }
 0x689   : > { %v4962_v5 = vmul.f32 %v12443_v44, %v16130_v57  ;;  %v16145_v57 = vld [vmem:[#allocation392_spill] sm:$0xff] }
 0x68b   : > { %5380 = vperm.xlu1 %7498, %v4963_v58   ;;  %5296 = vperm.xlu0 %7497, %v4935_v15   ;;  %v4998_v15 = vmul.f32 %v12471_v13, %v16131_v34 }
 0x68f   : > { %5476 = vperm.xlu1 %7498, %v4995_v12   ;;  %5302 = vperm.xlu0 %7497, %v4937_v33   ;;  %v4993_v12 = vmul.f32 %v12471_v13, %v16132_v59  ;;  %v16148_v59 = vld [vmem:[#allocation445_spill] sm:$0xff] }
 0x693   : > { %5524 = vperm.xlu1 %7498, %v5011_v23   ;;  %5308 = vperm.xlu0 %7497, %v4939_v27   ;;  %v4951_v23 = vmul.f32 %v12436_v25, %v16133_v20  ;;  %v4947_v27 = vmul.f32 %v12436_v25, %v16134_v41  ;;  %v16149_v20 = vld [vmem:[#allocation183_spill] sm:$0xff] }
 0x697   : > { %5383 = vperm.xlu1 %7498, %v4964_v31   ;;  %5317 = vperm.xlu0 %7497, %v4942_v2   ;;  %v4983_v2 = vmul.f32 %v12455_v8, %v16135_v11  ;;  %v16152_v11 = vld [vmem:[#allocation391_spill] sm:$0xff] }
 0x69b   : > { %5479 = vperm.xlu1 %7498, %v4996_v18   ;;  %5323 = vperm.xlu0 %7497, %v4944_v63   ;;  %v4979_v18 = vmul.f32 %v12455_v8, %v16136_v21  ;;  %v16153_v21 = vld [vmem:[#allocation371_spill] sm:$0xff] }
 0x69e   : > { %v12509_v52 = vpop.permute.xlu1 %5188  ;;  %v12511_v43 = vpop.permute.xlu0 %5164 }
 0x69f   : > { %16122 = vst [vmem:[#allocation372_spill] sm:$0xff] %v12509_v52  ;;  %5338 = vperm.xlu1 %7498, %v4949_v37   ;;  %5371 = vperm.xlu0 %7497, %v4960_v29   ;;  %v5015_v37 = vmul.f32 %v12487_v46, %v16137_v54  ;;  %v5010_v29 = vmul.f32 %v12487_v46, %v16138_v24  ;;  %v16156_v24 = vld [vmem:[#allocation419_spill] sm:$0xff] }
 0x6a2   : > { %v12517_v6 = vpop.permute.xlu1 %5203  ;;  %v12519_v7 = vpop.permute.xlu0 %5167 }
 0x6a3   : > { %16125 = vst [vmem:[#allocation462_spill] sm:$0xff] %v12517_v6  ;;  %5434 = vperm.xlu1 %7498, %v4981_v4   ;;  %5374 = vperm.xlu0 %7497, %v4961_v39   ;;  %v4968_v39 = vmul.f32 %v12443_v44, %v16140_v45  ;;  %v16157_v45 = vld [vmem:[#allocation406_spill] sm:$0xff]  ;;  %v16174_v6 = vld [vmem:[#allocation393_spill] sm:$0xff] }
 0x6a6   : > { %v12525_v61 = vpop.permute.xlu1 %5209  ;;  %v12527_v32 = vpop.permute.xlu0 %5170 }
 0x6a7   : > { %16128 = vst [vmem:[#allocation460_spill] sm:$0xff] %v12525_v61  ;;  %5530 = vperm.xlu1 %7498, %v5013_v53   ;;  %5422 = vperm.xlu0 %7497, %v4977_v55   ;;  %v4948_v53 = vmul.f32 %v12436_v25, %v16141_v51  ;;  %v16171_v61 = vld [vmem:[#allocation362_spill] sm:$0xff] }
 0x6aa   : > { %v12533_v60 = vpop.permute.xlu1 %5215  ;;  %v12535_v58 = vpop.permute.xlu0 %5173 }
 0x6ab   : > { %5389 = vperm.xlu1 %7498, %v4966_v42   ;;  %5377 = vperm.xlu0 %7497, %v4962_v5   ;;  %v5000_v42 = vmul.f32 %v12471_v13, %v16144_v49  ;;  %v4980_v5 = vmul.f32 %v12455_v8, %v16145_v57  ;;  %v16159_v49 = vld [vmem:[#allocation379_spill] sm:$0xff]  ;;  %v16160_v57 = vld [vmem:[#allocation357_spill] sm:$0xff] }
 0x6ae   : > { %v12541_v1 = vpop.permute.xlu1 %5221  ;;  %v12543_v33 = vpop.permute.xlu0 %5176 }
 0x6af   : > { %5485 = vperm.xlu1 %7498, %v4998_v15   ;;  %5470 = vperm.xlu0 %7497, %v4993_v12   ;;  %v4953_v12 = vmul.f32 %v12436_v25, %v16148_v59 }
 0x6b2   : > { %v12549_v35 = vpop.permute.xlu1 %5227  ;;  %v12551_v31 = vpop.permute.xlu0 %5179 }
 0x6b3   : > { %5344 = vperm.xlu1 %7498, %v4951_v23   ;;  %5332 = vperm.xlu0 %7497, %v4947_v27   ;;  %v5012_v23 = vmul.f32 %v12487_v46, %v16149_v20  ;;  %v16162_v20 = vld [vmem:[#allocation409_spill] sm:$0xff] }
 0x6b6   : > { %v12557_v3 = vpop.permute.xlu1 %5233  ;;  %v12559_v63 = vpop.permute.xlu0 %5182 }
 0x6b7   : > { %5440 = vperm.xlu1 %7498, %v4983_v2   ;;  %5428 = vperm.xlu0 %7497, %v4979_v18   ;;  %v4985_v2 = vmul.f32 %v12455_v8, %v16152_v11  ;;  %v4965_v18 = vmul.f32 %v12443_v44, %v16153_v21  ;;  %v16163_v11 = vld [vmem:[#allocation394_spill] sm:$0xff] }
 0x6ba   : > { %v12565_v16 = vpop.permute.xlu1 %5239  ;;  %v12567_v4 = vpop.permute.xlu0 %5185 }
 0x6bb   : > { %16139 = vst [vmem:[#allocation352_spill] sm:$0xff] %v12565_v16  ;;  %5536 = vperm.xlu1 %7498, %v5015_v37   ;;  %5521 = vperm.xlu0 %7497, %v5010_v29   ;;  %v5017_v29 = vmul.f32 %v12487_v46, %v16156_v24  ;;  %v16164_v24 = vld [vmem:[#allocation45_spill] sm:$0xff] }
 0x6be   : > { %v12573_v9 = vpop.permute.xlu1 %5245  ;;  %v12575_v55 = vpop.permute.xlu0 %5191 }
 0x6bf   : > { %16142 = vst [vmem:[#allocation469_spill] sm:$0xff] %v12573_v9  ;;  %16143 = vst [vmem:[#allocation375_spill] sm:$0xff] %v12575_v55  ;;  %5395 = vperm.xlu1 %7498, %v4968_v39   ;;  %5335 = vperm.xlu0 %7497, %v4948_v53   ;;  %v4997_v39 = vmul.f32 %v12471_v13, %v16157_v45  ;;  %v16165_v45 = vld [vmem:[#allocation348_spill] sm:$0xff]  ;;  %v16183_v9 = vld [vmem:[#allocation410_spill] sm:$0xff] }
 0x6c0   : > { %v16187_v55 = vld [vmem:[#allocation395_spill] sm:$0xff] }
 0x6c2   : > { %v12581_v34 = vpop.permute.xlu1 %5251  ;;  %v12583_v15 = vpop.permute.xlu0 %5194 }
 0x6c3   : > { %16146 = vst [vmem:[#allocation458_spill] sm:$0xff] %v12581_v34  ;;  %16147 = vst [vmem:[#allocation464_spill] sm:$0xff] %v12583_v15  ;;  %5491 = vperm.xlu1 %7498, %v5000_v42   ;;  %5431 = vperm.xlu0 %7497, %v4980_v5   ;;  %v4970_v42 = vmul.f32 %v12443_v44, %v16159_v49  ;;  %v4950_v5 = vmul.f32 %v12436_v25, %v16160_v57  ;;  %v16166_v57 = vld [vmem:[#allocation398_spill] sm:$0xff]  ;;  %v16177_v34 = vld [vmem:[#allocation293_spill] sm:$0xff] }
 0x6c6   : > { %v12589_v41 = vpop.permute.xlu1 %5257  ;;  %v12591_v27 = vpop.permute.xlu0 %5197 }
 0x6c7   : > { %16150 = vst [vmem:[#allocation396_spill] sm:$0xff] %v12589_v41  ;;  %16151 = vst [vmem:[#allocation461_spill] sm:$0xff] %v12591_v27  ;;  %5350 = vperm.xlu1 %7498, %v4953_v12   ;;  %5527 = vperm.xlu0 %7497, %v5012_v23   ;;  %v5002_v23 = vmul.f32 %v12471_v13, %v16162_v20  ;;  %v16167_v20 = vld [vmem:[#allocation454_spill] sm:$0xff]  ;;  %v4952_v41 = vmul.f32 %v12436_v25, %v16171_v61 }
 0x6c8   : > { %v16180_v27 = vld [vmem:[#allocation378_spill] sm:$0xff] }
 0x6c9   : > { %v4969_v15 = vmul.f32 %v12443_v44, %v16180_v27  ;;  %v16184_v27 = vld [vmem:[#allocation399_spill] sm:$0xff] }
 0x6ca   : > { %v12597_v54 = vpop.permute.xlu1 %5263  ;;  %v12599_v37 = vpop.permute.xlu0 %5200  ;;  %v4990_v52 = vmul.f32 %v12455_v8, %v16184_v27 }
 0x6cb   : > { %16154 = vst [vmem:[#allocation356_spill] sm:$0xff] %v12597_v54  ;;  %16155 = vst [vmem:[#allocation381_spill] sm:$0xff] %v12599_v37  ;;  %5446 = vperm.xlu1 %7498, %v4985_v2   ;;  %5386 = vperm.xlu0 %7497, %v4965_v18   ;;  %v4982_v2 = vmul.f32 %v12455_v8, %v16163_v11  ;;  %v4967_v11 = vmul.f32 %v12443_v44, %v16167_v20  ;;  %v16169_v54 = vld [vmem:[#allocation408_spill] sm:$0xff] }
 0x6cc   : > { %v5016_v37 = vmul.f32 %v12487_v46, %v16177_v34 }
 0x6ce   : > { %v12605_v51 = vpop.permute.xlu1 %5269  ;;  %v12607_v53 = vpop.permute.xlu0 %5206 }
 0x6cf   : > { %16158 = vst [vmem:[#allocation422_spill] sm:$0xff] %v12607_v53  ;;  %5542 = vperm.xlu1 %7498, %v5017_v29   ;;  %5482 = vperm.xlu0 %7497, %v4997_v39   ;;  %v4955_v29 = vmul.f32 %v12436_v25, %v16164_v24  ;;  %v5014_v39 = vmul.f32 %v12487_v46, %v16165_v45  ;;  %v16168_v24 = vld [vmem:[#allocation421_spill] sm:$0xff] }
 0x6d0   : > { %v5019_v45 = vmul.f32 %v12487_v46, %v16168_v24  ;;  %v16173_v24 = vld [vmem:[#allocation411_spill] sm:$0xff]  ;;  %v4984_v53 = vmul.f32 %v12455_v8, %v16174_v6 }
 0x6d2   : > { %v12613_v59 = vpop.permute.xlu1 %5275  ;;  %v12615_v12 = vpop.permute.xlu0 %5212 }
 0x6d3   : > { %16161 = vst [vmem:[#allocation457_spill] sm:$0xff] %v12615_v12  ;;  %5401 = vperm.xlu1 %7498, %v4970_v42   ;;  %5341 = vperm.xlu0 %7497, %v4950_v5   ;;  %v4987_v5 = vmul.f32 %v12455_v8, %v16166_v57  ;;  %v4999_v12 = vmul.f32 %v12471_v13, %v16169_v54  ;;  %v16170_v57 = vld [vmem:[#allocation386_spill] sm:$0xff] }
 0x6d4   : > { %v4972_v20 = vmul.f32 %v12443_v44, %v16170_v57  ;;  %v5004_v54 = vmul.f32 %v12471_v13, %v16173_v24  ;;  %v16176_v57 = vld [vmem:[#allocation448_spill] sm:$0xff] }
 0x6d5   : > { %v4957_v61 = vmul.f32 %v12436_v25, %v16176_v57  ;;  %v16179_v24 = vld [vmem:[#allocation400_spill] sm:$0xff]  ;;  %v16182_v57 = vld [vmem:[#allocation423_spill] sm:$0xff] }
 0x6d6   : > { %v12621_v21 = vpop.permute.xlu1 %5281  ;;  %v12623_v18 = vpop.permute.xlu0 %5218  ;;  %v4989_v6 = vmul.f32 %v12455_v8, %v16179_v24  ;;  %v5021_v34 = vmul.f32 %v12487_v46, %v16182_v57 }
 0x6d7   : > { %5497 = vperm.xlu1 %7498, %v5002_v23   ;;  %5437 = vperm.xlu0 %7497, %v4982_v2  }
 0x6da   : > { %v12629_v49 = vpop.permute.xlu1 %5287  ;;  %v12631_v42 = vpop.permute.xlu0 %5224 }
 0x6db   : > { %5356 = vperm.xlu1 %7498, %v4955_v29   ;;  %5533 = vperm.xlu0 %7497, %v5014_v39  }
 0x6de   : > { %v12637_v23 = vpop.permute.xlu1 %5293  ;;  %v12639_v2 = vpop.permute.xlu0 %5230 }
 0x6df   : > { %5452 = vperm.xlu1 %7498, %v4987_v5   ;;  %5392 = vperm.xlu0 %7497, %v4967_v11  }
 0x6e2   : > { %v12645_v29 = vpop.permute.xlu1 %5299  ;;  %v12647_v39 = vpop.permute.xlu0 %5236 }
 0x6e3   : > { %5548 = vperm.xlu1 %7498, %v5019_v45   ;;  %5488 = vperm.xlu0 %7497, %v4999_v12  }
 0x6e6   : > { %v12653_v5 = vpop.permute.xlu1 %5305  ;;  %v12655_v11 = vpop.permute.xlu0 %5242 }
 0x6e7   : > { %16172 = vst [vmem:[#allocation466_spill] sm:$0xff] %v12655_v11  ;;  %5407 = vperm.xlu1 %7498, %v4972_v20   ;;  %5347 = vperm.xlu0 %7497, %v4952_v41  }
 0x6ea   : > { %v12661_v45 = vpop.permute.xlu1 %5311  ;;  %v12663_v12 = vpop.permute.xlu0 %5248 }
 0x6eb   : > { %16175 = vst [vmem:[#allocation463_spill] sm:$0xff] %v12663_v12  ;;  %5503 = vperm.xlu1 %7498, %v5004_v54   ;;  %5443 = vperm.xlu0 %7497, %v4984_v53   ;;  %v16185_v12 = vld [vmem:[#allocation365_spill] sm:$0xff] }
 0x6ee   : > { %v12669_v20 = vpop.permute.xlu1 %5320  ;;  %v12671_v41 = vpop.permute.xlu0 %5254 }
 0x6ef   : > { %16178 = vst [vmem:[#allocation361_spill] sm:$0xff] %v12671_v41  ;;  %5362 = vperm.xlu1 %7498, %v4957_v61   ;;  %5539 = vperm.xlu0 %7497, %v5016_v37   ;;  %v5001_v41 = vmul.f32 %v12471_v13, %v16183_v9 }
 0x6f2   : > { %v12677_v54 = vpop.permute.xlu1 %5368  ;;  %v12679_v53 = vpop.permute.xlu0 %5260 }
 0x6f3   : > { %16181 = vst [vmem:[#allocation429_spill] sm:$0xff] %v12679_v53  ;;  %5458 = vperm.xlu1 %7498, %v4989_v6   ;;  %5398 = vperm.xlu0 %7497, %v4969_v15   ;;  %v4954_v6 = vmul.f32 %v12436_v25, %v16185_v12  ;;  %v5744_v15 = vrot.slane %v12605_v51, %v11846_v17 }
 0x6f4   : > { %v4986_v12 = vmul.f32 %v12455_v8, %v16187_v55  ;;  %v5754_v51 = vrot.slane %v12613_v59, %v11864_v36  ;;  %v5764_v59 = vrot.slane %v12621_v21, %v11882_v56 }
 0x6f6   : > { %v12685_v61 = vpop.permute.xlu1 %5326  ;;  %v5267_v37 = vpop.permute.xlu0 %5266 }
 0x6f7   : > { %5554 = vperm.xlu1 %7498, %v5021_v34   ;;  %5494 = vperm.xlu0 %7497, %v5001_v41   ;;  %v5740_v24 = vrot.slane %v5267_v37, %v11852_v22  ;;  %v16186_v37 = vld [vmem:[#allocation444_spill] sm:$0xff] }
 0x6f8   : > { %v5022_v27 = vmul.f32 %v12487_v46, %v16186_v37 }
 0x6f9   : > { %v5745_v41 = vsel %vm4133_vm3, %v5744_v15, %v5740_v24 }
 0x6fa   : > { %v12694_v57 = vpop.permute.xlu1 %5419  ;;  %v5273_v53 = vpop.permute.xlu0 %5272 }
 0x6fb   : > { %v5749_v9 = vrot.slane %v5273_v53, %v11867_v40  ;;  %5461 = vperm.xlu1 %7498, %v4990_v52   ;;  %5353 = vperm.xlu0 %7497, %v4954_v6   ;;  %v16190_v6 = vld [vmem:[#allocation416_spill] sm:$0xff] }
 0x6fc   : > { %v5007_v15 = vmul.f32 %v12471_v13, %v16190_v6 }
 0x6fd   : > { %v5750_v34 = vsel %vm4140_vm4, %v5749_v9, %v5745_v41  ;;  %v16191_v9 = vld [vmem:[#allocation440_spill] sm:$0xff] }
 0x6fe   : > { %v12705_v16 = vpop.permute.xlu1 %5329  ;;  %v5279_v11 = vpop.permute.xlu0 %5278  ;;  %v5755_v52 = vsel %vm16188_vm2, %v5754_v51, %v5750_v34  ;;  %v5018_v55 = vmul.f32 %v12487_v46, %v16191_v9  ;;  %v5774_v34 = vrot.slane %v12629_v49, %v11899_v62  ;;  %v16192_v51 = vld [vmem:[#allocation415_spill] sm:$0xff]  ;;  %v5784_v49 = vrot.slane %v12637_v23, %v11927_v26 }
 0x6ff   : > { %v5759_v53 = vrot.slane %v5279_v11, %v11873_v19  ;;  %5557 = vperm.xlu1 %7498, %v5022_v27   ;;  %5449 = vperm.xlu0 %7497, %v4986_v12   ;;  %v5794_v23 = vrot.slane %v12645_v29, %v11940_v10  ;;  %v5804_v29 = vrot.slane %v12653_v5, %v11956_v28  ;;  %vm16199_vm2 = vcmask 851712  }
 0x700   : > { %v5814_v5 = vrot.slane %v12661_v45, %v12066_v30 }
 0x701   : > { %v5760_v24 = vsel %vm16189_vm14, %v5759_v53, %v5755_v52  ;;  %v5008_v53 = vmul.f32 %v12471_v13, %v16192_v51  ;;  %v16193_v52 = vld [vmem:[#allocation377_spill] sm:$0xff]  ;;  %vm16194_vm14 = vcmask 523712  }
 0x702   : > { %v12716_v41 = vpop.permute.xlu1 %5425  ;;  %v5285_v37 = vpop.permute.xlu0 %5284  ;;  %v5765_v27 = vsel %vm4161_vm7, %v5764_v59, %v5760_v24  ;;  %v4971_v21 = vmul.f32 %v12443_v44, %v16193_v52 }
 0x703   : > { %v5769_v11 = vrot.slane %v5285_v37, %v11879_v47  ;;  %5512 = vperm.xlu1 %7498, %v5007_v15   ;;  %5545 = vperm.xlu0 %7497, %v5018_v55   ;;  %v16195_v55 = vld [vmem:[#allocation427_spill] sm:$0xff] }
 0x704   : > { %v5025_v59 = vmul.f32 %v12487_v46, %v16195_v55 }
 0x705   : > { %v5770_v12 = vsel %vm4168_vm8, %v5769_v11, %v5765_v27  ;;  %v16196_v11 = vld [vmem:[#allocation412_spill] sm:$0xff] }
 0x706   : > { %v12727_v6 = vpop.permute.xlu1 %5473  ;;  %v5775_v9 = vsel %vm16194_vm14, %v5774_v34, %v5770_v12  ;;  %v5291_v37 = vpop.permute.xlu0 %5290  ;;  %v5003_v27 = vmul.f32 %v12471_v13, %v16196_v11  ;;  %vm16202_vm14 = vcmask 982912  }
 0x707   : > { %v5779_v15 = vrot.slane %v5291_v37, %v11894_v0  ;;  %5515 = vperm.xlu1 %7498, %v5008_v53   ;;  %5404 = vperm.xlu0 %7497, %v4971_v21   ;;  %v16197_v21 = vld [vmem:[#allocation451_spill] sm:$0xff]  ;;  %v16198_v37 = vld [vmem:[#allocation368_spill] sm:$0xff] }
 0x709   : > { %v5780_v24 = vsel %vm4182_vm10, %v5779_v15, %v5775_v9  ;;  %v4958_v9 = vmul.f32 %v12436_v25, %v16197_v21  ;;  %v4956_v15 = vmul.f32 %v12436_v25, %v16198_v37  ;;  %v16203_v37 = vld [vmem:[#allocation430_spill] sm:$0xff] }
 0x70a   : > { %v12738_v51 = vpop.permute.xlu1 %5380  ;;  %v5785_v34 = vsel %vm4189_vm11, %v5784_v49, %v5780_v24  ;;  %v5297_v12 = vpop.permute.xlu0 %5296 }
 0x70b   : > { %v5789_v52 = vrot.slane %v5297_v12, %v11924_v48  ;;  %5566 = vperm.xlu1 %7498, %v5025_v59   ;;  %5500 = vperm.xlu0 %7497, %v5003_v27   ;;  %v16200_v27 = vld [vmem:[#allocation401_spill] sm:$0xff] }
 0x70c   : > { %v16201_v12 = vld [vmem:[#allocation397_spill] sm:$0xff] }
 0x70d   : > { %v5790_v53 = vsel %vm4196_vm12, %v5789_v52, %v5785_v34  ;;  %v4992_v34 = vmul.f32 %v12455_v8, %v16200_v27  ;;  %v4988_v25 = vmul.f32 %v12455_v8, %v16201_v12  ;;  %v5827_v27 = vrot.slane %v12669_v20, %v11846_v17  ;;  %v16205_v12 = vld [vmem:[#allocation384_spill] sm:$0xff] }
 0x70e   : > { %v12749_v55 = vpop.permute.xlu1 %5476  ;;  %v5795_v49 = vsel %vm4203_vm13, %v5794_v23, %v5790_v53  ;;  %v5303_v24 = vpop.permute.xlu0 %5302  ;;  %v5842_v20 = vrot.slane %v12705_v16, %v11873_v19 }
 0x70f   : > { %v5799_v11 = vrot.slane %v5303_v24, %v11937_v50  ;;  %5365 = vperm.xlu1 %7498, %v4958_v9   ;;  %5359 = vperm.xlu0 %7497, %v4956_v15   ;;  %v5026_v15 = vmul.f32 %v12487_v46, %v16203_v37  ;;  %v16206_v37 = vld [vmem:[#allocation414_spill] sm:$0xff] }
 0x711   : > { %v5800_v59 = vsel %vm16199_vm2, %v5799_v11, %v5795_v49  ;;  %v16204_v49 = vld [vmem:[#allocation442_spill] sm:$0xff]  ;;  %vm16207_vm2 = vcmask 261312  }
 0x712   : > { %v12760_v52 = vpop.permute.xlu1 %5524  ;;  %v5805_v23 = vsel %vm4217_vm15, %v5804_v29, %v5800_v59  ;;  %v5309_v53 = vpop.permute.xlu0 %5308  ;;  %v5020_v24 = vmul.f32 %v12487_v46, %v16204_v49 }
 0x713   : > { %v5809_v21 = vrot.slane %v5309_v53, %v11943_v14  ;;  %5467 = vperm.xlu1 %7498, %v4992_v34   ;;  %5455 = vperm.xlu0 %7497, %v4988_v25   ;;  %v4973_v25 = vmul.f32 %v12443_v44, %v16205_v12  ;;  %v16209_v12 = vld [vmem:[#allocation70_spill] sm:$0xff] }
 0x715   : > { %v5810_v9 = vsel %vm16202_vm14, %v5809_v21, %v5805_v23  ;;  %vm16208_vm14 = vcmask 326912  }
 0x716   : > { %v12772_v11 = vsel %vm14978_vm1, %v5814_v5, %v5810_v9  ;;  %v12774_v29 = vpop.permute.xlu1 %5383  ;;  %v5318_v59 = vpop.permute.xlu0 %5317  ;;  %v5837_v5 = vrot.slane %v12685_v61, %v11864_v36 }
 0x717   : > { %v5823_v34 = vrot.slane %v5318_v59, %v11852_v22  ;;  %5569 = vperm.xlu1 %7498, %v5026_v15   ;;  %5551 = vperm.xlu0 %7497, %v5020_v24   ;;  %v5005_v15 = vmul.f32 %v12471_v13, %v16206_v37 }
 0x719   : > { %v5828_v45 = vsel %vm4133_vm3, %v5827_v27, %v5823_v34  ;;  %v5906_v27 = vrot.slane %v12677_v54, %v11852_v22 }
 0x71a   : > { %v12782_v23 = vpop.permute.xlu1 %5479  ;;  %v5324_v53 = vpop.permute.xlu0 %5323 }
 0x71b   : > { %v5832_v21 = vrot.slane %v5324_v53, %v11867_v40  ;;  %5410 = vperm.xlu0 %7497, %v4973_v25  }
 0x71d   : > { %v5833_v9 = vsel %vm4140_vm4, %v5832_v21, %v5828_v45  ;;  %v4974_v45 = vmul.f32 %v12443_v44, %v16209_v12 }
 0x71e   : > { %v5838_v49 = vsel %vm16207_vm2, %v5837_v5, %v5833_v9  ;;  %v12793_v24 = vpop.permute.xlu1 %5338  ;;  %v5372_v59 = vpop.permute.xlu0 %5371  ;;  %v16210_v9 = vld [vmem:[#allocation413_spill] sm:$0xff] }
 0x71f   : > { %v5910_v34 = vrot.slane %v5372_v59, %v11846_v17  ;;  %5506 = vperm.xlu0 %7497, %v5005_v15   ;;  %v5843_v61 = vsel %vm16208_vm14, %v5842_v20, %v5838_v49  ;;  %v5006_v54 = vmul.f32 %v12471_v13, %v16210_v9  ;;  %v5989_v20 = vrot.slane %v12694_v57, %v11852_v22 }
 0x720   : > { %v5998_v59 = vrot.slane %v12716_v41, %v11867_v40  ;;  %v5925_v57 = vrot.slane %v12738_v51, %v11873_v19  ;;  %v6081_v51 = vrot.slane %v12749_v55, %v11867_v40 }
 0x721   : > { %v5911_v16 = vsel %vm4133_vm3, %v5910_v34, %v5906_v27  ;;  %v16211_v34 = vld [vmem:[#allocation148_spill] sm:$0xff] }
 0x722   : > { %v12802_v25 = vpop.permute.xlu1 %5434  ;;  %v5375_v53 = vpop.permute.xlu0 %5374 }
 0x723   : > { %v5915_v21 = vrot.slane %v5375_v53, %v11867_v40  ;;  %5413 = vperm.xlu0 %7497, %v4974_v45  }
 0x725   : > { %v5916_v5 = vsel %vm4140_vm4, %v5915_v21, %v5911_v16  ;;  %v4991_v16 = vmul.f32 %v12455_v8, %v16211_v34 }
 0x726   : > { %v12808_v37 = vpop.permute.xlu1 %5530  ;;  %v5423_v15 = vpop.permute.xlu0 %5422 }
 0x727   : > { %v5993_v49 = vrot.slane %v5423_v15, %v11846_v17  ;;  %5509 = vperm.xlu0 %7497, %v5006_v54   ;;  %v16212_v54 = vld [vmem:[#allocation425_spill] sm:$0xff] }
 0x728   : > { %v5023_v41 = vmul.f32 %v12487_v46, %v16212_v54 }
 0x729   : > { %v5994_v27 = vsel %vm4133_vm3, %v5993_v49, %v5989_v20  ;;  %v6076_v49 = vrot.slane %v12727_v6, %v11846_v17 }
 0x72a   : > { %v12818_v12 = vpop.permute.xlu1 %5389  ;;  %v5378_v45 = vpop.permute.xlu0 %5377  ;;  %v5999_v53 = vsel %vm4140_vm4, %v5998_v59, %v5994_v27  ;;  %v16213_v27 = vld [vmem:[#allocation446_spill] sm:$0xff] }
 0x72b   : > { %v5920_v21 = vrot.slane %v5378_v45, %v11864_v36  ;;  %5464 = vperm.xlu0 %7497, %v4991_v16   ;;  %v5024_v34 = vmul.f32 %v12487_v46, %v16213_v27  ;;  %v16216_v27 = vld [vmem:[#allocation136_spill] sm:$0xff] }
 0x72d   : > { %v5921_v9 = vsel %vm16207_vm2, %v5920_v21, %v5916_v5 }
 0x72e   : > { %v12828_v15 = vsel %vm16208_vm14, %v5925_v57, %v5921_v9  ;;  %v12830_v8 = vpop.permute.xlu1 %5485  ;;  %v5471_v20 = vpop.permute.xlu0 %5470  ;;  %v16214_v9 = vld [vmem:[#allocation336_spill] sm:$0xff]  ;;  %vm16217_vm14 = vcmask 523712  }
 0x72f   : > { %v6072_v59 = vrot.slane %v5471_v20, %v11852_v22  ;;  %5560 = vperm.xlu0 %7497, %v5023_v41   ;;  %v4941_v54 = vmul.f32 %v12402_v38, %v16214_v9 }
 0x731   : > { %v6077_v5 = vsel %vm4133_vm3, %v6076_v49, %v6072_v59  ;;  %v16215_v49 = vld [vmem:[#allocation383_spill] sm:$0xff] }
 0x732   : > { %v12841_v16 = vsel %vm4140_vm4, %v6081_v51, %v6077_v5  ;;  %v12843_v45 = vpop.permute.xlu1 %5344  ;;  %v5333_v21 = vpop.permute.xlu0 %5332  ;;  %v4975_v59 = vmul.f32 %v12443_v44, %v16215_v49  ;;  %v7859_v49 = vmov 0.0  }
 0x733   : > { %v5847_v57 = vrot.slane %v5333_v21, %v11882_v56  ;;  %5563 = vperm.xlu0 %7497, %v5024_v34   ;;  %6431 = vmatprep.mubr.f32.mxu0 %v7859_v49  ;;  %391 = vst [vmem:[#allocation2 + $0x100] sm:$0x3] %v7859_v49 }
 0x734   : > { %6485 = vmatprep.mubr.f32.mxu1 %v7859_v49 }
 0x735   : > { %v5848_v6 = vsel %vm4161_vm7, %v5847_v57, %v5843_v61  ;;  %v5009_v61 = vmul.f32 %v12471_v13, %v16216_v27  ;;  %v5857_v57 = vrot.slane %v12793_v24, %v11899_v62  ;;  %v6013_v13 = vrot.slane %v12802_v25, %v11882_v56 }
 0x736   : > { %v12849_v55 = vpop.permute.xlu1 %5440  ;;  %v5429_v41 = vpop.permute.xlu0 %5428  ;;  %v6159_v25 = vrot.slane %v12760_v52, %v11846_v17 }
 0x737   : > { %v6003_v20 = vrot.slane %v5429_v41, %v11864_v36  ;;  %5314 = vperm.xlu0 %7497, %v4941_v54  }
 0x739   : > { %v6004_v46 = vsel %vm16207_vm2, %v6003_v20, %v5999_v53  ;;  %vm16218_vm2 = vcmask 15360  }
 0x73a   : > { %v12855_v51 = vpop.permute.xlu1 %5536  ;;  %v5522_v5 = vpop.permute.xlu0 %5521  ;;  %360 = vst.msk [vmem:[#allocation2 + $0x8] sm:$0xff] %vm16218_vm2, %v7859_v49  ;;  %vm16219_vm9 = vmmov %vm16218_vm2 }
 0x73b   : > { %5416 = vperm.xlu0 %7497, %v4975_v59   ;;  %v6155_v20 = vrot.slane %v5522_v5, %v11852_v22  ;;  %362 = vst.msk [vmem:[#allocation2 + $0x18] sm:$0xff] %vm16219_vm9, %v7859_v49  ;;  %vm16220_vm5 = vmmov %vm16218_vm2 }
 0x73c   : > { %364 = vst.msk [vmem:[#allocation2 + $0x28] sm:$0xff] %vm16220_vm5, %v7859_v49  ;;  %vm16222_vm6 = vmmov %vm16218_vm2 }
 0x73d   : > { %368 = vst.msk [vmem:[#allocation2 + $0x48] sm:$0xff] %vm16222_vm6, %v7859_v49  ;;  %vm16223_vm0 = vmmov %vm16218_vm2 }
 0x73e   : > { %v12859_v34 = vpop.permute.xlu1 %5395  ;;  %v5336_v38 = vpop.permute.xlu0 %5335  ;;  %370 = vst.msk [vmem:[#allocation2 + $0x58] sm:$0xff] %vm16223_vm0, %v7859_v49  ;;  %vm16224_vm1 = vmmov %vm16223_vm0 }
 0x73f   : > { %v5852_v21 = vrot.slane %v5336_v38, %v11879_v47  ;;  %5518 = vperm.xlu0 %7497, %v5009_v61   ;;  %372 = vst.msk [vmem:[#allocation2 + $0x68] sm:$0xff] %vm16224_vm1, %v7859_v49  ;;  %vm16226_vm9 = vmmov %vm16223_vm0  ;;  %v6169_v61 = vrot.slane %v12808_v37, %v11864_v36  ;;  %v6160_v38 = vsel %vm4133_vm3, %v6159_v25, %v6155_v20 }
 0x740   : > { %376 = vst.msk [vmem:[#allocation2 + $0x88] sm:$0xff] %vm16226_vm9, %v7859_v49  ;;  %vm16227_vm5 = vmmov %vm16223_vm0  ;;  %v6086_v20 = vrot.slane %v12782_v23, %v11864_v36 }
 0x741   : > { %v5853_v53 = vsel %vm4168_vm8, %v5852_v21, %v5848_v6  ;;  %378 = vst.msk [vmem:[#allocation2 + $0x98] sm:$0xff] %vm16227_vm5, %v7859_v49  ;;  %vm16229_vm6 = vmmov %vm16223_vm0  ;;  %vm16233_vm5 = vcmask 9216  }
 0x742   : > { %v12865_v9 = vpop.permute.xlu1 %5491  ;;  %v5432_v44 = vpop.permute.xlu0 %5431  ;;  %v5858_v54 = vsel %vm16217_vm14, %v5857_v57, %v5853_v53  ;;  %vm16221_vm14 = vmmov %vm16218_vm2  ;;  %382 = vst.msk [vmem:[#allocation2 + $0xb8] sm:$0xff] %vm16229_vm6, %v7859_v49  ;;  %vm16235_vm6 = vcmask 261312  }
 0x743   : > { %v6008_v41 = vrot.slane %v5432_v44, %v11873_v19  ;;  %366 = vst.msk [vmem:[#allocation2 + $0x38] sm:$0xff] %vm16221_vm14, %v7859_v49  ;;  %vm16225_vm2 = vmmov %vm16223_vm0 }
 0x744   : > { %374 = vst.msk [vmem:[#allocation2 + $0x78] sm:$0xff] %vm16225_vm2, %v7859_v49  ;;  %vm16228_vm14 = vmmov %vm16223_vm0 }
 0x745   : > { %380 = vst.msk [vmem:[#allocation2 + $0xa8] sm:$0xff] %vm16228_vm14, %v7859_v49  ;;  %vm16230_vm1 = vmmov %vm16223_vm0  ;;  %vm16234_vm14 = vcmask 326912  }
 0x746   : > { %384 = vst.msk [vmem:[#allocation2 + $0xc8] sm:$0xff] %vm16223_vm0, %v7859_v49  ;;  %vm16231_vm2 = vmmov %vm16223_vm0  ;;  %v6009_v24 = vsel %vm16234_vm14, %v6008_v41, %v6004_v46  ;;  %v12912_v6 = vpop.permute.xlu1 %5350  ;;  %v5528_v59 = vpop.permute.xlu0 %5527  ;;  %v5930_v46 = vrot.slane %v12774_v29, %v11882_v56  ;;  %v5940_v41 = vrot.slane %v12818_v12, %v11899_v62 }
 0x747   : > { %386 = vst.msk [vmem:[#allocation2 + $0xd8] sm:$0xff] %vm16230_vm1, %v7859_v49  ;;  %vm16232_vm9 = vmmov %vm16223_vm0  ;;  %v6014_v5 = vsel %vm4161_vm7, %v6013_v13, %v6009_v24  ;;  %v6164_v27 = vrot.slane %v5528_v59, %v11867_v40  ;;  %vm16236_vm0 = vcmask 523712   ;;  %v6096_v59 = vrot.slane %v12830_v8, %v11882_v56 }
 0x748   : > { %388 = vst.msk [vmem:[#allocation2 + $0xe8] sm:$0xff] %vm16231_vm2, %v7859_v49  ;;  %v5931_v37 = vsel %vm4161_vm7, %v5930_v46, %v12828_v15  ;;  %vm16237_vm1 = vmmov %vm16235_vm6 }
 0x749   : > { %390 = vst.msk [vmem:[#allocation2 + $0xf8] sm:$0xff] %vm16232_vm9, %v7859_v49  ;;  %v6165_v21 = vsel %vm4140_vm4, %v6164_v27, %v6160_v38  ;;  %v6087_v27 = vsel %vm16237_vm1, %v6086_v20, %v12841_v16  ;;  %vm16238_vm2 = vmmov %vm16234_vm14 }
 0x74a   : > { %393 = vst.msk [vmem:[#allocation2 + $0x108] sm:$0x3] %vm16233_vm5, %v7859_v49  ;;  %v5387_v57 = vpop.permute.xlu0 %5386  ;;  %v6170_v52 = vsel %vm16235_vm6, %v6169_v61, %v6165_v21  ;;  %v12923_v53 = vpop.permute.xlu1 %5446  ;;  %v5867_v21 = vrot.slane %v12843_v45, %v11927_v26  ;;  %vm16239_vm9 = vmmov %vm16236_vm0  ;;  %v6179_v45 = vrot.slane %v12855_v51, %v11882_v56 }
 0x74b   : > { %v5935_v44 = vrot.slane %v5387_v57, %v11879_v47  ;;  %vm16240_vm5 = vmmov %vm16238_vm2 }
 0x74c   : > { %vm16241_vm14 = vmmov %vm16237_vm1 }
 0x74d   : > { %v5936_v13 = vsel %vm4168_vm8, %v5935_v44, %v5931_v37  ;;  %vm16242_vm6 = vmmov %vm16238_vm2 }
 0x74e   : > { %v5483_v24 = vpop.permute.xlu0 %5482  ;;  %v5941_v29 = vsel %vm16236_vm0, %v5940_v41, %v5936_v13  ;;  %v12939_v12 = vpop.permute.xlu1 %5542  ;;  %v6023_v41 = vrot.slane %v12849_v55, %v11899_v62  ;;  %vm16243_vm0 = vmmov %vm16237_vm1 }
 0x74f   : > { %v6091_v25 = vrot.slane %v5483_v24, %v11873_v19  ;;  %vm16244_vm1 = vmmov %vm16239_vm9 }
 0x751   : > { %v6092_v15 = vsel %vm16238_vm2, %v6091_v25, %v6087_v27 }
 0x752   : > { %v5342_v61 = vpop.permute.xlu0 %5341  ;;  %v6097_v38 = vsel %vm4161_vm7, %v6096_v59, %v6092_v15  ;;  %v12948_v44 = vpop.permute.xlu1 %5401 }
 0x753   : > { %v5862_v23 = vrot.slane %v5342_v61, %v11894_v0 }
 0x755   : > { %v5863_v46 = vsel %vm4182_vm10, %v5862_v23, %v5858_v54 }
 0x756   : > { %v5438_v57 = vpop.permute.xlu0 %5437  ;;  %v5868_v8 = vsel %vm4189_vm11, %v5867_v21, %v5863_v46  ;;  %v12958_v54 = vpop.permute.xlu1 %5497 }
 0x757   : > { %v6018_v16 = vrot.slane %v5438_v57, %v11879_v47 }
 0x759   : > { %v6019_v37 = vsel %vm4168_vm8, %v6018_v16, %v6014_v5  ;;  %v5950_v5 = vrot.slane %v12859_v34, %v11927_v26 }
 0x75a   : > { %v5534_v13 = vpop.permute.xlu0 %5533  ;;  %v6024_v20 = vsel %vm16239_vm9, %v6023_v41, %v6019_v37  ;;  %v12971_v51 = vpop.permute.xlu1 %5356  ;;  %vm16264_vm9 = vcmask 982912  }
 0x75b   : > { %v6174_v24 = vrot.slane %v5534_v13, %v11873_v19  ;;  %v5661_v13 = vrot.slane %v12623_v18, %v11846_v17 }
 0x75d   : > { %v6175_v25 = vsel %vm16240_vm5, %v6174_v24, %v6170_v52  ;;  %vm16265_vm5 = vmmov %vm16264_vm9 }
 0x75e   : > { %v5393_v59 = vpop.permute.xlu0 %5392  ;;  %v12962_v27 = vsel %vm4161_vm7, %v6179_v45, %v6175_v25  ;;  %v12978_v16 = vpop.permute.xlu1 %5452  ;;  %v5657_v45 = vrot.slane %v12533_v60, %v11852_v22 }
 0x75f   : > { %v5945_v55 = vrot.slane %v5393_v59, %v11894_v0 }
 0x760   : > { %v5662_v25 = vsel %vm4133_vm3, %v5661_v13, %v5657_v45 }
 0x761   : > { %v5946_v15 = vsel %vm4182_vm10, %v5945_v55, %v5941_v29 }
 0x762   : > { %v5489_v61 = vpop.permute.xlu0 %5488  ;;  %v12969_v23 = vsel %vm4189_vm11, %v5950_v5, %v5946_v15  ;;  %v5681_v15 = vrot.slane %v12639_v2, %v11882_v56 }
 0x763   : > { %v6101_v21 = vrot.slane %v5489_v61, %v11879_v47  ;;  %v5676_v61 = vrot.slane %v12549_v35, %v11873_v19 }
 0x765   : > { %v12975_v52 = vsel %vm4168_vm8, %v6101_v21, %v6097_v38  ;;  %v12991_v38 = vpop.permute.xlu1 %5548 }
 0x766   : > { %v5348_v46 = vpop.permute.xlu0 %5347 }
 0x767   : > { %v5872_v57 = vrot.slane %v5348_v46, %v11924_v48  ;;  %v5574_v46 = vrot.slane %v12511_v43, %v11852_v22  ;;  %v5598_v43 = vrot.slane %v12551_v31, %v11882_v56  ;;  %v16247_v31 = vld [vmem:[#allocation352_spill] sm:$0xff] }
 0x769   : > { %v12981_v34 = vsel %vm4196_vm12, %v5872_v57, %v5868_v8  ;;  %v5671_v8 = vrot.slane %v12631_v42, %v11864_v36  ;;  %v13003_v18 = vpop.permute.xlu1 %5407  ;;  %v5578_v42 = vrot.slane %v12519_v7, %v11846_v17  ;;  %v5588_v57 = vrot.slane %v12535_v58, %v11864_v36 }
 0x76a   : > { %v5444_v29 = vpop.permute.xlu0 %5443  ;;  %v5593_v17 = vrot.slane %v12543_v33, %v11873_v19  ;;  %v5603_v58 = vrot.slane %v12559_v63, %v11879_v47  ;;  %v5608_v19 = vrot.slane %v12567_v4, %v11899_v62 }
 0x76b   : > { %v6028_v41 = vrot.slane %v5444_v29, %v11894_v0  ;;  %v5691_v29 = vrot.slane %v12647_v39, %v11899_v62 }
 0x76d   : > { %v12985_v37 = vsel %vm4182_vm10, %v6028_v41, %v6024_v20  ;;  %v5666_v20 = vrot.slane %v12541_v1, %v11867_v40  ;;  %v5583_v1 = vrot.slane %v12527_v32, %v11867_v40  ;;  %v5686_v40 = vrot.slane %v12557_v3, %v11879_v47  ;;  %v13028_v7 = vpop.permute.xlu1 %5503  ;;  %v16245_v3 = vld [vmem:[#allocation466_spill] sm:$0xff] }
 0x76e   : > { %v12989_v24 = vpop.permute.xlu0 %5539  ;;  %v5579_v32 = vsel %vm4133_vm3, %v5578_v42, %v5574_v46  ;;  %v5701_v13 = vrot.slane %v16245_v3, %v11927_v26  ;;  %vm16246_vm3 = vmmov %vm16238_vm2  ;;  %v16250_v42 = vld [vmem:[#allocation463_spill] sm:$0xff]  ;;  %v16251_v46 = vld [vmem:[#allocation372_spill] sm:$0xff] }
 0x76f   : > { %v5667_v55 = vsel %vm4140_vm4, %v5666_v20, %v5662_v25  ;;  %v5584_v36 = vsel %vm4140_vm4, %v5583_v1, %v5579_v32  ;;  %v5696_v25 = vrot.slane %v16247_v31, %v11894_v0  ;;  %vm16248_vm4 = vmmov %vm16244_vm1  ;;  %v5711_v1 = vrot.slane %v16250_v42, %v11940_v10  ;;  %v16254_v32 = vld [vmem:[#allocation461_spill] sm:$0xff]  ;;  %v16257_v31 = vld [vmem:[#allocation458_spill] sm:$0xff] }
 0x770   : > { %v5672_v5 = vsel %vm16241_vm14, %v5671_v8, %v5667_v55  ;;  %v5589_v41 = vsel %vm16243_vm0, %v5588_v57, %v5584_v36  ;;  %v5613_v57 = vrot.slane %v16251_v46, %v11894_v0  ;;  %v16256_v3 = vld [vmem:[#allocation361_spill] sm:$0xff] }
 0x771   : > { %v5677_v21 = vsel %vm16242_vm6, %v5676_v61, %v5672_v5  ;;  %v5594_v56 = vsel %vm16246_vm3, %v5593_v17, %v5589_v41  ;;  %v5363_v55 = vpop.permute.xlu1 %5362  ;;  %v16249_v5 = vld [vmem:[#allocation375_spill] sm:$0xff]  ;;  %v16253_v17 = vld [vmem:[#allocation464_spill] sm:$0xff]  ;;  %vm16268_vm6 = vcmask 1048512   ;;  %vm16271_vm3 = vmmov %vm16265_vm5 }
 0x772   : > { %v12998_v59 = vpop.permute.xlu0 %5398  ;;  %v5682_v2 = vsel %vm4161_vm7, %v5681_v15, %v5677_v21  ;;  %v5599_v63 = vsel %vm4161_vm7, %v5598_v43, %v5594_v56  ;;  %v5618_v15 = vrot.slane %v16249_v5, %v11927_v26  ;;  %v5628_v43 = vrot.slane %v16254_v32, %v11940_v10  ;;  %v16259_v5 = vld [vmem:[#allocation422_spill] sm:$0xff]  ;;  %v16263_v32 = vld [vmem:[#allocation396_spill] sm:$0xff]  ;;  %vm16269_vm0 = vmmov %vm16268_vm6 }
 0x773   : > { %v5687_v39 = vsel %vm4168_vm8, %v5686_v40, %v5682_v2  ;;  %v5604_v8 = vsel %vm4168_vm8, %v5603_v58, %v5599_v63  ;;  %v16252_v2 = vld [vmem:[#allocation469_spill] sm:$0xff]  ;;  %v5623_v40 = vrot.slane %v16253_v17, %v11924_v48  ;;  %vm16258_vm7 = vcmask 851712  }
 0x774   : > { %v5692_v33 = vsel %vm16244_vm1, %v5691_v29, %v5687_v39  ;;  %v5609_v4 = vsel %vm16248_vm4, %v5608_v19, %v5604_v8  ;;  %v5706_v29 = vrot.slane %v16252_v2, %v11924_v48  ;;  %v16255_v58 = vld [vmem:[#allocation381_spill] sm:$0xff]  ;;  %vm16260_vm2 = vmmov %vm16258_vm7  ;;  %v5877_v17 = vrot.slane %v12912_v6, %v11940_v10 }
 0x775   : > { %v5697_v20 = vsel %vm4182_vm10, %v5696_v25, %v5692_v33  ;;  %v5614_v36 = vsel %vm4182_vm10, %v5613_v57, %v5609_v4  ;;  %v5633_v39 = vrot.slane %v16255_v58, %v11937_v50  ;;  %v5716_v25 = vrot.slane %v16257_v31, %v11937_v50  ;;  %v13078_v8 = vpop.permute.xlu1 %5458  ;;  %v16262_v2 = vld [vmem:[#allocation429_spill] sm:$0xff]  ;;  %vm16266_vm14 = vmmov %vm16260_vm2 }
 0x776   : > { %v13008_v60 = vpop.permute.xlu0 %5494  ;;  %v5702_v61 = vsel %vm4189_vm11, %v5701_v13, %v5697_v20  ;;  %v5619_v19 = vsel %vm4189_vm11, %v5618_v15, %v5614_v36  ;;  %v5721_v13 = vrot.slane %v16256_v3, %v11956_v28  ;;  %v5643_v15 = vrot.slane %v16259_v5, %v11943_v14 }
 0x777   : > { %v5707_v41 = vsel %vm4196_vm12, %v5706_v29, %v5702_v61  ;;  %v5624_v63 = vsel %vm4196_vm12, %v5623_v40, %v5619_v19  ;;  %v5731_v29 = vrot.slane %v16262_v2, %v12066_v30  ;;  %vm16270_vm1 = vcmask 1041409  }
 0x778   : > { %v5712_v33 = vsel %vm4203_vm13, %v5711_v1, %v5707_v41  ;;  %v5629_v20 = vsel %vm4203_vm13, %v5628_v43, %v5624_v63  ;;  %v16261_v1 = vld [vmem:[#allocation462_spill] sm:$0xff]  ;;  %v5726_v43 = vrot.slane %v16263_v32, %v11943_v14  ;;  %v5897_v63 = vrot.slane %v5363_v55, %v12066_v30 }
 0x779   : > { %v5634_v4 = vsel %vm16258_vm7, %v5633_v39, %v5629_v20  ;;  %v5717_v61 = vsel %vm16260_vm2, %v5716_v25, %v5712_v33  ;;  %v5638_v46 = vrot.slane %v16261_v1, %v11956_v28  ;;  %v13100_v41 = vpop.permute.xlu1 %5554  ;;  %v16267_v33 = vld [vmem:[#allocation460_spill] sm:$0xff]  ;;  %vm16272_vm4 = vcmask 1042434   ;;  %vm16273_vm7 = vmmov %vm16269_vm0 }
 0x77a   : > { %v5354_v35 = vpop.permute.xlu0 %5353  ;;  %v5722_v57 = vsel %vm4217_vm15, %v5721_v13, %v5717_v61  ;;  %v5648_v6 = vrot.slane %v16267_v33, %v12066_v30  ;;  %v5887_v13 = vrot.slane %v12971_v51, %v11956_v28  ;;  %vm16274_vm2 = vcmask 1043459  }
 0x77b   : > { %v5882_v42 = vrot.slane %v5354_v35, %v11937_v50  ;;  %v5639_v36 = vsel %vm4217_vm15, %v5638_v46, %v5634_v4  ;;  %v5878_v35 = vsel %vm4203_vm13, %v5877_v17, %v12981_v34  ;;  %v5727_v39 = vsel %vm16265_vm5, %v5726_v43, %v5722_v57  ;;  %vm16276_vm5 = vmmov %vm16266_vm14 }
 0x77c   : > { %v5644_v58 = vsel %vm16264_vm9, %v5643_v15, %v5639_v36  ;;  %v5732_v3 = vsel %vm16268_vm6, %v5731_v29, %v5727_v39  ;;  %v5955_v55 = vrot.slane %v12998_v59, %v11924_v48  ;;  %v6106_v32 = vrot.slane %v12865_v9, %v11899_v62  ;;  %vm16278_vm6 = vmmov %vm16269_vm0 }
 0x77d   : > { %v5883_v19 = vsel %vm16266_vm14, %v5882_v42, %v5878_v35  ;;  %v5649_v34 = vsel %vm16269_vm0, %v5648_v6, %v5644_v58  ;;  %v13117_v51 = vpop.permute.xlu1 %5461  ;;  %v5960_v43 = vrot.slane %v12948_v44, %v11940_v10  ;;  %v6033_v35 = vrot.slane %v12923_v53, %v11927_v26  ;;  %vm16277_vm14 = vmmov %vm16271_vm3 }
 0x77e   : > { %v13043_v45 = vpop.permute.xlu0 %5449  ;;  %v5888_v20 = vsel %vm4217_vm15, %v5887_v13, %v5883_v19  ;;  %v6235_v4 = vsel %vm16270_vm1, %v5732_v3, %v5649_v34  ;;  %v5956_v29 = vsel %vm4196_vm12, %v5955_v55, %v12969_v23  ;;  %vm16275_vm9 = vcmask 523712   ;;  %vm16279_vm0 = vmmov %vm16276_vm5 }
 0x77f   : > { %v6236_v15 = vsel %vm16272_vm4, %v12772_v11, %v6235_v4  ;;  %v6111_v11 = vrot.slane %v13008_v60, %v11894_v0  ;;  %v6038_v59 = vrot.slane %v13043_v45, %v11924_v48  ;;  %v6107_v23 = vsel %vm16275_vm9, %v6106_v32, %v12975_v52  ;;  %vm16283_vm4 = vmmov %vm16277_vm14 }
 0x780   : > { %v5961_v60 = vsel %vm4203_vm13, %v5960_v43, %v5956_v29  ;;  %v6116_v45 = vrot.slane %v12958_v54, %v11927_v26  ;;  %v5970_v53 = vrot.slane %v13003_v18, %v11956_v28  ;;  %v6034_v52 = vsel %vm4189_vm11, %v6033_v35, %v12985_v37 }
 0x781   : > { %v13124_v57 = vpop.permute.xlu1 %5557  ;;  %v6184_v19 = vrot.slane %v12989_v24, %v11879_v47  ;;  %v6039_v33 = vsel %vm4196_vm12, %v6038_v59, %v6034_v52  ;;  %v6126_v37 = vrot.slane %v13028_v7, %v11940_v10  ;;  %v6189_v7 = vrot.slane %v12939_v12, %v11899_v62 }
 0x782   : > { %v13057_v21 = vpop.permute.xlu0 %5545  ;;  %vm16280_vm1 = vcmask 1044484   ;;  %v6058_v29 = vrot.slane %v13117_v51, %v11943_v14 }
 0x785   : > { %v5513_v58 = vpop.permute.xlu1 %5512 }
 0x786   : > { %v5405_v56 = vpop.permute.xlu0 %5404 }
 0x787   : > { %v5965_v17 = vrot.slane %v5405_v56, %v11937_v50  ;;  %v6112_v56 = vsel %vm4182_vm10, %v6111_v11, %v6107_v23 }
 0x788   : > { %v6117_v13 = vsel %vm4189_vm11, %v6116_v45, %v6112_v56 }
 0x789   : > { %v5966_v9 = vsel %vm16276_vm5, %v5965_v17, %v5961_v60  ;;  %v5516_v34 = vpop.permute.xlu1 %5515  ;;  %vm16288_vm5 = vcmask 1046534  }
 0x78a   : > { %v5501_v40 = vpop.permute.xlu0 %5500  ;;  %v5971_v54 = vsel %vm4217_vm15, %v5970_v53, %v5966_v9  ;;  %v6146_v59 = vrot.slane %v5516_v34, %v12066_v30  ;;  %v6214_v9 = vrot.slane %v13124_v57, %v11937_v50 }
 0x78b   : > { %v6121_v39 = vrot.slane %v5501_v40, %v11924_v48  ;;  %v6043_v40 = vrot.slane %v12978_v16, %v11940_v10  ;;  %v6194_v16 = vrot.slane %v13057_v21, %v11894_v0  ;;  %v6141_v21 = vrot.slane %v5513_v58, %v11943_v14 }
 0x78d   : > { %v5567_v17 = vpop.permute.xlu1 %5566 }
 0x78e   : > { %v5360_v31 = vpop.permute.xlu0 %5359  ;;  %v6229_v52 = vrot.slane %v5567_v17, %v12066_v30 }
 0x78f   : > { %v5892_v25 = vrot.slane %v5360_v31, %v11943_v14  ;;  %v6122_v31 = vsel %vm4196_vm12, %v6121_v39, %v6117_v13 }
 0x791   : > { %v5893_v5 = vsel %vm16271_vm3, %v5892_v25, %v5888_v20  ;;  %v6185_v25 = vsel %vm4168_vm8, %v6184_v19, %v12962_v27  ;;  %v6127_v27 = vsel %vm4203_vm13, %v6126_v37, %v6122_v31  ;;  %vm16281_vm8 = vmmov %vm16275_vm9  ;;  %v5366_v39 = vpop.permute.xlu1 %5365 }
 0x792   : > { %v5898_v61 = vsel %vm16273_vm7, %v5897_v63, %v5893_v5  ;;  %v5456_v42 = vpop.permute.xlu0 %5455  ;;  %v6044_v63 = vsel %vm4203_vm13, %v6043_v40, %v6039_v33  ;;  %vm16282_vm3 = vmmov %vm16279_vm0 }
 0x793   : > { %v6237_v1 = vsel %vm16274_vm2, %v5898_v61, %v6236_v15  ;;  %v6048_v6 = vrot.slane %v5456_v42, %v11937_v50  ;;  %v6053_v61 = vrot.slane %v13078_v8, %v11956_v28  ;;  %v6190_v42 = vsel %vm16281_vm8, %v6189_v7, %v6185_v25  ;;  %vm16285_vm7 = vmmov %vm16278_vm6 }
 0x794   : > { %v6195_v62 = vsel %vm4182_vm10, %v6194_v16, %v6190_v42  ;;  %v6199_v8 = vrot.slane %v12991_v38, %v11927_v26  ;;  %vm16284_vm10 = vmmov %vm16283_vm4  ;;  %v6209_v26 = vrot.slane %v13100_v41, %v11940_v10  ;;  %vm16286_vm2 = vcmask 1045509   ;;  %v16290_v41 = vld [vmem:[#allocation457_spill] sm:$0xff] }
 0x795   : > { %v6049_v4 = vsel %vm16279_vm0, %v6048_v6, %v6044_v63  ;;  %vm16287_vm9 = vmmov %vm16278_vm6  ;;  %v5653_v53 = vrot.slane %v16290_v41, %v11852_v22  ;;  %v5468_v57 = vpop.permute.xlu1 %5467 }
 0x796   : > { %v13120_v46 = vpop.permute.xlu0 %5551  ;;  %v6054_v12 = vsel %vm4217_vm15, %v6053_v61, %v6049_v4  ;;  %v6068_v25 = vrot.slane %v5468_v57, %v11852_v22  ;;  %vm16298_vm8 = vmmov %vm16286_vm2  ;;  %v16317_v57 = vld [vmem:[#allocation25_spill] sm:$0xff] }
 0x79a   : > { %v5411_v2 = vpop.permute.xlu0 %5410 }
 0x79b   : > { %v5975_v44 = vrot.slane %v5411_v2, %v11943_v14 }
 0x79d   : > { %v5976_v47 = vsel %vm16277_vm14, %v5975_v44, %v5971_v54  ;;  %vm16294_vm14 = vcmask 1047559   ;;  %v5902_v54 = vrot.slane %v5366_v39, %v11852_v22 }
 0x79e   : > { %v5507_v36 = vpop.permute.xlu0 %5506 }
 0x79f   : > { %v6131_v24 = vrot.slane %v5507_v36, %v11937_v50  ;;  %v6200_v36 = vsel %vm4189_vm11, %v6199_v8, %v6195_v62  ;;  %vm16289_vm11 = vmmov %vm16279_vm0  ;;  %vm16296_vm0 = vcmask 1042434  }
 0x7a1   : > { %v6132_v55 = vsel %vm16282_vm3, %v6131_v24, %v6127_v27  ;;  %vm16299_vm3 = vmmov %vm16288_vm5 }
 0x7a2   : > { %v5414_v3 = vpop.permute.xlu0 %5413 }
 0x7a3   : > { %v5980_v18 = vrot.slane %v5414_v3, %v12066_v30 }
 0x7a5   : > { %v5981_v20 = vsel %vm16278_vm6, %v5980_v18, %v5976_v47  ;;  %v5570_v47 = vpop.permute.xlu1 %5569 }
 0x7a6   : > { %v6238_v5 = vsel %vm16280_vm1, %v5981_v20, %v6237_v1  ;;  %v5510_v15 = vpop.permute.xlu0 %5509  ;;  %v6204_v1 = vrot.slane %v13120_v46, %v11924_v48  ;;  %v6059_v48 = vsel %vm16284_vm10, %v6058_v29, %v6054_v12  ;;  %v6234_v63 = vrot.slane %v5570_v47, %v11852_v22 }
 0x7a7   : > { %v6136_v0 = vrot.slane %v5510_v15, %v11956_v28  ;;  %vm6315_vm10 = vcmask 64512  }
 0x7a8   : > { %v6205_v46 = vsel %vm4196_vm12, %v6204_v1, %v6200_v36  ;;  %vm16291_vm12 = vmmov %vm16283_vm4  ;;  %v16303_v36 = vld [vmem:[#allocation63_spill] sm:$0xff] }
 0x7a9   : > { %v6137_v2 = vsel %vm4217_vm15, %v6136_v0, %v6132_v55  ;;  %v6210_v60 = vsel %vm4203_vm13, %v6209_v26, %v6205_v46  ;;  %vm16293_vm13 = vmmov %vm16278_vm6  ;;  %vm16295_vm6 = vcmask 1041409   ;;  %v16304_v46 = vld [vmem:[#allocation21_spill] sm:$0xff] }
 0x7aa   : > { %v5465_v11 = vpop.permute.xlu0 %5464  ;;  %v6142_v32 = vsel %vm16283_vm4, %v6141_v21, %v6137_v2  ;;  %v6215_v45 = vsel %vm16289_vm11, %v6214_v9, %v6210_v60  ;;  %vm16300_vm4 = vmmov %vm16294_vm14  ;;  %v16310_v9 = vld [vmem:[#allocation433_spill] sm:$0xff] }
 0x7ab   : > { %v6063_v43 = vrot.slane %v5465_v11, %v12066_v30  ;;  %v6147_v23 = vsel %vm16287_vm9, %v6146_v59, %v6142_v32  ;;  %v16301_v32 = vld [vmem:[#allocation54_spill] sm:$0xff] }
 0x7ad   : > { %v6064_v35 = vsel %vm16285_vm7, %v6063_v43, %v6059_v48  ;;  %v16302_v43 = vld [vmem:[#allocation170_spill] sm:$0xff]  ;;  %vm16307_vm7 = vcmask 15360  }
 0x7ae   : > { %v6239_v38 = vsel %vm16286_vm2, %v6064_v35, %v6238_v5  ;;  %v5561_v51 = vpop.permute.xlu0 %5560  ;;  %v1236_v59 = vmul.f32 %v16302_v43, %v16301_v32  ;;  %v1235_v48 = vmul.f32 %v16302_v43, %v16303_v36  ;;  %v16305_v35 = vld [vmem:[#allocation244_spill] sm:$0xff]  ;;  %vm16311_vm2 = vmmov %vm16307_vm7  ;;  %v16335_v32 = vld [vmem:[#allocation191_spill] sm:$0xff] }
 0x7af   : > { %v6240_v58 = vsel %vm16288_vm5, %v6147_v23, %v6239_v38  ;;  %v6219_v56 = vrot.slane %v5561_v51, %v11956_v28  ;;  %v16292_v28 = vld [vmem:[#allocation356_spill] sm:$0xff]  ;;  %v1202_v26 = vmul.f32 %v16305_v35, %v16304_v46  ;;  %vm16320_vm9 = vmmov %vm16311_vm2 }
 0x7b0   : > { %v5736_v6 = vrot.slane %v16292_v28, %v11852_v22  ;;  %v16306_v38 = vld [vmem:[#allocation20_spill] sm:$0xff]  ;;  %v1482_v23 = vsel %vm16307_vm7, %v1236_v59, 0.0  ;;  %vm16322_vm5 = vmmov %vm16311_vm2  ;;  %v16336_v59 = vld [vmem:[#allocation437_spill] sm:$0xff] }
 0x7b1   : > { %v6220_v19 = vsel %vm4217_vm15, %v6219_v56, %v6215_v45  ;;  %vm16297_vm15 = vcmask 1043459   ;;  %v1201_v51 = vmul.f32 %v16305_v35, %v16306_v38  ;;  %v16309_v56 = vld [vmem:[#allocation95_spill] sm:$0xff]  ;;  %v16312_v45 = vld [vmem:[#allocation24_spill] sm:$0xff]  ;;  %vm16324_vm11 = vmmov %vm16311_vm2  ;;  %v1372_v36 = vmul.f32 %v16336_v59, %v16335_v32 }
 0x7b2   : > { %v5564_v44 = vpop.permute.xlu0 %5563  ;;  %v6242_v13 = vsel %vm16295_vm6, %v5736_v6, %v5653_v53  ;;  %v1270_v39 = vmul.f32 %v16310_v9, %v16309_v56  ;;  %v16313_v53 = vld [vmem:[#allocation110_spill] sm:$0xff]  ;;  %v16337_v46 = vld [vmem:[#allocation32_spill] sm:$0xff]  ;;  %v16338_v38 = vld [vmem:[#allocation187_spill] sm:$0xff] }
 0x7b3   : > { %v6224_v10 = vrot.slane %v5564_v44, %v11943_v14  ;;  %v1481_v44 = vsel %vm16311_vm2, %v1202_v26, 0.0  ;;  %v13323_v26 = vmul.f32 %v16305_v35, %v16337_v46  ;;  %vm16346_vm6 = vmmov %vm16311_vm2  ;;  %v16363_v32 = vld [vmem:[#allocation298_spill] sm:$0xff] }
 0x7b4   : > { %v1483_v41 = vadd.f32 %v1482_v23, %v1481_v44 }
 0x7b5   : > { %v6225_v33 = vsel %vm16291_vm12, %v6224_v10, %v6220_v19  ;;  %v1203_v10 = vmul.f32 %v16305_v35, %v16312_v45  ;;  %v16314_v19 = vld [vmem:[#allocation126_spill] sm:$0xff]  ;;  %vm16329_vm12 = vmmov %vm16311_vm2 }
 0x7b6   : > { %v5315_v3 = vpop.permute.xlu0 %5314  ;;  %v6230_v50 = vsel %vm16293_vm13, %v6229_v52, %v6225_v33  ;;  %v1269_v52 = vmul.f32 %v16310_v9, %v16313_v53  ;;  %v16315_v33 = vld [vmem:[#allocation435_spill] sm:$0xff]  ;;  %vm16330_vm13 = vmmov %vm16311_vm2 }
 0x7b7   : > { %v5819_v40 = vrot.slane %v5315_v3, %v11852_v22  ;;  %v6241_v14 = vsel %vm16294_vm14, %v6230_v50, %v6240_v58  ;;  %v16308_v58 = vld [vmem:[#allocation72_spill] sm:$0xff]  ;;  %v1304_v28 = vmul.f32 %v16315_v33, %v16314_v19  ;;  %v16316_v3 = vld [vmem:[#allocation107_spill] sm:$0xff]  ;;  %vm16342_vm14 = vmmov %vm16311_vm2 }
 0x7b8   : > { %6251 = vxpose.xlu0.b32.start.end [1/1] (short) %v6241_v14, 128  ;;  %v1237_v60 = vmul.f32 %v16302_v43, %v16308_v58  ;;  %v1271_v50 = vmul.f32 %v16310_v9, %v16316_v3  ;;  %v16318_v14 = vld [vmem:[#allocation23_spill] sm:$0xff]  ;;  %v16339_v58 = vld [vmem:[#allocation116_spill] sm:$0xff] }
 0x7b9   : > { %v6243_v30 = vsel %vm16296_vm0, %v5819_v40, %v6242_v13  ;;  %v1204_v40 = vmul.f32 %v16305_v35, %v16317_v57  ;;  %v1206_v13 = vmul.f32 %v16305_v35, %v16318_v14  ;;  %v16345_v19 = vld [vmem:[#allocation436_spill] sm:$0xff]  ;;  %vm16348_vm0 = vmmov %vm16311_vm2  ;;  %v16349_v14 = vld [vmem:[#allocation251_spill] sm:$0xff] }
 0x7ba   : > { %v5417_v18 = vpop.permute.xlu0 %5416  ;;  %v6244_v31 = vsel %vm16297_vm15, %v5902_v54, %v6243_v30  ;;  %v1496_v6 = vadd.f32 %v1237_v60, %v1203_v10  ;;  %v16319_v30 = vld [vmem:[#allocation144_spill] sm:$0xff]  ;;  %v1273_v60 = vmul.f32 %v16310_v9, %v16339_v58  ;;  %vm16353_vm15 = vmmov %vm16348_vm0 }
 0x7bb   : > { %v5985_v37 = vrot.slane %v5417_v18, %v11852_v22  ;;  %v1303_v54 = vmul.f32 %v16315_v33, %v16319_v30  ;;  %vm16371_vm7 = vmmov %vm16348_vm0 }
 0x7bc   : > { %vm16376_vm2 = vmmov %vm16348_vm0 }
 0x7bd   : > { %v6245_v24 = vsel %vm16280_vm1, %v5985_v37, %v6244_v31  ;;  %v1484_v37 = vsel %vm16320_vm9, %v1270_v39, 0.0  ;;  %v16321_v31 = vld [vmem:[#allocation62_spill] sm:$0xff]  ;;  %v16341_v39 = vld [vmem:[#allocation235_spill] sm:$0xff]  ;;  %vm16354_vm1 = vmmov %vm16348_vm0 }
 0x7be   : > { %v5519_v16 = vpop.permute.xlu0 %5518  ;;  %v6246_v20 = vsel %vm16298_vm8, %v6068_v25, %v6245_v24  ;;  %v1238_v47 = vmul.f32 %v16302_v43, %v16321_v31  ;;  %v1485_v24 = vadd.f32 %v1484_v37, %v1483_v41  ;;  %v1486_v25 = vsel %vm16322_vm5, %v1304_v28, 0.0  ;;  %v16343_v41 = vld [vmem:[#allocation130_spill] sm:$0xff]  ;;  %v16351_v37 = vld [vmem:[#allocation156_spill] sm:$0xff]  ;;  %vm16355_vm8 = vmmov %vm16348_vm0 }
 0x7bf   : > { %v6151_v34 = vrot.slane %v5519_v16, %v11852_v22  ;;  %v16323_v16 = vld [vmem:[#allocation151_spill] sm:$0xff]  ;;  %v1371_v44 = vmul.f32 %v16336_v59, %v16341_v39  ;;  %v1306_v53 = vmul.f32 %v16315_v33, %v16343_v41  ;;  %vm16377_vm9 = vmmov %vm16348_vm0 }
 0x7c0   : > { %v16369_v41 = vld [vmem:[#allocation283_spill] sm:$0xff]  ;;  %vm16378_vm5 = vmmov %vm16348_vm0 }
 0x7c1   : > { %v6247_v7 = vsel %vm16299_vm3, %v6151_v34, %v6246_v20  ;;  %v1305_v34 = vmul.f32 %v16315_v33, %v16323_v16  ;;  %v1503_v20 = vsel %vm16324_vm11, %v1204_v40, 0.0  ;;  %v1490_v40 = vsel %vm16348_vm0, %v1372_v36, 0.0  ;;  %vm16358_vm3 = vmmov %vm16348_vm0 }
 0x7c2   : > { %v6248_v4 = vsel %vm16300_vm4, %v6234_v63, %v6247_v7  ;;  %v1497_v63 = vadd.f32 %v1496_v6, %v1271_v50  ;;  %v16325_v7 = vld [vmem:[#allocation29_spill] sm:$0xff]  ;;  %v16347_v50 = vld [vmem:[#allocation56_spill] sm:$0xff]  ;;  %vm16362_vm4 = vmmov %vm16348_vm0  ;;  %v1407_v36 = vmul.f32 %v16345_v19, %v16363_v32 }
 0x7c3   : > { %6283 = vxpose.xlu1.b32.start.end [1/1] (short) (narrow) %v6248_v4, 8  ;;  %v1205_v4 = vmul.f32 %v16305_v35, %v16325_v7  ;;  %v1240_v57 = vmul.f32 %v16302_v43, %v16347_v50  ;;  %v16356_v7 = vld [vmem:[#allocation98_spill] sm:$0xff]  ;;  %vm16379_vm11 = vmmov %vm16348_vm0 }
 0x7c4   : > { %v16372_v50 = vld [vmem:[#allocation150_spill] sm:$0xff] }
 0x838   : > { %v6267_v5 = vpop.trf.xlu0 }
 0x839   : > { %7340 = vmatmul.mubr.msk.f32.vlgmr.msra.gmra.mrb[0].mxu0 %vm6315_vm10, %v6267_v5  ;;  %v16326_v5 = vld [vmem:[#allocation26_spill] sm:$0xff] }
 0x83a   : > { %6437 = vmatprep.mubr.f32.mxu0 %v7859_v49 }
 0x83c   : > { %v6268_v15 = vpop.trf.xlu0 }
 0x83d   : > { %7341 = vmatmul.mubr.msk.f32.gmra.mrb[2].mxu0 %vm6315_vm10, %v6268_v15  ;;  %v13303_v15 = vmul.f32 %v16305_v35, %v16326_v5  ;;  %v1276_v5 = vmul.f32 %v16310_v9, %v16356_v7 }
 0x83e   : > { %6443 = vmatprep.mubr.f32.mxu0 %v7859_v49 }
 0x840   : > { %v6269_v61 = vpop.trf.xlu0 }
 0x841   : > { %7342 = vmatmul.mubr.msk.f32.gmra.mrb[4].mxu0 %vm6315_vm10, %v6269_v61 }
 0x842   : > { %6449 = vmatprep.mubr.f32.mxu0 %v7859_v49 }
 0x843   : > { %v6299_v17 = vpop.trf.xlu1 }
 0x844   : > { %v6270_v22 = vpop.trf.xlu0 }
 0x845   : > { %7343 = vmatmul.mubr.msk.f32.gmra.mrb[6].mxu0 %vm6315_vm10, %v6270_v22  ;;  %v16327_v22 = vld [vmem:[#allocation160_spill] sm:$0xff] }
 0x846   : > { %6455 = vmatprep.mubr.f32.mxu0 %v7859_v49 }
 0x848   : > { %v6271_v27 = vpop.trf.xlu0 }
 0x849   : > { %7344 = vmatmul.mubr.msk.f32.gmra.mrb[8].mxu0 %vm6315_vm10, %v6271_v27  ;;  %v16328_v27 = vld [vmem:[#allocation434_spill] sm:$0xff] }
 0x84a   : > { %6461 = vmatprep.mubr.f32.mxu0 %v7859_v49  ;;  %v1340_v31 = vmul.f32 %v16328_v27, %v16351_v37 }
 0x84c   : > { %v6272_v0 = vpop.trf.xlu0 }
 0x84d   : > { %7345 = vmatmul.mubr.msk.f32.gmra.mrb[10].mxu0 %vm6315_vm10, %v6272_v0  ;;  %v1338_v0 = vmul.f32 %v16328_v27, %v16327_v22 }
 0x84e   : > { %6467 = vmatprep.mubr.f32.mxu0 %v7859_v49 }
 0x84f   : > { %v1488_v10 = vsel %vm16342_vm14, %v1338_v0, 0.0  ;;  %vm16384_vm14 = vmmov %vm16348_vm0 }
 0x850   : > { %v6273_v21 = vpop.trf.xlu0 }
 0x851   : > { %7346 = vmatmul.mubr.msk.f32.gmra.mrb[12].mxu0 %vm6315_vm10, %v6273_v21  ;;  %v1504_v21 = vsel %vm16329_vm12, %v1238_v47, 0.0  ;;  %vm16380_vm12 = vmmov %vm16348_vm0 }
 0x852   : > { %6473 = vmatprep.mubr.f32.mxu0 %v7859_v49  ;;  %v1505_v23 = vadd.f32 %v1504_v21, %v1503_v20  ;;  %v1526_v21 = vsel %vm16358_vm3, %v1240_v57, 0.0  ;;  %v1307_v57 = vmul.f32 %v16315_v33, %v16372_v50  ;;  %vm16399_vm3 = vmmov %vm16348_vm0 }
 0x854   : > { %v6274_v42 = vpop.trf.xlu0 }
 0x855   : > { %7347 = vmatmul.mubr.msk.f32.gmra.mrb[14].mxu0 %vm6315_vm10, %v6274_v42  ;;  %v1525_v42 = vsel %vm16330_vm13, %v1206_v13, 0.0  ;;  %v1373_v13 = vmul.f32 %v16336_v59, %v16349_v14  ;;  %vm16383_vm13 = vmmov %vm16348_vm0 }
 0x856   : > { %6479 = vmatprep.mubr.f32.mxu0 %v7859_v49 }
 0x858   : > { %v6275_v55 = vpop.trf.xlu0 }
 0x859   : > { %7348 = vmatmul.mubr.msk.f32.gmra.mrb[16].mxu0 %vm6315_vm10, %v6275_v55  ;;  %v1487_v55 = vadd.f32 %v1486_v25, %v1485_v24  ;;  %v16352_v24 = vld [vmem:[#allocation111_spill] sm:$0xff] }
 0x85a   : > { %v13350_v25 = vmul.f32 %v16310_v9, %v16352_v24 }
 0x85b   : > { %v1489_v6 = vadd.f32 %v1488_v10, %v1487_v55  ;;  %v16359_v55 = vld [vmem:[#allocation118_spill] sm:$0xff]  ;;  %v16368_v10 = vld [vmem:[#allocation339_spill] sm:$0xff] }
 0x85c   : > { %v6276_v62 = vpop.trf.xlu0 }
 0x85d   : > { %7349 = vmatmul.mubr.msk.f32.vlgmr.msra.gmra.mrb[0].mxu1 %vm6315_vm10, %v6276_v62  ;;  %v16331_v62 = vld [vmem:[#allocation92_spill] sm:$0xff]  ;;  %v1491_v0 = vadd.f32 %v1490_v40, %v1489_v6 }
 0x85e   : > { %6491 = vmatprep.mubr.f32.mxu1 %v7859_v49 }
 0x860   : > { %v6277_v12 = vpop.trf.xlu0 }
 0x861   : > { %7350 = vmatmul.mubr.msk.f32.gmra.mrb[2].mxu1 %vm6315_vm10, %v6277_v12  ;;  %v1272_v12 = vmul.f32 %v16310_v9, %v16331_v62  ;;  %v13362_v62 = vmul.f32 %v16310_v9, %v16359_v55 }
 0x862   : > { %6497 = vmatprep.mubr.f32.mxu1 %v7859_v49 }
 0x863   : > { %v1506_v3 = vsel %vm16346_vm6, %v1272_v12, 0.0  ;;  %v16360_v12 = vld [vmem:[#allocation280_spill] sm:$0xff]  ;;  %vm16392_vm6 = vmmov %vm16348_vm0 }
 0x864   : > { %v6278_v1 = vpop.trf.xlu0  ;;  %v1507_v47 = vadd.f32 %v1506_v3, %v1505_v23  ;;  %v16366_v23 = vld [vmem:[#allocation334_spill] sm:$0xff] }
 0x865   : > { %7351 = vmatmul.mubr.msk.f32.gmra.mrb[4].mxu1 %vm6315_vm10, %v6278_v1  ;;  %v16332_v1 = vld [vmem:[#allocation27_spill] sm:$0xff] }
 0x866   : > { %6503 = vmatprep.mubr.f32.mxu1 %v7859_v49 }
 0x868   : > { %v6279_v2 = vpop.trf.xlu0 }
 0x869   : > { %7352 = vmatmul.mubr.msk.f32.gmra.mrb[6].mxu1 %vm6315_vm10, %v6279_v2  ;;  %v1208_v2 = vmul.f32 %v16305_v35, %v16332_v1  ;;  %v16361_v1 = vld [vmem:[#allocation438_spill] sm:$0xff] }
 0x86a   : > { %6509 = vmatprep.mubr.f32.mxu1 %v7859_v49  ;;  %v1439_v58 = vmul.f32 %v16361_v1, %v16366_v23  ;;  %v16388_v23 = vld [vmem:[#allocation247_spill] sm:$0xff] }
 0x86b   : > { %v1547_v16 = vsel %vm16353_vm15, %v1208_v2, 0.0  ;;  %v1440_v2 = vmul.f32 %v16361_v1, %v16360_v12  ;;  %v16382_v12 = vld [vmem:[#allocation67_spill] sm:$0xff]  ;;  %vm16396_vm15 = vmmov %vm16348_vm0 }
 0x86c   : > { %v6280_v8 = vpop.trf.xlu0 }
 0x86d   : > { %7353 = vmatmul.mubr.msk.f32.gmra.mrb[8].mxu1 %vm6315_vm10, %v6280_v8  ;;  %v16333_v8 = vld [vmem:[#allocation33_spill] sm:$0xff]  ;;  %v1494_v6 = vsel %vm16371_vm7, %v1440_v2, 0.0  ;;  %v1244_v2 = vmul.f32 %v16302_v43, %v16382_v12  ;;  %v16403_v12 = vld [vmem:[#allocation80_spill] sm:$0xff]  ;;  %vm16415_vm7 = vmmov %vm16348_vm0 }
 0x86e   : > { %6515 = vmatprep.mubr.f32.mxu1 %v7859_v49 }
 0x870   : > { %v6281_v29 = vpop.trf.xlu0 }
 0x871   : > { %7354 = vmatmul.mubr.msk.f32.gmra.mrb[10].mxu1 %vm6315_vm10, %v6281_v29  ;;  %v13315_v29 = vmul.f32 %v16305_v35, %v16333_v8 }
 0x872   : > { %6521 = vmatprep.mubr.f32.mxu1 %v7859_v49 }
 0x874   : > { %v6282_v11 = vpop.trf.xlu0 }
 0x875   : > { %7355 = vmatmul.mubr.msk.f32.gmra.mrb[12].mxu1 %vm6315_vm10, %v6282_v11  ;;  %v16334_v11 = vld [vmem:[#allocation189_spill] sm:$0xff] }
 0x876   : > { %6527 = vmatprep.mubr.f32.mxu1 %v7859_v49  ;;  %v1473_v49 = vadd.f32 %v1235_v48, %v1201_v51  ;;  %v1498_v48 = vadd.f32 %v1497_v63, %v1305_v34  ;;  %v1339_v51 = vmul.f32 %v16328_v27, %v16338_v38  ;;  %v1508_v63 = vsel %vm16354_vm1, %v1306_v53, 0.0  ;;  %vm16397_vm1 = vmmov %vm16348_vm0 }
 0x877   : > { %v1509_v38 = vadd.f32 %v1508_v63, %v1507_v47  ;;  %v1442_v53 = vmul.f32 %v16361_v1, %v16369_v41  ;;  %v1570_v41 = vsel %vm16348_vm0, %v1244_v2, 0.0  ;;  %v1245_v2 = vmul.f32 %v16302_v43, %v16403_v12 }
 0x878   : > { %v1474_v18 = vadd.f32 %v1473_v49, %v1269_v52  ;;  %v16340_v49 = vld [vmem:[#allocation100_spill] sm:$0xff]  ;;  %v16344_v52 = vld [vmem:[#allocation238_spill] sm:$0xff]  ;;  %v1499_v30 = vadd.f32 %v1498_v48, %v1339_v51  ;;  %v16364_v48 = vld [vmem:[#allocation195_spill] sm:$0xff] }
 0x879   : > { %7356 = vmatmul.mubr.msk.f32.gmra.mrb[14].mxu1 %vm6315_vm10, %v6299_v17  ;;  %v1337_v17 = vmul.f32 %v16328_v27, %v16334_v11  ;;  %v1274_v56 = vmul.f32 %v16310_v9, %v16340_v49  ;;  %v1406_v28 = vmul.f32 %v16345_v19, %v16344_v52  ;;  %v1374_v46 = vmul.f32 %v16336_v59, %v16364_v48  ;;  %vm16365_vm10 = vmmov %vm16348_vm0  ;;  %v16370_v52 = vld [vmem:[#allocation127_spill] sm:$0xff] }
 0x87a   : > { %v1475_v61 = vadd.f32 %v1474_v18, %v1303_v54  ;;  %v16350_v54 = vld [vmem:[#allocation71_spill] sm:$0xff]  ;;  %v1500_v11 = vadd.f32 %v1499_v30, %v1373_v13  ;;  %v1510_v51 = vsel %vm16365_vm10, %v1340_v31, 0.0  ;;  %v16373_v13 = vld [vmem:[#allocation76_spill] sm:$0xff]  ;;  %v1516_v7 = vsel %vm16379_vm11, %v1442_v53, 0.0  ;;  %vm16409_vm10 = vmmov %vm16348_vm0 }
 0x87b   : > { %v1239_v18 = vmul.f32 %v16302_v43, %v16350_v54  ;;  %v1528_v20 = vsel %vm16355_vm8, %v1274_v56, 0.0  ;;  %v1492_v8 = vsel %vm16362_vm4, %v1406_v28, 0.0  ;;  %v16367_v56 = vld [vmem:[#allocation232_spill] sm:$0xff]  ;;  %v1308_v28 = vmul.f32 %v16315_v33, %v16370_v52  ;;  %v16393_v52 = vld [vmem:[#allocation155_spill] sm:$0xff]  ;;  %vm16398_vm8 = vmmov %vm16348_vm0 }
 0x87c   : > { %v1476_v45 = vadd.f32 %v1475_v61, %v1337_v17  ;;  %v16357_v61 = vld [vmem:[#allocation303_spill] sm:$0xff]  ;;  %v1408_v39 = vmul.f32 %v16345_v19, %v16367_v56  ;;  %v1501_v3 = vadd.f32 %v1500_v11, %v1407_v36  ;;  %v1511_v14 = vadd.f32 %v1510_v51, %v1509_v38  ;;  %v16374_v30 = vld [vmem:[#allocation68_spill] sm:$0xff]  ;;  %v16386_v36 = vld [vmem:[#allocation193_spill] sm:$0xff] }
 0x87d   : > { %v1405_v22 = vmul.f32 %v16345_v19, %v16357_v61  ;;  %v1518_v17 = vadd.f32 %v1239_v18, %v1205_v4  ;;  %v1441_v4 = vmul.f32 %v16361_v1, %v16368_v10  ;;  %v1242_v54 = vmul.f32 %v16302_v43, %v16374_v30  ;;  %v16375_v18 = vld [vmem:[#allocation105_spill] sm:$0xff]  ;;  %v16387_v38 = vld [vmem:[#allocation75_spill] sm:$0xff]  ;;  %vm16402_vm4 = vmmov %vm16348_vm0 }
 0x87e   : > { %v1477_v34 = vadd.f32 %v1476_v45, %v1371_v44  ;;  %v1527_v44 = vadd.f32 %v1526_v21, %v1525_v42  ;;  %v1493_v45 = vadd.f32 %v1492_v8, %v1491_v0  ;;  %v1241_v42 = vmul.f32 %v16302_v43, %v16373_v13  ;;  %v16381_v21 = vld [vmem:[#allocation164_spill] sm:$0xff]  ;;  %v16390_v56 = vld [vmem:[#allocation241_spill] sm:$0xff]  ;;  %vm16425_vm11 = vmmov %vm16348_vm0 }
 0x87f   : > { %v1519_v40 = vadd.f32 %v1518_v17, %v1273_v60  ;;  %v1278_v37 = vmul.f32 %v16310_v9, %v16375_v18  ;;  %v1512_v47 = vsel %vm16376_vm2, %v1374_v46, 0.0  ;;  %v1514_v60 = vsel %vm16378_vm5, %v1408_v39, 0.0  ;;  %v16385_v17 = vld [vmem:[#allocation197_spill] sm:$0xff]  ;;  %vm16416_vm2 = vmmov %vm16348_vm0 }
 0x880   : > { %v1478_v49 = vadd.f32 %v1477_v34, %v1405_v22  ;;  %v1529_v24 = vadd.f32 %v1528_v20, %v1527_v44  ;;  %v1550_v34 = vsel %vm16377_vm9, %v1276_v5, 0.0  ;;  %v13395_v63 = vadd.f32 %v1494_v6, %v1493_v45  ;;  %vm16420_vm9 = vmmov %vm16348_vm0 }
 0x881   : > { %v1530_v61 = vsel %vm16380_vm12, %v1308_v28, 0.0  ;;  %v13400_v22 = vadd.f32 %v1501_v3, %v1441_v4  ;;  %v1520_v0 = vadd.f32 %v1519_v40, %v1307_v57  ;;  %v1342_v55 = vmul.f32 %v16328_v27, %v16381_v21  ;;  %v16394_v3 = vld [vmem:[#allocation132_spill] sm:$0xff]  ;;  %v16395_v57 = vld [vmem:[#allocation337_spill] sm:$0xff]  ;;  %vm16423_vm5 = vmmov %vm16348_vm0 }
 0x882   : > { %v13391_v31 = vadd.f32 %v1478_v49, %v1439_v58  ;;  %v1513_v20 = vadd.f32 %v1512_v47, %v1511_v14  ;;  %v1540_v5 = vadd.f32 %v1241_v42, %v13303_v15  ;;  %v1548_v8 = vsel %vm16383_vm13, %v1242_v54, 0.0  ;;  %v16389_v49 = vld [vmem:[#allocation311_spill] sm:$0xff]  ;;  %vm16428_vm12 = vmmov %vm16348_vm0 }
 0x883   : > { %v1569_v11 = vsel %vm16384_vm14, %v13323_v26, 0.0  ;;  %v1341_v32 = vmul.f32 %v16328_v27, %v16385_v17  ;;  %v1376_v48 = vmul.f32 %v16336_v59, %v16386_v36  ;;  %v1531_v46 = vadd.f32 %v1530_v61, %v1529_v24  ;;  %v16391_v26 = vld [vmem:[#allocation281_spill] sm:$0xff]  ;;  %v16401_v61 = vld [vmem:[#allocation134_spill] sm:$0xff]  ;;  %vm16430_vm13 = vmmov %vm16348_vm0 }
 0x884   : > { %v1243_v51 = vmul.f32 %v16302_v43, %v16387_v38  ;;  %v1375_v58 = vmul.f32 %v16336_v59, %v16388_v23  ;;  %v1409_v15 = vmul.f32 %v16345_v19, %v16389_v49  ;;  %v1410_v39 = vmul.f32 %v16345_v19, %v16390_v56  ;;  %v16406_v17 = vld [vmem:[#allocation162_spill] sm:$0xff]  ;;  %vm16431_vm14 = vmmov %vm16348_vm0 }
 0x885   : > { %v1444_v44 = vmul.f32 %v16361_v1, %v16391_v26  ;;  %v1521_v45 = vadd.f32 %v1520_v0, %v1341_v32  ;;  %v1532_v10 = vsel %vm16392_vm6, %v1342_v55, 0.0  ;;  %v1549_v4 = vadd.f32 %v1548_v8, %v1547_v16  ;;  %v16405_v8 = vld [vmem:[#allocation153_spill] sm:$0xff]  ;;  %v16410_v49 = vld [vmem:[#allocation74_spill] sm:$0xff]  ;;  %v16411_v26 = vld [vmem:[#allocation239_spill] sm:$0xff] }
 0x886   : > { %v1515_v53 = vadd.f32 %v1514_v60, %v1513_v20  ;;  %v1309_v28 = vmul.f32 %v16315_v33, %v16393_v52  ;;  %v1541_v6 = vadd.f32 %v1540_v5, %v13350_v25  ;;  %v1310_v50 = vmul.f32 %v16315_v33, %v16394_v3  ;;  %v16400_v25 = vld [vmem:[#allocation192_spill] sm:$0xff]  ;;  %v16404_v5 = vld [vmem:[#allocation22_spill] sm:$0xff]  ;;  %vm16433_vm6 = vmmov %vm16348_vm0 }
 0x887   : > { %v1443_v40 = vmul.f32 %v16361_v1, %v16395_v57  ;;  %v1533_v14 = vadd.f32 %v1532_v10, %v1531_v46  ;;  %v1534_v13 = vsel %vm16396_vm15, %v1376_v48, 0.0  ;;  %v1562_v42 = vadd.f32 %v1243_v51, %v13315_v29  ;;  %v16408_v46 = vld [vmem:[#allocation30_spill] sm:$0xff]  ;;  %v16417_v57 = vld [vmem:[#allocation115_spill] sm:$0xff]  ;;  %vm16440_vm15 = vmmov %vm16348_vm0 }
 0x888   : > { %v1536_v16 = vsel %vm16397_vm1, %v1410_v39, 0.0  ;;  %v1538_v30 = vsel %vm16398_vm8, %v1444_v44, 0.0  ;;  %v1571_v54 = vadd.f32 %v1570_v41, %v1569_v11  ;;  %v1572_v18 = vsel %vm16399_vm3, %v1278_v37, 0.0  ;;  %v16412_v44 = vld [vmem:[#allocation291_spill] sm:$0xff]  ;;  %vm16445_vm1 = vmmov %vm16348_vm0 }
 0x889   : > { %v1522_v47 = vadd.f32 %v1521_v45, %v1375_v58  ;;  %v1343_v24 = vmul.f32 %v16328_v27, %v16400_v25  ;;  %v1551_v60 = vadd.f32 %v1550_v34, %v1549_v4  ;;  %v1312_v0 = vmul.f32 %v16315_v33, %v16401_v61  ;;  %v16422_v61 = vld [vmem:[#allocation161_spill] sm:$0xff]  ;;  %vm16451_vm8 = vmmov %vm16348_vm0 }
 0x88a   : > { %v13442_v21 = vadd.f32 %v1516_v7, %v1515_v53  ;;  %v1542_v55 = vadd.f32 %v1541_v6, %v1309_v28  ;;  %v1552_v29 = vsel %vm16402_vm4, %v1310_v50, 0.0  ;;  %v1535_v20 = vadd.f32 %v1534_v13, %v1533_v14  ;;  %v16407_v7 = vld [vmem:[#allocation199_spill] sm:$0xff]  ;;  %v16413_v53 = vld [vmem:[#allocation168_spill] sm:$0xff]  ;;  %vm16452_vm3 = vmmov %vm16348_vm0 }
 0x88b   : > { %v1377_v37 = vmul.f32 %v16336_v59, %v16404_v5  ;;  %v1311_v11 = vmul.f32 %v16315_v33, %v16405_v8  ;;  %v1563_v34 = vadd.f32 %v1562_v42, %v13362_v62  ;;  %v1344_v32 = vmul.f32 %v16328_v27, %v16406_v17  ;;  %v16418_v42 = vld [vmem:[#allocation202_spill] sm:$0xff]  ;;  %v16426_v8 = vld [vmem:[#allocation304_spill] sm:$0xff]  ;;  %vm16453_vm4 = vmmov %vm16348_vm0 }
 0x88c   : > { %v1378_v36 = vmul.f32 %v16336_v59, %v16407_v7  ;;  %v1573_v48 = vadd.f32 %v1572_v18, %v1571_v54  ;;  %v1211_v38 = vmul.f32 %v16305_v35, %v16408_v46  ;;  %v1523_v51 = vadd.f32 %v1522_v47, %v1409_v15  ;;  %v16414_v15 = vld [vmem:[#allocation31_spill] sm:$0xff]  ;;  %v16429_v46 = vld [vmem:[#allocation137_spill] sm:$0xff] }
 0x88d   : > { %v1553_v23 = vadd.f32 %v1552_v29, %v1551_v60  ;;  %v1574_v58 = vsel %vm16409_vm10, %v1312_v0, 0.0  ;;  %v1246_v56 = vmul.f32 %v16302_v43, %v16410_v49  ;;  %v1543_v39 = vadd.f32 %v1542_v55, %v1343_v24  ;;  %v16421_v24 = vld [vmem:[#allocation252_spill] sm:$0xff]  ;;  %vm16455_vm10 = vmmov %vm16348_vm0 }
 0x88e   : > { %v1412_v62 = vmul.f32 %v16345_v19, %v16411_v26  ;;  %v1446_v45 = vmul.f32 %v16361_v1, %v16412_v44  ;;  %v1584_v10 = vadd.f32 %v1245_v2, %v1211_v38  ;;  %v1537_v4 = vadd.f32 %v1536_v16, %v1535_v20  ;;  %v16419_v16 = vld [vmem:[#allocation198_spill] sm:$0xff]  ;;  %v16424_v2 = vld [vmem:[#allocation104_spill] sm:$0xff]  ;;  %v16432_v44 = vld [vmem:[#allocation245_spill] sm:$0xff] }
 0x88f   : > { %v1564_v41 = vadd.f32 %v1563_v34, %v1311_v11  ;;  %v1346_v52 = vmul.f32 %v16328_v27, %v16413_v53  ;;  %v1212_v28 = vmul.f32 %v16305_v35, %v16414_v15  ;;  %v1554_v6 = vsel %vm16415_vm7, %v1344_v32, 0.0  ;;  %v16427_v34 = vld [vmem:[#allocation287_spill] sm:$0xff]  ;;  %vm16457_vm7 = vmmov %vm16348_vm0 }
 0x890   : > { %v1556_v3 = vsel %vm16416_vm2, %v1378_v36, 0.0  ;;  %v1575_v50 = vadd.f32 %v1574_v58, %v1573_v48  ;;  %v1279_v14 = vmul.f32 %v16310_v9, %v16417_v57  ;;  %v1555_v13 = vadd.f32 %v1554_v6, %v1553_v23  ;;  %v16437_v6 = vld [vmem:[#allocation290_spill] sm:$0xff]  ;;  %v16438_v57 = vld [vmem:[#allocation28_spill] sm:$0xff]  ;;  %vm16460_vm2 = vmmov %vm16348_vm0 }
 0x891   : > { %v1345_v54 = vmul.f32 %v16328_v27, %v16418_v42  ;;  %v1380_v18 = vmul.f32 %v16336_v59, %v16419_v16  ;;  %v1592_v47 = vsel %vm16420_vm9, %v1246_v56, 0.0  ;;  %v1544_v25 = vadd.f32 %v1543_v39, %v1377_v37  ;;  %v16439_v42 = vld [vmem:[#allocation79_spill] sm:$0xff]  ;;  %vm16468_vm9 = vmmov %vm16348_vm0 }
 0x892   : > { %v1379_v60 = vmul.f32 %v16336_v59, %v16421_v24  ;;  %v1313_v0 = vmul.f32 %v16315_v33, %v16422_v61  ;;  %v1585_v55 = vadd.f32 %v1584_v10, %v1279_v14  ;;  %v1576_v12 = vsel %vm16423_vm5, %v1346_v52, 0.0  ;;  %v16435_v52 = vld [vmem:[#allocation196_spill] sm:$0xff]  ;;  %v16442_v24 = vld [vmem:[#allocation73_spill] sm:$0xff]  ;;  %vm16470_vm5 = vmmov %vm16348_vm0 }
 0x893   : > { %v1565_v29 = vadd.f32 %v1564_v41, %v1345_v54  ;;  %v1280_v20 = vmul.f32 %v16310_v9, %v16424_v2  ;;  %v1591_v5 = vsel %vm16425_vm11, %v1212_v28, 0.0  ;;  %v1411_v11 = vmul.f32 %v16345_v19, %v16426_v8  ;;  %v16436_v28 = vld [vmem:[#allocation340_spill] sm:$0xff]  ;;  %v16446_v8 = vld [vmem:[#allocation249_spill] sm:$0xff]  ;;  %vm16472_vm11 = vmmov %vm16348_vm0 }
 0x894   : > { %v1445_v37 = vmul.f32 %v16361_v1, %v16427_v34  ;;  %v1577_v17 = vadd.f32 %v1576_v12, %v1575_v50  ;;  %v1593_v32 = vadd.f32 %v1592_v47, %v1591_v5  ;;  %v13490_v7 = vadd.f32 %v1523_v51, %v1443_v40  ;;  %v16434_v51 = vld [vmem:[#allocation315_spill] sm:$0xff]  ;;  %v16447_v34 = vld [vmem:[#allocation36_spill] sm:$0xff] }
 0x895   : > { %v1557_v36 = vadd.f32 %v1556_v3, %v1555_v13  ;;  %v1578_v48 = vsel %vm16428_vm12, %v1380_v18, 0.0  ;;  %v1314_v38 = vmul.f32 %v16315_v33, %v16429_v46  ;;  %v13495_v23 = vadd.f32 %v1538_v30, %v1537_v4  ;;  %v16441_v47 = vld [vmem:[#allocation167_spill] sm:$0xff]  ;;  %vm16474_vm12 = vmmov %vm16348_vm0 }
 0x896   : > { %v1545_v58 = vadd.f32 %v1544_v25, %v1411_v11  ;;  %v1558_v49 = vsel %vm16430_vm13, %v1412_v62, 0.0  ;;  %v1586_v56 = vadd.f32 %v1585_v55, %v1313_v0  ;;  %v1560_v39 = vsel %vm16431_vm14, %v1446_v45, 0.0  ;;  %v16443_v0 = vld [vmem:[#allocation205_spill] sm:$0xff]  ;;  %v16444_v12 = vld [vmem:[#allocation39_spill] sm:$0xff]  ;;  %vm16483_vm13 = vmmov %vm16348_vm0 }
 0x897   : > { %v1566_v26 = vadd.f32 %v1565_v29, %v1379_v60  ;;  %v1414_v10 = vmul.f32 %v16345_v19, %v16432_v44  ;;  %v1594_v40 = vsel %vm16433_vm6, %v1280_v20, 0.0  ;;  %v1413_v41 = vmul.f32 %v16345_v19, %v16434_v51  ;;  %v16454_v51 = vld [vmem:[#allocation122_spill] sm:$0xff]  ;;  %vm16487_vm14 = vmmov %vm16348_vm0 }
 0x898   : > { %v1579_v53 = vadd.f32 %v1578_v48, %v1577_v17  ;;  %v1347_v30 = vmul.f32 %v16328_v27, %v16435_v52  ;;  %v1595_v4 = vadd.f32 %v1594_v40, %v1593_v32  ;;  %v1559_v15 = vadd.f32 %v1558_v49, %v1557_v36  ;;  %v16448_v17 = vld [vmem:[#allocation309_spill] sm:$0xff]  ;;  %v16449_v36 = vld [vmem:[#allocation346_spill] sm:$0xff]  ;;  %v16450_v49 = vld [vmem:[#allocation296_spill] sm:$0xff] }
 0x899   : > { %v1447_v62 = vmul.f32 %v16361_v1, %v16436_v28  ;;  %v1448_v45 = vmul.f32 %v16361_v1, %v16437_v6  ;;  %v1596_v3 = vsel %vm16348_vm0, %v1314_v38, 0.0  ;;  %v13511_v50 = vadd.f32 %v1545_v58, %v1445_v37  ;;  %v16456_v52 = vld [vmem:[#allocation109_spill] sm:$0xff]  ;;  %v16459_v6 = vld [vmem:[#allocation158_spill] sm:$0xff]  ;;  %vm16488_vm6 = vmmov %vm16348_vm0 }
 0x89a   : > { %v1381_v14 = vmul.f32 %v16336_v59, %v16438_v57  ;;  %v1587_v13 = vadd.f32 %v1586_v56, %v1347_v30  ;;  %v1247_v54 = vmul.f32 %v16302_v43, %v16439_v42  ;;  %v1567_v16 = vadd.f32 %v1566_v26, %v1413_v41 }
 0x89b   : > { %v1580_v18 = vsel %vm16440_vm15, %v1414_v10, 0.0  ;;  %v1348_v25 = vmul.f32 %v16328_v27, %v16441_v47  ;;  %v1248_v60 = vmul.f32 %v16302_v43, %v16442_v24  ;;  %v1382_v55 = vmul.f32 %v16336_v59, %v16443_v0  ;;  %v16464_v24 = vld [vmem:[#allocation208_spill] sm:$0xff]  ;;  %vm16489_vm15 = vmmov %vm16348_vm0 }
 0x89c   : > { %v1581_v61 = vadd.f32 %v1580_v18, %v1579_v53  ;;  %v1597_v29 = vadd.f32 %v1596_v3, %v1595_v4  ;;  %v1213_v2 = vmul.f32 %v16305_v35, %v16444_v12  ;;  %v13526_v20 = vadd.f32 %v1560_v39, %v1559_v15  ;;  %v16458_v15 = vld [vmem:[#allocation78_spill] sm:$0xff]  ;;  %v16463_v18 = vld [vmem:[#allocation35_spill] sm:$0xff] }
 0x89d   : > { %v1582_v5 = vsel %vm16445_vm1, %v1448_v45, 0.0  ;;  %v1416_v11 = vmul.f32 %v16345_v19, %v16446_v8  ;;  %v1214_v37 = vmul.f32 %v16305_v35, %v16447_v34  ;;  %v1415_v32 = vmul.f32 %v16345_v19, %v16448_v17  ;;  %v16467_v12 = vld [vmem:[#allocation343_spill] sm:$0xff]  ;;  %v16469_v8 = vld [vmem:[#allocation34_spill] sm:$0xff]  ;;  %vm16493_vm1 = vmmov %vm16348_vm0 }
 0x89e   : > { %v1449_v48 = vmul.f32 %v16361_v1, %v16449_v36  ;;  %v1588_v46 = vadd.f32 %v1587_v13, %v1381_v14  ;;  %v1606_v38 = vadd.f32 %v1247_v54, %v1213_v2  ;;  %v13537_v58 = vadd.f32 %v1567_v16, %v1447_v62  ;;  %v16461_v13 = vld [vmem:[#allocation139_spill] sm:$0xff]  ;;  %v16462_v54 = vld [vmem:[#allocation85_spill] sm:$0xff] }
 0x89f   : > { %v1450_v56 = vmul.f32 %v16361_v1, %v16450_v49  ;;  %v1598_v39 = vsel %vm16451_vm8, %v1348_v25, 0.0  ;;  %v1614_v26 = vsel %vm16452_vm3, %v1248_v60, 0.0  ;;  %v13543_v44 = vadd.f32 %v1582_v5, %v1581_v61  ;;  %v16465_v61 = vld [vmem:[#allocation257_spill] sm:$0xff]  ;;  %v16471_v36 = vld [vmem:[#allocation83_spill] sm:$0xff]  ;;  %vm16494_vm8 = vmmov %vm16348_vm0 }
 0x8a0   : > { %v1599_v10 = vadd.f32 %v1598_v39, %v1597_v29  ;;  %v1600_v40 = vsel %vm16453_vm4, %v1382_v55, 0.0  ;;  %v1281_v41 = vmul.f32 %v16310_v9, %v16454_v51  ;;  %v1602_v53 = vsel %vm16455_vm10, %v1416_v11, 0.0  ;;  %v16466_v55 = vld [vmem:[#allocation321_spill] sm:$0xff]  ;;  %vm16495_vm3 = vmmov %vm16348_vm0 }
 0x8a1   : > { %v1282_v30 = vmul.f32 %v16310_v9, %v16456_v52  ;;  %v1613_v4 = vsel %vm16457_vm7, %v1214_v37, 0.0  ;;  %v1250_v28 = vmul.f32 %v16302_v43, %v16458_v15  ;;  %v1589_v62 = vadd.f32 %v1588_v46, %v1415_v32  ;;  %v16478_v15 = vld [vmem:[#allocation120_spill] sm:$0xff]  ;;  %vm16501_vm4 = vmmov %vm16348_vm0 }
 0x8a2   : > { %v1315_v45 = vmul.f32 %v16315_v33, %v16459_v6  ;;  %v1607_v3 = vadd.f32 %v1606_v38, %v1281_v41  ;;  %v1615_v57 = vadd.f32 %v1614_v26, %v1613_v4  ;;  %v1604_v14 = vsel %vm16460_vm2, %v1450_v56, 0.0  ;;  %v16473_v56 = vld [vmem:[#allocation108_spill] sm:$0xff]  ;;  %vm16502_vm10 = vmmov %vm16348_vm0 }
 0x8a3   : > { %v1316_v42 = vmul.f32 %v16315_v33, %v16461_v13  ;;  %v1249_v16 = vmul.f32 %v16302_v43, %v16462_v54  ;;  %v1216_v47 = vmul.f32 %v16305_v35, %v16463_v18  ;;  %v1601_v25 = vadd.f32 %v1600_v40, %v1599_v10  ;;  %v16475_v40 = vld [vmem:[#allocation173_spill] sm:$0xff]  ;;  %vm16507_vm7 = vmmov %vm16348_vm0 }
 0x8a4   : > { %v1349_v60 = vmul.f32 %v16328_v27, %v16464_v24  ;;  %v1383_v0 = vmul.f32 %v16336_v59, %v16465_v61  ;;  %v1417_v29 = vmul.f32 %v16345_v19, %v16466_v55  ;;  %v13571_v2 = vmul.f32 %v16361_v1, %v16467_v12  ;;  %v16484_v24 = vld [vmem:[#allocation42_spill] sm:$0xff]  ;;  %v16485_v12 = vld [vmem:[#allocation295_spill] sm:$0xff]  ;;  %vm16508_vm2 = vmmov %vm16348_vm0 }
 0x8a5   : > { %v1616_v5 = vsel %vm16468_vm9, %v1282_v30, 0.0  ;;  %v1215_v11 = vmul.f32 %v16305_v35, %v16469_v8  ;;  %v1636_v34 = vsel %vm16470_vm5, %v1250_v28, 0.0  ;;  %v13577_v37 = vadd.f32 %v1589_v62, %v1449_v48  ;;  %v16476_v48 = vld [vmem:[#allocation44_spill] sm:$0xff]  ;;  %v16479_v62 = vld [vmem:[#allocation141_spill] sm:$0xff]  ;;  %vm16518_vm9 = vmmov %vm16348_vm0 }
 0x8a6   : > { %v1608_v17 = vadd.f32 %v1607_v3, %v1315_v45  ;;  %v1617_v32 = vadd.f32 %v1616_v5, %v1615_v57  ;;  %v1251_v46 = vmul.f32 %v16302_v43, %v16471_v36  ;;  %v1618_v38 = vsel %vm16472_vm11, %v1316_v42, 0.0  ;;  %v16477_v30 = vld [vmem:[#allocation204_spill] sm:$0xff]  ;;  %v16480_v45 = vld [vmem:[#allocation77_spill] sm:$0xff]  ;;  %vm16519_vm5 = vmmov %vm16348_vm0 }
 0x8a7   : > { %v1628_v49 = vadd.f32 %v1249_v16, %v1215_v11  ;;  %v1284_v39 = vmul.f32 %v16310_v9, %v16473_v56  ;;  %v1635_v26 = vsel %vm16474_vm12, %v1216_v47, 0.0  ;;  %v1603_v10 = vadd.f32 %v1602_v53, %v1601_v25  ;;  %v16481_v57 = vld [vmem:[#allocation253_spill] sm:$0xff]  ;;  %v16482_v16 = vld [vmem:[#allocation166_spill] sm:$0xff]  ;;  %v16486_v8 = vld [vmem:[#allocation128_spill] sm:$0xff] }
 0x8a8   : > { %v1350_v51 = vmul.f32 %v16328_v27, %v16475_v40  ;;  %v1637_v41 = vadd.f32 %v1636_v34, %v1635_v26  ;;  %v1217_v52 = vmul.f32 %v16305_v35, %v16476_v48  ;;  %v1384_v4 = vmul.f32 %v16336_v59, %v16477_v30  ;;  %v16491_v26 = vld [vmem:[#allocation172_spill] sm:$0xff]  ;;  %vm16521_vm11 = vmmov %vm16348_vm0 }
 0x8a9   : > { %v1283_v28 = vmul.f32 %v16310_v9, %v16478_v15  ;;  %v1318_v6 = vmul.f32 %v16315_v33, %v16479_v62  ;;  %v1252_v3 = vmul.f32 %v16302_v43, %v16480_v45  ;;  %v1609_v53 = vadd.f32 %v1608_v17, %v1349_v60  ;;  %v16492_v40 = vld [vmem:[#allocation112_spill] sm:$0xff]  ;;  %vm16522_vm12 = vmmov %vm16348_vm0 }
 0x8aa   : > { %v1418_v13 = vmul.f32 %v16345_v19, %v16481_v57  ;;  %v1619_v42 = vadd.f32 %v1618_v38, %v1617_v32  ;;  %v1650_v54 = vadd.f32 %v1251_v46, %v1217_v52  ;;  %v1317_v18 = vmul.f32 %v16315_v33, %v16482_v16 }
 0x8ab   : > { %v1629_v47 = vadd.f32 %v1628_v49, %v1283_v28  ;;  %v1638_v25 = vsel %vm16483_vm13, %v1284_v39, 0.0  ;;  %v1218_v61 = vmul.f32 %v16305_v35, %v16484_v24  ;;  %v13604_v55 = vadd.f32 %v1604_v14, %v1603_v10  ;;  %v16490_v49 = vld [vmem:[#allocation165_spill] sm:$0xff]  ;;  %v16503_v24 = vld [vmem:[#allocation40_spill] sm:$0xff]  ;;  %vm16524_vm13 = vmmov %vm16348_vm0 }
 0x8ac   : > { %v1452_v5 = vmul.f32 %v16361_v1, %v16485_v12  ;;  %v1639_v60 = vadd.f32 %v1638_v25, %v1637_v41  ;;  %v1285_v11 = vmul.f32 %v16310_v9, %v16486_v8  ;;  %v1620_v34 = vsel %vm16487_vm14, %v1350_v51, 0.0  ;;  %v16497_v28 = vld [vmem:[#allocation209_spill] sm:$0xff]  ;;  %v16504_v12 = vld [vmem:[#allocation316_spill] sm:$0xff]  ;;  %v16505_v8 = vld [vmem:[#allocation214_spill] sm:$0xff] }
 0x8ad   : > { %v1622_v17 = vsel %vm16488_vm6, %v1384_v4, 0.0  ;;  %v1640_v32 = vsel %vm16348_vm0, %v1318_v6, 0.0  ;;  %v1658_v36 = vsel %vm16489_vm15, %v1252_v3, 0.0  ;;  %v1610_v46 = vadd.f32 %v1609_v53, %v1383_v0  ;;  %v16496_v4 = vld [vmem:[#allocation203_spill] sm:$0xff]  ;;  %v16499_v3 = vld [vmem:[#allocation89_spill] sm:$0xff]  ;;  %vm16526_vm14 = vmmov %vm16348_vm0 }
 0x8ae   : > { %v1621_v38 = vadd.f32 %v1620_v34, %v1619_v42  ;;  %v1319_v14 = vmul.f32 %v16315_v33, %v16490_v49  ;;  %v1651_v56 = vadd.f32 %v1650_v54, %v1285_v11  ;;  %v1630_v39 = vadd.f32 %v1629_v47, %v1317_v18  ;;  %v16498_v6 = vld [vmem:[#allocation143_spill] sm:$0xff]  ;;  %v16500_v54 = vld [vmem:[#allocation270_spill] sm:$0xff]  ;;  %v16509_v49 = vld [vmem:[#allocation301_spill] sm:$0xff] }
 0x8af   : > { %v1352_v10 = vmul.f32 %v16328_v27, %v16491_v26  ;;  %v1286_v41 = vmul.f32 %v16310_v9, %v16492_v40  ;;  %v1657_v51 = vsel %vm16493_vm1, %v1218_v61, 0.0  ;;  %v1624_v48 = vsel %vm16494_vm8, %v1418_v13, 0.0  ;;  %v16506_v34 = vld [vmem:[#allocation255_spill] sm:$0xff]  ;;  %v16511_v40 = vld [vmem:[#allocation177_spill] sm:$0xff]  ;;  %vm16535_vm6 = vmmov %vm16348_vm0 }
 0x8b0   : > { %v1626_v52 = vsel %vm16495_vm3, %v1452_v5, 0.0  ;;  %v1641_v30 = vadd.f32 %v1640_v32, %v1639_v60  ;;  %v1659_v0 = vadd.f32 %v1658_v36, %v1657_v51  ;;  %v1351_v15 = vmul.f32 %v16328_v27, %v16496_v4  ;;  %v16512_v51 = vld [vmem:[#allocation124_spill] sm:$0xff]  ;;  %vm16537_vm15 = vmmov %vm16348_vm0 }
 0x8b1   : > { %v1386_v62 = vmul.f32 %v16336_v59, %v16497_v28  ;;  %v1320_v45 = vmul.f32 %v16315_v33, %v16498_v6  ;;  %v1253_v53 = vmul.f32 %v16302_v43, %v16499_v3  ;;  %v1611_v57 = vadd.f32 %v1610_v46, %v1417_v29  ;;  %v16514_v28 = vld [vmem:[#allocation211_spill] sm:$0xff]  ;;  %vm16538_vm1 = vmmov %vm16348_vm0 }
 0x8b2   : > { %v1623_v42 = vadd.f32 %v1622_v17, %v1621_v38  ;;  %v1385_v13 = vmul.f32 %v16336_v59, %v16500_v54  ;;  %v1652_v16 = vadd.f32 %v1651_v56, %v1319_v14  ;;  %v1631_v18 = vadd.f32 %v1630_v39, %v1351_v15  ;;  %v16510_v56 = vld [vmem:[#allocation263_spill] sm:$0xff]  ;;  %vm16539_vm8 = vmmov %vm16348_vm0 }
 0x8b3   : > { %v1642_v47 = vsel %vm16501_vm4, %v1352_v10, 0.0  ;;  %v1660_v25 = vsel %vm16502_vm10, %v1286_v41, 0.0  ;;  %v1219_v61 = vmul.f32 %v16305_v35, %v16503_v24  ;;  %v1419_v5 = vmul.f32 %v16345_v19, %v16504_v12  ;;  %v16520_v24 = vld [vmem:[#allocation258_spill] sm:$0xff]  ;;  %vm16541_vm3 = vmmov %vm16348_vm0 }
 0x8b4   : > { %v1643_v60 = vadd.f32 %v1642_v47, %v1641_v30  ;;  %v1353_v29 = vmul.f32 %v16328_v27, %v16505_v8  ;;  %v1661_v11 = vadd.f32 %v1660_v25, %v1659_v0  ;;  %v1420_v17 = vmul.f32 %v16345_v19, %v16506_v34  ;;  %v16513_v0 = vld [vmem:[#allocation82_spill] sm:$0xff]  ;;  %vm16551_vm4 = vmmov %vm16348_vm0 }
 0x8b5   : > { %v1644_v32 = vsel %vm16507_vm7, %v1386_v62, 0.0  ;;  %v1662_v36 = vsel %vm16508_vm2, %v1320_v45, 0.0  ;;  %v1672_v46 = vadd.f32 %v1253_v53, %v1219_v61  ;;  %v1625_v38 = vadd.f32 %v1624_v48, %v1623_v42  ;;  %v16515_v45 = vld [vmem:[#allocation350_spill] sm:$0xff]  ;;  %v16516_v53 = vld [vmem:[#allocation171_spill] sm:$0xff]  ;;  %vm16554_vm10 = vmmov %vm16348_vm0 }
 0x8b6   : > { %v1454_v14 = vmul.f32 %v16361_v1, %v16509_v49  ;;  %v1387_v39 = vmul.f32 %v16336_v59, %v16510_v56  ;;  %v1653_v26 = vadd.f32 %v1652_v16, %v1353_v29  ;;  %v1632_v10 = vadd.f32 %v1631_v18, %v1385_v13  ;;  %v16517_v13 = vld [vmem:[#allocation41_spill] sm:$0xff]  ;;  %v16523_v29 = vld [vmem:[#allocation347_spill] sm:$0xff]  ;;  %vm16555_vm7 = vmmov %vm16348_vm0 }
 0x8b7   : > { %v1354_v41 = vmul.f32 %v16328_v27, %v16511_v40  ;;  %v1287_v30 = vmul.f32 %v16310_v9, %v16512_v51  ;;  %v1254_v4 = vmul.f32 %v16302_v43, %v16513_v0  ;;  %v13656_v15 = vadd.f32 %v1611_v57, %v13571_v2  ;;  %v16530_v40 = vld [vmem:[#allocation210_spill] sm:$0xff]  ;;  %v16532_v0 = vld [vmem:[#allocation87_spill] sm:$0xff]  ;;  %vm16556_vm2 = vmmov %vm16348_vm0 }
 0x8b8   : > { %v1645_v48 = vadd.f32 %v1644_v32, %v1643_v60  ;;  %v1388_v62 = vmul.f32 %v16336_v59, %v16514_v28  ;;  %v1663_v6 = vadd.f32 %v1662_v36, %v1661_v11  ;;  %v1453_v3 = vmul.f32 %v16361_v1, %v16515_v45  ;;  %v16531_v51 = vld [vmem:[#allocation146_spill] sm:$0xff] }
 0x8b9   : > { %v1321_v42 = vmul.f32 %v16315_v33, %v16516_v53  ;;  %v1673_v54 = vadd.f32 %v1672_v46, %v1287_v30  ;;  %v1220_v16 = vmul.f32 %v16305_v35, %v16517_v13  ;;  %v13666_v18 = vadd.f32 %v1626_v52, %v1625_v38  ;;  %v16527_v46 = vld [vmem:[#allocation81_spill] sm:$0xff] }
 0x8ba   : > { %v1646_v2 = vsel %vm16518_vm9, %v1420_v17, 0.0  ;;  %v1648_v57 = vsel %vm16519_vm5, %v1454_v14, 0.0  ;;  %v1654_v47 = vadd.f32 %v1653_v26, %v1387_v39  ;;  %v1633_v25 = vadd.f32 %v1632_v10, %v1419_v5  ;;  %v16525_v17 = vld [vmem:[#allocation113_spill] sm:$0xff]  ;;  %v16528_v14 = vld [vmem:[#allocation259_spill] sm:$0xff]  ;;  %v16529_v39 = vld [vmem:[#allocation300_spill] sm:$0xff] }
 0x8bb   : > { %v1421_v61 = vmul.f32 %v16345_v19, %v16520_v24  ;;  %v1664_v12 = vsel %vm16521_vm11, %v1354_v41, 0.0  ;;  %v1680_v60 = vsel %vm16522_vm12, %v1254_v4, 0.0  ;;  %v1647_v8 = vadd.f32 %v1646_v2, %v1645_v48  ;;  %v16533_v48 = vld [vmem:[#allocation48_spill] sm:$0xff]  ;;  %v16534_v53 = vld [vmem:[#allocation37_spill] sm:$0xff]  ;;  %vm16557_vm9 = vmmov %vm16348_vm0 }
 0x8bc   : > { %v1455_v11 = vmul.f32 %v16361_v1, %v16523_v29  ;;  %v1665_v34 = vadd.f32 %v1664_v12, %v1663_v6  ;;  %v1666_v52 = vsel %vm16524_vm13, %v1388_v62, 0.0  ;;  %v1674_v32 = vadd.f32 %v1673_v54, %v1321_v42  ;;  %vm16559_vm5 = vmmov %vm16348_vm0 }
 0x8bd   : > { %v1288_v36 = vmul.f32 %v16310_v9, %v16525_v17  ;;  %v1679_v5 = vsel %vm16526_vm14, %v1220_v16, 0.0  ;;  %v1256_v38 = vmul.f32 %v16302_v43, %v16527_v46  ;;  %v1655_v49 = vadd.f32 %v1654_v47, %v1421_v61  ;;  %v16536_v16 = vld [vmem:[#allocation50_spill] sm:$0xff]  ;;  %v16544_v46 = vld [vmem:[#allocation133_spill] sm:$0xff]  ;;  %vm16568_vm11 = vmmov %vm16348_vm0 }
 0x8be   : > { %v1422_v56 = vmul.f32 %v16345_v19, %v16528_v14  ;;  %v1456_v26 = vmul.f32 %v16361_v1, %v16529_v39  ;;  %v1681_v10 = vadd.f32 %v1680_v60, %v1679_v5  ;;  %v1355_v41 = vmul.f32 %v16328_v27, %v16530_v40  ;;  %v16540_v60 = vld [vmem:[#allocation114_spill] sm:$0xff]  ;;  %v16548_v40 = vld [vmem:[#allocation215_spill] sm:$0xff]  ;;  %vm16571_vm12 = vmmov %vm16348_vm0 }
 0x8bf   : > { %v1322_v30 = vmul.f32 %v16315_v33, %v16531_v51  ;;  %v1255_v4 = vmul.f32 %v16302_v43, %v16532_v0  ;;  %v1222_v28 = vmul.f32 %v16305_v35, %v16533_v48  ;;  %v13694_v62 = vadd.f32 %v1633_v25, %v1453_v3  ;;  %vm16572_vm13 = vmmov %vm16348_vm0 }
 0x8c0   : > { %v13696_v6 = vadd.f32 %v1648_v57, %v1647_v8  ;;  %v1667_v45 = vadd.f32 %v1666_v52, %v1665_v34  ;;  %v1389_v42 = vmul.f32 %v16336_v59, %v16534_v53  ;;  %v1675_v54 = vadd.f32 %v1674_v32, %v1355_v41  ;;  %v16542_v52 = vld [vmem:[#allocation176_spill] sm:$0xff]  ;;  %v16552_v53 = vld [vmem:[#allocation46_spill] sm:$0xff]  ;;  %vm16573_vm14 = vmmov %vm16348_vm0 }
 0x8c1   : > { %v1682_v13 = vsel %vm16535_vm6, %v1288_v36, 0.0  ;;  %v1221_v2 = vmul.f32 %v16305_v35, %v16536_v16  ;;  %v1702_v47 = vsel %vm16348_vm0, %v1256_v38, 0.0  ;;  %v13704_v24 = vadd.f32 %v1655_v49, %v1455_v11  ;;  %v16543_v11 = vld [vmem:[#allocation84_spill] sm:$0xff]  ;;  %v16545_v49 = vld [vmem:[#allocation147_spill] sm:$0xff]  ;;  %vm16575_vm6 = vmmov %vm16348_vm0 }
 0x8c2   : > { %v1668_v61 = vsel %vm16537_vm15, %v1422_v56, 0.0  ;;  %v1670_v3 = vsel %vm16538_vm1, %v1456_v26, 0.0  ;;  %v1683_v57 = vadd.f32 %v1682_v13, %v1681_v10  ;;  %v1684_v25 = vsel %vm16539_vm8, %v1322_v30, 0.0  ;;  %v16546_v56 = vld [vmem:[#allocation94_spill] sm:$0xff]  ;;  %v16549_v30 = vld [vmem:[#allocation47_spill] sm:$0xff]  ;;  %vm16587_vm15 = vmmov %vm16348_vm0 }
 0x8c3   : > { %v1694_v12 = vadd.f32 %v1255_v4, %v1221_v2  ;;  %v1290_v8 = vmul.f32 %v16310_v9, %v16540_v60  ;;  %v1701_v29 = vsel %vm16541_vm3, %v1222_v28, 0.0  ;;  %v1669_v34 = vadd.f32 %v1668_v61, %v1667_v45  ;;  %v16547_v26 = vld [vmem:[#allocation322_spill] sm:$0xff]  ;;  %v16550_v4 = vld [vmem:[#allocation169_spill] sm:$0xff]  ;;  %vm16589_vm1 = vmmov %vm16348_vm0 }
 0x8c4   : > { %v1356_v32 = vmul.f32 %v16328_v27, %v16542_v52  ;;  %v1703_v17 = vadd.f32 %v1702_v47, %v1701_v29  ;;  %v1258_v36 = vmul.f32 %v16302_v43, %v16543_v11  ;;  %v1676_v5 = vadd.f32 %v1675_v54, %v1389_v42  ;;  %v16553_v13 = vld [vmem:[#allocation354_spill] sm:$0xff]  ;;  %v16558_v29 = vld [vmem:[#allocation117_spill] sm:$0xff]  ;;  %v16560_v11 = vld [vmem:[#allocation180_spill] sm:$0xff] }
 0x8c5   : > { %v1289_v38 = vmul.f32 %v16310_v9, %v16544_v46  ;;  %v1324_v14 = vmul.f32 %v16315_v33, %v16545_v49  ;;  %v1257_v39 = vmul.f32 %v16302_v43, %v16546_v56  ;;  %v1423_v10 = vmul.f32 %v16345_v19, %v16547_v26  ;;  %v16561_v46 = vld [vmem:[#allocation131_spill] sm:$0xff]  ;;  %v16563_v49 = vld [vmem:[#allocation305_spill] sm:$0xff]  ;;  %vm16590_vm8 = vmmov %vm16348_vm0 }
 0x8c6   : > { %v1390_v41 = vmul.f32 %v16336_v59, %v16548_v40  ;;  %v1685_v51 = vadd.f32 %v1684_v25, %v1683_v57  ;;  %v1224_v0 = vmul.f32 %v16305_v35, %v16549_v30  ;;  %v1323_v48 = vmul.f32 %v16315_v33, %v16550_v4  ;;  %v16567_v30 = vld [vmem:[#allocation175_spill] sm:$0xff]  ;;  %vm16591_vm3 = vmmov %vm16348_vm0 }
 0x8c7   : > { %v1695_v28 = vadd.f32 %v1694_v12, %v1289_v38  ;;  %v1704_v45 = vsel %vm16551_vm4, %v1290_v8, 0.0  ;;  %v1223_v42 = vmul.f32 %v16305_v35, %v16552_v53  ;;  %v13733_v54 = vadd.f32 %v1670_v3, %v1669_v34  ;;  %v16569_v53 = vld [vmem:[#allocation91_spill] sm:$0xff]  ;;  %vm16592_vm4 = vmmov %vm16348_vm0 }
 0x8c8   : > { %v1457_v16 = vmul.f32 %v16361_v1, %v16553_v13  ;;  %v1705_v2 = vadd.f32 %v1704_v45, %v1703_v17  ;;  %v1724_v47 = vsel %vm16554_vm10, %v1258_v36, 0.0  ;;  %v1677_v61 = vadd.f32 %v1676_v5, %v1423_v10  ;;  %v16565_v10 = vld [vmem:[#allocation220_spill] sm:$0xff]  ;;  %v16570_v13 = vld [vmem:[#allocation271_spill] sm:$0xff]  ;;  %vm16596_vm10 = vmmov %vm16348_vm0 }
 0x8c9   : > { %v1686_v57 = vsel %vm16555_vm7, %v1356_v32, 0.0  ;;  %v1706_v25 = vsel %vm16556_vm2, %v1324_v14, 0.0  ;;  %v1716_v60 = vadd.f32 %v1257_v39, %v1223_v42  ;;  %v1688_v8 = vsel %vm16557_vm9, %v1390_v41, 0.0  ;;  %v16562_v32 = vld [vmem:[#allocation261_spill] sm:$0xff]  ;;  %vm16603_vm7 = vmmov %vm16348_vm0 }
 0x8ca   : > { %v1687_v12 = vadd.f32 %v1686_v57, %v1685_v51  ;;  %v1292_v52 = vmul.f32 %v16310_v9, %v16558_v29  ;;  %v1723_v3 = vsel %vm16559_vm5, %v1224_v0, 0.0  ;;  %v1696_v34 = vadd.f32 %v1695_v28, %v1323_v48  ;;  %v16564_v39 = vld [vmem:[#allocation149_spill] sm:$0xff]  ;;  %vm16604_vm2 = vmmov %vm16348_vm0 }
 0x8cb   : > { %v1358_v17 = vmul.f32 %v16328_v27, %v16560_v11  ;;  %v1291_v36 = vmul.f32 %v16310_v9, %v16561_v46  ;;  %v1725_v5 = vadd.f32 %v1724_v47, %v1723_v3  ;;  %v1424_v38 = vmul.f32 %v16345_v19, %v16562_v32  ;;  %v16566_v41 = vld [vmem:[#allocation217_spill] sm:$0xff]  ;;  %vm16609_vm9 = vmmov %vm16348_vm0 }
 0x8cc   : > { %v1458_v14 = vmul.f32 %v16361_v1, %v16563_v49  ;;  %v1707_v56 = vadd.f32 %v1706_v25, %v1705_v2  ;;  %v1326_v26 = vmul.f32 %v16315_v33, %v16564_v39  ;;  %v1357_v40 = vmul.f32 %v16328_v27, %v16565_v10  ;;  %vm16611_vm5 = vmmov %vm16348_vm0 }
 0x8cd   : > { %v1392_v51 = vmul.f32 %v16336_v59, %v16566_v41  ;;  %v1325_v0 = vmul.f32 %v16315_v33, %v16567_v30  ;;  %v1717_v4 = vadd.f32 %v1716_v60, %v1291_v36  ;;  %v13760_v48 = vadd.f32 %v1677_v61, %v1457_v16  ;;  %v16574_v16 = vld [vmem:[#allocation57_spill] sm:$0xff]  ;;  %v16582_v30 = vld [vmem:[#allocation222_spill] sm:$0xff] }
 0x8ce   : > { %v1689_v28 = vadd.f32 %v1688_v8, %v1687_v12  ;;  %v1726_v45 = vsel %vm16568_vm11, %v1292_v52, 0.0  ;;  %v1259_v42 = vmul.f32 %v16302_v43, %v16569_v53  ;;  %v1391_v2 = vmul.f32 %v16336_v59, %v16570_v13  ;;  %v16576_v8 = vld [vmem:[#allocation264_spill] sm:$0xff]  ;;  %v16577_v36 = vld [vmem:[#allocation265_spill] sm:$0xff]  ;;  %vm16617_vm11 = vmmov %vm16348_vm0 }
 0x8cf   : > { %v1697_v47 = vadd.f32 %v1696_v34, %v1357_v40  ;;  %v1708_v57 = vsel %vm16571_vm12, %v1358_v17, 0.0  ;;  %v1727_v25 = vadd.f32 %v1726_v45, %v1725_v5  ;;  %v1690_v29 = vsel %vm16572_vm13, %v1424_v38, 0.0  ;;  %v16578_v5 = vld [vmem:[#allocation182_spill] sm:$0xff]  ;;  %v16581_v40 = vld [vmem:[#allocation307_spill] sm:$0xff]  ;;  %vm16619_vm12 = vmmov %vm16348_vm0 }
 0x8d0   : > { %v1709_v3 = vadd.f32 %v1708_v57, %v1707_v56  ;;  %v1728_v60 = vsel %vm16573_vm14, %v1326_v26, 0.0  ;;  %v1225_v61 = vmul.f32 %v16305_v35, %v16574_v16  ;;  %v1692_v12 = vsel %vm16575_vm6, %v1458_v14, 0.0  ;;  %v16579_v56 = vld [vmem:[#allocation216_spill] sm:$0xff]  ;;  %v16580_v14 = vld [vmem:[#allocation86_spill] sm:$0xff]  ;;  %v16584_v45 = vld [vmem:[#allocation351_spill] sm:$0xff] }
 0x8d1   : > { %v1425_v52 = vmul.f32 %v16345_v19, %v16576_v8  ;;  %v1710_v11 = vsel %vm16348_vm0, %v1392_v51, 0.0  ;;  %v1718_v46 = vadd.f32 %v1717_v4, %v1325_v0  ;;  %v1691_v34 = vadd.f32 %v1690_v29, %v1689_v28  ;;  %v16583_v4 = vld [vmem:[#allocation138_spill] sm:$0xff]  ;;  %vm16621_vm13 = vmmov %vm16348_vm0 }
 0x8d2   : > { %v1426_v17 = vmul.f32 %v16345_v19, %v16577_v36  ;;  %v1360_v32 = vmul.f32 %v16328_v27, %v16578_v5  ;;  %v1738_v38 = vadd.f32 %v1259_v42, %v1225_v61  ;;  %v1698_v49 = vadd.f32 %v1697_v47, %v1391_v2  ;;  %v16585_v42 = vld [vmem:[#allocation43_spill] sm:$0xff]  ;;  %v16586_v47 = vld [vmem:[#allocation53_spill] sm:$0xff]  ;;  %vm16622_vm14 = vmmov %vm16348_vm0 }
 0x8d3   : > { %v1359_v39 = vmul.f32 %v16328_v27, %v16579_v56  ;;  %v1729_v26 = vadd.f32 %v1728_v60, %v1727_v25  ;;  %v1260_v10 = vmul.f32 %v16302_v43, %v16580_v14  ;;  %v1460_v41 = vmul.f32 %v16361_v1, %v16581_v40  ;;  %v16595_v40 = vld [vmem:[#allocation119_spill] sm:$0xff]  ;;  %vm16623_vm6 = vmmov %vm16348_vm0 }
 0x8d4   : > { %v1711_v51 = vadd.f32 %v1710_v11, %v1709_v3  ;;  %v1394_v0 = vmul.f32 %v16336_v59, %v16582_v30  ;;  %v1293_v28 = vmul.f32 %v16310_v9, %v16583_v4  ;;  %v1459_v53 = vmul.f32 %v16361_v1, %v16584_v45  ;;  %v16588_v3 = vld [vmem:[#allocation174_spill] sm:$0xff]  ;;  %v16600_v45 = vld [vmem:[#allocation152_spill] sm:$0xff] }
 0x8d5   : > { %v1393_v13 = vmul.f32 %v16336_v59, %v16585_v42  ;;  %v1719_v2 = vadd.f32 %v1718_v46, %v1359_v39  ;;  %v1226_v57 = vmul.f32 %v16305_v35, %v16586_v47  ;;  %v13796_v25 = vadd.f32 %v1692_v12, %v1691_v34  ;;  %v16593_v39 = vld [vmem:[#allocation101_spill] sm:$0xff] }
 0x8d6   : > { %v1730_v29 = vsel %vm16587_vm15, %v1360_v32, 0.0  ;;  %v1327_v60 = vmul.f32 %v16315_v33, %v16588_v3  ;;  %v1739_v16 = vadd.f32 %v1738_v38, %v1293_v28  ;;  %v1699_v61 = vadd.f32 %v1698_v49, %v1425_v52  ;;  %v16594_v32 = vld [vmem:[#allocation268_spill] sm:$0xff]  ;;  %v16597_v38 = vld [vmem:[#allocation38_spill] sm:$0xff]  ;;  %vm16627_vm15 = vmmov %vm16348_vm0 }
 0x8d7   : > { %v1712_v8 = vsel %vm16589_vm1, %v1426_v17, 0.0  ;;  %v1731_v11 = vadd.f32 %v1730_v29, %v1729_v26  ;;  %v1746_v36 = vsel %vm16590_vm8, %v1260_v10, 0.0  ;;  %v1714_v46 = vsel %vm16591_vm3, %v1460_v41, 0.0  ;;  %v16598_v41 = vld [vmem:[#allocation51_spill] sm:$0xff]  ;;  %vm16629_vm1 = vmmov %vm16348_vm0 }
 0x8d8   : > { %v1713_v5 = vadd.f32 %v1712_v8, %v1711_v51  ;;  %v1732_v56 = vsel %vm16592_vm4, %v1394_v0, 0.0  ;;  %v1261_v12 = vmul.f32 %v16302_v43, %v16593_v39  ;;  %v1720_v34 = vadd.f32 %v1719_v2, %v1393_v13  ;;  %v16599_v0 = vld [vmem:[#allocation358_spill] sm:$0xff]  ;;  %vm16633_vm8 = vmmov %vm16348_vm0 }
 0x8d9   : > { %v1428_v14 = vmul.f32 %v16345_v19, %v16594_v32  ;;  %v1294_v52 = vmul.f32 %v16310_v9, %v16595_v40  ;;  %v1745_v17 = vsel %vm16596_vm10, %v1226_v57, 0.0  ;;  %v1427_v49 = vmul.f32 %v16345_v19, %v16597_v38  ;;  %v16601_v2 = vld [vmem:[#allocation310_spill] sm:$0xff]  ;;  %v16608_v40 = vld [vmem:[#allocation184_spill] sm:$0xff]  ;;  %vm16639_vm3 = vmmov %vm16348_vm0 }
 0x8da   : > { %v1740_v26 = vadd.f32 %v1739_v16, %v1327_v60  ;;  %v1747_v10 = vadd.f32 %v1746_v36, %v1745_v17  ;;  %v1227_v51 = vmul.f32 %v16305_v35, %v16598_v41  ;;  %v13816_v30 = vadd.f32 %v1699_v61, %v1459_v53  ;;  %v16602_v57 = vld [vmem:[#allocation226_spill] sm:$0xff]  ;;  %v16605_v61 = vld [vmem:[#allocation88_spill] sm:$0xff]  ;;  %v16613_v41 = vld [vmem:[#allocation181_spill] sm:$0xff] }
 0x8db   : > { %v1461_v4 = vmul.f32 %v16361_v1, %v16599_v0  ;;  %v1733_v28 = vadd.f32 %v1732_v56, %v1731_v11  ;;  %v1328_v42 = vmul.f32 %v16315_v33, %v16600_v45  ;;  %v13822_v13 = vadd.f32 %v1714_v46, %v1713_v5  ;;  %v16606_v11 = vld [vmem:[#allocation277_spill] sm:$0xff]  ;;  %v16607_v56 = vld [vmem:[#allocation135_spill] sm:$0xff]  ;;  %v16612_v38 = vld [vmem:[#allocation224_spill] sm:$0xff] }
 0x8dc   : > { %v1462_v47 = vmul.f32 %v16361_v1, %v16601_v2  ;;  %v1361_v29 = vmul.f32 %v16328_v27, %v16602_v57  ;;  %v1760_v3 = vadd.f32 %v1261_v12, %v1227_v51  ;;  %v1721_v60 = vadd.f32 %v1720_v34, %v1427_v49  ;;  %v16614_v51 = vld [vmem:[#allocation272_spill] sm:$0xff]  ;;  %v16616_v2 = vld [vmem:[#allocation313_spill] sm:$0xff]  ;;  %vm16640_vm4 = vmmov %vm16348_vm0 }
 0x8dd   : > { %v1734_v53 = vsel %vm16603_vm7, %v1428_v14, 0.0  ;;  %v1748_v16 = vsel %vm16604_vm2, %v1294_v52, 0.0  ;;  %v1262_v8 = vmul.f32 %v16302_v43, %v16605_v61  ;;  %v1395_v36 = vmul.f32 %v16336_v59, %v16606_v11  ;;  %v16610_v14 = vld [vmem:[#allocation52_spill] sm:$0xff]  ;;  %vm16643_vm10 = vmmov %vm16348_vm0 }
 0x8de   : > { %v1741_v5 = vadd.f32 %v1740_v26, %v1361_v29  ;;  %v1749_v46 = vadd.f32 %v1748_v16, %v1747_v10  ;;  %v1295_v39 = vmul.f32 %v16310_v9, %v16607_v56  ;;  %v1735_v32 = vadd.f32 %v1734_v53, %v1733_v28  ;;  %v16615_v28 = vld [vmem:[#allocation273_spill] sm:$0xff]  ;;  %vm16644_vm7 = vmmov %vm16348_vm0 }
 0x8df   : > { %v1362_v12 = vmul.f32 %v16328_v27, %v16608_v40  ;;  %v1750_v34 = vsel %vm16609_vm9, %v1328_v42, 0.0  ;;  %v1228_v52 = vmul.f32 %v16305_v35, %v16610_v14  ;;  %v1736_v17 = vsel %vm16611_vm5, %v1462_v47, 0.0  ;;  %v16618_v47 = vld [vmem:[#allocation355_spill] sm:$0xff]  ;;  %vm16646_vm2 = vmmov %vm16348_vm0 }
 0x8e0   : > { %v1396_v49 = vmul.f32 %v16336_v59, %v16612_v38  ;;  %v1329_v26 = vmul.f32 %v16315_v33, %v16613_v41  ;;  %v1761_v10 = vadd.f32 %v1760_v3, %v1295_v39  ;;  %v1429_v0 = vmul.f32 %v16345_v19, %v16614_v51  ;;  %v16620_v39 = vld [vmem:[#allocation121_spill] sm:$0xff]  ;;  %vm16647_vm9 = vmmov %vm16348_vm0 }
 0x8e1   : > { %v1430_v45 = vmul.f32 %v16345_v19, %v16615_v28  ;;  %v1464_v42 = vmul.f32 %v16361_v1, %v16616_v2  ;;  %v1768_v57 = vsel %vm16617_vm11, %v1262_v8, 0.0  ;;  %v13853_v29 = vadd.f32 %v1721_v60, %v1461_v4  ;;  %v16625_v28 = vld [vmem:[#allocation223_spill] sm:$0xff]  ;;  %v16626_v2 = vld [vmem:[#allocation228_spill] sm:$0xff]  ;;  %vm16649_vm5 = vmmov %vm16348_vm0 }
 0x8e2   : > { %v1463_v53 = vmul.f32 %v16361_v1, %v16618_v47  ;;  %v1742_v16 = vadd.f32 %v1741_v5, %v1395_v36  ;;  %v1751_v61 = vadd.f32 %v1750_v34, %v1749_v46  ;;  %v13857_v3 = vadd.f32 %v1736_v17, %v1735_v32  ;;  %v16624_v46 = vld [vmem:[#allocation154_spill] sm:$0xff]  ;;  %vm16653_vm11 = vmmov %vm16348_vm0 }
 0x8e3   : > { %v1752_v56 = vsel %vm16619_vm12, %v1362_v12, 0.0  ;;  %v1296_v40 = vmul.f32 %v16310_v9, %v16620_v39  ;;  %v1767_v14 = vsel %vm16621_vm13, %v1228_v52, 0.0  ;;  %v1754_v4 = vsel %vm16622_vm14, %v1396_v49, 0.0  ;;  %v6535_v34 = vld [vmem:[#allocation2 + $0x8] sm:$0xff]  ;;  %vm16654_vm12 = vmmov %vm16348_vm0 }
 0x8e4   : > { %v1762_v60 = vadd.f32 %v1761_v10, %v1329_v26  ;;  %v1769_v8 = vadd.f32 %v1768_v57, %v1767_v14  ;;  %v1756_v36 = vsel %vm16623_vm6, %v1430_v45, 0.0  ;;  %v13866_v5 = vsel %vm16348_vm0, %v1464_v42, 0.0  ;;  %v16628_v57 = vld [vmem:[#allocation96_spill] sm:$0xff]  ;;  %vm16661_vm13 = vmmov %vm16348_vm0 }
 0x8e5   : > { %v1330_v32 = vmul.f32 %v16315_v33, %v16624_v46  ;;  %v1743_v52 = vadd.f32 %v1742_v16, %v1429_v0  ;;  %v1753_v17 = vadd.f32 %v1752_v56, %v1751_v61  ;;  %v1363_v49 = vmul.f32 %v16328_v27, %v16625_v28  ;;  %v16630_v56 = vld [vmem:[#allocation64_spill] sm:$0xff]  ;;  %v16632_v28 = vld [vmem:[#allocation363_spill] sm:$0xff]  ;;  %vm16662_vm14 = vmmov %vm16348_vm0 }
 0x8e6   : > { %v1397_v45 = vmul.f32 %v16336_v59, %v16626_v2  ;;  %v1770_v42 = vsel %vm16627_vm15, %v1296_v40, 0.0  ;;  %v1263_v47 = vmul.f32 %v16302_v43, %v16628_v57  ;;  %vm16663_vm6 = vmmov %vm16348_vm0 }
 0x8e7   : > { %v1763_v39 = vadd.f32 %v1762_v60, %v1363_v49  ;;  %v1771_v14 = vadd.f32 %v1770_v42, %v1769_v8  ;;  %v1772_v61 = vsel %vm16629_vm1, %v1330_v32, 0.0  ;;  %v1755_v40 = vadd.f32 %v1754_v4, %v1753_v17  ;;  %v16634_v49 = vld [vmem:[#allocation186_spill] sm:$0xff]  ;;  %v16635_v4 = vld [vmem:[#allocation229_spill] sm:$0xff]  ;;  %vm16664_vm15 = vmmov %vm16348_vm0 }
 0x8e8   : > { %v1465_v60 = vmul.f32 %v16361_v1, %v16632_v28  ;;  %v1398_v17 = vmul.f32 %v16336_v59, %v16635_v4  ;;  %vm16665_vm1 = vmmov %vm16348_vm0 }
 0x8e9   : > { %v1773_v42 = vadd.f32 %v1772_v61, %v1771_v14  ;;  %v16641_v61 = vld [vmem:[#allocation178_spill] sm:$0xff] }
 0x8ea   : > { %v1776_v4 = vsel %vm16643_vm10, %v1398_v17, 0.0  ;;  %vm16679_vm10 = vmmov %vm16348_vm0 }
 0x90c   : > { %v6433_v11 = vpop.f32.mrb[0].mxu0 }
 0x90d   : > { %v6568_v38 = vmul.f32 0.5, %v6433_v11  ;;  %v6435_v41 = vpop.f32.mrb[1].mxu0 }
 0x90e   : > { %v6569_v51 = vmul.f32 0.5, %v6435_v41  ;;  %v6537_v41 = vld [vmem:[#allocation2 + $0x18] sm:$0xff] }
 0x90f   : > { %v13871_v12 = vsub.f32 %v13391_v31, %v6568_v38 }
 0x910   : > { %v6603_v26 = vsub.f32 %v13395_v63, %v6569_v51  ;;  %v6439_v10 = vpop.f32.mrb[2].mxu0  ;;  %v1229_v63 = vmul.f32 %v16305_v35, %v16630_v56  ;;  %v16631_v51 = vld [vmem:[#allocation328_spill] sm:$0xff]  ;;  %v16636_v56 = vld [vmem:[#allocation142_spill] sm:$0xff] }
 0x911   : > { %v6570_v11 = vmul.f32 0.5, %v6439_v10  ;;  %v6441_v31 = vpop.f32.mrb[3].mxu0  ;;  %6741 = vxpose.xlu0.b32.start [1/16] %v13871_v12, 128  ;;  %v1431_v46 = vmul.f32 %v16345_v19, %v16631_v51 }
 0x912   : > { %v6637_v0 = vadd.f32 %v6603_v26, %v6535_v34  ;;  %v6571_v16 = vmul.f32 0.5, %v6441_v31  ;;  %v13894_v34 = vadd.f32 %v1743_v52, %v1463_v53  ;;  %v1782_v26 = vadd.f32 %v1263_v47, %v1229_v63  ;;  %v6539_v53 = vld [vmem:[#allocation2 + $0x28] sm:$0xff]  ;;  %v16637_v47 = vld [vmem:[#allocation275_spill] sm:$0xff] }
 0x913   : > { %v13885_v38 = vsub.f32 %v13400_v22, %v6570_v11  ;;  %v1364_v22 = vmul.f32 %v16328_v27, %v16634_v49  ;;  %v1764_v31 = vadd.f32 %v1763_v39, %v1397_v45  ;;  %v1757_v52 = vadd.f32 %v1756_v36, %v1755_v40  ;;  %v16638_v63 = vld [vmem:[#allocation317_spill] sm:$0xff]  ;;  %v16642_v40 = vld [vmem:[#allocation90_spill] sm:$0xff] }
 0x914   : > { %6671 = vst.msk [vmem:[#allocation2 + $0x8] sm:$0xff] %vm16633_vm8, %v6637_v0  ;;  %v6605_v8 = vsub.f32 %v13442_v21, %v6571_v16  ;;  %v6445_v32 = vpop.f32.mrb[4].mxu0  ;;  %v1297_v0 = vmul.f32 %v16310_v9, %v16636_v56  ;;  %v1432_v16 = vmul.f32 %v16345_v19, %v16637_v47  ;;  %v1466_v51 = vmul.f32 %v16361_v1, %v16638_v63  ;;  %vm16666_vm8 = vmmov %vm16348_vm0 }
 0x915   : > { %v6572_v10 = vmul.f32 0.5, %v6445_v32  ;;  %v6447_v2 = vpop.f32.mrb[5].mxu0  ;;  %6742 = vxpose.xlu0.b32.cont [2/16] %v13885_v38, 128  ;;  %v1774_v14 = vsel %vm16640_vm4, %v1364_v22, 0.0  ;;  %v1264_v32 = vmul.f32 %v16302_v43, %v16642_v40  ;;  %v13923_v22 = vadd.f32 %v13866_v5, %v1757_v52  ;;  %vm16678_vm4 = vmmov %vm16348_vm0 }
 0x916   : > { %v6639_v57 = vadd.f32 %v6605_v8, %v6537_v41  ;;  %v6573_v11 = vmul.f32 0.5, %v6447_v2  ;;  %v1783_v41 = vadd.f32 %v1782_v26, %v1297_v0  ;;  %v1775_v36 = vadd.f32 %v1774_v14, %v1773_v42  ;;  %v16645_v42 = vld [vmem:[#allocation60_spill] sm:$0xff] }
 0x917   : > { %v13903_v21 = vsub.f32 %v13490_v7, %v6572_v10  ;;  %v1331_v7 = vmul.f32 %v16315_v33, %v16641_v61  ;;  %v1765_v2 = vadd.f32 %v1764_v31, %v1431_v46  ;;  %v1778_v26 = vsel %vm16644_vm7, %v1432_v16, 0.0  ;;  %v16651_v61 = vld [vmem:[#allocation279_spill] sm:$0xff]  ;;  %vm16683_vm7 = vmmov %vm16348_vm0 }
 0x918   : > { %6673 = vst.msk [vmem:[#allocation2 + $0x18] sm:$0xff] %vm16639_vm3, %v6639_v57  ;;  %v6607_v45 = vsub.f32 %v13495_v23, %v6573_v11  ;;  %v6451_v39 = vpop.f32.mrb[6].mxu0  ;;  %v6541_v57 = vld [vmem:[#allocation2 + $0x38] sm:$0xff]  ;;  %v1230_v11 = vmul.f32 %v16305_v35, %v16645_v42  ;;  %v1780_v17 = vsel %vm16647_vm9, %v1466_v51, 0.0  ;;  %v1777_v5 = vadd.f32 %v1776_v4, %v1775_v36  ;;  %v6543_v51 = vld [vmem:[#allocation2 + $0x48] sm:$0xff]  ;;  %vm16669_vm3 = vmmov %vm16348_vm0 }
 0x919   : > { %v6574_v28 = vmul.f32 0.5, %v6451_v39  ;;  %v6453_v8 = vpop.f32.mrb[7].mxu0  ;;  %6743 = vxpose.xlu0.b32.cont [3/16] %v13903_v21, 128  ;;  %v1784_v0 = vadd.f32 %v1783_v41, %v1331_v7  ;;  %v1790_v52 = vsel %vm16649_vm5, %v1264_v32, 0.0  ;;  %v16650_v39 = vld [vmem:[#allocation285_spill] sm:$0xff]  ;;  %v1433_v7 = vmul.f32 %v16345_v19, %v16651_v61  ;;  %v16652_v41 = vld [vmem:[#allocation123_spill] sm:$0xff]  ;;  %vm16690_vm5 = vmmov %vm16348_vm0 }
 0x91a   : > { %v6641_v49 = vadd.f32 %v6607_v45, %v6539_v53  ;;  %v6575_v10 = vmul.f32 0.5, %v6453_v8  ;;  %v13934_v45 = vadd.f32 %v1765_v2, %v1465_v60  ;;  %v1399_v14 = vmul.f32 %v16336_v59, %v16650_v39  ;;  %v16655_v32 = vld [vmem:[#allocation157_spill] sm:$0xff] }
 0x91b   : > { %v13919_v23 = vsub.f32 %v13511_v50, %v6574_v28  ;;  %v16648_v50 = vld [vmem:[#allocation234_spill] sm:$0xff]  ;;  %v1298_v28 = vmul.f32 %v16310_v9, %v16652_v41  ;;  %v1789_v8 = vsel %vm16653_vm11, %v1230_v11, 0.0  ;;  %v1779_v4 = vadd.f32 %v1778_v26, %v1777_v5  ;;  %v16660_v5 = vld [vmem:[#allocation319_spill] sm:$0xff]  ;;  %vm16691_vm11 = vmmov %vm16348_vm0 }
 0x91c   : > { %6675 = vst.msk [vmem:[#allocation2 + $0x28] sm:$0xff] %vm16646_vm2, %v6641_v49  ;;  %v6609_v46 = vsub.f32 %v13526_v20, %v6575_v10  ;;  %v6457_v31 = vpop.f32.mrb[8].mxu0  ;;  %v1365_v56 = vmul.f32 %v16328_v27, %v16648_v50  ;;  %v1791_v49 = vadd.f32 %v1790_v52, %v1789_v8  ;;  %v16657_v50 = vld [vmem:[#allocation231_spill] sm:$0xff]  ;;  %v1468_v52 = vmul.f32 %v16361_v1, %v16660_v5  ;;  %vm16686_vm2 = vmmov %vm16348_vm0 }
 0x91d   : > { %v6576_v53 = vmul.f32 0.5, %v6457_v31  ;;  %v6459_v47 = vpop.f32.mrb[9].mxu0  ;;  %6744 = vxpose.xlu0.b32.cont [4/16] %v13919_v23, 128  ;;  %v1400_v11 = vmul.f32 %v16336_v59, %v16657_v50  ;;  %vm16687_vm9 = vcmask 1041408  }
 0x91e   : > { %v6643_v16 = vadd.f32 %v6609_v46, %v6541_v57  ;;  %v6577_v63 = vmul.f32 0.5, %v6459_v47  ;;  %v1785_v40 = vadd.f32 %v1784_v0, %v1365_v56  ;;  %v16656_v57 = vld [vmem:[#allocation188_spill] sm:$0xff]  ;;  %v16659_v47 = vld [vmem:[#allocation359_spill] sm:$0xff] }
 0x91f   : > { %v13939_v20 = vsub.f32 %v13537_v58, %v6576_v53  ;;  %v1332_v58 = vmul.f32 %v16315_v33, %v16655_v32  ;;  %v1366_v42 = vmul.f32 %v16328_v27, %v16656_v57  ;;  %v16658_v53 = vld [vmem:[#allocation278_spill] sm:$0xff]  ;;  %v6545_v0 = vld [vmem:[#allocation2 + $0x58] sm:$0xff]  ;;  %v1467_v26 = vmul.f32 %v16361_v1, %v16659_v47  ;;  %v16672_v47 = vld [vmem:[#allocation93_spill] sm:$0xff] }
 0x920   : > { %6677 = vst.msk [vmem:[#allocation2 + $0x38] sm:$0xff] %vm16654_vm12, %v6643_v16  ;;  %v6611_v60 = vsub.f32 %v13543_v44, %v6577_v63  ;;  %v6463_v36 = vpop.f32.mrb[10].mxu0  ;;  %v1434_v44 = vmul.f32 %v16345_v19, %v16658_v53  ;;  %v1792_v16 = vsel %vm16661_vm13, %v1298_v28, 0.0  ;;  %v1266_v5 = vmul.f32 %v16302_v43, %v16672_v47  ;;  %vm16692_vm12 = vmmov %vm16687_vm9 }
 0x921   : > { %v6578_v10 = vmul.f32 0.5, %v6463_v36  ;;  %v6465_v2 = vpop.f32.mrb[11].mxu0  ;;  %6745 = vxpose.xlu0.b32.cont [5/16] %v13939_v20, 128  ;;  %v1793_v61 = vadd.f32 %v1792_v16, %v1791_v49  ;;  %v1796_v36 = vsel %vm16348_vm0, %v1366_v42, 0.0  ;;  %v16668_v49 = vld [vmem:[#allocation106_spill] sm:$0xff]  ;;  %vm16693_vm13 = vcmask 9216  }
 0x922   : > { %v6645_v46 = vadd.f32 %v6611_v60, %v6543_v51  ;;  %v6579_v31 = vmul.f32 0.5, %v6465_v2  ;;  %v1786_v51 = vadd.f32 %v1785_v40, %v1399_v14  ;;  %v13969_v60 = vadd.f32 %v1780_v17, %v1779_v4  ;;  %v6547_v14 = vld [vmem:[#allocation2 + $0x68] sm:$0xff] }
 0x923   : > { %v13958_v56 = vsub.f32 %v13577_v37, %v6578_v10  ;;  %v1794_v37 = vsel %vm16663_vm6, %v1332_v58, 0.0  ;;  %v1798_v2 = vsel %vm16664_vm15, %v1400_v11, 0.0  ;;  %v13974_v28 = vsel %vm16665_vm1, %v1434_v44, 0.0  ;;  %v16667_v17 = vld [vmem:[#allocation58_spill] sm:$0xff]  ;;  %v16671_v44 = vld [vmem:[#allocation185_spill] sm:$0xff]  ;;  %vm16697_vm6 = vmmov %vm16693_vm13 }
 0x924   : > { %6679 = vst.msk [vmem:[#allocation2 + $0x48] sm:$0xff] %vm16662_vm14, %v6645_v46  ;;  %v6613_v63 = vsub.f32 %v13604_v55, %v6579_v31  ;;  %v6469_v39 = vpop.f32.mrb[12].mxu0  ;;  %v13981_v40 = vsel %vm16666_vm8, %v1468_v52, 0.0  ;;  %v1231_v58 = vmul.f32 %v16305_v35, %v16667_v17  ;;  %v1265_v4 = vmul.f32 %v16302_v43, %v16668_v49  ;;  %v16670_v31 = vld [vmem:[#allocation140_spill] sm:$0xff]  ;;  %vm16694_vm14 = vmmov %vm16348_vm0 }
 0x925   : > { %v6580_v41 = vmul.f32 0.5, %v6469_v39  ;;  %v6471_v8 = vpop.f32.mrb[13].mxu0  ;;  %6746 = vxpose.xlu0.b32.cont [6/16] %v13958_v56, 128  ;;  %v1787_v46 = vadd.f32 %v1786_v51, %v1433_v7  ;;  %v1299_v50 = vmul.f32 %v16310_v9, %v16670_v31  ;;  %v16674_v7 = vld [vmem:[#allocation55_spill] sm:$0xff]  ;;  %vm16702_vm15 = vmmov %vm16687_vm9 }
 0x926   : > { %v6647_v32 = vadd.f32 %v6613_v63, %v6545_v0  ;;  %v6581_v10 = vmul.f32 0.5, %v6471_v8  ;;  %v13993_v0 = vmul.f32 %v16315_v33, %v16671_v44  ;;  %v16673_v63 = vld [vmem:[#allocation230_spill] sm:$0xff]  ;;  %v14003_v39 = vmul.f32 %v16336_v59, %v16674_v7  ;;  %v16680_v44 = vld [vmem:[#allocation99_spill] sm:$0xff]  ;;  %vm16703_vm1 = vmmov %vm16697_vm6 }
 0x927   : > { %v13977_v55 = vsub.f32 %v13656_v15, %v6580_v41  ;;  %v1795_v15 = vadd.f32 %v1794_v37, %v1793_v61  ;;  %v6549_v61 = vld [vmem:[#allocation2 + $0x78] sm:$0xff]  ;;  %v16676_v8 = vld [vmem:[#allocation366_spill] sm:$0xff]  ;;  %v14021_v49 = vadd.f32 %v1787_v46, %v1467_v26  ;;  %v1267_v47 = vmul.f32 %v16302_v43, %v16680_v44  ;;  %vm16704_vm8 = vmmov %vm16687_vm9 }
 0x928   : > { %6681 = vst.msk [vmem:[#allocation2 + $0x58] sm:$0xff] %vm16669_vm3, %v6647_v32  ;;  %v6615_v57 = vsub.f32 %v13666_v18, %v6581_v10  ;;  %v6475_v42 = vpop.f32.mrb[14].mxu0  ;;  %v13999_v18 = vmul.f32 %v16328_v27, %v16673_v63  ;;  %v16675_v37 = vld [vmem:[#allocation331_spill] sm:$0xff]  ;;  %v14015_v32 = vmul.f32 %v16361_v1, %v16676_v8  ;;  %vm16705_vm3 = vmmov %vm16348_vm0 }
 0x929   : > { %v6582_v11 = vmul.f32 0.5, %v6475_v42  ;;  %v6477_v53 = vpop.f32.mrb[15].mxu0  ;;  %6747 = vxpose.xlu0.b32.cont [7/16] %v13977_v55, 128  ;;  %v14011_v41 = vmul.f32 %v16345_v19, %v16675_v37  ;;  %v16677_v10 = vld [vmem:[#allocation59_spill] sm:$0xff]  ;;  %v1804_v42 = vadd.f32 %v1265_v4, %v1231_v58  ;;  %v16681_v37 = vld [vmem:[#allocation125_spill] sm:$0xff] }
 0x92a   : > { %v6649_v52 = vadd.f32 %v6615_v57, %v6547_v14  ;;  %v6583_v16 = vmul.f32 0.5, %v6477_v53  ;;  %v1232_v14 = vmul.f32 %v16305_v35, %v16677_v10  ;;  %v1797_v57 = vadd.f32 %v1796_v36, %v1795_v15  ;;  %v6551_v36 = vld [vmem:[#allocation2 + $0x88] sm:$0xff] }
 0x92b   : > { %v14006_v51 = vsub.f32 %v13694_v62, %v6582_v11  ;;  %v1812_v53 = vsel %vm16679_vm10, %v1266_v5, 0.0  ;;  %v1300_v8 = vmul.f32 %v16310_v9, %v16681_v37  ;;  %v16684_v4 = vld [vmem:[#allocation65_spill] sm:$0xff]  ;;  %vm16707_vm10 = vmmov %vm16348_vm0 }
 0x92c   : > { %6683 = vst.msk [vmem:[#allocation2 + $0x68] sm:$0xff] %vm16678_vm4, %v6649_v52  ;;  %v6617_v17 = vsub.f32 %v13696_v6, %v6583_v16  ;;  %v6481_v62 = vpop.f32.mrb[16].mxu0  ;;  %v16682_v52 = vld [vmem:[#allocation159_spill] sm:$0xff]  ;;  %v1811_v58 = vsel %vm16683_vm7, %v1232_v14, 0.0  ;;  %v1233_v46 = vmul.f32 %v16305_v35, %v16684_v4  ;;  %v16685_v15 = vld [vmem:[#allocation97_spill] sm:$0xff]  ;;  %v14041_v10 = vadd.f32 %v1798_v2, %v1797_v57  ;;  %v16688_v14 = vld [vmem:[#allocation66_spill] sm:$0xff] }
 0x92d   : > { %v6584_v31 = vmul.f32 0.5, %v6481_v62  ;;  %v6483_v11 = vpop.f32.mrb[17].mxu0  ;;  %v1334_v6 = vmul.f32 %v16315_v33, %v16682_v52  ;;  %6748 = vxpose.xlu0.b32.cont [8/16] %v14006_v51, 128  ;;  %v1268_v5 = vmul.f32 %v16302_v43, %v16685_v15  ;;  %v1234_v44 = vmul.f32 %v16305_v35, %v16688_v14  ;;  %v16689_v4 = vld [vmem:[#allocation190_spill] sm:$0xff]  ;;  %v6553_v2 = vld [vmem:[#allocation2 + $0x98] sm:$0xff]  ;;  %v16696_v15 = vld [vmem:[#allocation129_spill] sm:$0xff] }
 0x92e   : > { %v6651_v63 = vadd.f32 %v6617_v17, %v6549_v61  ;;  %v6585_v7 = vmul.f32 0.5, %v6483_v11  ;;  %v1813_v17 = vadd.f32 %v1812_v53, %v1811_v58  ;;  %v1828_v11 = vsel %vm16687_vm9, %v1267_v47, 0.0  ;;  %v16699_v14 = vld [vmem:[#allocation237_spill] sm:$0xff]  ;;  %vm16706_vm4 = vmmov %vm16703_vm1 }
 0x92f   : > { %v14031_v26 = vsub.f32 %v13704_v24, %v6584_v31  ;;  %v1805_v24 = vadd.f32 %v1804_v42, %v1299_v50  ;;  %v1368_v43 = vmul.f32 %v16328_v27, %v16689_v4  ;;  %v1816_v50 = vsel %vm16691_vm11, %v1334_v6, 0.0  ;;  %vm16708_vm7 = vmmov %vm16348_vm0 }
 0x930   : > { %6685 = vst.msk [vmem:[#allocation2 + $0x78] sm:$0xff] %vm16686_vm2, %v6651_v63  ;;  %v6619_v16 = vsub.f32 %v13733_v54, %v6585_v7  ;;  %v6487_v61 = vpop.f32.mrb[0].mxu1  ;;  %v1814_v63 = vsel %vm16690_vm5, %v1300_v8, 0.0  ;;  %v1827_v57 = vsel %vm16692_vm12, %v1233_v46, 0.0  ;;  %v1844_v42 = vsel %vm16693_vm13, %v1268_v5, 0.0  ;;  %v16695_v7 = vld [vmem:[#allocation145_spill] sm:$0xff]  ;;  %vm16714_vm2 = vmmov %vm16348_vm0 }
 0x931   : > { %v6586_v62 = vmul.f32 0.5, %v6487_v61  ;;  %v6489_v31 = vpop.f32.mrb[1].mxu1  ;;  %6749 = vxpose.xlu0.b32.cont [9/16] %v14031_v26, 128  ;;  %v1815_v47 = vadd.f32 %v1814_v63, %v1813_v17  ;;  %v1301_v8 = vmul.f32 %v16310_v9, %v16695_v7  ;;  %v1843_v6 = vsel %vm16697_vm6, %v1234_v44, 0.0  ;;  %v16698_v5 = vld [vmem:[#allocation179_spill] sm:$0xff]  ;;  %v6555_v17 = vld [vmem:[#allocation2 + $0xa8] sm:$0xff]  ;;  %vm16715_vm9 = vmmov %vm16704_vm8 }
 0x932   : > { %v6653_v37 = vadd.f32 %v6619_v16, %v6551_v36  ;;  %v6587_v52 = vmul.f32 0.5, %v6489_v31  ;;  %v1302_v16 = vmul.f32 %v16310_v9, %v16696_v15  ;;  %v1845_v31 = vadd.f32 %v1844_v42, %v1843_v6  ;;  %v16700_v9 = vld [vmem:[#allocation163_spill] sm:$0xff]  ;;  %v16701_v63 = vld [vmem:[#allocation221_spill] sm:$0xff]  ;;  %vm16716_vm5 = vmmov %vm16703_vm1 }
 0x933   : > { %v14050_v54 = vsub.f32 %v13760_v48, %v6586_v62  ;;  %v1829_v48 = vadd.f32 %v1828_v11, %v1827_v57  ;;  %v1335_v62 = vmul.f32 %v16315_v33, %v16698_v5  ;;  %v1806_v11 = vadd.f32 %v1805_v24, %v13993_v0  ;;  %vm16717_vm11 = vmmov %vm16704_vm8 }
 0x934   : > { %6687 = vst.msk [vmem:[#allocation2 + $0x88] sm:$0xff] %vm16694_vm14, %v6653_v37  ;;  %v6621_v35 = vsub.f32 %v13796_v25, %v6587_v52  ;;  %v6493_v53 = vpop.f32.mrb[2].mxu1  ;;  %v1402_v37 = vmul.f32 %v16336_v59, %v16699_v14  ;;  %v1336_v44 = vmul.f32 %v16315_v33, %v16700_v9  ;;  %v1830_v57 = vsel %vm16702_vm15, %v1301_v8, 0.0  ;;  %vm16718_vm12 = vmmov %vm16348_vm0 }
 0x935   : > { %v6588_v36 = vmul.f32 0.5, %v6493_v53  ;;  %v6495_v58 = vpop.f32.mrb[3].mxu1  ;;  %6750 = vxpose.xlu0.b32.cont [10/16] %v14050_v54, 128  ;;  %v1831_v0 = vadd.f32 %v1830_v57, %v1829_v48  ;;  %v1846_v24 = vsel %vm16703_vm1, %v1302_v16, 0.0  ;;  %v1832_v33 = vsel %vm16704_vm8, %v1335_v62, 0.0  ;;  %vm16719_vm13 = vmmov %vm16703_vm1 }
 0x936   : > { %v6655_v46 = vadd.f32 %v6621_v35, %v6553_v2  ;;  %v6589_v61 = vmul.f32 0.5, %v6495_v58  ;;  %v1817_v2 = vadd.f32 %v1816_v50, %v1815_v47  ;;  %v1807_v50 = vadd.f32 %v1806_v11, %v13999_v18  ;;  %v16711_v11 = vld [vmem:[#allocation288_spill] sm:$0xff]  ;;  %vm16720_vm14 = vmmov %vm16348_vm0 }
 0x937   : > { %v14066_v25 = vsub.f32 %v13816_v30, %v6588_v36  ;;  %v1436_v30 = vmul.f32 %v16345_v19, %v16701_v63  ;;  %v1847_v36 = vadd.f32 %v1846_v24, %v1845_v31  ;;  %v1818_v47 = vsel %vm16705_vm3, %v1368_v43, 0.0  ;;  %v16710_v31 = vld [vmem:[#allocation194_spill] sm:$0xff]  ;;  %v16713_v63 = vld [vmem:[#allocation240_spill] sm:$0xff]  ;;  %vm16724_vm6 = vmmov %vm16348_vm0 }
 0x938   : > { %6689 = vst.msk [vmem:[#allocation2 + $0x98] sm:$0xff] %vm16348_vm0, %v6655_v46  ;;  %v6623_v52 = vsub.f32 %v13822_v13, %v6589_v61  ;;  %v6499_v4 = vpop.f32.mrb[4].mxu1  ;;  %v6557_v13 = vld [vmem:[#allocation2 + $0xb8] sm:$0xff]  ;;  %v1848_v8 = vsel %vm16706_vm4, %v1336_v44, 0.0  ;;  %v1819_v16 = vadd.f32 %v1818_v47, %v1817_v2  ;;  %v1820_v6 = vsel %vm16708_vm7, %v1402_v37, 0.0  ;;  %v16709_v46 = vld [vmem:[#allocation61_spill] sm:$0xff]  ;;  %vm16726_vm15 = vmmov %vm16704_vm8 }
 0x939   : > { %v6590_v42 = vmul.f32 0.5, %v6499_v4  ;;  %v6501_v35 = vpop.f32.mrb[5].mxu1  ;;  %6751 = vxpose.xlu0.b32.cont [11/16] %v14066_v25, 128  ;;  %v1833_v62 = vadd.f32 %v1832_v33, %v1831_v0  ;;  %v1370_v18 = vmul.f32 %v16328_v27, %v16710_v31  ;;  %v1403_v14 = vmul.f32 %v16336_v59, %v16711_v11  ;;  %v6559_v44 = vld [vmem:[#allocation2 + $0xc8] sm:$0xff]  ;;  %vm16727_vm1 = vmmov %vm16704_vm8 }
 0x93a   : > { %v6657_v53 = vadd.f32 %v6623_v52, %v6555_v17  ;;  %v6591_v7 = vmul.f32 0.5, %v6501_v35  ;;  %v1849_v9 = vadd.f32 %v1848_v8, %v1847_v36  ;;  %v1801_v37 = vadd.f32 %v13974_v28, %v14041_v10  ;;  %v16712_v52 = vld [vmem:[#allocation323_spill] sm:$0xff]  ;;  %vm16728_vm8 = vmmov %vm16706_vm4 }
 0x93b   : > { %v14082_v58 = vsub.f32 %v13853_v29, %v6590_v42  ;;  %v1369_v29 = vmul.f32 %v16328_v27, %v16709_v46  ;;  %v1470_v4 = vmul.f32 %v16361_v1, %v16712_v52  ;;  %v1404_v27 = vmul.f32 %v16336_v59, %v16713_v63  ;;  %vm16729_vm3 = vmmov %vm16706_vm4 }
 0x93c   : > { %6691 = vst.msk [vmem:[#allocation2 + $0xa8] sm:$0xff] %vm16707_vm10, %v6657_v53  ;;  %v6625_v48 = vsub.f32 %v13857_v3, %v6591_v7  ;;  %v6505_v15 = vpop.f32.mrb[6].mxu1  ;;  %v1821_v42 = vadd.f32 %v1820_v6, %v1819_v16  ;;  %v1850_v24 = vsel %vm16716_vm5, %v1370_v18, 0.0  ;;  %v1836_v33 = vsel %vm16717_vm11, %v1403_v14, 0.0  ;;  %v16722_v16 = vld [vmem:[#allocation360_spill] sm:$0xff]  ;;  %vm16730_vm4 = vmmov %vm16348_vm0 }
 0x93d   : > { %v6592_v61 = vmul.f32 0.5, %v6505_v15  ;;  %v6507_v5 = vpop.f32.mrb[7].mxu1  ;;  %6752 = vxpose.xlu0.b32.cont [12/16] %v14082_v58, 128  ;;  %v1834_v35 = vsel %vm16715_vm9, %v1369_v29, 0.0  ;;  %v1851_v59 = vadd.f32 %v1850_v24, %v1849_v9  ;;  %v16721_v15 = vld [vmem:[#allocation335_spill] sm:$0xff]  ;;  %v1471_v6 = vmul.f32 %v16361_v1, %v16722_v16  ;;  %v16723_v29 = vld [vmem:[#allocation286_spill] sm:$0xff]  ;;  %vm16731_vm10 = vmmov %vm16348_vm0 }
 0x93e   : > { %v6659_v43 = vadd.f32 %v6625_v48, %v6557_v13  ;;  %v6593_v17 = vmul.f32 0.5, %v6507_v5  ;;  %v1835_v10 = vadd.f32 %v1834_v35, %v1833_v62  ;;  %v1803_v13 = vadd.f32 %v13981_v40, %v1801_v37  ;;  %vm16732_vm7 = vmmov %vm16729_vm3 }
 0x93f   : > { %v14098_v3 = vsub.f32 %v13894_v34, %v6592_v61  ;;  %v1808_v34 = vadd.f32 %v1807_v50, %v14003_v39  ;;  %v1822_v39 = vsel %vm16718_vm12, %v1436_v30, 0.0  ;;  %v1852_v50 = vsel %vm16719_vm13, %v1404_v27, 0.0  ;;  %vm16734_vm9 = vmmov %vm16729_vm3 }
 0x940   : > { %6693 = vst.msk [vmem:[#allocation2 + $0xb8] sm:$0xff] %vm16714_vm2, %v6659_v43  ;;  %v6627_v2 = vsub.f32 %v13923_v22, %v6593_v17  ;;  %v6511_v57 = vpop.f32.mrb[8].mxu1  ;;  %v6561_v22 = vld [vmem:[#allocation2 + $0xd8] sm:$0xff]  ;;  %v1837_v30 = vadd.f32 %v1836_v33, %v1835_v10  ;;  %v1438_v61 = vmul.f32 %v16345_v19, %v16723_v29  ;;  %v1823_v31 = vadd.f32 %v1822_v39, %v1821_v42  ;;  %v16725_v17 = vld [vmem:[#allocation325_spill] sm:$0xff]  ;;  %vm16733_vm2 = vmmov %vm16348_vm0 }
 0x941   : > { %v6594_v0 = vmul.f32 0.5, %v6511_v57  ;;  %v6513_v28 = vpop.f32.mrb[9].mxu1  ;;  %6753 = vxpose.xlu0.b32.cont [13/16] %v14098_v3, 128  ;;  %v1809_v48 = vadd.f32 %v1808_v34, %v14011_v41  ;;  %v1853_v18 = vadd.f32 %v1852_v50, %v1851_v59  ;;  %v6563_v41 = vld [vmem:[#allocation2 + $0xe8] sm:$0xff]  ;;  %v1824_v43 = vsel %vm16724_vm6, %v1470_v4, 0.0  ;;  %v6565_v42 = vld [vmem:[#allocation2 + $0xf8] sm:$0xff]  ;;  %vm16735_vm5 = vmmov %vm16348_vm0 }
 0x942   : > { %v6661_v53 = vadd.f32 %v6627_v2, %v6559_v44  ;;  %v6595_v7 = vmul.f32 0.5, %v6513_v28  ;;  %v1472_v11 = vmul.f32 %v16361_v1, %v16725_v17  ;;  %v1840_v37 = vsel %vm16727_vm1, %v1471_v6, 0.0  ;;  %vm16736_vm11 = vmmov %vm16348_vm0 }
 0x943   : > { %v14114_v36 = vsub.f32 %v13934_v45, %v6594_v0  ;;  %v1437_v45 = vmul.f32 %v16345_v19, %v16721_v15  ;;  %v1810_v19 = vadd.f32 %v1809_v48, %v14015_v32  ;;  %v1854_v4 = vsel %vm16728_vm8, %v1438_v61, 0.0  ;;  %vm16737_vm12 = vmmov %vm16348_vm0 }
 0x944   : > { %6695 = vst.msk [vmem:[#allocation2 + $0xc8] sm:$0xff] %vm16720_vm14, %v6661_v53  ;;  %v6629_v47 = vsub.f32 %v13969_v60, %v6595_v7  ;;  %v6517_v8 = vpop.f32.mrb[10].mxu1  ;;  %v1825_v2 = vadd.f32 %v1824_v43, %v1823_v31  ;;  %v1855_v57 = vadd.f32 %v1854_v4, %v1853_v18  ;;  %v1856_v35 = vsel %vm16729_vm3, %v1472_v11, 0.0  ;;  %v6566_v7 = vld [vmem:[#allocation2 + $0x100] sm:$0x3]  ;;  %vm16738_vm13 = vmmov %vm16348_vm0 }
 0x945   : > { %v6596_v40 = vmul.f32 0.5, %v6517_v8  ;;  %v6519_v46 = vpop.f32.mrb[11].mxu1  ;;  %6754 = vxpose.xlu0.b32.cont [14/16] %v14114_v36, 128  ;;  %v1838_v44 = vsel %vm16726_vm15, %v1437_v45, 0.0  ;;  %v14155_v15 = vstv %s6903_s26  ;;  %vm16739_vm14 = vmmov %vm16348_vm0 }
 0x946   : > { %v6663_v5 = vadd.f32 %v6629_v47, %v6561_v22  ;;  %v6597_v62 = vmul.f32 0.5, %v6519_v46  ;;  %v1839_v63 = vadd.f32 %v1838_v44, %v1837_v30  ;;  %v1857_v33 = vadd.f32 %v1856_v35, %v1855_v57  ;;  %vm16740_vm6 = vmmov %vm16348_vm0 }
 0x947   : > { %v14130_v60 = vsub.f32 %v14021_v49, %v6596_v40  ;;  %v14159_v40 = vld [vmem:[#allocation2 + $0x8] sm:$0xff]  ;;  %vm16741_vm15 = vmmov %vm16348_vm0 }
 0x948   : > { %6697 = vst.msk [vmem:[#allocation2 + $0xd8] sm:$0xff] %vm16348_vm0, %v6663_v5  ;;  %v6631_v14 = vsub.f32 %v1803_v13, %v6597_v62  ;;  %v6523_v9 = vpop.f32.mrb[12].mxu1  ;;  %v1841_v28 = vadd.f32 %v1840_v37, %v1839_v63  ;;  %v6567_v13 = vld [vmem:[#allocation2 + $0x108] sm:$0x3]  ;;  %v14164_v5 = vld [vmem:[#allocation2 + $0x18] sm:$0xff]  ;;  %vm16742_vm1 = vmmov %vm16348_vm0 }
 0x949   : > { %v6598_v49 = vmul.f32 0.5, %v6523_v9  ;;  %v6525_v52 = vpop.f32.mrb[13].mxu1  ;;  %6755 = vxpose.xlu0.b32.cont [15/16] %v14130_v60, 128  ;;  %vm16743_vm8 = vmmov %vm16348_vm0 }
 0x94a   : > { %v6665_v27 = vadd.f32 %v6631_v14, %v6563_v41  ;;  %v6599_v1 = vmul.f32 0.5, %v6525_v52  ;;  %v14169_v41 = vld [vmem:[#allocation2 + $0x28] sm:$0xff]  ;;  %v14174_v14 = vld [vmem:[#allocation2 + $0x38] sm:$0xff]  ;;  %vm16744_vm3 = vmmov %vm16348_vm0 }
 0x94b   : > { %v14141_v34 = vsub.f32 %v1810_v19, %v6598_v49  ;;  %v14179_v52 = vld [vmem:[#allocation2 + $0x48] sm:$0xff] }
 0x94c   : > { %6699 = vst.msk [vmem:[#allocation2 + $0xe8] sm:$0xff] %vm16730_vm4, %v6665_v27  ;;  %v6633_v32 = vsub.f32 %v1825_v2, %v6599_v1  ;;  %v6529_v0 = vpop.f32.mrb[14].mxu1  ;;  %vm16745_vm4 = vmmov %vm16348_vm0 }
 0x94d   : > { %v6600_v10 = vmul.f32 0.5, %v6529_v0  ;;  %v6531_v24 = vpop.f32.mrb[15].mxu1  ;;  %6756 = vxpose.xlu0.b32.end [16/16] %v14141_v34, 128 }
 0x94e   : > { %v6667_v53 = vadd.f32 %v6633_v32, %v6565_v42  ;;  %v6601_v59 = vmul.f32 0.5, %v6531_v24 }
 0x94f   : > { %v6634_v22 = vsub.f32 %v1841_v28, %v6600_v10 }
 0x950   : > { %6701 = vst.msk [vmem:[#allocation2 + $0xf8] sm:$0xff] %vm16731_vm10, %v6667_v53  ;;  %v6635_v39 = vsub.f32 %v1857_v33, %v6601_v59  ;;  %vm16746_vm10 = vmmov %vm16348_vm0 }
 0x951   : > { %v6668_v50 = vadd.f32 %v6634_v22, %v6566_v7  ;;  %v14198_v22 = vld [vmem:[#allocation2 + $0x78] sm:$0xff] }
 0x952   : > { %v6669_v47 = vadd.f32 %v6635_v39, %v6567_v13 }
 0x953   : > { %6702 = vst [vmem:[#allocation2 + $0x100] sm:$0x3] %v6668_v50 }
 0x954   : > { %6703 = vst.msk [vmem:[#allocation2 + $0x108] sm:$0x3] %vm16732_vm7, %v6669_v47  ;;  %vm16747_vm7 = vmmov %vm16348_vm0 }
 0x95a   : > { %v14149_v8 = vld [vmem:[#allocation2 + $0x100] sm:$0x3] }
 0x95b   : > { %6805 = vxpose.xlu1.b32.start.end [1/1] (short) %v14149_v8, 128  ;;  %v14152_v48 = vld [vmem:[#allocation2 + $0x108] sm:$0x3] }
 0x95c   : > { %6837 = vxpose.xlu0.b32.start.end [1/1] (short) (narrow) %v14152_v48, 8 }
 0x991   : > { %v6757_v45 = vpop.trf.xlu0 }
 0x992   : > { %v6869_v16 = vadd.f32 %v6757_v45, %v13871_v12 }
 0x994   : > { %v6905_v6 = vadd.f32 %v14155_v15, %v6869_v16 }
 0x995   : > { %v6758_v46 = vpop.trf.xlu0 }
 0x996   : > { %v7357_v30 = vmul.f32 -1.442695, %v6905_v6  ;;  %v6871_v29 = vadd.f32 %v6758_v46, %v13885_v38  ;;  %v14204_v6 = vld [vmem:[#allocation2 + $0x88] sm:$0xff] }
 0x998   : > { %6773 = vxpose.xlu1.b32.start [1/16] (narrow) %v14159_v40, 8  ;;  %7502 = vpow2.f32 %v7357_v30  ;;  %v6907_v61 = vadd.f32 %v14155_v15, %v6871_v29 }
 0x999   : > { %v6759_v62 = vpop.trf.xlu0 }
 0x99a   : > { %v7359_v31 = vmul.f32 -1.442695, %v6907_v61  ;;  %v6873_v12 = vadd.f32 %v6759_v62, %v13903_v21 }
 0x99c   : > { %6774 = vxpose.xlu1.b32.cont [2/16] (narrow) %v14164_v5, 8  ;;  %7504 = vpow2.f32 %v7359_v31  ;;  %v6909_v18 = vadd.f32 %v14155_v15, %v6873_v12  ;;  %v14210_v12 = vld [vmem:[#allocation2 + $0x98] sm:$0xff] }
 0x99d   : > { %v6760_v43 = vpop.trf.xlu0 }
 0x99e   : > { %v7361_v38 = vmul.f32 -1.442695, %v6909_v18  ;;  %v6875_v17 = vadd.f32 %v6760_v43, %v13919_v23 }
 0x9a0   : > { %6775 = vxpose.xlu1.b32.cont [3/16] (narrow) %v14169_v41, 8  ;;  %7506 = vpow2.f32 %v7361_v38  ;;  %v6911_v11 = vadd.f32 %v14155_v15, %v6875_v17 }
 0x9a1   : > { %v6761_v19 = vpop.trf.xlu0 }
 0x9a2   : > { %v7503_v9 = vpop.eup %7502  ;;  %v7363_v21 = vmul.f32 -1.442695, %v6911_v11  ;;  %v6877_v44 = vadd.f32 %v6761_v19, %v13939_v20  ;;  %v14185_v20 = vld [vmem:[#allocation2 + $0x58] sm:$0xff] }
 0x9a3   : > { %v7041_v37 = vadd.f32 1.0, %v7503_v9  ;;  %v14216_v9 = vld [vmem:[#allocation2 + $0xa8] sm:$0xff] }
 0x9a4   : > { %6776 = vxpose.xlu1.b32.cont [4/16] (narrow) %v14174_v14, 8  ;;  %7508 = vpow2.f32 %v7363_v21  ;;  %v6913_v49 = vadd.f32 %v14155_v15, %v6877_v44 }
 0x9a5   : > { %7510 = vrcp.f32 %v7041_v37  ;;  %v6762_v23 = vpop.trf.xlu0 }
 0x9a6   : > { %v7505_v63 = vpop.eup %7504  ;;  %v7365_v4 = vmul.f32 -1.442695, %v6913_v49  ;;  %v6879_v27 = vadd.f32 %v6762_v23, %v13958_v56  ;;  %v14190_v56 = vld [vmem:[#allocation2 + $0x68] sm:$0xff] }
 0x9a7   : > { %v7043_v2 = vadd.f32 1.0, %v7505_v63 }
 0x9a8   : > { %6777 = vxpose.xlu1.b32.cont [5/16] (narrow) %v14179_v52, 8  ;;  %7512 = vpow2.f32 %v7365_v4  ;;  %v6915_v1 = vadd.f32 %v14155_v15, %v6879_v27  ;;  %v14222_v4 = vld [vmem:[#allocation2 + $0xb8] sm:$0xff] }
 0x9a9   : > { %7514 = vrcp.f32 %v7043_v2  ;;  %v6763_v57 = vpop.trf.xlu0 }
 0x9aa   : > { %v7507_v42 = vpop.eup %7506  ;;  %v7367_v35 = vmul.f32 -1.442695, %v6915_v1  ;;  %v6881_v32 = vadd.f32 %v6763_v57, %v13977_v55 }
 0x9ab   : > { %v7045_v0 = vadd.f32 1.0, %v7507_v42 }
 0x9ac   : > { %6778 = vxpose.xlu1.b32.cont [6/16] (narrow) %v14185_v20, 8  ;;  %7516 = vpow2.f32 %v7367_v35  ;;  %v6917_v28 = vadd.f32 %v14155_v15, %v6881_v32  ;;  %v14228_v32 = vld [vmem:[#allocation2 + $0xc8] sm:$0xff] }
 0x9ad   : > { %7518 = vrcp.f32 %v7045_v0  ;;  %v6764_v10 = vpop.trf.xlu0 }
 0x9ae   : > { %v7509_v24 = vpop.eup %7508  ;;  %v7369_v53 = vmul.f32 -1.442695, %v6917_v28  ;;  %v6883_v7 = vadd.f32 %v6764_v10, %v14006_v51 }
 0x9af   : > { %v7511_v33 = vpop.eup %7510  ;;  %v7047_v59 = vadd.f32 1.0, %v7509_v24 }
 0x9b0   : > { %6779 = vxpose.xlu1.b32.cont [7/16] (narrow) %v14190_v56, 8  ;;  %7143 = vst [vmem:[%s14194_s19] sm:$0xff] %v7511_v33  ;;  %7520 = vpow2.f32 %v7369_v53  ;;  %v6919_v55 = vadd.f32 %v14155_v15, %v6883_v7  ;;  %v14234_v33 = vld [vmem:[#allocation2 + $0xd8] sm:$0xff] }
 0x9b1   : > { %7522 = vrcp.f32 %v7047_v59  ;;  %v6765_v13 = vpop.trf.xlu0 }
 0x9b2   : > { %v7513_v39 = vpop.eup %7512  ;;  %v7371_v50 = vmul.f32 -1.442695, %v6919_v55  ;;  %v6885_v51 = vadd.f32 %v6765_v13, %v14031_v26 }
 0x9b3   : > { %v7515_v47 = vpop.eup %7514  ;;  %v7049_v45 = vadd.f32 1.0, %v7513_v39 }
 0x9b4   : > { %6780 = vxpose.xlu1.b32.cont [8/16] (narrow) %v14198_v22, 8  ;;  %7145 = vst [vmem:[%s14194_s19 + $0x10] sm:$0xff] %v7515_v47  ;;  %7524 = vpow2.f32 %v7371_v50  ;;  %v6921_v16 = vadd.f32 %v14155_v15, %v6885_v51  ;;  %v14240_v47 = vld [vmem:[#allocation2 + $0xe8] sm:$0xff] }
 0x9b5   : > { %7526 = vrcp.f32 %v7049_v45  ;;  %v6766_v46 = vpop.trf.xlu0 }
 0x9b6   : > { %v7517_v30 = vpop.eup %7516  ;;  %v7373_v29 = vmul.f32 -1.442695, %v6921_v16  ;;  %v6887_v61 = vadd.f32 %v6766_v46, %v14050_v54 }
 0x9b7   : > { %v7519_v62 = vpop.eup %7518  ;;  %v7051_v31 = vadd.f32 1.0, %v7517_v30 }
 0x9b8   : > { %6781 = vxpose.xlu1.b32.cont [9/16] (narrow) %v14204_v6, 8  ;;  %7147 = vst [vmem:[%s14194_s19 + $0x20] sm:$0xff] %v7519_v62  ;;  %7528 = vpow2.f32 %v7373_v29  ;;  %v6923_v26 = vadd.f32 %v14155_v15, %v6887_v61  ;;  %v14246_v62 = vld [vmem:[#allocation2 + $0xf8] sm:$0xff] }
 0x9b9   : > { %7530 = vrcp.f32 %v7051_v31  ;;  %v6767_v18 = vpop.trf.xlu0 }
 0x9ba   : > { %v7521_v43 = vpop.eup %7520  ;;  %v7375_v38 = vmul.f32 -1.442695, %v6923_v26  ;;  %v6889_v17 = vadd.f32 %v6767_v18, %v14066_v25 }
 0x9bb   : > { %v7523_v11 = vpop.eup %7522  ;;  %v7053_v19 = vadd.f32 1.0, %v7521_v43 }
 0x9bc   : > { %6782 = vxpose.xlu1.b32.cont [10/16] (narrow) %v14210_v12, 8  ;;  %7149 = vst [vmem:[%s14194_s19 + $0x30] sm:$0xff] %v7523_v11  ;;  %7532 = vpow2.f32 %v7375_v38  ;;  %v6925_v54 = vadd.f32 %v14155_v15, %v6889_v17 }
 0x9bd   : > { %7534 = vrcp.f32 %v7053_v19  ;;  %v6768_v21 = vpop.trf.xlu0 }
 0x9be   : > { %v7525_v44 = vpop.eup %7524  ;;  %v7377_v37 = vmul.f32 -1.442695, %v6925_v54  ;;  %v6891_v49 = vadd.f32 %v6768_v21, %v14082_v58 }
 0x9bf   : > { %v7527_v23 = vpop.eup %7526  ;;  %v7055_v63 = vadd.f32 1.0, %v7525_v44 }
 0x9c0   : > { %6783 = vxpose.xlu1.b32.cont [11/16] (narrow) %v14216_v9, 8  ;;  %7151 = vst [vmem:[%s14194_s19 + $0x40] sm:$0xff] %v7527_v23  ;;  %7536 = vpow2.f32 %v7377_v37  ;;  %v6927_v25 = vadd.f32 %v14155_v15, %v6891_v49 }
 0x9c1   : > { %7538 = vrcp.f32 %v7055_v63  ;;  %v6769_v27 = vpop.trf.xlu0 }
 0x9c2   : > { %v7529_v2 = vpop.eup %7528  ;;  %v7379_v1 = vmul.f32 -1.442695, %v6927_v25  ;;  %v6893_v57 = vadd.f32 %v6769_v27, %v14098_v3 }
 0x9c3   : > { %v7531_v42 = vpop.eup %7530  ;;  %v7057_v35 = vadd.f32 1.0, %v7529_v2 }
 0x9c4   : > { %6784 = vxpose.xlu1.b32.cont [12/16] (narrow) %v14222_v4, 8  ;;  %7153 = vst [vmem:[%s14194_s19 + $0x50] sm:$0xff] %v7531_v42  ;;  %7540 = vpow2.f32 %v7379_v1  ;;  %v6929_v58 = vadd.f32 %v14155_v15, %v6893_v57 }
 0x9c5   : > { %7542 = vrcp.f32 %v7057_v35  ;;  %v6770_v0 = vpop.trf.xlu0 }
 0x9c6   : > { %v7533_v28 = vpop.eup %7532  ;;  %v7381_v10 = vmul.f32 -1.442695, %v6929_v58  ;;  %v6895_v24 = vadd.f32 %v6770_v0, %v14114_v36 }
 0x9c7   : > { %v7535_v53 = vpop.eup %7534  ;;  %v7059_v7 = vadd.f32 1.0, %v7533_v28 }
 0x9c8   : > { %6785 = vxpose.xlu1.b32.cont [13/16] (narrow) %v14228_v32, 8  ;;  %7155 = vst [vmem:[%s14194_s19 + $0x60] sm:$0xff] %v7535_v53  ;;  %7544 = vpow2.f32 %v7381_v10  ;;  %v6931_v3 = vadd.f32 %v14155_v15, %v6895_v24 }
 0x9c9   : > { %7546 = vrcp.f32 %v7059_v7  ;;  %v6771_v59 = vpop.trf.xlu0 }
 0x9ca   : > { %v7537_v55 = vpop.eup %7536  ;;  %v7383_v13 = vmul.f32 -1.442695, %v6931_v3  ;;  %v6897_v39 = vadd.f32 %v6771_v59, %v14130_v60 }
 0x9cb   : > { %v7539_v50 = vpop.eup %7538  ;;  %v7061_v51 = vadd.f32 1.0, %v7537_v55 }
 0x9cc   : > { %6786 = vxpose.xlu1.b32.cont [14/16] (narrow) %v14234_v33, 8  ;;  %7157 = vst [vmem:[%s14194_s19 + $0x70] sm:$0xff] %v7539_v50  ;;  %7548 = vpow2.f32 %v7383_v13  ;;  %v6933_v36 = vadd.f32 %v14155_v15, %v6897_v39 }
 0x9cd   : > { %7550 = vrcp.f32 %v7061_v51  ;;  %v6772_v45 = vpop.trf.xlu0 }
 0x9ce   : > { %v7541_v16 = vpop.eup %7540  ;;  %v7385_v46 = vmul.f32 -1.442695, %v6933_v36  ;;  %v6899_v30 = vadd.f32 %v6772_v45, %v14141_v34 }
 0x9cf   : > { %v7543_v29 = vpop.eup %7542  ;;  %v7063_v61 = vadd.f32 1.0, %v7541_v16 }
 0x9d0   : > { %6787 = vxpose.xlu1.b32.cont [15/16] (narrow) %v14240_v47, 8  ;;  %7159 = vst [vmem:[%s14194_s19 + $0x80] sm:$0xff] %v7543_v29  ;;  %7552 = vpow2.f32 %v7385_v46  ;;  %v6935_v60 = vadd.f32 %v14155_v15, %v6899_v30 }
 0x9d1   : > { %7554 = vrcp.f32 %v7063_v61 }
 0x9d2   : > { %v7545_v31 = vpop.eup %7544  ;;  %v7387_v26 = vmul.f32 -1.442695, %v6935_v60 }
 0x9d3   : > { %v7547_v18 = vpop.eup %7546  ;;  %v7065_v43 = vadd.f32 1.0, %v7545_v31 }
 0x9d4   : > { %6788 = vxpose.xlu1.b32.end [16/16] (narrow) %v14246_v62, 8  ;;  %7161 = vst [vmem:[%s14194_s19 + $0x90] sm:$0xff] %v7547_v18  ;;  %7556 = vpow2.f32 %v7387_v26 }
 0x9d5   : > { %7558 = vrcp.f32 %v7065_v43 }
 0x9d6   : > { %v7549_v34 = vpop.eup %7548 }
 0x9d7   : > { %v7551_v38 = vpop.eup %7550  ;;  %v7067_v17 = vadd.f32 1.0, %v7549_v34 }
 0x9d8   : > { %7163 = vst [vmem:[%s14194_s19 + $0xa0] sm:$0xff] %v7551_v38 }
 0x9d9   : > { %7560 = vrcp.f32 %v7067_v17 }
 0x9da   : > { %v7553_v19 = vpop.eup %7552 }
 0x9db   : > { %v6821_v11 = vpop.trf.xlu1  ;;  %v7555_v44 = vpop.eup %7554  ;;  %v7069_v37 = vadd.f32 1.0, %v7553_v19 }
 0x9dc   : > { %v6870_v54 = vadd.f32 %v6821_v11, %v14159_v40  ;;  %v6853_v21 = vpop.trf.xlu0  ;;  %7165 = vst [vmem:[%s14194_s19 + $0xb0] sm:$0xff] %v7555_v44 }
 0x9dd   : > { %v6902_v49 = vadd.f32 %v6853_v21, %v14152_v48  ;;  %7562 = vrcp.f32 %v7069_v37 }
 0x9de   : > { %v6906_v23 = vadd.f32 %v14155_v15, %v6870_v54  ;;  %v7557_v27 = vpop.eup %7556 }
 0x9df   : > { %v6938_v63 = vadd.f32 %v14155_v15, %v6902_v49  ;;  %v6822_v25 = vpop.trf.xlu1  ;;  %v7559_v57 = vpop.eup %7558  ;;  %v7071_v40 = vadd.f32 1.0, %v7557_v27 }
 0x9e0   : > { %v7358_v2 = vmul.f32 -1.442695, %v6906_v23  ;;  %v6872_v1 = vadd.f32 %v6822_v25, %v14164_v5  ;;  %7167 = vst [vmem:[%s14194_s19 + $0xc0] sm:$0xff] %v7559_v57 }
 0x9e1   : > { %v7390_v42 = vmul.f32 -1.442695, %v6938_v63 }
 0x9e2   : > { %7564 = vpow2.f32 %v7358_v2  ;;  %v6908_v48 = vadd.f32 %v14155_v15, %v6872_v1 }
 0x9e3   : > { %7566 = vrcp.f32 %v7071_v40  ;;  %v6823_v35 = vpop.trf.xlu1  ;;  %v7561_v28 = vpop.eup %7560 }
 0x9e4   : > { %7568 = vpow2.f32 %v7390_v42  ;;  %v7360_v58 = vmul.f32 -1.442695, %v6908_v48  ;;  %v6874_v0 = vadd.f32 %v6823_v35, %v14169_v41  ;;  %7169 = vst [vmem:[%s14194_s19 + $0xd0] sm:$0xff] %v7561_v28 }
 0x9e6   : > { %7570 = vpow2.f32 %v7360_v58  ;;  %v6910_v5 = vadd.f32 %v14155_v15, %v6874_v0 }
 0x9e7   : > { %v6824_v10 = vpop.trf.xlu1  ;;  %v7563_v7 = vpop.eup %7562 }
 0x9e8   : > { %v7362_v24 = vmul.f32 -1.442695, %v6910_v5  ;;  %v6876_v53 = vadd.f32 %v6824_v10, %v14174_v14  ;;  %7171 = vst [vmem:[%s14194_s19 + $0xe0] sm:$0xff] %v7563_v7 }
 0x9ea   : > { %7572 = vpow2.f32 %v7362_v24  ;;  %v6912_v3 = vadd.f32 %v14155_v15, %v6876_v53 }
 0x9eb   : > { %v6825_v59 = vpop.trf.xlu1 }
 0x9ec   : > { %v7565_v55 = vpop.eup %7564  ;;  %v7364_v13 = vmul.f32 -1.442695, %v6912_v3  ;;  %v6878_v41 = vadd.f32 %v6825_v59, %v14179_v52 }
 0x9ed   : > { %v7567_v39 = vpop.eup %7566  ;;  %v7042_v50 = vadd.f32 1.0, %v7565_v55 }
 0x9ee   : > { %v7569_v51 = vpop.eup %7568  ;;  %7173 = vst [vmem:[%s14194_s19 + $0xf0] sm:$0xff] %v7567_v39  ;;  %7574 = vpow2.f32 %v7364_v13  ;;  %v6914_v36 = vadd.f32 %v14155_v15, %v6878_v41 }
 0x9ef   : > { %7576 = vrcp.f32 %v7042_v50  ;;  %v7074_v45 = vadd.f32 1.0, %v7569_v51  ;;  %v6826_v14 = vpop.trf.xlu1 }
 0x9f0   : > { %v7571_v16 = vpop.eup %7570  ;;  %v7366_v46 = vmul.f32 -1.442695, %v6914_v36  ;;  %v6880_v30 = vadd.f32 %v6826_v14, %v14185_v20 }
 0x9f1   : > { %7578 = vrcp.f32 %v7074_v45  ;;  %v7044_v29 = vadd.f32 1.0, %v7571_v16 }
 0x9f2   : > { %7580 = vpow2.f32 %v7366_v46  ;;  %v6916_v61 = vadd.f32 %v14155_v15, %v6880_v30 }
 0x9f3   : > { %7582 = vrcp.f32 %v7044_v29  ;;  %v6827_v52 = vpop.trf.xlu1 }
 0x9f4   : > { %v7573_v60 = vpop.eup %7572  ;;  %v7368_v31 = vmul.f32 -1.442695, %v6916_v61  ;;  %v6882_v26 = vadd.f32 %v6827_v52, %v14190_v56 }
 0x9f5   : > { %v7046_v18 = vadd.f32 1.0, %v7573_v60 }
 0x9f6   : > { %7584 = vpow2.f32 %v7368_v31  ;;  %v6918_v43 = vadd.f32 %v14155_v15, %v6882_v26 }
 0x9f7   : > { %7586 = vrcp.f32 %v7046_v18  ;;  %v6828_v34 = vpop.trf.xlu1 }
 0x9f8   : > { %v7575_v20 = vpop.eup %7574  ;;  %v7370_v38 = vmul.f32 -1.442695, %v6918_v43  ;;  %v6884_v17 = vadd.f32 %v6828_v34, %v14198_v22 }
 0x9f9   : > { %v7577_v11 = vpop.eup %7576  ;;  %v7048_v19 = vadd.f32 1.0, %v7575_v20 }
 0x9fa   : > { %7144 = vst.msk [vmem:[%s14194_s19 + $0x8] sm:$0xff] %vm16733_vm2, %v7577_v11  ;;  %7588 = vpow2.f32 %v7370_v38  ;;  %v6920_v54 = vadd.f32 %v14155_v15, %v6884_v17  ;;  %vm16748_vm2 = vmmov %vm16348_vm0 }
 0x9fb   : > { %v7579_v56 = vpop.eup %7578  ;;  %7590 = vrcp.f32 %v7048_v19  ;;  %v6829_v21 = vpop.trf.xlu1 }
 0x9fc   : > { %v7581_v44 = vpop.eup %7580  ;;  %7176 = vst.msk [vmem:[%s14194_s19 + $0x108] sm:$0x3] %vm16734_vm9, %v7579_v56  ;;  %v7372_v37 = vmul.f32 -1.442695, %v6920_v54  ;;  %v6886_v49 = vadd.f32 %v6829_v21, %v14204_v6 }
 0x9fd   : > { %v7583_v23 = vpop.eup %7582  ;;  %v7050_v63 = vadd.f32 1.0, %v7581_v44 }
 0x9fe   : > { %7146 = vst.msk [vmem:[%s14194_s19 + $0x18] sm:$0xff] %vm16735_vm5, %v7583_v23  ;;  %7592 = vpow2.f32 %v7372_v37  ;;  %v6922_v22 = vadd.f32 %v14155_v15, %v6886_v49 }
 0x9ff   : > { %7594 = vrcp.f32 %v7050_v63  ;;  %v6830_v25 = vpop.trf.xlu1 }
 0xa00   : > { %v7585_v27 = vpop.eup %7584  ;;  %v7374_v2 = vmul.f32 -1.442695, %v6922_v22  ;;  %v6888_v1 = vadd.f32 %v6830_v25, %v14210_v12 }
 0xa01   : > { %v7587_v57 = vpop.eup %7586  ;;  %v7052_v40 = vadd.f32 1.0, %v7585_v27 }
 0xa02   : > { %7148 = vst.msk [vmem:[%s14194_s19 + $0x28] sm:$0xff] %vm16736_vm11, %v7587_v57  ;;  %7596 = vpow2.f32 %v7374_v2  ;;  %v6924_v6 = vadd.f32 %v14155_v15, %v6888_v1 }
 0xa03   : > { %7598 = vrcp.f32 %v7052_v40  ;;  %v6831_v42 = vpop.trf.xlu1 }
 0xa04   : > { %v7589_v48 = vpop.eup %7588  ;;  %v7376_v35 = vmul.f32 -1.442695, %v6924_v6  ;;  %v6890_v58 = vadd.f32 %v6831_v42, %v14216_v9 }
 0xa05   : > { %v7591_v0 = vpop.eup %7590  ;;  %v7054_v28 = vadd.f32 1.0, %v7589_v48 }
 0xa06   : > { %7150 = vst.msk [vmem:[%s14194_s19 + $0x38] sm:$0xff] %vm16737_vm12, %v7591_v0  ;;  %7600 = vpow2.f32 %v7376_v35  ;;  %v6926_v12 = vadd.f32 %v14155_v15, %v6890_v58 }
 0xa07   : > { %7602 = vrcp.f32 %v7054_v28  ;;  %v6832_v5 = vpop.trf.xlu1 }
 0xa08   : > { %v7593_v10 = vpop.eup %7592  ;;  %v7378_v24 = vmul.f32 -1.442695, %v6926_v12  ;;  %v6892_v53 = vadd.f32 %v6832_v5, %v14222_v4 }
 0xa09   : > { %v7595_v7 = vpop.eup %7594  ;;  %v7056_v3 = vadd.f32 1.0, %v7593_v10 }
 0xa0a   : > { %7152 = vst.msk [vmem:[%s14194_s19 + $0x48] sm:$0xff] %vm16738_vm13, %v7595_v7  ;;  %7604 = vpow2.f32 %v7378_v24  ;;  %v6928_v9 = vadd.f32 %v14155_v15, %v6892_v53 }
 0xa0b   : > { %7606 = vrcp.f32 %v7056_v3  ;;  %v6833_v59 = vpop.trf.xlu1 }
 0xa0c   : > { %v7597_v55 = vpop.eup %7596  ;;  %v7380_v13 = vmul.f32 -1.442695, %v6928_v9  ;;  %v6894_v41 = vadd.f32 %v6833_v59, %v14228_v32 }
 0xa0d   : > { %v7599_v39 = vpop.eup %7598  ;;  %v7058_v50 = vadd.f32 1.0, %v7597_v55 }
 0xa0e   : > { %7154 = vst.msk [vmem:[%s14194_s19 + $0x58] sm:$0xff] %vm16739_vm14, %v7599_v39  ;;  %7608 = vpow2.f32 %v7380_v13  ;;  %v6930_v4 = vadd.f32 %v14155_v15, %v6894_v41 }
 0xa0f   : > { %7610 = vrcp.f32 %v7058_v50  ;;  %v6834_v51 = vpop.trf.xlu1 }
 0xa10   : > { %v7601_v36 = vpop.eup %7600  ;;  %v7382_v45 = vmul.f32 -1.442695, %v6930_v4  ;;  %v6896_v14 = vadd.f32 %v6834_v51, %v14234_v33 }
 0xa11   : > { %v7603_v16 = vpop.eup %7602  ;;  %v7060_v46 = vadd.f32 1.0, %v7601_v36 }
 0xa12   : > { %7156 = vst.msk [vmem:[%s14194_s19 + $0x68] sm:$0xff] %vm16740_vm6, %v7603_v16  ;;  %7612 = vpow2.f32 %v7382_v45  ;;  %v6932_v32 = vadd.f32 %v14155_v15, %v6896_v14 }
 0xa13   : > { %7614 = vrcp.f32 %v7060_v46  ;;  %v6835_v30 = vpop.trf.xlu1 }
 0xa14   : > { %v7605_v29 = vpop.eup %7604  ;;  %v7384_v61 = vmul.f32 -1.442695, %v6932_v32  ;;  %v6898_v52 = vadd.f32 %v6835_v30, %v14240_v47 }
 0xa15   : > { %v7607_v60 = vpop.eup %7606  ;;  %v7062_v31 = vadd.f32 1.0, %v7605_v29 }
 0xa16   : > { %7158 = vst.msk [vmem:[%s14194_s19 + $0x78] sm:$0xff] %vm16348_vm0, %v7607_v60  ;;  %7616 = vpow2.f32 %v7384_v61  ;;  %v6934_v33 = vadd.f32 %v14155_v15, %v6898_v52 }
 0xa17   : > { %7618 = vrcp.f32 %v7062_v31  ;;  %v6836_v26 = vpop.trf.xlu1 }
 0xa18   : > { %v7609_v18 = vpop.eup %7608  ;;  %v7386_v43 = vmul.f32 -1.442695, %v6934_v33  ;;  %v6900_v34 = vadd.f32 %v6836_v26, %v14246_v62 }
 0xa19   : > { %v7611_v20 = vpop.eup %7610  ;;  %v7064_v38 = vadd.f32 1.0, %v7609_v18 }
 0xa1a   : > { %7160 = vst.msk [vmem:[%s14194_s19 + $0x88] sm:$0xff] %vm16741_vm15, %v7611_v20  ;;  %7620 = vpow2.f32 %v7386_v43  ;;  %v6936_v47 = vadd.f32 %v14155_v15, %v6900_v34 }
 0xa1b   : > { %7622 = vrcp.f32 %v7064_v38  ;;  %v6789_v17 = vpop.trf.xlu1 }
 0xa1c   : > { %v7613_v11 = vpop.eup %7612  ;;  %v7388_v19 = vmul.f32 -1.442695, %v6936_v47  ;;  %v6901_v54 = vadd.f32 %v6789_v17, %v14149_v8 }
 0xa1d   : > { %v7615_v56 = vpop.eup %7614  ;;  %v7066_v21 = vadd.f32 1.0, %v7613_v11 }
 0xa1e   : > { %7162 = vst.msk [vmem:[%s14194_s19 + $0x98] sm:$0xff] %vm16742_vm1, %v7615_v56  ;;  %7624 = vpow2.f32 %v7388_v19  ;;  %v6937_v62 = vadd.f32 %v14155_v15, %v6901_v54 }
 0xa1f   : > { %7626 = vrcp.f32 %v7066_v21 }
 0xa20   : > { %v7617_v44 = vpop.eup %7616  ;;  %v7389_v37 = vmul.f32 -1.442695, %v6937_v62 }
 0xa21   : > { %v7619_v49 = vpop.eup %7618  ;;  %v7068_v23 = vadd.f32 1.0, %v7617_v44 }
 0xa22   : > { %7164 = vst.msk [vmem:[%s14194_s19 + $0xa8] sm:$0xff] %vm16743_vm8, %v7619_v49  ;;  %7628 = vpow2.f32 %v7389_v37 }
 0xa23   : > { %7630 = vrcp.f32 %v7068_v23 }
 0xa24   : > { %v7621_v8 = vpop.eup %7620 }
 0xa25   : > { %v7623_v63 = vpop.eup %7622  ;;  %v7070_v22 = vadd.f32 1.0, %v7621_v8 }
 0xa26   : > { %7166 = vst.msk [vmem:[%s14194_s19 + $0xb8] sm:$0xff] %vm16744_vm3, %v7623_v63 }
 0xa27   : > { %7632 = vrcp.f32 %v7070_v22 }
 0xa28   : > { %v7625_v15 = vpop.eup %7624 }
 0xa29   : > { %v7627_v25 = vpop.eup %7626  ;;  %v7072_v27 = vadd.f32 1.0, %v7625_v15 }
 0xa2a   : > { %7168 = vst.msk [vmem:[%s14194_s19 + $0xc8] sm:$0xff] %vm16745_vm4, %v7627_v25 }
 0xa2b   : > { %7634 = vrcp.f32 %v7072_v27 }
 0xa2c   : > { %v7629_v2 = vpop.eup %7628 }
 0xa2d   : > { %v7631_v1 = vpop.eup %7630  ;;  %v7073_v57 = vadd.f32 1.0, %v7629_v2 }
 0xa2e   : > { %7170 = vst.msk [vmem:[%s14194_s19 + $0xd8] sm:$0xff] %vm16746_vm10, %v7631_v1 }
 0xa2f   : > { %7636 = vrcp.f32 %v7073_v57 }
 0xa31   : > { %v7633_v40 = vpop.eup %7632 }
 0xa32   : > { %7172 = vst.msk [vmem:[%s14194_s19 + $0xe8] sm:$0xff] %vm16747_vm7, %v7633_v40 }
 0xa35   : > { %v7635_v6 = vpop.eup %7634 }
 0xa36   : > { %7174 = vst.msk [vmem:[%s14194_s19 + $0xf8] sm:$0xff] %vm16748_vm2, %v7635_v6 }
 0xa39   : > { %v7637_v42 = vpop.eup %7636 }
 0xa3a   : > { %7175 = vst [vmem:[%s14194_s19 + $0x100] sm:$0x3] %v7637_v42 }
 0xa3b   : > { %7770 = shalt.err (!%p7767_p13)
}
 0xa3c   : > { %s7771_s12 = scalar_lea.hbm %s14331_s18, 4352  ;;  %s7775_s0 = scalar_lea.hbm %s14388_s5, 8704 }
 0xa3d   : > { %p7772_p9 = scmp.ne.s32.totalorder %s14331_s18, %s7771_s12  ;;  %p7776_p2 = scmp.lt.u32.totalorder %s14331_s18, %s14388_s5 }
 0xa3e   : > { %p7777_p8 = scmp.lt.u32.totalorder %s7775_s0, %s7771_s12  ;;  %p7779_p3 = scmp.lt.u32.totalorder %s7771_s12, %s14331_s18 }
 0xa3f   : > { %p7773_p5 = pnand %p7772_p9, %p16749_p6 }
 0xa40   : > { %p7778_p12 = por %p7777_p8, %p7776_p2 }
 0xa41   : > { %p7774_p11 = pneg %p7773_p5 }
 0xa42   : > { %p7780_p4 = por %p7779_p3, %p7778_p12 }
 0xa44   : > { %p7781_p10 = pnand %p7780_p4, %p7774_p11 }
 0xa46   : > { %7784 = shalt.err (!%p7781_p10)
}
 0xa47   : > { %s7861_s10 = smov 256   ;;  %s7862_s26 = smov 16  }
 0xa48   : > { %7415 = dma.vmem_to_hbm [thread:$0]  (%p16749_p6), %s14333_s14, 4352, %s14331_s18, %s7178_s9, %s7861_s10, %s7861_s10, %s7862_s26  }
 0xa49 PF: > { %s7206_s7 = sand.u32 1, %s7827_s20   ;;  %p16750_p1 = scmp.ne.s32.totalorder %s14991_s28, 0 }
 0xa4a   : > { %p16751_p0 = scmp.ge.s32.totalorder %s7847_s25, 2  ;;  %s7207_s19 = scalar_lea.sflag [#allocation6], %s7206_s7 }
 0xa4c   : > { %p7432_p7 = pnand %p16751_p0, %p16750_p1 }
 0xa4e   : > { %7822 = dma.done.wait (!%p7432_p7), %s7207_s19, 4352  }
 0xa4f   : > { %7824 = vsyncadd (!%p7432_p7), %s7207_s19, 4294962944  ;;  %s23_s25 = sadd.s32 1, %s7847_s25   ;;  %s16752_s23 = sld [smem:[#allocation16_spill]] }
 0xa50   : > { %p20_p13 = scmp.ge.s32.totalorder %s23_s25, 4   ;;  %s16753_s24 = sld [smem:[#allocation17_spill]] }
 0xa51   : > { %s16754_s20 = smov %s7831_s21  ;;  %s16755_s21 = smov %s7835_s22 }
 0xa52   : > { %s16756_s22 = smov %s7946_s6  ;;  %22 = sbr.rel (!%p20_p13) target bundleno = 11 (0xb), region = 120 }
 0xa59   :  { %7212 = vsyncpa [#allocation5], 1 }
 0xa5a   :  { %7214 = vsyncpa [#allocation5 + $0x1], 1 }
 0xa5b   :  { %7215 = vsyncpa [#allocation8], 1 }
 0xa5c   :  { %7216 = vsyncpa [#allocation6], 1 }
 0xa5d   :  { %7218 = vsyncpa [#allocation6 + $0x1], 1 }

</bundles_post_ra>
